<compile_context>
chip_gen: v5e
topology: v5e:2x2
jax: 0.10.0
libtpu: 0.0.40
codegen_flags: <defaults>
</compile_context>

<pallas_src>
from functools import partial

import jax
import jax.numpy as jnp
from jax.experimental import pallas as pl
from jax.experimental.pallas import tpu as pltpu


def _triangle_kernel(x_ref, w_ref, b_ref, ln_in_ref, ln_out_ref, wi_ref, o_ref,
                     *, S, c, c_i, outgoing, eps):
    """One batch element. x_ref / o_ref: (c_i, S*S), native channel-major layout."""
    N = S * S

    # channel-major -> channel-last inside VMEM (2-D transpose, XLU).
    x = jnp.transpose(x_ref[...]).astype(jnp.float32)                   # (N, c_i)

    # LayerNorm over c_i (lane-axis reduction), f32.
    mu = jnp.mean(x, axis=-1, keepdims=True)
    xc = x - mu
    var = jnp.mean(xc * xc, axis=-1, keepdims=True)
    xn = xc * jax.lax.rsqrt(var + eps) * ln_in_ref[0:1, :] + ln_in_ref[1:2, :]

    # One fused, lane-dense bf16 MXU matmul for all five projections.
    y = jnp.dot(xn.astype(jnp.bfloat16), w_ref[...],
                preferred_element_type=jnp.float32) + b_ref[...]        # (N, 4c + c_i)

    sig = lambda z: 0.5 * (jnp.tanh(0.5 * z) + 1.0)    # EUP tanh, no divide
    a2 = sig(y[:, 0 * c:1 * c]) * y[:, 1 * c:2 * c]                      # (N, c)
    b2 = sig(y[:, 2 * c:3 * c]) * y[:, 3 * c:4 * c]                      # (N, c)
    gate = sig(y[:, 4 * c:])                                             # (N, c_i)

    # (N, c) -> (S, S, c): leading-dim split, no relayout.
    a3 = a2.reshape(S, S, c)
    b3 = b2.reshape(S, S, c)

    # Triangle contraction: statically unrolled VPU multiply-accumulate in f32.
    acc = jnp.zeros((S, S, c), jnp.float32)
    for k in range(S):
        if outgoing:
            ak = a3[:, k, :]          # a[i, k, c] -> (S_i, c)
            bk = b3[:, k, :]          # b[j, k, c] -> (S_j, c)
        else:
            ak = a3[k]                # a[k, i, c] -> (S_i, c)
            bk = b3[k]                # b[k, j, c] -> (S_j, c)
        acc = acc + ak[:, None, :] * bk[None, :, :]                      # (S_i, S_j, c)

    # LayerNorm over c (lane-axis reduction), f32.
    t2 = acc.reshape(N, c)
    mu2 = jnp.mean(t2, axis=-1, keepdims=True)
    tc = t2 - mu2
    var2 = jnp.mean(tc * tc, axis=-1, keepdims=True)
    tn = tc * jax.lax.rsqrt(var2 + eps) * ln_out_ref[0:1, :] + ln_out_ref[1:2, :]

    # Final projection (bf16 MXU, f32 acc) + gating, then back to channel-major.
    proj = jnp.dot(tn.astype(jnp.bfloat16), wi_ref[0:c, :].astype(jnp.bfloat16),
                   preferred_element_type=jnp.float32) + wi_ref[c:c + 1, :]
    out = gate * proj                                                    # (N, c_i)
    o_ref[...] = jnp.transpose(out).astype(o_ref.dtype)                  # (c_i, N)


def pack_params(params, mxu_dtype=jnp.bfloat16):
    """Consolidate the 16 module parameters into 5 packed arrays."""
    w_packed = jnp.concatenate(
        [params["w_ag"], params["w_ap"], params["w_bg"], params["w_bp"], params["w_g"]],
        axis=1).astype(mxu_dtype)                                        # (c_i, 4c + c_i)
    b_packed = jnp.concatenate(
        [params["b_ag"], params["b_ap"], params["b_bg"], params["b_bp"], params["b_g"]],
        axis=1).astype(jnp.float32)                                      # (1, 4c + c_i)
    ln_in = jnp.concatenate([params["ln_in_g"], params["ln_in_b"]], axis=0)    # (2, c_i)
    ln_out = jnp.concatenate([params["ln_out_g"], params["ln_out_b"]], axis=0)  # (2, c)
    wi = jnp.concatenate([params["w_i"], params["b_i"]], axis=0)         # (c + 1, c_i)
    return {"w": w_packed, "b": b_packed, "ln_in": ln_in, "ln_out": ln_out, "wi": wi}


@partial(jax.jit, static_argnames=("mult_type", "eps"))
def triangle_multiplication(x, packed, mult_type="outgoing", eps=1e-5):
    """x: (B, c_i, S, S) -> (B, c_i, S, S)."""
    if mult_type not in ("outgoing", "incoming"):
        raise ValueError("mult_type must be either 'outgoing' or 'incoming'")
    B, c_i, S, S2 = x.shape
    assert S == S2, "expected a square (seq_len, seq_len) pair representation"
    c = packed["ln_out"].shape[1]
    N = S * S

    xp = x.reshape(B, c_i, N)     # free reshape — no HBM transpose

    kernel = partial(_triangle_kernel, S=S, c=c, c_i=c_i,
                     outgoing=(mult_type == "outgoing"), eps=float(eps))

    def full_spec(arr):
        return pl.BlockSpec(arr.shape, lambda b: (0, 0))

    out = pl.pallas_call(
        kernel,
        grid=(B,),
        in_specs=[pl.BlockSpec((None, c_i, N), lambda b: (b, 0, 0)),
                  full_spec(packed["w"]), full_spec(packed["b"]),
                  full_spec(packed["ln_in"]), full_spec(packed["ln_out"]),
                  full_spec(packed["wi"])],
        out_specs=pl.BlockSpec((None, c_i, N), lambda b: (b, 0, 0)),
        out_shape=jax.ShapeDtypeStruct((B, c_i, N), x.dtype),
        compiler_params=pltpu.CompilerParams(
            dimension_semantics=("parallel",)),
    )(xp, packed["w"], packed["b"], packed["ln_in"], packed["ln_out"], packed["wi"])

    return out.reshape(B, c_i, S, S)


def triangle_multiplication_reference(x, params, mult_type="outgoing", eps=1e-5):
    """Pure-JAX f32/HIGHEST reference mirroring the PyTorch module."""
    hi = jax.lax.Precision.HIGHEST
    xp = jnp.transpose(x, (0, 2, 3, 1)).astype(jnp.float32)              # (B,S,S,c_i)

    def ln(v, g, b):
        mu = jnp.mean(v, axis=-1, keepdims=True)
        var = jnp.mean((v - mu) ** 2, axis=-1, keepdims=True)
        return (v - mu) / jnp.sqrt(var + eps) * g + b

    sg = lambda z: 1.0 / (1.0 + jnp.exp(-z))
    dot = lambda u, w: jnp.einsum("bijd,dc->bijc", u, w, precision=hi)

    xn = ln(xp, params["ln_in_g"], params["ln_in_b"])
    a = sg(dot(xn, params["w_ag"]) + params["b_ag"]) * (dot(xn, params["w_ap"]) + params["b_ap"])
    b = sg(dot(xn, params["w_bg"]) + params["b_bg"]) * (dot(xn, params["w_bp"]) + params["b_bp"])
    g = sg(dot(xn, params["w_g"]) + params["b_g"])
    if mult_type == "outgoing":
        t = jnp.einsum("bikc,bjkc->bijc", a, b, precision=hi)
    else:
        t = jnp.einsum("bkic,bkjc->bijc", a, b, precision=hi)
    out = g * (dot(ln(t, params["ln_out_g"], params["ln_out_b"]), params["w_i"])
               + params["b_i"])
    return jnp.transpose(out, (0, 3, 1, 2))


def init_params(key, c_i, c):
    ks = jax.random.split(key, 10)

    def w(k, fan_in, shape):
        return jax.random.normal(k, shape, jnp.float32) / jnp.sqrt(fan_in)

    return {
        "ln_in_g": 1.0 + 0.1 * jax.random.normal(ks[0], (1, c_i), jnp.float32),
        "ln_in_b": 0.1 * jax.random.normal(ks[1], (1, c_i), jnp.float32),
        "w_ag": w(ks[2], c_i, (c_i, c)), "b_ag": jnp.full((1, c), 0.1, jnp.float32),
        "w_ap": w(ks[3], c_i, (c_i, c)), "b_ap": jnp.zeros((1, c), jnp.float32),
        "w_bg": w(ks[4], c_i, (c_i, c)), "b_bg": jnp.full((1, c), -0.1, jnp.float32),
        "w_bp": w(ks[5], c_i, (c_i, c)), "b_bp": jnp.zeros((1, c), jnp.float32),
        "w_g": w(ks[6], c_i, (c_i, c_i)), "b_g": jnp.zeros((1, c_i), jnp.float32),
        "ln_out_g": 1.0 + 0.1 * jax.random.normal(ks[7], (1, c), jnp.float32),
        "ln_out_b": 0.1 * jax.random.normal(ks[8], (1, c), jnp.float32),
        "w_i": w(ks[9], c, (c, c_i)), "b_i": jnp.zeros((1, c_i), jnp.float32),
    }


if __name__ == "__main__":
    # Module config: c_i = 128 (lane-dense interaction channels), c = 32
    # (module default), seq_len = 16, batch = 2.
    B, c_i, S, c = 2, 128, 16, 32

    key = jax.random.PRNGKey(0)
    k_x, k_p = jax.random.split(key)
    x = jax.random.normal(k_x, (B, c_i, S, S), dtype=jnp.float32)
    params = init_params(k_p, c_i, c)
    packed = pack_params(params)

    for mult_type in ("outgoing", "incoming"):
        out = triangle_multiplication(x, packed, mult_type=mult_type)
        out = jax.block_until_ready(out)
        assert out.shape == (B, c_i, S, S)
        assert bool(jnp.all(jnp.isfinite(out)))
        ref = triangle_multiplication_reference(x, params, mult_type=mult_type)
        max_err = float(jnp.max(jnp.abs(out - ref)))
        mean_err = float(jnp.mean(jnp.abs(out - ref)))
        # Tolerances account for bf16 MXU operands (per perf feedback) vs. an
        # f32 / HIGHEST-precision reference.
        assert max_err < 7.5e-2, f"{mult_type}: max abs err {max_err}"
        assert mean_err < 2e-2, f"{mult_type}: mean abs err {mean_err}"

    print("KERNEL_OK")
</pallas_src>

<mosaic_0001>
module attributes {stable_mosaic.version = 11 : i64} {
  func.func @_triangle_kernel(%arg0: i32, %arg1: memref<1x128x256xf32, #tpu.memory_space<vmem>>, %arg2: memref<128x256xbf16, #tpu.memory_space<vmem>>, %arg3: memref<1x256xf32, #tpu.memory_space<vmem>>, %arg4: memref<2x128xf32, #tpu.memory_space<vmem>>, %arg5: memref<2x32xf32, #tpu.memory_space<vmem>>, %arg6: memref<33x128xf32, #tpu.memory_space<vmem>>, %arg7: memref<1x128x256xf32, #tpu.memory_space<vmem>>) attributes {dimension_semantics = [#tpu.dimension_semantics<parallel>], iteration_bounds = array<i64: 2>, scalar_prefetch = 0 : i64, scratch_operands = 0 : i64, tpu.core_type = #tpu.core_type<tc>, window_params = [{transform_indices = @transform_0, window_bounds = array<i64: 1, 128, 256>}, {pipeline_mode = #tpu.pipeline_mode<synchronous>, transform_indices = @transform_1, window_bounds = array<i64: 128, 256>}, {pipeline_mode = #tpu.pipeline_mode<synchronous>, transform_indices = @transform_2, window_bounds = array<i64: 1, 256>}, {pipeline_mode = #tpu.pipeline_mode<synchronous>, transform_indices = @transform_3, window_bounds = array<i64: 2, 128>}, {pipeline_mode = #tpu.pipeline_mode<synchronous>, transform_indices = @transform_4, window_bounds = array<i64: 2, 32>}, {pipeline_mode = #tpu.pipeline_mode<synchronous>, transform_indices = @transform_5, window_bounds = array<i64: 33, 128>}, {transform_indices = @transform_6, window_bounds = array<i64: 1, 128, 256>}]} {
    %c0 = arith.constant 0 : index
    %c0_0 = arith.constant 0 : index
    %c0_1 = arith.constant 0 : index
    %0 = vector.load %arg1[%c0, %c0_0, %c0_1] : memref<1x128x256xf32, #tpu.memory_space<vmem>>, vector<1x128x256xf32>
    %1 = vector.shape_cast %0 : vector<1x128x256xf32> to vector<128x256xf32>
    %2 = tpu.transpose %1, [1, 0] : vector<128x256xf32> -> vector<256x128xf32>
    %cst = arith.constant dense<0.000000e+00> : vector<256xf32>
    %3 = vector.multi_reduction <add>, %2, %cst [1] : vector<256x128xf32> to vector<256xf32>
    %4 = vector.shape_cast %3 : vector<256xf32> to vector<256x1xf32>
    %cst_2 = arith.constant 1.280000e+02 : f32
    %5 = vector.broadcast %cst_2 : f32 to vector<256x1xf32>
    %6 = arith.divf %4, %5 : vector<256x1xf32>
    %7 = vector.broadcast %6 : vector<256x1xf32> to vector<256x128xf32>
    %8 = arith.subf %2, %7 : vector<256x128xf32>
    %9 = arith.mulf %8, %8 : vector<256x128xf32>
    %cst_3 = arith.constant dense<0.000000e+00> : vector<256xf32>
    %10 = vector.multi_reduction <add>, %9, %cst_3 [1] : vector<256x128xf32> to vector<256xf32>
    %11 = vector.shape_cast %10 : vector<256xf32> to vector<256x1xf32>
    %cst_4 = arith.constant 1.280000e+02 : f32
    %12 = vector.broadcast %cst_4 : f32 to vector<256x1xf32>
    %13 = arith.divf %11, %12 : vector<256x1xf32>
    %cst_5 = arith.constant 9.99999974E-6 : f32
    %14 = vector.broadcast %cst_5 : f32 to vector<256x1xf32>
    %15 = arith.addf %13, %14 : vector<256x1xf32>
    %16 = math.rsqrt %15 : vector<256x1xf32>
    %17 = vector.broadcast %16 : vector<256x1xf32> to vector<256x128xf32>
    %18 = arith.mulf %8, %17 : vector<256x128xf32>
    %c0_6 = arith.constant 0 : index
    %c0_7 = arith.constant 0 : index
    %19 = vector.load %arg4[%c0_6, %c0_7] : memref<2x128xf32, #tpu.memory_space<vmem>>, vector<1x128xf32>
    %20 = vector.broadcast %19 : vector<1x128xf32> to vector<256x128xf32>
    %21 = arith.mulf %18, %20 : vector<256x128xf32>
    %c1 = arith.constant 1 : index
    %c0_8 = arith.constant 0 : index
    %22 = vector.load %arg4[%c1, %c0_8] : memref<2x128xf32, #tpu.memory_space<vmem>>, vector<1x128xf32>
    %23 = vector.broadcast %22 : vector<1x128xf32> to vector<256x128xf32>
    %24 = arith.addf %21, %23 : vector<256x128xf32>
    %25 = arith.truncf %24 : vector<256x128xf32> to vector<256x128xbf16>
    %c0_9 = arith.constant 0 : index
    %c0_10 = arith.constant 0 : index
    %26 = vector.load %arg2[%c0_9, %c0_10] : memref<128x256xbf16, #tpu.memory_space<vmem>>, vector<128x256xbf16>
    %cst_11 = arith.constant dense<0.000000e+00> : vector<256x256xf32>
    %27 = tpu.matmul %25, %26, %cst_11 {dimension_numbers = #tpu.dot_dimension_numbers<[1], [0], [0], [1], [0, 0, 1, 1], [], []>} : vector<256x128xbf16>, vector<128x256xbf16>, vector<256x256xf32> -> vector<256x256xf32>
    %c0_12 = arith.constant 0 : index
    %c0_13 = arith.constant 0 : index
    %28 = vector.load %arg3[%c0_12, %c0_13] : memref<1x256xf32, #tpu.memory_space<vmem>>, vector<1x256xf32>
    %29 = vector.broadcast %28 : vector<1x256xf32> to vector<256x256xf32>
    %30 = arith.addf %27, %29 : vector<256x256xf32>
    %31 = vector.extract_strided_slice %30 {offsets = [0, 0], sizes = [256, 32], strides = [1, 1]} : vector<256x256xf32> to vector<256x32xf32>
    %cst_14 = arith.constant 5.000000e-01 : f32
    %32 = vector.broadcast %cst_14 : f32 to vector<256x32xf32>
    %33 = arith.mulf %32, %31 : vector<256x32xf32>
    %34 = math.tanh %33 : vector<256x32xf32>
    %cst_15 = arith.constant 1.000000e+00 : f32
    %35 = vector.broadcast %cst_15 : f32 to vector<256x32xf32>
    %36 = arith.addf %34, %35 : vector<256x32xf32>
    %cst_16 = arith.constant 5.000000e-01 : f32
    %37 = vector.broadcast %cst_16 : f32 to vector<256x32xf32>
    %38 = arith.mulf %37, %36 : vector<256x32xf32>
    %39 = vector.extract_strided_slice %30 {offsets = [0, 32], sizes = [256, 32], strides = [1, 1]} : vector<256x256xf32> to vector<256x32xf32>
    %40 = arith.mulf %38, %39 : vector<256x32xf32>
    %41 = vector.extract_strided_slice %30 {offsets = [0, 64], sizes = [256, 32], strides = [1, 1]} : vector<256x256xf32> to vector<256x32xf32>
    %cst_17 = arith.constant 5.000000e-01 : f32
    %42 = vector.broadcast %cst_17 : f32 to vector<256x32xf32>
    %43 = arith.mulf %42, %41 : vector<256x32xf32>
    %44 = math.tanh %43 : vector<256x32xf32>
    %cst_18 = arith.constant 1.000000e+00 : f32
    %45 = vector.broadcast %cst_18 : f32 to vector<256x32xf32>
    %46 = arith.addf %44, %45 : vector<256x32xf32>
    %cst_19 = arith.constant 5.000000e-01 : f32
    %47 = vector.broadcast %cst_19 : f32 to vector<256x32xf32>
    %48 = arith.mulf %47, %46 : vector<256x32xf32>
    %49 = vector.extract_strided_slice %30 {offsets = [0, 96], sizes = [256, 32], strides = [1, 1]} : vector<256x256xf32> to vector<256x32xf32>
    %50 = arith.mulf %48, %49 : vector<256x32xf32>
    %51 = vector.extract_strided_slice %30 {offsets = [0, 128], sizes = [256, 128], strides = [1, 1]} : vector<256x256xf32> to vector<256x128xf32>
    %cst_20 = arith.constant 5.000000e-01 : f32
    %52 = vector.broadcast %cst_20 : f32 to vector<256x128xf32>
    %53 = arith.mulf %52, %51 : vector<256x128xf32>
    %54 = math.tanh %53 : vector<256x128xf32>
    %cst_21 = arith.constant 1.000000e+00 : f32
    %55 = vector.broadcast %cst_21 : f32 to vector<256x128xf32>
    %56 = arith.addf %54, %55 : vector<256x128xf32>
    %cst_22 = arith.constant 5.000000e-01 : f32
    %57 = vector.broadcast %cst_22 : f32 to vector<256x128xf32>
    %58 = arith.mulf %57, %56 : vector<256x128xf32>
    %59 = vector.shape_cast %40 : vector<256x32xf32> to vector<16x16x32xf32>
    %60 = vector.shape_cast %50 : vector<256x32xf32> to vector<16x16x32xf32>
    %cst_23 = arith.constant 0.000000e+00 : f32
    %61 = vector.broadcast %cst_23 : f32 to vector<16x16x32xf32>
    %62 = vector.extract_strided_slice %59 {offsets = [0, 0, 0], sizes = [16, 1, 32], strides = [1, 1, 1]} : vector<16x16x32xf32> to vector<16x1x32xf32>
    %63 = vector.shape_cast %62 : vector<16x1x32xf32> to vector<16x32xf32>
    %64 = vector.extract_strided_slice %60 {offsets = [0, 0, 0], sizes = [16, 1, 32], strides = [1, 1, 1]} : vector<16x16x32xf32> to vector<16x1x32xf32>
    %65 = vector.shape_cast %64 : vector<16x1x32xf32> to vector<16x32xf32>
    %66 = vector.shape_cast %63 : vector<16x32xf32> to vector<16x1x32xf32>
    %67 = vector.shape_cast %65 : vector<16x32xf32> to vector<1x16x32xf32>
    %68 = vector.broadcast %66 : vector<16x1x32xf32> to vector<16x16x32xf32>
    %69 = vector.broadcast %67 : vector<1x16x32xf32> to vector<16x16x32xf32>
    %70 = arith.mulf %68, %69 : vector<16x16x32xf32>
    %71 = arith.addf %61, %70 : vector<16x16x32xf32>
    %72 = vector.extract_strided_slice %59 {offsets = [0, 1, 0], sizes = [16, 1, 32], strides = [1, 1, 1]} : vector<16x16x32xf32> to vector<16x1x32xf32>
    %73 = vector.shape_cast %72 : vector<16x1x32xf32> to vector<16x32xf32>
    %74 = vector.extract_strided_slice %60 {offsets = [0, 1, 0], sizes = [16, 1, 32], strides = [1, 1, 1]} : vector<16x16x32xf32> to vector<16x1x32xf32>
    %75 = vector.shape_cast %74 : vector<16x1x32xf32> to vector<16x32xf32>
    %76 = vector.shape_cast %73 : vector<16x32xf32> to vector<16x1x32xf32>
    %77 = vector.shape_cast %75 : vector<16x32xf32> to vector<1x16x32xf32>
    %78 = vector.broadcast %76 : vector<16x1x32xf32> to vector<16x16x32xf32>
    %79 = vector.broadcast %77 : vector<1x16x32xf32> to vector<16x16x32xf32>
    %80 = arith.mulf %78, %79 : vector<16x16x32xf32>
    %81 = arith.addf %71, %80 : vector<16x16x32xf32>
    %82 = vector.extract_strided_slice %59 {offsets = [0, 2, 0], sizes = [16, 1, 32], strides = [1, 1, 1]} : vector<16x16x32xf32> to vector<16x1x32xf32>
    %83 = vector.shape_cast %82 : vector<16x1x32xf32> to vector<16x32xf32>
    %84 = vector.extract_strided_slice %60 {offsets = [0, 2, 0], sizes = [16, 1, 32], strides = [1, 1, 1]} : vector<16x16x32xf32> to vector<16x1x32xf32>
    %85 = vector.shape_cast %84 : vector<16x1x32xf32> to vector<16x32xf32>
    %86 = vector.shape_cast %83 : vector<16x32xf32> to vector<16x1x32xf32>
    %87 = vector.shape_cast %85 : vector<16x32xf32> to vector<1x16x32xf32>
    %88 = vector.broadcast %86 : vector<16x1x32xf32> to vector<16x16x32xf32>
    %89 = vector.broadcast %87 : vector<1x16x32xf32> to vector<16x16x32xf32>
    %90 = arith.mulf %88, %89 : vector<16x16x32xf32>
    %91 = arith.addf %81, %90 : vector<16x16x32xf32>
    %92 = vector.extract_strided_slice %59 {offsets = [0, 3, 0], sizes = [16, 1, 32], strides = [1, 1, 1]} : vector<16x16x32xf32> to vector<16x1x32xf32>
    %93 = vector.shape_cast %92 : vector<16x1x32xf32> to vector<16x32xf32>
    %94 = vector.extract_strided_slice %60 {offsets = [0, 3, 0], sizes = [16, 1, 32], strides = [1, 1, 1]} : vector<16x16x32xf32> to vector<16x1x32xf32>
    %95 = vector.shape_cast %94 : vector<16x1x32xf32> to vector<16x32xf32>
    %96 = vector.shape_cast %93 : vector<16x32xf32> to vector<16x1x32xf32>
    %97 = vector.shape_cast %95 : vector<16x32xf32> to vector<1x16x32xf32>
    %98 = vector.broadcast %96 : vector<16x1x32xf32> to vector<16x16x32xf32>
    %99 = vector.broadcast %97 : vector<1x16x32xf32> to vector<16x16x32xf32>
    %100 = arith.mulf %98, %99 : vector<16x16x32xf32>
    %101 = arith.addf %91, %100 : vector<16x16x32xf32>
    %102 = vector.extract_strided_slice %59 {offsets = [0, 4, 0], sizes = [16, 1, 32], strides = [1, 1, 1]} : vector<16x16x32xf32> to vector<16x1x32xf32>
    %103 = vector.shape_cast %102 : vector<16x1x32xf32> to vector<16x32xf32>
    %104 = vector.extract_strided_slice %60 {offsets = [0, 4, 0], sizes = [16, 1, 32], strides = [1, 1, 1]} : vector<16x16x32xf32> to vector<16x1x32xf32>
    %105 = vector.shape_cast %104 : vector<16x1x32xf32> to vector<16x32xf32>
    %106 = vector.shape_cast %103 : vector<16x32xf32> to vector<16x1x32xf32>
    %107 = vector.shape_cast %105 : vector<16x32xf32> to vector<1x16x32xf32>
    %108 = vector.broadcast %106 : vector<16x1x32xf32> to vector<16x16x32xf32>
    %109 = vector.broadcast %107 : vector<1x16x32xf32> to vector<16x16x32xf32>
    %110 = arith.mulf %108, %109 : vector<16x16x32xf32>
    %111 = arith.addf %101, %110 : vector<16x16x32xf32>
    %112 = vector.extract_strided_slice %59 {offsets = [0, 5, 0], sizes = [16, 1, 32], strides = [1, 1, 1]} : vector<16x16x32xf32> to vector<16x1x32xf32>
    %113 = vector.shape_cast %112 : vector<16x1x32xf32> to vector<16x32xf32>
    %114 = vector.extract_strided_slice %60 {offsets = [0, 5, 0], sizes = [16, 1, 32], strides = [1, 1, 1]} : vector<16x16x32xf32> to vector<16x1x32xf32>
    %115 = vector.shape_cast %114 : vector<16x1x32xf32> to vector<16x32xf32>
    %116 = vector.shape_cast %113 : vector<16x32xf32> to vector<16x1x32xf32>
    %117 = vector.shape_cast %115 : vector<16x32xf32> to vector<1x16x32xf32>
    %118 = vector.broadcast %116 : vector<16x1x32xf32> to vector<16x16x32xf32>
    %119 = vector.broadcast %117 : vector<1x16x32xf32> to vector<16x16x32xf32>
    %120 = arith.mulf %118, %119 : vector<16x16x32xf32>
    %121 = arith.addf %111, %120 : vector<16x16x32xf32>
    %122 = vector.extract_strided_slice %59 {offsets = [0, 6, 0], sizes = [16, 1, 32], strides = [1, 1, 1]} : vector<16x16x32xf32> to vector<16x1x32xf32>
    %123 = vector.shape_cast %122 : vector<16x1x32xf32> to vector<16x32xf32>
    %124 = vector.extract_strided_slice %60 {offsets = [0, 6, 0], sizes = [16, 1, 32], strides = [1, 1, 1]} : vector<16x16x32xf32> to vector<16x1x32xf32>
    %125 = vector.shape_cast %124 : vector<16x1x32xf32> to vector<16x32xf32>
    %126 = vector.shape_cast %123 : vector<16x32xf32> to vector<16x1x32xf32>
    %127 = vector.shape_cast %125 : vector<16x32xf32> to vector<1x16x32xf32>
    %128 = vector.broadcast %126 : vector<16x1x32xf32> to vector<16x16x32xf32>
    %129 = vector.broadcast %127 : vector<1x16x32xf32> to vector<16x16x32xf32>
    %130 = arith.mulf %128, %129 : vector<16x16x32xf32>
    %131 = arith.addf %121, %130 : vector<16x16x32xf32>
    %132 = vector.extract_strided_slice %59 {offsets = [0, 7, 0], sizes = [16, 1, 32], strides = [1, 1, 1]} : vector<16x16x32xf32> to vector<16x1x32xf32>
    %133 = vector.shape_cast %132 : vector<16x1x32xf32> to vector<16x32xf32>
    %134 = vector.extract_strided_slice %60 {offsets = [0, 7, 0], sizes = [16, 1, 32], strides = [1, 1, 1]} : vector<16x16x32xf32> to vector<16x1x32xf32>
    %135 = vector.shape_cast %134 : vector<16x1x32xf32> to vector<16x32xf32>
    %136 = vector.shape_cast %133 : vector<16x32xf32> to vector<16x1x32xf32>
    %137 = vector.shape_cast %135 : vector<16x32xf32> to vector<1x16x32xf32>
    %138 = vector.broadcast %136 : vector<16x1x32xf32> to vector<16x16x32xf32>
    %139 = vector.broadcast %137 : vector<1x16x32xf32> to vector<16x16x32xf32>
    %140 = arith.mulf %138, %139 : vector<16x16x32xf32>
    %141 = arith.addf %131, %140 : vector<16x16x32xf32>
    %142 = vector.extract_strided_slice %59 {offsets = [0, 8, 0], sizes = [16, 1, 32], strides = [1, 1, 1]} : vector<16x16x32xf32> to vector<16x1x32xf32>
    %143 = vector.shape_cast %142 : vector<16x1x32xf32> to vector<16x32xf32>
    %144 = vector.extract_strided_slice %60 {offsets = [0, 8, 0], sizes = [16, 1, 32], strides = [1, 1, 1]} : vector<16x16x32xf32> to vector<16x1x32xf32>
    %145 = vector.shape_cast %144 : vector<16x1x32xf32> to vector<16x32xf32>
    %146 = vector.shape_cast %143 : vector<16x32xf32> to vector<16x1x32xf32>
    %147 = vector.shape_cast %145 : vector<16x32xf32> to vector<1x16x32xf32>
    %148 = vector.broadcast %146 : vector<16x1x32xf32> to vector<16x16x32xf32>
    %149 = vector.broadcast %147 : vector<1x16x32xf32> to vector<16x16x32xf32>
    %150 = arith.mulf %148, %149 : vector<16x16x32xf32>
    %151 = arith.addf %141, %150 : vector<16x16x32xf32>
    %152 = vector.extract_strided_slice %59 {offsets = [0, 9, 0], sizes = [16, 1, 32], strides = [1, 1, 1]} : vector<16x16x32xf32> to vector<16x1x32xf32>
    %153 = vector.shape_cast %152 : vector<16x1x32xf32> to vector<16x32xf32>
    %154 = vector.extract_strided_slice %60 {offsets = [0, 9, 0], sizes = [16, 1, 32], strides = [1, 1, 1]} : vector<16x16x32xf32> to vector<16x1x32xf32>
    %155 = vector.shape_cast %154 : vector<16x1x32xf32> to vector<16x32xf32>
    %156 = vector.shape_cast %153 : vector<16x32xf32> to vector<16x1x32xf32>
    %157 = vector.shape_cast %155 : vector<16x32xf32> to vector<1x16x32xf32>
    %158 = vector.broadcast %156 : vector<16x1x32xf32> to vector<16x16x32xf32>
    %159 = vector.broadcast %157 : vector<1x16x32xf32> to vector<16x16x32xf32>
    %160 = arith.mulf %158, %159 : vector<16x16x32xf32>
    %161 = arith.addf %151, %160 : vector<16x16x32xf32>
    %162 = vector.extract_strided_slice %59 {offsets = [0, 10, 0], sizes = [16, 1, 32], strides = [1, 1, 1]} : vector<16x16x32xf32> to vector<16x1x32xf32>
    %163 = vector.shape_cast %162 : vector<16x1x32xf32> to vector<16x32xf32>
    %164 = vector.extract_strided_slice %60 {offsets = [0, 10, 0], sizes = [16, 1, 32], strides = [1, 1, 1]} : vector<16x16x32xf32> to vector<16x1x32xf32>
    %165 = vector.shape_cast %164 : vector<16x1x32xf32> to vector<16x32xf32>
    %166 = vector.shape_cast %163 : vector<16x32xf32> to vector<16x1x32xf32>
    %167 = vector.shape_cast %165 : vector<16x32xf32> to vector<1x16x32xf32>
    %168 = vector.broadcast %166 : vector<16x1x32xf32> to vector<16x16x32xf32>
    %169 = vector.broadcast %167 : vector<1x16x32xf32> to vector<16x16x32xf32>
    %170 = arith.mulf %168, %169 : vector<16x16x32xf32>
    %171 = arith.addf %161, %170 : vector<16x16x32xf32>
    %172 = vector.extract_strided_slice %59 {offsets = [0, 11, 0], sizes = [16, 1, 32], strides = [1, 1, 1]} : vector<16x16x32xf32> to vector<16x1x32xf32>
    %173 = vector.shape_cast %172 : vector<16x1x32xf32> to vector<16x32xf32>
    %174 = vector.extract_strided_slice %60 {offsets = [0, 11, 0], sizes = [16, 1, 32], strides = [1, 1, 1]} : vector<16x16x32xf32> to vector<16x1x32xf32>
    %175 = vector.shape_cast %174 : vector<16x1x32xf32> to vector<16x32xf32>
    %176 = vector.shape_cast %173 : vector<16x32xf32> to vector<16x1x32xf32>
    %177 = vector.shape_cast %175 : vector<16x32xf32> to vector<1x16x32xf32>
    %178 = vector.broadcast %176 : vector<16x1x32xf32> to vector<16x16x32xf32>
    %179 = vector.broadcast %177 : vector<1x16x32xf32> to vector<16x16x32xf32>
    %180 = arith.mulf %178, %179 : vector<16x16x32xf32>
    %181 = arith.addf %171, %180 : vector<16x16x32xf32>
    %182 = vector.extract_strided_slice %59 {offsets = [0, 12, 0], sizes = [16, 1, 32], strides = [1, 1, 1]} : vector<16x16x32xf32> to vector<16x1x32xf32>
    %183 = vector.shape_cast %182 : vector<16x1x32xf32> to vector<16x32xf32>
    %184 = vector.extract_strided_slice %60 {offsets = [0, 12, 0], sizes = [16, 1, 32], strides = [1, 1, 1]} : vector<16x16x32xf32> to vector<16x1x32xf32>
    %185 = vector.shape_cast %184 : vector<16x1x32xf32> to vector<16x32xf32>
    %186 = vector.shape_cast %183 : vector<16x32xf32> to vector<16x1x32xf32>
    %187 = vector.shape_cast %185 : vector<16x32xf32> to vector<1x16x32xf32>
    %188 = vector.broadcast %186 : vector<16x1x32xf32> to vector<16x16x32xf32>
    %189 = vector.broadcast %187 : vector<1x16x32xf32> to vector<16x16x32xf32>
    %190 = arith.mulf %188, %189 : vector<16x16x32xf32>
    %191 = arith.addf %181, %190 : vector<16x16x32xf32>
    %192 = vector.extract_strided_slice %59 {offsets = [0, 13, 0], sizes = [16, 1, 32], strides = [1, 1, 1]} : vector<16x16x32xf32> to vector<16x1x32xf32>
    %193 = vector.shape_cast %192 : vector<16x1x32xf32> to vector<16x32xf32>
    %194 = vector.extract_strided_slice %60 {offsets = [0, 13, 0], sizes = [16, 1, 32], strides = [1, 1, 1]} : vector<16x16x32xf32> to vector<16x1x32xf32>
    %195 = vector.shape_cast %194 : vector<16x1x32xf32> to vector<16x32xf32>
    %196 = vector.shape_cast %193 : vector<16x32xf32> to vector<16x1x32xf32>
    %197 = vector.shape_cast %195 : vector<16x32xf32> to vector<1x16x32xf32>
    %198 = vector.broadcast %196 : vector<16x1x32xf32> to vector<16x16x32xf32>
    %199 = vector.broadcast %197 : vector<1x16x32xf32> to vector<16x16x32xf32>
    %200 = arith.mulf %198, %199 : vector<16x16x32xf32>
    %201 = arith.addf %191, %200 : vector<16x16x32xf32>
    %202 = vector.extract_strided_slice %59 {offsets = [0, 14, 0], sizes = [16, 1, 32], strides = [1, 1, 1]} : vector<16x16x32xf32> to vector<16x1x32xf32>
    %203 = vector.shape_cast %202 : vector<16x1x32xf32> to vector<16x32xf32>
    %204 = vector.extract_strided_slice %60 {offsets = [0, 14, 0], sizes = [16, 1, 32], strides = [1, 1, 1]} : vector<16x16x32xf32> to vector<16x1x32xf32>
    %205 = vector.shape_cast %204 : vector<16x1x32xf32> to vector<16x32xf32>
    %206 = vector.shape_cast %203 : vector<16x32xf32> to vector<16x1x32xf32>
    %207 = vector.shape_cast %205 : vector<16x32xf32> to vector<1x16x32xf32>
    %208 = vector.broadcast %206 : vector<16x1x32xf32> to vector<16x16x32xf32>
    %209 = vector.broadcast %207 : vector<1x16x32xf32> to vector<16x16x32xf32>
    %210 = arith.mulf %208, %209 : vector<16x16x32xf32>
    %211 = arith.addf %201, %210 : vector<16x16x32xf32>
    %212 = vector.extract_strided_slice %59 {offsets = [0, 15, 0], sizes = [16, 1, 32], strides = [1, 1, 1]} : vector<16x16x32xf32> to vector<16x1x32xf32>
    %213 = vector.shape_cast %212 : vector<16x1x32xf32> to vector<16x32xf32>
    %214 = vector.extract_strided_slice %60 {offsets = [0, 15, 0], sizes = [16, 1, 32], strides = [1, 1, 1]} : vector<16x16x32xf32> to vector<16x1x32xf32>
    %215 = vector.shape_cast %214 : vector<16x1x32xf32> to vector<16x32xf32>
    %216 = vector.shape_cast %213 : vector<16x32xf32> to vector<16x1x32xf32>
    %217 = vector.shape_cast %215 : vector<16x32xf32> to vector<1x16x32xf32>
    %218 = vector.broadcast %216 : vector<16x1x32xf32> to vector<16x16x32xf32>
    %219 = vector.broadcast %217 : vector<1x16x32xf32> to vector<16x16x32xf32>
    %220 = arith.mulf %218, %219 : vector<16x16x32xf32>
    %221 = arith.addf %211, %220 : vector<16x16x32xf32>
    %222 = vector.shape_cast %221 : vector<16x16x32xf32> to vector<256x32xf32>
    %cst_24 = arith.constant dense<0.000000e+00> : vector<256xf32>
    %223 = vector.multi_reduction <add>, %222, %cst_24 [1] : vector<256x32xf32> to vector<256xf32>
    %224 = vector.shape_cast %223 : vector<256xf32> to vector<256x1xf32>
    %cst_25 = arith.constant 3.200000e+01 : f32
    %225 = vector.broadcast %cst_25 : f32 to vector<256x1xf32>
    %226 = arith.divf %224, %225 : vector<256x1xf32>
    %227 = vector.broadcast %226 : vector<256x1xf32> to vector<256x32xf32>
    %228 = arith.subf %222, %227 : vector<256x32xf32>
    %229 = arith.mulf %228, %228 : vector<256x32xf32>
    %cst_26 = arith.constant dense<0.000000e+00> : vector<256xf32>
    %230 = vector.multi_reduction <add>, %229, %cst_26 [1] : vector<256x32xf32> to vector<256xf32>
    %231 = vector.shape_cast %230 : vector<256xf32> to vector<256x1xf32>
    %cst_27 = arith.constant 3.200000e+01 : f32
    %232 = vector.broadcast %cst_27 : f32 to vector<256x1xf32>
    %233 = arith.divf %231, %232 : vector<256x1xf32>
    %cst_28 = arith.constant 9.99999974E-6 : f32
    %234 = vector.broadcast %cst_28 : f32 to vector<256x1xf32>
    %235 = arith.addf %233, %234 : vector<256x1xf32>
    %236 = math.rsqrt %235 : vector<256x1xf32>
    %237 = vector.broadcast %236 : vector<256x1xf32> to vector<256x32xf32>
    %238 = arith.mulf %228, %237 : vector<256x32xf32>
    %c0_29 = arith.constant 0 : index
    %c0_30 = arith.constant 0 : index
    %239 = vector.load %arg5[%c0_29, %c0_30] : memref<2x32xf32, #tpu.memory_space<vmem>>, vector<1x32xf32>
    %240 = vector.broadcast %239 : vector<1x32xf32> to vector<256x32xf32>
    %241 = arith.mulf %238, %240 : vector<256x32xf32>
    %c1_31 = arith.constant 1 : index
    %c0_32 = arith.constant 0 : index
    %242 = vector.load %arg5[%c1_31, %c0_32] : memref<2x32xf32, #tpu.memory_space<vmem>>, vector<1x32xf32>
    %243 = vector.broadcast %242 : vector<1x32xf32> to vector<256x32xf32>
    %244 = arith.addf %241, %243 : vector<256x32xf32>
    %245 = arith.truncf %244 : vector<256x32xf32> to vector<256x32xbf16>
    %c0_33 = arith.constant 0 : index
    %c0_34 = arith.constant 0 : index
    %246 = vector.load %arg6[%c0_33, %c0_34] : memref<33x128xf32, #tpu.memory_space<vmem>>, vector<32x128xf32>
    %247 = arith.truncf %246 : vector<32x128xf32> to vector<32x128xbf16>
    %cst_35 = arith.constant dense<0.000000e+00> : vector<256x128xf32>
    %248 = tpu.matmul %245, %247, %cst_35 {dimension_numbers = #tpu.dot_dimension_numbers<[1], [0], [0], [1], [0, 0, 1, 1], [], []>} : vector<256x32xbf16>, vector<32x128xbf16>, vector<256x128xf32> -> vector<256x128xf32>
    %c32 = arith.constant 32 : index
    %c0_36 = arith.constant 0 : index
    %249 = vector.load %arg6[%c32, %c0_36] : memref<33x128xf32, #tpu.memory_space<vmem>>, vector<1x128xf32>
    %250 = vector.broadcast %249 : vector<1x128xf32> to vector<256x128xf32>
    %251 = arith.addf %248, %250 : vector<256x128xf32>
    %252 = arith.mulf %58, %251 : vector<256x128xf32>
    %253 = tpu.transpose %252, [1, 0] : vector<256x128xf32> -> vector<128x256xf32>
    %c0_37 = arith.constant 0 : index
    %c0_38 = arith.constant 0 : index
    %c0_39 = arith.constant 0 : index
    %254 = vector.load %arg7[%c0_37, %c0_38, %c0_39] : memref<1x128x256xf32, #tpu.memory_space<vmem>>, vector<1x128x256xf32>
    %255 = vector.shape_cast %254 : vector<1x128x256xf32> to vector<128x256xf32>
    %256 = vector.shape_cast %253 : vector<128x256xf32> to vector<1x128x256xf32>
    tpu.vector_store %arg7[%c0_37, %c0_38, %c0_39], %256 {strides = array<i32>} : memref<1x128x256xf32, #tpu.memory_space<vmem>>, vector<1x128x256xf32>,
    return
  }
  func.func @transform_0(%arg0: i32) -> (i32, i32, i32) {
    %c0_i32 = arith.constant 0 : i32
    %c0_i32_0 = arith.constant 0 : i32
    %c0_i32_1 = arith.constant 0 : i32
    return %arg0, %c0_i32, %c0_i32_0 : i32, i32, i32
  }
  func.func @transform_1(%arg0: i32) -> (i32, i32) {
    %c0_i32 = arith.constant 0 : i32
    %c0_i32_0 = arith.constant 0 : i32
    %c0_i32_1 = arith.constant 0 : i32
    return %c0_i32, %c0_i32_0 : i32, i32
  }
  func.func @transform_2(%arg0: i32) -> (i32, i32) {
    %c0_i32 = arith.constant 0 : i32
    %c0_i32_0 = arith.constant 0 : i32
    %c0_i32_1 = arith.constant 0 : i32
    return %c0_i32, %c0_i32_0 : i32, i32
  }
  func.func @transform_3(%arg0: i32) -> (i32, i32) {
    %c0_i32 = arith.constant 0 : i32
    %c0_i32_0 = arith.constant 0 : i32
    %c0_i32_1 = arith.constant 0 : i32
    return %c0_i32, %c0_i32_0 : i32, i32
  }
  func.func @transform_4(%arg0: i32) -> (i32, i32) {
    %c0_i32 = arith.constant 0 : i32
    %c0_i32_0 = arith.constant 0 : i32
    %c0_i32_1 = arith.constant 0 : i32
    return %c0_i32, %c0_i32_0 : i32, i32
  }
  func.func @transform_5(%arg0: i32) -> (i32, i32) {
    %c0_i32 = arith.constant 0 : i32
    %c0_i32_0 = arith.constant 0 : i32
    %c0_i32_1 = arith.constant 0 : i32
    return %c0_i32, %c0_i32_0 : i32, i32
  }
  func.func @transform_6(%arg0: i32) -> (i32, i32, i32) {
    %c0_i32 = arith.constant 0 : i32
    %c0_i32_0 = arith.constant 0 : i32
    %c0_i32_1 = arith.constant 0 : i32
    return %arg0, %c0_i32, %c0_i32_0 : i32, i32, i32
  }
}

</mosaic_0001>

<bundles_post_ra>
// kernel: triangle_multiplication.1
= control target key start
LH: loop header
LB: loop body
LE: loop exit
PB: predicated region body
PF: predicated region fallthrough
CT: control target
= control target key end

     0   :  { %s5221_s21 = smov 0   ;;  %s10163_s0 = inlined_call_operand.vmem [shape: f32[2,128,256], index: 0, kind: input, shape index: {}]   ;;  %s10164_s1 = inlined_call_operand.vmem [shape: bf16[128,256], index: 1, kind: input, shape index: {}]   ;;  %s10165_s2 = inlined_call_operand.vmem [shape: f32[1,256], index: 2, kind: input, shape index: {}]   ;;  %s10166_s3 = inlined_call_operand.vmem [shape: f32[2,128], index: 3, kind: input, shape index: {}]   ;;  %s10167_s4 = inlined_call_operand.vmem [shape: f32[2,32], index: 4, kind: input, shape index: {}]   ;;  %s10168_s5 = inlined_call_operand.vmem [shape: f32[33,128], index: 5, kind: input, shape index: {}]   ;;  %s10169_s6 = inlined_call_operand.vmem [shape: f32[2,128,256], index: 6, kind: output, shape index: {}]  }
   0x1 LB: > { %s4763_s22 = sadd.s32 4294967295, %s5180_s21   ;;  %p4767_p0 = scmp.ge.s32.totalorder %s5180_s21, 1  ;;  %s5180_s21 = sphi %s5221_s21, %s16_s21  }
   0x2   : > { %p212_p1 = scmp.lt.s32.totalorder %s5180_s21, 3 }
   0x4   : > { %p213_p2 = pnand %p4767_p0, %p212_p1 }
   0x6   : > { %216 = sbr.rel (%p213_p2) target bundleno = 2587 (0xa1b), region = 44 }
   0xb   : > { %p242_p3 = scmp.lt.s32.totalorder %s4763_s22, 1  ;;  %v5182_v28 = vmov 128.0   ;;  %v4830_v56 = vld [vmem:[%s10164_s1 + $0x70] sm:$0xf]  ;;  %v4871_v57 = vld [vmem:[%s10164_s1 + $0x74] sm:$0xf0] }
   0xc   : > { %4907 = vrcp.f32 %v5182_v28  ;;  %v4870_v58 = vld [vmem:[%s10164_s1 + $0x74] sm:$0xf]  ;;  %v4831_v60 = vor.u32 %v4871_v57, %v4830_v56  ;;  %v4832_v61 = vld [vmem:[%s10164_s1 + $0x78] sm:$0xf0]  ;;  %s5183_s12 = smov 96   ;;  %s5184_s17 = smov 64  }
   0xd   : > { %s11026_s22 = smov (!%p242_p3, %s4763_s22), 1  ;;  %v5318_v62 = vor.u32 %v4870_v58, %v4832_v61  ;;  %v4857_v61 = vld [vmem:[%s10164_s1 + $0x4] sm:$0xf0] }
   0xe   : > { %s4854_s23 = sshll.u32 %s11026_s22, 8  ;;  %1182 = vmatpush.bf16.msra.mxu0 %v4831_v60  ;;  %4872 = vmatpush.bf16.msra.mxu3 %v4831_v60  ;;  %v4774_v60 = vld [vmem:[%s10164_s1] sm:$0xf] }
   0xf   : > { %s5237_s26 = scalar_lea.vmem %s10163_s0, %s4854_s23  ;;  %1271 = vmatpush.bf16.msra.mxu1 %v5318_v62  ;;  %s10120_s27 = scalar_lea.vmem %s10169_s6, %s4854_s23 }
  0x10   : > { %v253_v0 = vld [vmem:[%s5237_s26] sm:$0xff]  ;;  %v255_v1 = vld [vmem:[%s5237_s26 + $0x10] sm:$0xff]  ;;  %v254_v55 = vld [vmem:[%s5237_s26 + $0x8] sm:$0xff] }
  0x11   : > { %285 = vxpose.xlu0.b32.start [1/16] %v253_v0, 128  ;;  %v257_v2 = vld [vmem:[%s5237_s26 + $0x20] sm:$0xff]  ;;  %v259_v3 = vld [vmem:[%s5237_s26 + $0x30] sm:$0xff]  ;;  %v258_v28 = vld [vmem:[%s5237_s26 + $0x28] sm:$0xff] }
  0x12   : > { %v261_v4 = vld [vmem:[%s5237_s26 + $0x40] sm:$0xff]  ;;  %v263_v5 = vld [vmem:[%s5237_s26 + $0x50] sm:$0xff]  ;;  %v4908_v29 = vpop.eup %4907 }
  0x13   : > { %v265_v6 = vld [vmem:[%s5237_s26 + $0x60] sm:$0xff]  ;;  %v267_v7 = vld [vmem:[%s5237_s26 + $0x70] sm:$0xff]  ;;  %v414_v30 = vmul.f32 128.0, %v4908_v29  ;;  %vm418_vm0 = vweird.f32 %v4908_v29 }
  0x14   : > { %v269_v8 = vld [vmem:[%s5237_s26 + $0x80] sm:$0xff]  ;;  %v271_v9 = vld [vmem:[%s5237_s26 + $0x90] sm:$0xff] }
  0x15   : > { %v273_v10 = vld [vmem:[%s5237_s26 + $0xa0] sm:$0xff]  ;;  %v275_v11 = vld [vmem:[%s5237_s26 + $0xb0] sm:$0xff]  ;;  %v415_v31 = vsub.f32 1.0, %v414_v30  ;;  %v4863_v30 = vld [vmem:[%s10164_s1 + $0x34] sm:$0xf0] }
  0x16   : > { %v277_v12 = vld [vmem:[%s5237_s26 + $0xc0] sm:$0xff]  ;;  %v279_v13 = vld [vmem:[%s5237_s26 + $0xd0] sm:$0xff] }
  0x17   : > { %v281_v14 = vld [vmem:[%s5237_s26 + $0xe0] sm:$0xff]  ;;  %v283_v15 = vld [vmem:[%s5237_s26 + $0xf0] sm:$0xff]  ;;  %v416_v32 = vmul.f32 %v4908_v29, %v415_v31 }
  0x18   : > { %v4822_v0 = vld [vmem:[%s10164_s1 + $0x60] sm:$0xf]  ;;  %v4862_v31 = vld [vmem:[%s10164_s1 + $0x34] sm:$0xf] }
  0x19   : > { %286 = vxpose.xlu0.b32.cont [2/16] %v255_v1, 128  ;;  %v417_v33 = vadd.f32 %v4908_v29, %v416_v32  ;;  %v4869_v1 = vld [vmem:[%s10164_s1 + $0x64] sm:$0xf0] }
  0x1b   : > { %v5276_v34 = vsel %vm418_vm0, %v4908_v29, %v417_v33  ;;  %v4798_v29 = vld [vmem:[%s10164_s1 + $0x30] sm:$0xf] }
  0x1c   : > { %v4799_v33 = vor.u32 %v4863_v30, %v4798_v29 }
  0x21   : > { %287 = vxpose.xlu0.b32.cont [3/16] %v257_v2, 128  ;;  %v4868_v2 = vld [vmem:[%s10164_s1 + $0x64] sm:$0xf] }
  0x29   : > { %288 = vxpose.xlu0.b32.cont [4/16] %v259_v3, 128  ;;  %v4823_v3 = vor.u32 %v4869_v1, %v4822_v0  ;;  %v4856_v0 = vld [vmem:[%s10164_s1 + $0x4] sm:$0xf]  ;;  %v4775_v1 = vor.u32 %v4857_v61, %v4774_v60 }
  0x2b   : > { %1183 = vmatpush.bf16.msra.mxu0 %v4823_v3  ;;  %4873 = vmatpush.bf16.msra.mxu3 %v4823_v3 }
  0x31   : > { %289 = vxpose.xlu0.b32.cont [5/16] %v261_v4, 128  ;;  %v4824_v4 = vld [vmem:[%s10164_s1 + $0x68] sm:$0xf0] }
  0x39   : > { %290 = vxpose.xlu0.b32.cont [6/16] %v263_v5, 128  ;;  %v5335_v5 = vor.u32 %v4868_v2, %v4824_v4  ;;  %v4776_v2 = vld [vmem:[%s10164_s1 + $0x8] sm:$0xf0] }
  0x3a   : > { %v5439_v4 = vor.u32 %v4856_v0, %v4776_v2 }
  0x3b   : > { %1272 = vmatpush.bf16.msra.mxu1 %v5335_v5 }
  0x41   : > { %291 = vxpose.xlu0.b32.cont [7/16] %v265_v6, 128  ;;  %v256_v6 = vld [vmem:[%s5237_s26 + $0x18] sm:$0xff] }
  0x49   : > { %292 = vxpose.xlu0.b32.cont [8/16] %v267_v7, 128  ;;  %v4814_v7 = vld [vmem:[%s10164_s1 + $0x50] sm:$0xf] }
  0x51   : > { %293 = vxpose.xlu0.b32.cont [9/16] %v269_v8, 128  ;;  %v4867_v8 = vld [vmem:[%s10164_s1 + $0x54] sm:$0xf0] }
  0x59   : > { %294 = vxpose.xlu0.b32.cont [10/16] %v271_v9, 128  ;;  %v4866_v9 = vld [vmem:[%s10164_s1 + $0x54] sm:$0xf] }
  0x61   : > { %295 = vxpose.xlu0.b32.cont [11/16] %v273_v10, 128 }
  0x69   : > { %296 = vxpose.xlu0.b32.cont [12/16] %v275_v11, 128  ;;  %v4815_v11 = vor.u32 %v4867_v8, %v4814_v7 }
  0x6b   : > { %1184 = vmatpush.bf16.msra.mxu0 %v4815_v11  ;;  %4874 = vmatpush.bf16.msra.mxu3 %v4815_v11 }
  0x71   : > { %297 = vxpose.xlu0.b32.cont [13/16] %v277_v12, 128  ;;  %v4816_v12 = vld [vmem:[%s10164_s1 + $0x58] sm:$0xf0] }
  0x79   : > { %298 = vxpose.xlu0.b32.cont [14/16] %v279_v13, 128  ;;  %v5353_v13 = vor.u32 %v4866_v9, %v4816_v12 }
  0x7b   : > { %1273 = vmatpush.bf16.msra.mxu1 %v5353_v13 }
  0x81   : > { %299 = vxpose.xlu0.b32.cont [15/16] %v281_v14, 128 }
  0x89   : > { %300 = vxpose.xlu0.b32.end [16/16] %v283_v15, 128  ;;  %v4806_v15 = vld [vmem:[%s10164_s1 + $0x40] sm:$0xf] }
  0xb5   : > { %v301_v16 = vpop.trf.xlu0 }
  0xb6   : > { %349 = vadd.xlane.f32.xlu1 %v301_v16 }
  0xbd   : > { %v302_v17 = vpop.trf.xlu0 }
  0xbe   : > { %351 = vadd.xlane.f32.xlu1 %v302_v17 }
  0xc5   : > { %v303_v18 = vpop.trf.xlu0 }
  0xc6   : > { %353 = vadd.xlane.f32.xlu2 %v303_v18 }
  0xcd   : > { %v304_v19 = vpop.trf.xlu0 }
  0xce   : > { %355 = vadd.xlane.f32.xlu2 %v304_v19 }
  0xd5   : > { %v305_v20 = vpop.trf.xlu0 }
  0xd6   : > { %357 = vadd.xlane.f32.xlu1 %v305_v20 }
  0xdd   : > { %v5255_v21 = vpop.trf.xlu0 }
  0xde   : > { %359 = vadd.xlane.f32.xlu2 %v5255_v21 }
  0xe5   : > { %v5258_v22 = vpop.trf.xlu0 }
  0xe6   : > { %361 = vadd.xlane.f32.xlu1 %v5258_v22 }
  0xed   : > { %v5261_v23 = vpop.trf.xlu0 }
  0xee   : > { %363 = vadd.xlane.f32.xlu2 %v5261_v23 }
  0xf5   : > { %v5264_v24 = vpop.trf.xlu0 }
  0xf6   : > { %365 = vadd.xlane.f32.xlu1 %v5264_v24 }
  0xfd   : > { %v5267_v25 = vpop.trf.xlu0 }
  0xfe   : > { %367 = vadd.xlane.f32.xlu2 %v5267_v25 }
 0x105   : > { %v5270_v26 = vpop.trf.xlu0 }
 0x106   : > { %369 = vadd.xlane.f32.xlu1 %v5270_v26 }
 0x10d   : > { %v5273_v27 = vpop.trf.xlu0 }
 0x10e   : > { %371 = vadd.xlane.f32.xlu2 %v5273_v27 }
 0x129   : > { %v350_v35 = vpop.xlane.xlu1 %349 }
 0x12a   : > { %v420_v36 = vmul.f32 %v5276_v34, %v350_v35  ;;  %v4800_v35 = vld [vmem:[%s10164_s1 + $0x38] sm:$0xf0] }
 0x12c   : > { %v5279_v37 = vsub.f32 %v301_v16, %v420_v36  ;;  %v4865_v16 = vld [vmem:[%s10164_s1 + $0x44] sm:$0xf0]  ;;  %v5388_v36 = vor.u32 %v4862_v31, %v4800_v35 }
 0x12d   : > { %v266_v31 = vld [vmem:[%s5237_s26 + $0x68] sm:$0xff] }
 0x12e   : > { %v484_v38 = vmul.f32 %v5279_v37, %v5279_v37 }
 0x130   : > { %516 = vadd.xlane.f32.xlu1 %v484_v38 }
 0x131   : > { %v352_v39 = vpop.xlane.xlu1 %351 }
 0x132   : > { %v421_v40 = vmul.f32 %v5276_v34, %v352_v39  ;;  %v4790_v39 = vld [vmem:[%s10164_s1 + $0x20] sm:$0xf] }
 0x134   : > { %v5284_v41 = vsub.f32 %v302_v17, %v421_v40  ;;  %v4864_v17 = vld [vmem:[%s10164_s1 + $0x44] sm:$0xf]  ;;  %v4861_v40 = vld [vmem:[%s10164_s1 + $0x24] sm:$0xf0] }
 0x136   : > { %v485_v42 = vmul.f32 %v5284_v41, %v5284_v41 }
 0x138   : > { %518 = vadd.xlane.f32.xlu2 %v485_v42  ;;  %v4860_v42 = vld [vmem:[%s10164_s1 + $0x24] sm:$0xf] }
 0x139   : > { %v354_v43 = vpop.xlane.xlu2 %353 }
 0x13a   : > { %v422_v44 = vmul.f32 %v5276_v34, %v354_v43  ;;  %v4791_v43 = vor.u32 %v4861_v40, %v4790_v39  ;;  %v5452_v40 = vpop.trf.xlu0 }
 0x13c   : > { %v5289_v45 = vsub.f32 %v303_v18, %v422_v44  ;;  %v4807_v18 = vor.u32 %v4865_v16, %v4806_v15  ;;  %v4792_v44 = vld [vmem:[%s10164_s1 + $0x28] sm:$0xf0]  ;;  %v264_v15 = vld [vmem:[%s5237_s26 + $0x58] sm:$0xff] }
 0x13e   : > { %v486_v46 = vmul.f32 %v5289_v45, %v5289_v45  ;;  %1185 = vmatpush.bf16.msra.mxu0 %v4807_v18  ;;  %4875 = vmatpush.bf16.msra.mxu3 %v4807_v18 }
 0x140   : > { %520 = vadd.xlane.f32.xlu1 %v486_v46  ;;  %v5405_v46 = vor.u32 %v4860_v42, %v4792_v44 }
 0x141   : > { %v356_v47 = vpop.xlane.xlu2 %355 }
 0x142   : > { %v423_v48 = vmul.f32 %v5276_v34, %v356_v47  ;;  %1186 = vmatpush.bf16.msra.mxu0 %v4799_v33  ;;  %4876 = vmatpush.bf16.msra.mxu3 %v4799_v33  ;;  %v260_v47 = vld [vmem:[%s5237_s26 + $0x38] sm:$0xff]  ;;  %v5472_v60 = vpop.trf.xlu0 }
 0x144   : > { %v5294_v49 = vsub.f32 %v304_v19, %v423_v48  ;;  %v4808_v19 = vld [vmem:[%s10164_s1 + $0x48] sm:$0xf0]  ;;  %v4782_v48 = vld [vmem:[%s10164_s1 + $0x10] sm:$0xf] }
 0x146   : > { %v487_v50 = vmul.f32 %v5294_v49, %v5294_v49  ;;  %1187 = vmatpush.bf16.msra.mxu0 %v4791_v43  ;;  %4877 = vmatpush.bf16.msra.mxu3 %v4791_v43 }
 0x148   : > { %522 = vadd.xlane.f32.xlu2 %v487_v50  ;;  %v4859_v50 = vld [vmem:[%s10164_s1 + $0x14] sm:$0xf0] }
 0x149   : > { %v358_v51 = vpop.xlane.xlu1 %357 }
 0x14a   : > { %v424_v52 = vmul.f32 %v5276_v34, %v358_v51  ;;  %v4858_v51 = vld [vmem:[%s10164_s1 + $0x14] sm:$0xf] }
 0x14c   : > { %v5299_v53 = vsub.f32 %v305_v20, %v424_v52  ;;  %v5370_v20 = vor.u32 %v4864_v17, %v4808_v19 }
 0x14e   : > { %v488_v54 = vmul.f32 %v5299_v53, %v5299_v53  ;;  %1274 = vmatpush.bf16.msra.mxu1 %v5370_v20 }
 0x150   : > { %524 = vadd.xlane.f32.xlu1 %v488_v54  ;;  %v4783_v54 = vor.u32 %v4859_v50, %v4782_v48  ;;  %373 = vadd.xlane.f32.xlu2 %v5452_v40 }
 0x151   : > { %v5313_v59 = vpop.xlane.xlu2 %359 }
 0x152   : > { %1275 = vmatpush.bf16.msra.mxu1 %v5388_v36  ;;  %1188 = vmatpush.bf16.msra.mxu0 %v4783_v54 }
 0x153   : > { %4878 = vmatpush.bf16.msra.mxu3 %v4783_v54 }
 0x156   : > { %1276 = vmatpush.bf16.msra.mxu1 %v5405_v46  ;;  %1189 = vmatpush.bf16.msra.mxu0 %v4775_v1 }
 0x157   : > { %4879 = vmatpush.bf16.msra.mxu3 %v4775_v1 }
 0x158   : > { %375 = vadd.xlane.f32.xlu2 %v5472_v60 }
 0x159   : > { %v5320_v63 = vpop.xlane.xlu1 %361 }
 0x15b   : > { %4880 = vmatpush.bf16.msrb.mxu3 %v5318_v62 }
 0x15f   : > { %4881 = vmatpush.bf16.msrb.mxu3 %v5335_v5 }
 0x161   : > { %v5348_v10 = vpop.xlane.xlu2 %363 }
 0x163   : > { %4882 = vmatpush.bf16.msrb.mxu3 %v5353_v13 }
 0x167   : > { %4883 = vmatpush.bf16.msrb.mxu3 %v5370_v20 }
 0x169   : > { %v5355_v14 = vpop.xlane.xlu1 %365 }
 0x16b   : > { %4884 = vmatpush.bf16.msrb.mxu3 %v5388_v36 }
 0x16f   : > { %4885 = vmatpush.bf16.msrb.mxu3 %v5405_v46 }
 0x171   : > { %v5383_v32 = vpop.xlane.xlu2 %367 }
 0x179   : > { %v5390_v38 = vpop.xlane.xlu1 %369 }
 0x181   : > { %v5418_v52 = vpop.xlane.xlu2 %371 }
 0x18a   : > { %317 = vxpose.xlu1.b32.start [1/16] %v254_v55, 128  ;;  %v4784_v55 = vld [vmem:[%s10164_s1 + $0x18] sm:$0xf0] }
 0x18b   : > { %v5423_v56 = vor.u32 %v4858_v51, %v4784_v55  ;;  %v268_v51 = vld [vmem:[%s5237_s26 + $0x78] sm:$0xff] }
 0x18d   : > { %1277 = vmatpush.bf16.msra.mxu1 %v5423_v56  ;;  %4886 = vmatpush.bf16.msrb.mxu3 %v5423_v56 }
 0x191   : > { %1278 = vmatpush.bf16.msra.mxu1 %v5439_v4  ;;  %4887 = vmatpush.bf16.msrb.mxu3 %v5439_v4 }
 0x192   : > { %318 = vxpose.xlu1.b32.cont [2/16] %v256_v6, 128  ;;  %v262_v6 = vld [vmem:[%s5237_s26 + $0x48] sm:$0xff] }
 0x19a   : > { %319 = vxpose.xlu1.b32.cont [3/16] %v258_v28, 128 }
 0x1a2   : > { %320 = vxpose.xlu1.b32.cont [4/16] %v260_v47, 128  ;;  %v5461_v47 = vld [vmem:[%s10166_s3] ss:$0 sm:$0xff] }
 0x1a3   : > { %v517_v57 = vpop.xlane.xlu1 %516 }
 0x1a4   : > { %v580_v58 = vmul.f32 %v517_v57, %v5276_v34  ;;  %v5470_v57 = vld [vmem:[%s10166_s3 + $0x1] ss:$0 sm:$0xff] }
 0x1a6   : > { %v612_v3 = vadd.f32 1e-05, %v580_v58 }
 0x1a8   : > { %4909 = vrsqrt.f32 %v612_v3  ;;  %vm650_vm2 = vweird.f32 %v612_v3 }
 0x1aa   : > { %321 = vxpose.xlu1.b32.cont [5/16] %v262_v6, 128  ;;  %v270_v6 = vld [vmem:[%s5237_s26 + $0x88] sm:$0xff] }
 0x1ab   : > { %v519_v7 = vpop.xlane.xlu2 %518 }
 0x1ac   : > { %v581_v8 = vmul.f32 %v519_v7, %v5276_v34 }
 0x1ae   : > { %v4910_v9 = vpop.eup %4909  ;;  %v613_v11 = vadd.f32 1e-05, %v581_v8 }
 0x1af   : > { %v645_v12 = vmul.f32 %v4910_v9, %v612_v3  ;;  %vm651_vm1 = vweird.f32 %v4910_v9 }
 0x1b0   : > { %4911 = vrsqrt.f32 %v613_v11  ;;  %vm652_vm3 = vmor %vm650_vm2, %vm651_vm1  ;;  %vm660_vm5 = vweird.f32 %v613_v11 }
 0x1b1   : > { %v646_v16 = vmul.f32 %v4910_v9, %v645_v12 }
 0x1b2   : > { %322 = vxpose.xlu1.b32.cont [6/16] %v264_v15, 128 }
 0x1b3   : > { %v647_v17 = vmul.f32 0.5, %v646_v16  ;;  %v521_v18 = vpop.xlane.xlu1 %520 }
 0x1b4   : > { %v582_v62 = vmul.f32 %v521_v18, %v5276_v34 }
 0x1b5   : > { %v648_v19 = vsub.f32 1.5, %v647_v17  ;;  %v272_v17 = vld [vmem:[%s5237_s26 + $0x98] sm:$0xff] }
 0x1b6   : > { %v4912_v28 = vpop.eup %4911  ;;  %v614_v29 = vadd.f32 1e-05, %v582_v62 }
 0x1b7   : > { %v649_v5 = vmul.f32 %v4910_v9, %v648_v19  ;;  %v655_v30 = vmul.f32 %v4912_v28, %v613_v11  ;;  %vm661_vm4 = vweird.f32 %v4912_v28  ;;  %v5480_v11 = vpop.trf.xlu0 }
 0x1b8   : > { %4913 = vrsqrt.f32 %v614_v29  ;;  %vm662_vm6 = vmor %vm660_vm5, %vm661_vm4  ;;  %vm670_vm8 = vweird.f32 %v614_v29  ;;  %377 = vadd.xlane.f32.xlu2 %v5480_v11 }
 0x1b9   : > { %v656_v13 = vmul.f32 %v4912_v28, %v655_v30  ;;  %v653_v39 = vsel %vm652_vm3, %v4910_v9, %v649_v5  ;;  %v274_v5 = vld [vmem:[%s5237_s26 + $0xa8] sm:$0xff] }
 0x1ba   : > { %323 = vxpose.xlu1.b32.cont [7/16] %v266_v31, 128  ;;  %v964_v44 = vmul.f32 %v653_v39, %v5279_v37  ;;  %v276_v31 = vld [vmem:[%s5237_s26 + $0xb8] sm:$0xff] }
 0x1bb   : > { %v657_v33 = vmul.f32 0.5, %v656_v13  ;;  %v523_v35 = vpop.xlane.xlu2 %522  ;;  %v284_v39 = vld [vmem:[%s5237_s26 + $0xf8] sm:$0xff] }
 0x1bc   : > { %v583_v20 = vmul.f32 %v523_v35, %v5276_v34  ;;  %v998_v37 = vmul.f32 %v5461_v47, %v964_v44  ;;  %v282_v35 = vld [vmem:[%s5237_s26 + $0xe8] sm:$0xff] }
 0x1bd   : > { %v658_v42 = vsub.f32 1.5, %v657_v33  ;;  %v280_v33 = vld [vmem:[%s5237_s26 + $0xd8] sm:$0xff] }
 0x1be   : > { %v4914_v43 = vpop.eup %4913  ;;  %v615_v36 = vadd.f32 1e-05, %v583_v20 }
 0x1bf   : > { %v659_v48 = vmul.f32 %v4912_v28, %v658_v42  ;;  %v665_v50 = vmul.f32 %v4914_v43, %v614_v29  ;;  %vm671_vm7 = vweird.f32 %v4914_v43  ;;  %v316_v13 = vpop.trf.xlu0 }
 0x1c0   : > { %4915 = vrsqrt.f32 %v615_v36  ;;  %vm672_vm9 = vmor %vm670_vm8, %vm671_vm7  ;;  %vm680_vm11 = vweird.f32 %v615_v36  ;;  %379 = vadd.xlane.f32.xlu0 %v316_v13 }
 0x1c1   : > { %v666_v46 = vmul.f32 %v4914_v43, %v665_v50  ;;  %v663_v54 = vsel %vm662_vm6, %v4912_v28, %v659_v48 }
 0x1c2   : > { %324 = vxpose.xlu1.b32.cont [8/16] %v268_v51, 128  ;;  %v965_v55 = vmul.f32 %v663_v54, %v5284_v41  ;;  %v1032_v41 = vadd.f32 %v5470_v57, %v998_v37 }
 0x1c3   : > { %v667_v58 = vmul.f32 0.5, %v666_v46  ;;  %v5496_v20 = vpop.xlane.xlu1 %524 }
 0x1c4   : > { %v999_v61 = vmul.f32 %v5461_v47, %v965_v55 }
 0x1c5   : > { %v668_v56 = vsub.f32 1.5, %v667_v58 }
 0x1c6   : > { %v4916_v0 = vpop.eup %4915  ;;  %v1033_v1 = vadd.f32 %v5470_v57, %v999_v61 }
 0x1c7   : > { %v669_v2 = vmul.f32 %v4914_v43, %v668_v56  ;;  %v675_v3 = vmul.f32 %v4916_v0, %v615_v36  ;;  %vm681_vm10 = vweird.f32 %v4916_v0 }
 0x1c8   : > { %v1064_v7 = vpack.c.bf16 %v1033_v1, %v1032_v41  ;;  %vm682_vm12 = vmor %vm680_vm11, %vm681_vm10 }
 0x1c9   : > { %v676_v8 = vmul.f32 %v4916_v0, %v675_v3  ;;  %v673_v4 = vsel %vm672_vm9, %v4914_v43, %v669_v2 }
 0x1ca   : > { %325 = vxpose.xlu1.b32.cont [9/16] %v270_v6, 128  ;;  %1190 = vmatmul.bf16.vlgmr.msra.gmra.mxu0 %v1064_v7  ;;  %v966_v15 = vmul.f32 %v673_v4, %v5289_v45  ;;  %v425_v6 = vmul.f32 %v5276_v34, %v5313_v59  ;;  %v374_v4 = vpop.xlane.xlu2 %373 }
 0x1cb   : > { %v677_v9 = vmul.f32 0.5, %v676_v8  ;;  %1279 = vmatmul.bf16.vlgmr.msra.gmra.mxu1 %v1064_v7  ;;  %v426_v8 = vmul.f32 %v5276_v34, %v5320_v63  ;;  %v428_v63 = vmul.f32 %v5276_v34, %v5355_v14 }
 0x1cc   : > { %v1000_v19 = vmul.f32 %v5461_v47, %v966_v15  ;;  %v5543_v7 = vsub.f32 %v5255_v21, %v425_v6  ;;  %v427_v15 = vmul.f32 %v5276_v34, %v5348_v10  ;;  %v429_v10 = vmul.f32 %v5276_v34, %v5383_v32 }
 0x1cd   : > { %v678_v12 = vsub.f32 1.5, %v677_v9 }
 0x1ce   : > { %v1034_v29 = vadd.f32 %v5470_v57, %v1000_v19  ;;  %v489_v9 = vmul.f32 %v5543_v7, %v5543_v7 }
 0x1cf   : > { %v679_v16 = vmul.f32 %v4916_v0, %v678_v12  ;;  %v5550_v12 = vsub.f32 %v5258_v22, %v426_v8  ;;  %v5564_v22 = vsub.f32 %v5264_v24, %v428_v63 }
 0x1d1   : > { %v683_v18 = vsel %vm682_vm12, %v4916_v0, %v679_v16  ;;  %v490_v59 = vmul.f32 %v5550_v12, %v5550_v12  ;;  %v5557_v16 = vsub.f32 %v5261_v23, %v427_v15  ;;  %v5571_v23 = vsub.f32 %v5267_v25, %v429_v10 }
 0x1d2   : > { %326 = vxpose.xlu1.b32.cont [10/16] %v272_v17, 128  ;;  %v967_v62 = vmul.f32 %v683_v18, %v5294_v49  ;;  %v278_v49 = vld [vmem:[%s5237_s26 + $0xc8] sm:$0xff]  ;;  %v376_v21 = vpop.xlane.xlu2 %375  ;;  %v430_v25 = vmul.f32 %v5276_v34, %v5390_v38 }
 0x1d3   : > { %v491_v17 = vmul.f32 %v5557_v16, %v5557_v16  ;;  %v433_v15 = vmul.f32 %v5276_v34, %v376_v21 }
 0x1d4   : > { %v1001_v28 = vmul.f32 %v5461_v47, %v967_v62  ;;  %v492_v62 = vmul.f32 %v5564_v22, %v5564_v22 }
 0x1d5   : > { %v5632_v10 = vsub.f32 %v5472_v60, %v433_v15 }
 0x1d6   : > { %v1035_v45 = vadd.f32 %v5470_v57, %v1001_v28  ;;  %v493_v28 = vmul.f32 %v5571_v23, %v5571_v23 }
 0x1d8   : > { %v1065_v30 = vpack.c.bf16 %v1035_v45, %v1034_v29 }
 0x1da   : > { %327 = vxpose.xlu1.b32.cont [11/16] %v274_v5, 128  ;;  %1195 = vmatmul.bf16.gmra.mxu0 %v1065_v30 }
 0x1db   : > { %1284 = vmatmul.bf16.gmra.mxu1 %v1065_v30 }
 0x1e2   : > { %328 = vxpose.xlu1.b32.cont [12/16] %v276_v31, 128 }
 0x1ea   : > { %329 = vxpose.xlu1.b32.cont [13/16] %v278_v49, 128 }
 0x1f2   : > { %330 = vxpose.xlu1.b32.cont [14/16] %v280_v33, 128  ;;  %v5591_v33 = vsub.f32 %v5270_v26, %v430_v25  ;;  %v1096_v26 = vld [vmem:[%s10165_s2] sm:$0x3] }
 0x1f4   : > { %v494_v38 = vmul.f32 %v5591_v33, %v5591_v33 }
 0x1fa   : > { %331 = vxpose.xlu1.b32.cont [15/16] %v282_v35, 128 }
 0x202   : > { %332 = vxpose.xlu1.b32.end [16/16] %v284_v39, 128  ;;  %v431_v39 = vmul.f32 %v5276_v34, %v5418_v52  ;;  %v432_v52 = vmul.f32 %v5276_v34, %v374_v4 }
 0x22b   : > { %v378_v18 = vpop.xlane.xlu2 %377 }
 0x22e   : > { %v5498_v42 = vpop.trf.xlu1 }
 0x233   : > { %v380_v0 = vpop.xlane.xlu0 %379 }
 0x234   : > { %v435_v41 = vmul.f32 %v5276_v34, %v380_v0  ;;  %v5606_v0 = vsub.f32 %v5273_v27, %v431_v39 }
 0x236   : > { %v5500_v43 = vpop.trf.xlu1  ;;  %v5532_v2 = vsub.f32 %v316_v13, %v435_v41  ;;  %v5608_v41 = vperm.slane %v1096_v26, 0 }
 0x238   : > { %v499_v3 = vmul.f32 %v5532_v2, %v5532_v2 }
 0x23e   : > { %v5502_v36 = vpop.trf.xlu1 }
 0x246   : > { %v5504_v44 = vpop.trf.xlu1 }
 0x247   : > { %v5587_v13 = vpop.f32.mrf.mxu0 }
 0x24e   : > { %v5506_v48 = vpop.trf.xlu1 }
 0x256   : > { %v5508_v50 = vpop.trf.xlu1 }
 0x257   : > { %391 = vadd.xlane.f32.xlu0 %v5508_v50 }
 0x25e   : > { %v5511_v51 = vpop.trf.xlu1 }
 0x266   : > { %v5513_v46 = vpop.trf.xlu1 }
 0x26e   : > { %v341_v54 = vpop.trf.xlu1 }
 0x26f   : > { %397 = vadd.xlane.f32.xlu2 %v341_v54 }
 0x276   : > { %v342_v55 = vpop.trf.xlu1 }
 0x277   : > { %399 = vadd.xlane.f32.xlu2 %v342_v55 }
 0x27e   : > { %v5515_v37 = vpop.trf.xlu1 }
 0x27f   : > { %381 = vadd.xlane.f32.xlu2 %v5498_v42 }
 0x286   : > { %v5518_v58 = vpop.trf.xlu1 }
 0x287   : > { %383 = vadd.xlane.f32.xlu2 %v5500_v43 }
 0x28e   : > { %v5521_v61 = vpop.trf.xlu1 }
 0x28f   : > { %401 = vadd.xlane.f32.xlu2 %v5515_v37 }
 0x296   : > { %v5524_v56 = vpop.trf.xlu1 }
 0x297   : > { %403 = vadd.xlane.f32.xlu2 %v5518_v58 }
 0x29e   : > { %v5528_v1 = vpop.trf.xlu1 }
 0x29f   : > { %385 = vadd.xlane.f32.xlu2 %v5502_v36  ;;  %409 = vadd.xlane.f32.xlu0 %v5528_v1 }
 0x2a7   : > { %387 = vadd.xlane.f32.xlu2 %v5504_v44  ;;  %546 = vadd.xlane.f32.xlu0 %v499_v3  ;;  %v495_v3 = vmul.f32 %v5606_v0, %v5606_v0 }
 0x2af   : > { %405 = vadd.xlane.f32.xlu2 %v5521_v61 }
 0x2b7   : > { %407 = vadd.xlane.f32.xlu2 %v5524_v56 }
 0x2bf   : > { %389 = vadd.xlane.f32.xlu2 %v5506_v48 }
 0x2c7   : > { %526 = vadd.xlane.f32.xlu2 %v489_v9  ;;  %v5621_v9 = vsub.f32 %v5452_v40, %v432_v52  ;;  %v497_v40 = vmul.f32 %v5632_v10, %v5632_v10 }
 0x2cf   : > { %528 = vadd.xlane.f32.xlu2 %v490_v59  ;;  %v496_v59 = vmul.f32 %v5621_v9, %v5621_v9 }
 0x2d7   : > { %530 = vadd.xlane.f32.xlu2 %v491_v17 }
 0x2df   : > { %532 = vadd.xlane.f32.xlu2 %v492_v62 }
 0x2e2   : > { %v398_v19 = vpop.xlane.xlu2 %397 }
 0x2e3   : > { %v444_v14 = vmul.f32 %v5276_v34, %v398_v19  ;;  %v5640_v19 = vpop.trf.xlu1 }
 0x2e5   : > { %v5576_v29 = vsub.f32 %v341_v54, %v444_v14  ;;  %v434_v14 = vmul.f32 %v5276_v34, %v378_v18 }
 0x2e7   : > { %534 = vadd.xlane.f32.xlu2 %v493_v28  ;;  %v508_v24 = vmul.f32 %v5576_v29, %v5576_v29 }
 0x2e9   : > { %564 = vadd.xlane.f32.xlu1 %v508_v24  ;;  %v5647_v24 = vsub.f32 %v5480_v11, %v434_v14 }
 0x2ea   : > { %v400_v32 = vpop.xlane.xlu2 %399 }
 0x2eb   : > { %v445_v45 = vmul.f32 %v5276_v34, %v400_v32 }
 0x2ed   : > { %v5581_v5 = vsub.f32 %v342_v55, %v445_v45 }
 0x2ef   : > { %v509_v30 = vmul.f32 %v5581_v5, %v5581_v5 }
 0x2f1   : > { %566 = vadd.xlane.f32.xlu2 %v509_v30  ;;  %v584_v30 = vmul.f32 %v5496_v20, %v5276_v34 }
 0x2f2   : > { %v382_v31 = vpop.xlane.xlu2 %381 }
 0x2f3   : > { %v436_v49 = vmul.f32 %v5276_v34, %v382_v31  ;;  %v616_v39 = vadd.f32 1e-05, %v584_v30 }
 0x2f5   : > { %v5594_v35 = vsub.f32 %v5498_v42, %v436_v49  ;;  %v1193_v42 = vpop.f32.mrf.mxu0  ;;  %4917 = vrsqrt.f32 %v616_v39  ;;  %vm690_vm14 = vweird.f32 %v616_v39 }
 0x2f6   : > { %v5614_v6 = vadd.f32 %v1193_v42, %v5608_v41 }
 0x2f7   : > { %v500_v54 = vmul.f32 %v5594_v35, %v5594_v35 }
 0x2f9   : > { %536 = vadd.xlane.f32.xlu2 %v494_v38  ;;  %548 = vadd.xlane.f32.xlu0 %v500_v54  ;;  %v392_v54 = vpop.xlane.xlu0 %391 }
 0x2fa   : > { %v384_v55 = vpop.xlane.xlu2 %383 }
 0x2fb   : > { %v437_v32 = vmul.f32 %v5276_v34, %v384_v55  ;;  %v4918_v55 = vpop.eup %4917 }
 0x2fc   : > { %vm691_vm13 = vweird.f32 %v4918_v55 }
 0x2fd   : > { %v5654_v18 = vsub.f32 %v5500_v43, %v437_v32  ;;  %vm692_vm15 = vmor %vm690_vm14, %vm691_vm13 }
 0x2ff   : > { %v501_v11 = vmul.f32 %v5654_v18, %v5654_v18 }
 0x301   : > { %538 = vadd.xlane.f32.xlu2 %v495_v3  ;;  %393 = vadd.xlane.f32.xlu0 %v5511_v51  ;;  %v685_v3 = vmul.f32 %v4918_v55, %v616_v39 }
 0x302   : > { %1522 = vrot.lane.b32.xlu1 %v5614_v6, %s5183_s12  ;;  %v402_v27 = vpop.xlane.xlu2 %401 }
 0x303   : > { %v446_v8 = vmul.f32 %v5276_v34, %v402_v27 }
 0x305   : > { %v5624_v4 = vsub.f32 %v5515_v37, %v446_v8 }
 0x307   : > { %v510_v63 = vmul.f32 %v5624_v4, %v5624_v4 }
 0x309   : > { %540 = vadd.xlane.f32.xlu2 %v496_v59  ;;  %568 = vadd.xlane.f32.xlu0 %v510_v63  ;;  %v686_v63 = vmul.f32 %v4918_v55, %v685_v3 }
 0x30a   : > { %v404_v17 = vpop.xlane.xlu2 %403 }
 0x30b   : > { %v447_v43 = vmul.f32 %v5276_v34, %v404_v17 }
 0x30d   : > { %v5669_v26 = vsub.f32 %v5518_v58, %v447_v43 }
 0x30f   : > { %v511_v15 = vmul.f32 %v5669_v26, %v5669_v26 }
 0x311   : > { %542 = vadd.xlane.f32.xlu2 %v497_v40 }
 0x312   : > { %v386_v37 = vpop.xlane.xlu2 %385  ;;  %v410_v42 = vpop.xlane.xlu0 %409 }
 0x313   : > { %v438_v62 = vmul.f32 %v5276_v34, %v386_v37  ;;  %v450_v27 = vmul.f32 %v5276_v34, %v410_v42 }
 0x315   : > { %v5638_v21 = vsub.f32 %v5502_v36, %v438_v62  ;;  %v498_v36 = vmul.f32 %v5647_v24, %v5647_v24  ;;  %v5685_v40 = vsub.f32 %v5528_v1, %v450_v27  ;;  %v687_v62 = vmul.f32 0.5, %v686_v63 }
 0x317   : > { %v502_v28 = vmul.f32 %v5638_v21, %v5638_v21  ;;  %v688_v32 = vsub.f32 1.5, %v687_v62 }
 0x319   : > { %411 = vadd.xlane.f32.xlu2 %v5640_v19  ;;  %552 = vadd.xlane.f32.xlu0 %v502_v28  ;;  %v689_v30 = vmul.f32 %v4918_v55, %v688_v32 }
 0x31a   : > { %v388_v60 = vpop.xlane.xlu2 %387 }
 0x31b   : > { %v439_v8 = vmul.f32 %v5276_v34, %v388_v60  ;;  %v514_v60 = vmul.f32 %v5685_v40, %v5685_v40  ;;  %v693_v42 = vsel %vm692_vm15, %v4918_v55, %v689_v30 }
 0x321   : > { %544 = vadd.xlane.f32.xlu2 %v498_v36 }
 0x322   : > { %v406_v45 = vpop.xlane.xlu2 %405 }
 0x323   : > { %v448_v25 = vmul.f32 %v5276_v34, %v406_v45 }
 0x325   : > { %v5659_v31 = vsub.f32 %v5521_v61, %v448_v25 }
 0x327   : > { %v512_v49 = vmul.f32 %v5659_v31, %v5659_v31 }
 0x329   : > { %550 = vadd.xlane.f32.xlu2 %v501_v11  ;;  %572 = vadd.xlane.f32.xlu0 %v512_v49  ;;  %v441_v49 = vmul.f32 %v5276_v34, %v392_v54 }
 0x32a   : > { %v408_v38 = vpop.xlane.xlu2 %407 }
 0x32b   : > { %v449_v14 = vmul.f32 %v5276_v34, %v408_v38  ;;  %v5701_v3 = vsub.f32 %v5508_v50, %v441_v49 }
 0x32d   : > { %v5694_v1 = vsub.f32 %v5524_v56, %v449_v14  ;;  %v505_v63 = vmul.f32 %v5701_v3, %v5701_v3 }
 0x32f   : > { %v513_v38 = vmul.f32 %v5694_v1, %v5694_v1 }
 0x331   : > { %395 = vadd.xlane.f32.xlu2 %v5513_v46 }
 0x332   : > { %v390_v20 = vpop.xlane.xlu2 %389 }
 0x333   : > { %v440_v61 = vmul.f32 %v5276_v34, %v390_v20 }
 0x335   : > { %v5672_v52 = vsub.f32 %v5506_v48, %v440_v61  ;;  %v5682_v48 = vsub.f32 %v5504_v44, %v439_v8 }
 0x337   : > { %v504_v59 = vmul.f32 %v5672_v52, %v5672_v52  ;;  %v503_v28 = vmul.f32 %v5682_v48, %v5682_v48 }
 0x339   : > { %570 = vadd.xlane.f32.xlu2 %v511_v15  ;;  %556 = vadd.xlane.f32.xlu0 %v504_v59  ;;  %v968_v15 = vmul.f32 %v693_v42, %v5299_v53 }
 0x33a   : > { %v527_v58 = vpop.xlane.xlu2 %526 }
 0x33b   : > { %v585_v17 = vmul.f32 %v527_v58, %v5276_v34 }
 0x33d   : > { %v617_v37 = vadd.f32 1e-05, %v585_v17  ;;  %v1002_v17 = vmul.f32 %v5461_v47, %v968_v15 }
 0x33f   : > { %4919 = vrsqrt.f32 %v617_v37  ;;  %vm700_vm1 = vweird.f32 %v617_v37 }
 0x341   : > { %554 = vadd.xlane.f32.xlu2 %v503_v28  ;;  %576 = vadd.xlane.f32.xlu0 %v514_v60 }
 0x342   : > { %v529_v36 = vpop.xlane.xlu2 %528 }
 0x343   : > { %v586_v44 = vmul.f32 %v529_v36, %v5276_v34  ;;  %v1036_v36 = vadd.f32 %v5470_v57, %v1002_v17 }
 0x345   : > { %v4920_v45 = vpop.eup %4919  ;;  %v618_v25 = vadd.f32 1e-05, %v586_v44 }
 0x346   : > { %v695_v11 = vmul.f32 %v4920_v45, %v617_v37  ;;  %vm701_vm0 = vweird.f32 %v4920_v45 }
 0x347   : > { %4921 = vrsqrt.f32 %v618_v25  ;;  %vm702_vm2 = vmor %vm700_vm1, %vm701_vm0  ;;  %vm710_vm4 = vweird.f32 %v618_v25 }
 0x348   : > { %v696_v43 = vmul.f32 %v4920_v45, %v695_v11 }
 0x349   : > { %574 = vadd.xlane.f32.xlu2 %v513_v38 }
 0x34a   : > { %v697_v20 = vmul.f32 0.5, %v696_v43  ;;  %v531_v61 = vpop.xlane.xlu2 %530 }
 0x34b   : > { %v587_v56 = vmul.f32 %v531_v61, %v5276_v34 }
 0x34c   : > { %v698_v27 = vsub.f32 1.5, %v697_v20 }
 0x34d   : > { %v4922_v8 = vpop.eup %4921  ;;  %v619_v54 = vadd.f32 1e-05, %v587_v56 }
 0x34e   : > { %v699_v59 = vmul.f32 %v4920_v45, %v698_v27  ;;  %v705_v39 = vmul.f32 %v4922_v8, %v618_v25  ;;  %vm711_vm3 = vweird.f32 %v4922_v8 }
 0x34f   : > { %4923 = vrsqrt.f32 %v619_v54  ;;  %vm712_vm5 = vmor %vm710_vm4, %vm711_vm3  ;;  %vm720_vm7 = vweird.f32 %v619_v54 }
 0x350   : > { %v706_v55 = vmul.f32 %v4922_v8, %v705_v39  ;;  %v703_v58 = vsel %vm702_vm2, %v4920_v45, %v699_v59 }
 0x351   : > { %558 = vadd.xlane.f32.xlu2 %v505_v63  ;;  %v969_v50 = vmul.f32 %v703_v58, %v5543_v7 }
 0x352   : > { %v707_v62 = vmul.f32 0.5, %v706_v55  ;;  %v533_v14 = vpop.xlane.xlu2 %532 }
 0x353   : > { %v588_v28 = vmul.f32 %v533_v14, %v5276_v34  ;;  %v1003_v53 = vmul.f32 %v5461_v47, %v969_v50  ;;  %v5718_v14 = vpop.xlane.xlu0 %546 }
 0x354   : > { %v708_v37 = vsub.f32 1.5, %v707_v62 }
 0x355   : > { %v4924_v60 = vpop.eup %4923  ;;  %v620_v32 = vadd.f32 1e-05, %v588_v28  ;;  %v1037_v44 = vadd.f32 %v5470_v57, %v1003_v53 }
 0x356   : > { %v709_v30 = vmul.f32 %v4922_v8, %v708_v37  ;;  %v715_v45 = vmul.f32 %v4924_v60, %v619_v54  ;;  %vm721_vm6 = vweird.f32 %v4924_v60 }
 0x357   : > { %4925 = vrsqrt.f32 %v620_v32  ;;  %v1066_v7 = vpack.c.bf16 %v1037_v44, %v1036_v36  ;;  %vm722_vm8 = vmor %vm720_vm7, %vm721_vm6  ;;  %vm730_vm10 = vweird.f32 %v620_v32 }
 0x358   : > { %v716_v11 = vmul.f32 %v4924_v60, %v715_v45  ;;  %v713_v43 = vsel %vm712_vm5, %v4922_v8, %v709_v30 }
 0x359   : > { %1200 = vmatmul.bf16.gmra.mxu0 %v1066_v7  ;;  %1289 = vmatmul.bf16.gmra.mxu1 %v1066_v7  ;;  %v970_v59 = vmul.f32 %v713_v43, %v5550_v12 }
 0x35a   : > { %v717_v49 = vmul.f32 0.5, %v716_v11  ;;  %v535_v38 = vpop.xlane.xlu2 %534 }
 0x35b   : > { %v589_v20 = vmul.f32 %v535_v38, %v5276_v34  ;;  %v1004_v50 = vmul.f32 %v5461_v47, %v970_v59 }
 0x35c   : > { %v718_v61 = vsub.f32 1.5, %v717_v49  ;;  %v565_v42 = vpop.xlane.xlu1 %564 }
 0x35d   : > { %v4926_v56 = vpop.eup %4925  ;;  %v621_v27 = vadd.f32 1e-05, %v589_v20  ;;  %v604_v15 = vmul.f32 %v565_v42, %v5276_v34  ;;  %v1038_v37 = vadd.f32 %v5470_v57, %v1004_v50 }
 0x35e   : > { %v719_v39 = vmul.f32 %v4924_v60, %v718_v61  ;;  %v725_v25 = vmul.f32 %v4926_v56, %v620_v32  ;;  %vm731_vm9 = vweird.f32 %v4926_v56 }
 0x35f   : > { %4927 = vrsqrt.f32 %v621_v27  ;;  %v636_v63 = vadd.f32 1e-05, %v604_v15  ;;  %vm732_vm11 = vmor %vm730_vm10, %vm731_vm9  ;;  %vm740_vm13 = vweird.f32 %v621_v27 }
 0x360   : > { %v726_v55 = vmul.f32 %v4926_v56, %v725_v25  ;;  %v723_v58 = vsel %vm722_vm8, %v4924_v60, %v719_v39 }
 0x361   : > { %4929 = vrsqrt.f32 %v636_v63  ;;  %v971_v8 = vmul.f32 %v723_v58, %v5557_v16  ;;  %vm890_vm0 = vweird.f32 %v636_v63 }
 0x362   : > { %v727_v17 = vmul.f32 0.5, %v726_v55 }
 0x363   : > { %v1005_v62 = vmul.f32 %v5461_v47, %v971_v8 }
 0x364   : > { %v728_v28 = vsub.f32 1.5, %v727_v17  ;;  %v567_v12 = vpop.xlane.xlu2 %566 }
 0x365   : > { %v4928_v53 = vpop.eup %4927  ;;  %v605_v54 = vmul.f32 %v567_v12, %v5276_v34  ;;  %v1039_v36 = vadd.f32 %v5470_v57, %v1005_v62 }
 0x366   : > { %v729_v60 = vmul.f32 %v4926_v56, %v728_v28  ;;  %v735_v44 = vmul.f32 %v4928_v53, %v621_v27  ;;  %vm741_vm12 = vweird.f32 %v4928_v53 }
 0x367   : > { %v4930_v16 = vpop.eup %4929  ;;  %v637_v30 = vadd.f32 1e-05, %v605_v54  ;;  %v1067_v45 = vpack.c.bf16 %v1039_v36, %v1038_v37  ;;  %vm742_vm14 = vmor %vm740_vm13, %vm741_vm12 }
 0x368   : > { %v736_v7 = vmul.f32 %v4928_v53, %v735_v44  ;;  %v885_v11 = vmul.f32 %v4930_v16, %v636_v63  ;;  %v733_v43 = vsel %vm732_vm11, %v4926_v56, %v729_v60  ;;  %vm891_vm15 = vweird.f32 %v4930_v16 }
 0x369   : > { %4931 = vrsqrt.f32 %v637_v30  ;;  %1205 = vmatmul.bf16.gmra.mxu0 %v1067_v45  ;;  %1294 = vmatmul.bf16.gmra.mxu1 %v1067_v45  ;;  %v972_v39 = vmul.f32 %v733_v43, %v5564_v22  ;;  %vm892_vm1 = vmor %vm890_vm0, %vm891_vm15  ;;  %vm900_vm3 = vweird.f32 %v637_v30 }
 0x36a   : > { %v737_v49 = vmul.f32 0.5, %v736_v7  ;;  %v886_v38 = vmul.f32 %v4930_v16, %v885_v11 }
 0x36b   : > { %v1006_v62 = vmul.f32 %v5461_v47, %v972_v39 }
 0x36c   : > { %v738_v20 = vsub.f32 1.5, %v737_v49  ;;  %v887_v61 = vmul.f32 0.5, %v886_v38  ;;  %v537_v42 = vpop.xlane.xlu2 %536  ;;  %v5723_v15 = vpop.xlane.xlu0 %548 }
 0x36d   : > { %v590_v59 = vmul.f32 %v537_v42, %v5276_v34  ;;  %v1040_v60 = vadd.f32 %v5470_v57, %v1006_v62 }
 0x36e   : > { %v739_v32 = vmul.f32 %v4928_v53, %v738_v20  ;;  %v888_v25 = vsub.f32 1.5, %v887_v61 }
 0x36f   : > { %v4932_v55 = vpop.eup %4931  ;;  %v622_v58 = vadd.f32 1e-05, %v590_v59 }
 0x370   : > { %v889_v8 = vmul.f32 %v4930_v16, %v888_v25  ;;  %v895_v50 = vmul.f32 %v4932_v55, %v637_v30  ;;  %v743_v56 = vsel %vm742_vm14, %v4928_v53, %v739_v32  ;;  %vm901_vm2 = vweird.f32 %v4932_v55 }
 0x371   : > { %4933 = vrsqrt.f32 %v622_v58  ;;  %v973_v17 = vmul.f32 %v743_v56, %v5571_v23  ;;  %vm902_vm4 = vmor %vm900_vm3, %vm901_vm2  ;;  %vm750_vm6 = vweird.f32 %v622_v58 }
 0x372   : > { %v896_v28 = vmul.f32 %v4932_v55, %v895_v50  ;;  %v893_v54 = vsel %vm892_vm1, %v4930_v16, %v889_v8  ;;  %v595_v8 = vmul.f32 %v5718_v14, %v5276_v34 }
 0x373   : > { %v1007_v22 = vmul.f32 %v5461_v47, %v973_v17  ;;  %v988_v11 = vmul.f32 %v893_v54, %v5576_v29 }
 0x374   : > { %v897_v12 = vmul.f32 0.5, %v896_v28  ;;  %v539_v27 = vpop.xlane.xlu2 %538  ;;  %v394_v36 = vpop.xlane.xlu0 %393 }
 0x375   : > { %v591_v37 = vmul.f32 %v539_v27, %v5276_v34  ;;  %v1041_v53 = vadd.f32 %v5470_v57, %v1007_v22  ;;  %v442_v23 = vmul.f32 %v5276_v34, %v394_v36  ;;  %v1022_v59 = vmul.f32 %v5461_v47, %v988_v11 }
 0x376   : > { %v898_v44 = vsub.f32 1.5, %v897_v12  ;;  %v5750_v22 = vadd.f32 1e-05, %v595_v8 }
 0x377   : > { %v4934_v45 = vpop.eup %4933  ;;  %v623_v63 = vadd.f32 1e-05, %v591_v37  ;;  %v1068_v7 = vpack.c.bf16 %v1041_v53, %v1040_v60  ;;  %v5736_v16 = vsub.f32 %v5511_v51, %v442_v23  ;;  %v1056_v56 = vadd.f32 %v5470_v57, %v1022_v59 }
 0x378   : > { %v899_v49 = vmul.f32 %v4932_v55, %v898_v44  ;;  %v745_v38 = vmul.f32 %v4934_v45, %v622_v58  ;;  %vm751_vm5 = vweird.f32 %v4934_v45  ;;  %vm800_vm1 = vweird.f32 %v5750_v22 }
 0x379   : > { %4935 = vrsqrt.f32 %v623_v63  ;;  %1210 = vmatmul.bf16.gmra.mxu0 %v1068_v7  ;;  %1299 = vmatmul.bf16.gmra.mxu1 %v1068_v7  ;;  %v506_v20 = vmul.f32 %v5736_v16, %v5736_v16  ;;  %vm752_vm7 = vmor %vm750_vm6, %vm751_vm5  ;;  %vm760_vm9 = vweird.f32 %v623_v63 }
 0x37a   : > { %v746_v43 = vmul.f32 %v4934_v45, %v745_v38  ;;  %v903_v61 = vsel %vm902_vm4, %v4932_v55, %v899_v49 }
 0x37b   : > { %v989_v42 = vmul.f32 %v903_v61, %v5581_v5  ;;  %560 = vadd.xlane.f32.xlu0 %v506_v20  ;;  %v5766_v61 = vadd.f32 %v5587_v13, %v5608_v41 }
 0x37c   : > { %v747_v29 = vmul.f32 0.5, %v746_v43  ;;  %v541_v30 = vpop.xlane.xlu2 %540 }
 0x37d   : > { %v592_v39 = vmul.f32 %v541_v30, %v5276_v34  ;;  %v1023_v51 = vmul.f32 %v5461_v47, %v989_v42 }
 0x37e   : > { %v748_v32 = vsub.f32 1.5, %v747_v29 }
 0x37f   : > { %v4936_v25 = vpop.eup %4935  ;;  %v624_v50 = vadd.f32 1e-05, %v592_v39  ;;  %v1057_v55 = vadd.f32 %v5470_v57, %v1023_v51 }
 0x380   : > { %v749_v5 = vmul.f32 %v4934_v45, %v748_v32  ;;  %v755_v17 = vmul.f32 %v4936_v25, %v623_v63  ;;  %vm761_vm8 = vweird.f32 %v4936_v25 }
 0x381   : > { %4937 = vrsqrt.f32 %v624_v50  ;;  %v5748_v62 = vpack.c.bf16 %v1057_v55, %v1056_v56  ;;  %vm762_vm10 = vmor %vm760_vm9, %vm761_vm8  ;;  %vm770_vm12 = vweird.f32 %v624_v50 }
 0x382   : > { %v756_v28 = vmul.f32 %v4936_v25, %v755_v17  ;;  %v753_v27 = vsel %vm752_vm7, %v4934_v45, %v749_v5  ;;  %4939 = vrsqrt.f32 %v5750_v22  ;;  %v596_v45 = vmul.f32 %v5723_v15, %v5276_v34 }
 0x383   : > { %1250 = vmatmul.bf16.vlgmr.msra.gmra.mxu3 %v5748_v62  ;;  %v974_v53 = vmul.f32 %v753_v27, %v5591_v33 }
 0x384   : > { %v757_v12 = vmul.f32 0.5, %v756_v28  ;;  %v543_v14 = vpop.xlane.xlu2 %542  ;;  %v5768_v29 = vadd.f32 1e-05, %v596_v45 }
 0x385   : > { %v593_v54 = vmul.f32 %v543_v14, %v5276_v34  ;;  %v1008_v49 = vmul.f32 %v5461_v47, %v974_v53 }
 0x386   : > { %v758_v37 = vsub.f32 1.5, %v757_v12  ;;  %vm810_vm9 = vweird.f32 %v5768_v29 }
 0x387   : > { %v4938_v36 = vpop.eup %4937  ;;  %v625_v60 = vadd.f32 1e-05, %v593_v54 }
 0x388   : > { %v759_v58 = vmul.f32 %v4936_v25, %v758_v37  ;;  %v765_v44 = vmul.f32 %v4938_v36, %v624_v50  ;;  %v5760_v20 = vpop.eup %4939  ;;  %vm771_vm11 = vweird.f32 %v4938_v36 }
 0x389   : > { %4941 = vrsqrt.f32 %v625_v60  ;;  %v795_v39 = vmul.f32 %v5760_v20, %v5750_v22  ;;  %vm772_vm13 = vmor %vm770_vm12, %vm771_vm11  ;;  %vm780_vm15 = vweird.f32 %v625_v60  ;;  %vm801_vm2 = vweird.f32 %v5760_v20 }
 0x38a   : > { %v766_v23 = vmul.f32 %v4938_v36, %v765_v44  ;;  %v763_v7 = vsel %vm762_vm10, %v4936_v25, %v759_v58  ;;  %v569_v25 = vpop.xlane.xlu0 %568  ;;  %4943 = vrsqrt.f32 %v5768_v29  ;;  %vm5809_vm3 = vmor %vm800_vm1, %vm801_vm2 }
 0x38b   : > { %v975_v11 = vmul.f32 %v763_v7, %v5606_v0  ;;  %v1042_v0 = vadd.f32 %v5470_v57, %v1008_v49  ;;  %v606_v28 = vmul.f32 %v569_v25, %v5276_v34 }
 0x38c   : > { %v767_v38 = vmul.f32 0.5, %v766_v23  ;;  %v412_v43 = vpop.xlane.xlu2 %411 }
 0x38d   : > { %v451_v33 = vmul.f32 %v5276_v34, %v412_v43  ;;  %v1009_v63 = vmul.f32 %v5461_v47, %v975_v11  ;;  %v5788_v58 = vadd.f32 1e-05, %v606_v28 }
 0x38e   : > { %v768_v42 = vsub.f32 1.5, %v767_v38 }
 0x38f   : > { %v4942_v59 = vpop.eup %4941  ;;  %v1043_v15 = vadd.f32 %v5470_v57, %v1009_v63  ;;  %v5773_v30 = vsub.f32 %v5640_v19, %v451_v33  ;;  %1520 = vrot.lane.b32.xlu0 %v5766_v61, %s5183_s12  ;;  %v796_v19 = vmul.f32 %v5760_v20, %v795_v39 }
 0x390   : > { %v769_v51 = vmul.f32 %v4938_v36, %v768_v42  ;;  %v775_v32 = vmul.f32 %v4942_v59, %v625_v60  ;;  %vm781_vm14 = vweird.f32 %v4942_v59  ;;  %v5786_v53 = vpop.eup %4943 }
 0x391   : > { %v1069_v13 = vpack.c.bf16 %v1043_v15, %v1042_v0  ;;  %v515_v56 = vmul.f32 %v5773_v30, %v5773_v30  ;;  %v797_v54 = vmul.f32 0.5, %v796_v19  ;;  %vm782_vm0 = vmor %vm780_vm15, %vm781_vm14  ;;  %v805_v11 = vmul.f32 %v5786_v53, %v5768_v29 }
 0x392   : > { %v776_v8 = vmul.f32 %v4942_v59, %v775_v32  ;;  %v773_v17 = vsel %vm772_vm13, %v4938_v36, %v769_v51  ;;  %v553_v44 = vpop.xlane.xlu0 %552  ;;  %vm811_vm7 = vweird.f32 %v5786_v53  ;;  %vm910_vm14 = vweird.f32 %v5788_v58 }
 0x393   : > { %1215 = vmatmul.bf16.gmra.mxu0 %v1069_v13  ;;  %1304 = vmatmul.bf16.gmra.mxu1 %v1069_v13  ;;  %v976_v27 = vmul.f32 %v773_v17, %v5621_v9  ;;  %v798_v45 = vsub.f32 1.5, %v797_v54  ;;  %v598_v60 = vmul.f32 %v553_v44, %v5276_v34  ;;  %v806_v0 = vmul.f32 %v5786_v53, %v805_v11  ;;  %vm812_vm10 = vmor %vm810_vm9, %vm811_vm7 }
 0x394   : > { %v777_v55 = vmul.f32 0.5, %v776_v8  ;;  %578 = vadd.xlane.f32.xlu2 %v515_v56  ;;  %v545_v5 = vpop.xlane.xlu2 %544 }
 0x395   : > { %v594_v50 = vmul.f32 %v545_v5, %v5276_v34  ;;  %v1010_v7 = vmul.f32 %v5461_v47, %v976_v27  ;;  %v799_v42 = vmul.f32 %v5760_v20, %v798_v45  ;;  %v5806_v15 = vadd.f32 1e-05, %v598_v60 }
 0x396   : > { %v778_v12 = vsub.f32 1.5, %v777_v55  ;;  %v807_v25 = vmul.f32 0.5, %v806_v0 }
 0x397   : > { %v626_v14 = vadd.f32 1e-05, %v594_v50  ;;  %v1044_v33 = vadd.f32 %v5470_v57, %v1010_v7  ;;  %v803_v56 = vsel %vm5809_vm3, %v5760_v20, %v799_v42  ;;  %vm830_vm3 = vweird.f32 %v5806_v15 }
 0x398   : > { %v779_v37 = vmul.f32 %v4942_v59, %v778_v12  ;;  %v979_v27 = vmul.f32 %v803_v56, %v5532_v2  ;;  %v808_v54 = vsub.f32 1.5, %v807_v25  ;;  %v5839_v2 = vld [vmem:[%s10166_s3] ss:$0 sm:$0xff] }
 0x399   : > { %4945 = vrsqrt.f32 %v626_v14  ;;  %vm790_vm5 = vweird.f32 %v626_v14 }
 0x39a   : > { %v783_v36 = vsel %vm782_vm0, %v4942_v59, %v779_v37  ;;  %4947 = vrsqrt.f32 %v5788_v58  ;;  %v809_v60 = vmul.f32 %v5786_v53, %v808_v54 }
 0x39b   : > { %v977_v23 = vmul.f32 %v783_v36, %v5632_v10 }
 0x39c   : > { %v551_v9 = vpop.xlane.xlu2 %550  ;;  %v573_v32 = vpop.xlane.xlu0 %572 }
 0x39d   : > { %v597_v49 = vmul.f32 %v551_v9, %v5276_v34  ;;  %v1011_v38 = vmul.f32 %v5461_v47, %v977_v23  ;;  %v608_v5 = vmul.f32 %v573_v32, %v5276_v34  ;;  %v1013_v9 = vmul.f32 %v5839_v2, %v979_v27 }
 0x39f   : > { %v4946_v43 = vpop.eup %4945  ;;  %v5800_v10 = vadd.f32 1e-05, %v597_v49  ;;  %v1045_v63 = vadd.f32 %v5470_v57, %v1011_v38  ;;  %v5831_v36 = vadd.f32 1e-05, %v608_v5 }
 0x3a0   : > { %v785_v59 = vmul.f32 %v4946_v43, %v626_v14  ;;  %v5813_v51 = vpop.eup %4947  ;;  %vm791_vm4 = vweird.f32 %v4946_v43 }
 0x3a1   : > { %4949 = vrsqrt.f32 %v5800_v10  ;;  %v1070_v47 = vpack.c.bf16 %v1045_v63, %v1044_v33  ;;  %v905_v19 = vmul.f32 %v5813_v51, %v5788_v58  ;;  %vm792_vm6 = vmor %vm790_vm5, %vm791_vm4  ;;  %vm820_vm11 = vweird.f32 %v5800_v10 }
 0x3a2   : > { %v786_v39 = vmul.f32 %v4946_v43, %v785_v59  ;;  %4951 = vrsqrt.f32 %v5806_v15  ;;  %v5853_v59 = vld [vmem:[%s10166_s3 + $0x1] ss:$0 sm:$0xff]  ;;  %vm911_vm13 = vweird.f32 %v5813_v51 }
 0x3a3   : > { %1220 = vmatmul.bf16.gmra.mxu0 %v1070_v47  ;;  %1309 = vmatmul.bf16.gmra.mxu1 %v1070_v47  ;;  %v906_v37 = vmul.f32 %v5813_v51, %v905_v19  ;;  %4953 = vrsqrt.f32 %v5831_v36  ;;  %v1047_v22 = vadd.f32 %v5853_v59, %v1013_v9  ;;  %vm912_vm15 = vmor %vm910_vm14, %vm911_vm13 }
 0x3a4   : > { %v787_v57 = vmul.f32 0.5, %v786_v39  ;;  %v396_v13 = vpop.xlane.xlu2 %395 }
 0x3a5   : > { %v443_v8 = vmul.f32 %v5276_v34, %v396_v13 }
 0x3a6   : > { %v788_v55 = vsub.f32 1.5, %v787_v57  ;;  %v813_v57 = vsel %vm812_vm10, %v5786_v53, %v809_v60  ;;  %vm930_vm10 = vweird.f32 %v5831_v36 }
 0x3a7   : > { %v4950_v17 = vpop.eup %4949  ;;  %v5824_v28 = vsub.f32 %v5513_v46, %v443_v8 }
 0x3a8   : > { %v789_v50 = vmul.f32 %v4946_v43, %v788_v55  ;;  %v815_v12 = vmul.f32 %v4950_v17, %v5800_v10  ;;  %v5833_v7 = vpop.eup %4951  ;;  %vm821_vm8 = vweird.f32 %v4950_v17  ;;  %v980_v10 = vmul.f32 %v813_v57, %v5594_v35 }
 0x3a9   : > { %v507_v20 = vmul.f32 %v5824_v28, %v5824_v28  ;;  %vm822_vm12 = vmor %vm820_vm11, %vm821_vm8  ;;  %v5865_v29 = vpop.eup %4953  ;;  %vm831_vm1 = vweird.f32 %v5833_v7 }
 0x3aa   : > { %v816_v44 = vmul.f32 %v4950_v17, %v815_v12  ;;  %v793_v23 = vsel %vm792_vm6, %v4946_v43, %v789_v50  ;;  %v907_v43 = vmul.f32 0.5, %v906_v37  ;;  %v1014_v35 = vmul.f32 %v5839_v2, %v980_v10  ;;  %vm5901_vm5 = vmor %vm830_vm3, %vm831_vm1 }
 0x3ab   : > { %562 = vadd.xlane.f32.xlu2 %v507_v20  ;;  %v978_v46 = vmul.f32 %v793_v23, %v5647_v24  ;;  %v825_v24 = vmul.f32 %v5833_v7, %v5806_v15  ;;  %v1196_v23 = vpop.f32.mrf.mxu0  ;;  %vm931_vm7 = vweird.f32 %v5865_v29 }
 0x3ac   : > { %v817_v14 = vmul.f32 0.5, %v816_v44  ;;  %v571_v45 = vpop.xlane.xlu2 %570  ;;  %v557_v11 = vpop.xlane.xlu0 %556  ;;  %v908_v39 = vsub.f32 1.5, %v907_v43  ;;  %vm932_vm11 = vmor %vm930_vm10, %vm931_vm7 }
 0x3ad   : > { %v607_v49 = vmul.f32 %v571_v45, %v5276_v34  ;;  %v1012_v38 = vmul.f32 %v5839_v2, %v978_v46  ;;  %v600_v42 = vmul.f32 %v557_v11, %v5276_v34  ;;  %v826_v13 = vmul.f32 %v5833_v7, %v825_v24 }
 0x3ae   : > { %v818_v33 = vsub.f32 1.5, %v817_v14  ;;  %v909_v55 = vmul.f32 %v5813_v51, %v908_v39  ;;  %v1048_v11 = vadd.f32 %v5853_v59, %v1014_v35 }
 0x3af   : > { %v639_v63 = vadd.f32 1e-05, %v607_v49  ;;  %v1046_v0 = vadd.f32 %v5853_v59, %v1012_v38  ;;  %v5863_v25 = vadd.f32 1e-05, %v600_v42  ;;  %v827_v50 = vmul.f32 0.5, %v826_v13 }
 0x3b0   : > { %v819_v47 = vmul.f32 %v4950_v17, %v818_v33  ;;  %v913_v44 = vsel %vm912_vm15, %v5813_v51, %v909_v55 }
 0x3b1   : > { %4955 = vrsqrt.f32 %v639_v63  ;;  %v1071_v32 = vpack.c.bf16 %v1047_v22, %v1046_v0  ;;  %v828_v20 = vsub.f32 1.5, %v827_v50  ;;  %v990_v49 = vmul.f32 %v913_v44, %v5624_v4 }
 0x3b2   : > { %v823_v8 = vsel %vm822_vm12, %v4950_v17, %v819_v47  ;;  %v925_v17 = vmul.f32 %v5865_v29, %v5831_v36  ;;  %4957 = vrsqrt.f32 %v5863_v25  ;;  %vm920_vm2 = vweird.f32 %v639_v63 }
 0x3b3   : > { %1225 = vmatmul.bf16.gmra.mxu0 %v1071_v32  ;;  %1314 = vmatmul.bf16.gmra.mxu1 %v1071_v32  ;;  %v981_v53 = vmul.f32 %v823_v8, %v5654_v18  ;;  %v829_v43 = vmul.f32 %v5833_v7, %v828_v20  ;;  %v5897_v47 = vadd.f32 %v1196_v23, %v5608_v41 }
 0x3b4   : > { %v555_v56 = vpop.xlane.xlu2 %554  ;;  %v926_v37 = vmul.f32 %v5865_v29, %v925_v17  ;;  %v1024_v32 = vmul.f32 %v5839_v2, %v990_v49 }
 0x3b5   : > { %v599_v19 = vmul.f32 %v555_v56, %v5276_v34  ;;  %v1015_v18 = vmul.f32 %v5839_v2, %v981_v53  ;;  %v833_v15 = vsel %vm5901_vm5, %v5833_v7, %v829_v43  ;;  %v1198_v53 = vpop.f32.mrf.mxu0 }
 0x3b6   : > { %v927_v51 = vmul.f32 0.5, %v926_v37  ;;  %v1058_v50 = vadd.f32 %v5853_v59, %v1024_v32  ;;  %v5923_v37 = vadd.f32 %v1198_v53, %v5608_v41 }
 0x3b7   : > { %v4956_v5 = vpop.eup %4955  ;;  %v5875_v12 = vadd.f32 1e-05, %v599_v19  ;;  %v1049_v60 = vadd.f32 %v5853_v59, %v1015_v18 }
 0x3b8   : > { %v915_v27 = vmul.f32 %v4956_v5, %v639_v63  ;;  %v5883_v45 = vpop.eup %4957  ;;  %vm921_vm0 = vweird.f32 %v4956_v5  ;;  %v928_v57 = vsub.f32 1.5, %v927_v51 }
 0x3b9   : > { %4959 = vrsqrt.f32 %v5875_v12  ;;  %v845_v42 = vmul.f32 %v5883_v45, %v5863_v25  ;;  %vm922_vm4 = vmor %vm920_vm2, %vm921_vm0  ;;  %v1072_v39 = vpack.c.bf16 %v1049_v60, %v1048_v11  ;;  %vm840_vm8 = vweird.f32 %v5875_v12 }
 0x3ba   : > { %v916_v54 = vmul.f32 %v4956_v5, %v915_v27  ;;  %v929_v7 = vmul.f32 %v5865_v29, %v928_v57  ;;  %vm851_vm13 = vweird.f32 %v5883_v45  ;;  %vm850_vm0 = vweird.f32 %v5863_v25 }
 0x3bb   : > { %v846_v8 = vmul.f32 %v5883_v45, %v845_v42  ;;  %vm852_vm1 = vmor %vm850_vm0, %vm851_vm13 }
 0x3bc   : > { %v917_v46 = vmul.f32 0.5, %v916_v54  ;;  %v575_v14 = vpop.xlane.xlu2 %574  ;;  %v933_v11 = vsel %vm932_vm11, %v5865_v29, %v929_v7  ;;  %v577_v7 = vpop.xlane.xlu0 %576 }
 0x3bd   : > { %v609_v58 = vmul.f32 %v575_v14, %v5276_v34  ;;  %v847_v54 = vmul.f32 0.5, %v846_v8  ;;  %v992_v43 = vmul.f32 %v933_v11, %v5659_v31 }
 0x3be   : > { %v918_v9 = vsub.f32 1.5, %v917_v46 }
 0x3bf   : > { %v4960_v38 = vpop.eup %4959  ;;  %v5891_v24 = vadd.f32 1e-05, %v609_v58  ;;  %v848_v14 = vsub.f32 1.5, %v847_v54 }
 0x3c0   : > { %v919_v33 = vmul.f32 %v4956_v5, %v918_v9  ;;  %v835_v0 = vmul.f32 %v4960_v38, %v5875_v12  ;;  %vm841_vm6 = vweird.f32 %v4960_v38 }
 0x3c1   : > { %4961 = vrsqrt.f32 %v5891_v24  ;;  %vm842_vm9 = vmor %vm840_vm8, %vm841_vm6  ;;  %vm940_vm14 = vweird.f32 %v5891_v24 }
 0x3c2   : > { %v836_v22 = vmul.f32 %v4960_v38, %v835_v0  ;;  %v923_v63 = vsel %vm922_vm4, %v4956_v5, %v919_v33 }
 0x3c3   : > { %1524 = vrot.lane.b32.xlu2 %v5897_v47, %s5183_s12  ;;  %v991_v13 = vmul.f32 %v923_v63, %v5669_v26  ;;  %1230 = vmatmul.bf16.gmra.mxu0 %v1072_v39  ;;  %v982_v26 = vmul.f32 %v833_v15, %v5638_v21 }
 0x3c4   : > { %v837_v56 = vmul.f32 0.5, %v836_v22  ;;  %1319 = vmatmul.bf16.gmra.mxu1 %v1072_v39  ;;  %v559_v19 = vpop.xlane.xlu2 %558  ;;  %v1026_v22 = vmul.f32 %v5839_v2, %v992_v43 }
 0x3c5   : > { %v601_v10 = vmul.f32 %v559_v19, %v5276_v34  ;;  %v1025_v55 = vmul.f32 %v5839_v2, %v991_v13  ;;  %v1016_v46 = vmul.f32 %v5839_v2, %v982_v26 }
 0x3c6   : > { %v838_v5 = vsub.f32 1.5, %v837_v56  ;;  %v1060_v25 = vadd.f32 %v5853_v59, %v1026_v22 }
 0x3c7   : > { %v4962_v17 = vpop.eup %4961  ;;  %v633_v27 = vadd.f32 1e-05, %v601_v10  ;;  %v1059_v35 = vadd.f32 %v5853_v59, %v1025_v55  ;;  %v1050_v49 = vadd.f32 %v5853_v59, %v1016_v46 }
 0x3c8   : > { %v839_v18 = vmul.f32 %v4960_v38, %v838_v5  ;;  %v935_v20 = vmul.f32 %v4962_v17, %v5891_v24  ;;  %vm941_vm12 = vweird.f32 %v4962_v17 }
 0x3c9   : > { %4963 = vrsqrt.f32 %v633_v27  ;;  %v5925_v21 = vpack.c.bf16 %v1059_v35, %v1058_v50  ;;  %vm942_vm15 = vmor %vm940_vm14, %vm941_vm12  ;;  %vm860_vm3 = vweird.f32 %v633_v27  ;;  %v610_v35 = vmul.f32 %v577_v7, %v5276_v34 }
 0x3ca   : > { %v936_v44 = vmul.f32 %v4962_v17, %v935_v20  ;;  %v843_v23 = vsel %vm842_vm9, %v4960_v38, %v839_v18 }
 0x3cb   : > { %1526 = vrot.lane.b32.xlu2 %v5923_v37, %s5183_s12  ;;  %1255 = vmatmul.bf16.gmra.mxu3 %v5925_v21  ;;  %v983_v12 = vmul.f32 %v843_v23, %v5682_v48  ;;  %v849_v48 = vmul.f32 %v5883_v45, %v848_v14  ;;  %v642_v54 = vadd.f32 1e-05, %v610_v35 }
 0x3cc   : > { %v937_v58 = vmul.f32 0.5, %v936_v44 }
 0x3cd   : > { %v1017_v9 = vmul.f32 %v5839_v2, %v983_v12  ;;  %v853_v31 = vsel %vm852_vm1, %v5883_v45, %v849_v48  ;;  %4965 = vrsqrt.f32 %v642_v54  ;;  %vm950_vm6 = vweird.f32 %v642_v54 }
 0x3ce   : > { %v938_v60 = vsub.f32 1.5, %v937_v58  ;;  %vm1809_vm1 = vcmask 1041409  }
 0x3cf   : > { %v4964_v36 = vpop.eup %4963  ;;  %v1051_v38 = vadd.f32 %v5853_v59, %v1017_v9 }
 0x3d0   : > { %v939_v51 = vmul.f32 %v4962_v17, %v938_v60  ;;  %v855_v33 = vmul.f32 %v4964_v36, %v633_v27  ;;  %vm861_vm2 = vweird.f32 %v4964_v36 }
 0x3d1   : > { %v1073_v29 = vpack.c.bf16 %v1051_v38, %v1050_v49  ;;  %vm862_vm4 = vmor %vm860_vm3, %vm861_vm2  ;;  %vm1812_vm2 = vcmask 1042434   ;;  %vm1815_vm3 = vcmask 1043459  }
 0x3d2   : > { %v856_v42 = vmul.f32 %v4964_v36, %v855_v33  ;;  %v943_v0 = vsel %vm942_vm15, %v4962_v17, %v939_v51 }
 0x3d3   : > { %v993_v4 = vmul.f32 %v943_v0, %v5694_v1  ;;  %1235 = vmatmul.bf16.gmra.mxu0 %v1073_v29  ;;  %v984_v1 = vmul.f32 %v853_v31, %v5672_v52  ;;  %v4966_v44 = vpop.eup %4965 }
 0x3d4   : > { %v857_v39 = vmul.f32 0.5, %v856_v42  ;;  %1324 = vmatmul.bf16.gmra.mxu1 %v1073_v29  ;;  %v945_v23 = vmul.f32 %v4966_v44, %v642_v54  ;;  %vm951_vm5 = vweird.f32 %v4966_v44 }
 0x3d5   : > { %v1027_v63 = vmul.f32 %v5839_v2, %v993_v4  ;;  %v1018_v19 = vmul.f32 %v5839_v2, %v984_v1  ;;  %vm952_vm7 = vmor %vm950_vm6, %vm951_vm5  ;;  %vm1821_vm5 = vcmask 1045509   ;;  %vm1824_vm6 = vcmask 1046534  }
 0x3d6   : > { %v858_v24 = vsub.f32 1.5, %v857_v39  ;;  %v1201_v32 = vpop.f32.mrf.mxu0  ;;  %v946_v14 = vmul.f32 %v4966_v44, %v945_v23 }
 0x3d7   : > { %v5947_v57 = vadd.f32 %v1201_v32, %v5608_v41  ;;  %v1061_v13 = vadd.f32 %v5853_v59, %v1027_v63  ;;  %v1052_v53 = vadd.f32 %v5853_v59, %v1018_v19 }
 0x3d8   : > { %v859_v15 = vmul.f32 %v4964_v36, %v858_v24  ;;  %v947_v49 = vmul.f32 0.5, %v946_v14 }
 0x3d9   : > { %1528 = vrot.lane.b32.xlu0 %v5947_v57, %s5183_s12  ;;  %v5954_v45 = vpack.c.bf16 %v1061_v13, %v1060_v25 }
 0x3da   : > { %v863_v8 = vsel %vm862_vm4, %v4964_v36, %v859_v15  ;;  %v948_v51 = vsub.f32 1.5, %v947_v49  ;;  %vm1818_vm4 = vcmask 1044484  }
 0x3db   : > { %1260 = vmatmul.bf16.gmra.mxu3 %v5954_v45  ;;  %v985_v56 = vmul.f32 %v863_v8, %v5701_v3 }
 0x3dc   : > { %v949_v0 = vmul.f32 %v4966_v44, %v948_v51  ;;  %v1364_v51 = vmul.f32 0.5, %v5947_v57 }
 0x3dd   : > { %v1019_v10 = vmul.f32 %v5839_v2, %v985_v56 }
 0x3de   : > { %v1203_v55 = vpop.f32.mrf.mxu0  ;;  %v953_v32 = vsel %vm952_vm7, %v4966_v44, %v949_v0  ;;  %vm1827_vm7 = vcmask 1047559  }
 0x3df   : > { %v5961_v52 = vadd.f32 %v1203_v55, %v5608_v41  ;;  %v1053_v5 = vadd.f32 %v5853_v59, %v1019_v10  ;;  %v994_v1 = vmul.f32 %v953_v32, %v5685_v40 }
 0x3e1   : > { %1530 = vrot.lane.b32.xlu0 %v5961_v52, %s5183_s12  ;;  %v1074_v50 = vpack.c.bf16 %v1053_v5, %v1052_v53  ;;  %v1028_v55 = vmul.f32 %v5839_v2, %v994_v1 }
 0x3e3   : > { %1240 = vmatmul.bf16.gmra.mxu0 %v1074_v50 }
 0x3e4   : > { %1329 = vmatmul.bf16.gmra.mxu1 %v1074_v50 }
 0x3e6   : > { %v1206_v26 = vpop.f32.mrf.mxu0 }
 0x3e7   : > { %v5968_v3 = vadd.f32 %v1206_v26, %v5608_v41 }
 0x3e9   : > { %1532 = vrot.lane.b32.xlu0 %v5968_v3, %s5183_s12 }
 0x3ee   : > { %v1208_v17 = vpop.f32.mrf.mxu0  ;;  %v561_v12 = vpop.xlane.xlu0 %560 }
 0x3ef   : > { %v5973_v27 = vadd.f32 %v1208_v17, %v5608_v41  ;;  %v602_v60 = vmul.f32 %v561_v12, %v5276_v34  ;;  %v1062_v17 = vadd.f32 %v5853_v59, %v1028_v55 }
 0x3f1   : > { %1534 = vrot.lane.b32.xlu0 %v5973_v27, %s5183_s12  ;;  %v634_v43 = vadd.f32 1e-05, %v602_v60 }
 0x3f3   : > { %vm870_vm12 = vweird.f32 %v634_v43 }
 0x3f6   : > { %v1211_v18 = vpop.f32.mrf.mxu0 }
 0x3f7   : > { %v5979_v20 = vadd.f32 %v1211_v18, %v5608_v41 }
 0x3f9   : > { %1536 = vrot.lane.b32.xlu1 %v5979_v20, %s5183_s12  ;;  %v1368_v55 = vmul.f32 0.5, %v5979_v20 }
 0x3fe   : > { %v1213_v38 = vpop.f32.mrf.mxu0 }
 0x3ff   : > { %v5991_v33 = vadd.f32 %v1213_v38, %v5608_v41 }
 0x406   : > { %v1251_v46 = vpop.f32.mrf.mxu3 }
 0x407   : > { %v5984_v58 = vadd.f32 %v1251_v46, %v5608_v41  ;;  %v579_v11 = vpop.xlane.xlu2 %578 }
 0x408   : > { %v611_v9 = vmul.f32 %v579_v11, %v5276_v34  ;;  %v1361_v11 = vmul.f32 0.5, %v5614_v6 }
 0x409   : > { %1568 = vrot.lane.b32.xlu0 %v5984_v58, %s5183_s12 }
 0x40a   : > { %v643_v36 = vadd.f32 1e-05, %v611_v9 }
 0x40c   : > { %4967 = vrsqrt.f32 %v643_v36  ;;  %vm960_vm9 = vweird.f32 %v643_v36 }
 0x40d   : > { %4969 = vrsqrt.f32 %v634_v43 }
 0x40e   : > { %v1253_v48 = vpop.f32.mrf.mxu3 }
 0x40f   : > { %v5994_v29 = vadd.f32 %v1253_v48, %v5608_v41 }
 0x410   : > { %v1216_v22 = vpop.f32.mrf.mxu0 }
 0x411   : > { %1570 = vrot.lane.b32.xlu2 %v5994_v29, %s5183_s12  ;;  %1538 = vrot.lane.b32.xlu0 %v5991_v33, %s5183_s12  ;;  %v6001_v24 = vadd.f32 %v1216_v22, %v5608_v41 }
 0x412   : > { %v4968_v42 = vpop.eup %4967 }
 0x413   : > { %v955_v4 = vmul.f32 %v4968_v42, %v643_v36  ;;  %v4970_v31 = vpop.eup %4969  ;;  %vm961_vm8 = vweird.f32 %v4968_v42  ;;  %v1360_v36 = vmul.f32 0.5, %v5766_v61  ;;  %v1365_v61 = vmul.f32 0.5, %v5961_v52 }
 0x414   : > { %v865_v13 = vmul.f32 %v4970_v31, %v634_v43  ;;  %vm962_vm10 = vmor %vm960_vm9, %vm961_vm8  ;;  %vm871_vm11 = vweird.f32 %v4970_v31  ;;  %v1362_v43 = vmul.f32 0.5, %v5897_v47  ;;  %v1366_v47 = vmul.f32 0.5, %v5968_v3 }
 0x415   : > { %v956_v39 = vmul.f32 %v4968_v42, %v955_v4  ;;  %vm872_vm13 = vmor %vm870_vm12, %vm871_vm11  ;;  %vm3639_vm8 = vcmask 261120  }
 0x416   : > { %v866_v56 = vmul.f32 %v4970_v31, %v865_v13 }
 0x417   : > { %v957_v63 = vmul.f32 0.5, %v956_v39 }
 0x418   : > { %v867_v26 = vmul.f32 0.5, %v866_v56 }
 0x419   : > { %v958_v25 = vsub.f32 1.5, %v957_v63  ;;  %1540 = vrot.lane.b32.xlu2 %v6001_v24, %s5183_s12 }
 0x41a   : > { %v868_v35 = vsub.f32 1.5, %v867_v26 }
 0x41b   : > { %v959_v15 = vmul.f32 %v4968_v42, %v958_v25  ;;  %v1521_v25 = vpop.permute.xlu0 %1520 }
 0x41d   : > { %v963_v8 = vsel %vm962_vm10, %v4968_v42, %v959_v15 }
 0x41e   : > { %v563_v19 = vpop.xlane.xlu2 %562  ;;  %v995_v10 = vmul.f32 %v963_v8, %v5773_v30  ;;  %v869_v30 = vmul.f32 %v4970_v31, %v868_v35 }
 0x41f   : > { %v603_v53 = vmul.f32 %v563_v19, %v5276_v34  ;;  %v6015_v34 = vpop.f32.mrf.mxu0 }
 0x420   : > { %v1029_v5 = vmul.f32 %v5839_v2, %v995_v10  ;;  %v873_v12 = vsel %vm872_vm13, %v4970_v31, %v869_v30  ;;  %v1523_v31 = vpop.permute.xlu1 %1522 }
 0x421   : > { %v635_v50 = vadd.f32 1e-05, %v603_v53  ;;  %v986_v14 = vmul.f32 %v873_v12, %v5736_v16  ;;  %v1363_v16 = vmul.f32 0.5, %v5923_v37  ;;  %v1367_v37 = vmul.f32 0.5, %v5973_v27 }
 0x422   : > { %v1063_v40 = vadd.f32 %v5853_v59, %v1029_v5 }
 0x423   : > { %4971 = vrsqrt.f32 %v635_v50  ;;  %vm880_vm15 = vweird.f32 %v635_v50  ;;  %v1020_v38 = vmul.f32 %v5839_v2, %v986_v14 }
 0x424   : > { %v6012_v7 = vpack.c.bf16 %v1063_v40, %v1062_v17  ;;  %4973 = vtanh.f32 %v1361_v11  ;;  %v1385_v11 = vmul.f32 0.5, %v5994_v29 }
 0x425   : > { %4975 = vtanh.f32 %v1360_v36 }
 0x426   : > { %1265 = vmatmul.bf16.gmra.mxu3 %v6012_v7  ;;  %4977 = vtanh.f32 %v1362_v43  ;;  %v1525_v52 = vpop.permute.xlu2 %1524 }
 0x427   : > { %v6023_v48 = vpop.f32.mrf.mxu0  ;;  %4979 = vtanh.f32 %v1363_v16 }
 0x428   : > { %4981 = vtanh.f32 %v1364_v51 }
 0x429   : > { %v4972_v54 = vpop.eup %4971  ;;  %4983 = vtanh.f32 %v1365_v61 }
 0x42a   : > { %v875_v18 = vmul.f32 %v4972_v54, %v635_v50  ;;  %vm881_vm14 = vweird.f32 %v4972_v54  ;;  %v4974_v4 = vpop.eup %4973  ;;  %4985 = vtanh.f32 %v1366_v47 }
 0x42b   : > { %vm882_vm0 = vmor %vm880_vm15, %vm881_vm14  ;;  %4987 = vtanh.f32 %v1367_v37  ;;  %v6083_v37 = vadd.f32 %v6023_v48, %v5608_v41 }
 0x42c   : > { %v876_v44 = vmul.f32 %v4972_v54, %v875_v18  ;;  %4989 = vtanh.f32 %v1368_v55 }
 0x42d   : > { %4991 = vtanh.f32 %v1385_v11 }
 0x42e   : > { %v877_v23 = vmul.f32 0.5, %v876_v44 }
 0x42f   : > { %v6034_v22 = vpop.f32.mrf.mxu0 }
 0x430   : > { %v878_v46 = vsub.f32 1.5, %v877_v23 }
 0x432   : > { %v879_v9 = vmul.f32 %v4972_v54, %v878_v46 }
 0x434   : > { %v883_v60 = vsel %vm882_vm0, %v4972_v54, %v879_v9  ;;  %v1527_v54 = vpop.permute.xlu2 %1526 }
 0x435   : > { %v987_v49 = vmul.f32 %v883_v60, %v5824_v28  ;;  %v1054_v28 = vadd.f32 %v5853_v59, %v1020_v38 }
 0x436   : > { %1339 = vmatmul.bf16.vlgmr.msrb.gmra.mxu3 %v5748_v62  ;;  %v4976_v62 = vpop.eup %4975 }
 0x437   : > { %v1021_v6 = vmul.f32 %v5839_v2, %v987_v49  ;;  %v1425_v2 = vadd.f32 1.0, %v4974_v4  ;;  %v4978_v57 = vpop.eup %4977  ;;  %v1424_v3 = vadd.f32 1.0, %v4976_v62  ;;  %v6046_v30 = vpop.f32.mrf.mxu0 }
 0x438   : > { %v1426_v1 = vadd.f32 1.0, %v4978_v57 }
 0x439   : > { %v1055_v42 = vadd.f32 %v5853_v59, %v1021_v6  ;;  %v4980_v59 = vpop.eup %4979  ;;  %v1457_v32 = vmul.f32 0.5, %v1425_v2  ;;  %v1456_v56 = vmul.f32 0.5, %v1424_v3  ;;  %v6079_v2 = vadd.f32 %v6015_v34, %v5608_v41 }
 0x43a   : > { %v4982_v39 = vpop.eup %4981  ;;  %v1427_v8 = vadd.f32 1.0, %v4980_v59  ;;  %v1458_v5 = vmul.f32 0.5, %v1426_v1 }
 0x43b   : > { %v1075_v0 = vpack.c.bf16 %v1055_v42, %v1054_v28  ;;  %v4984_v63 = vpop.eup %4983  ;;  %v6036_v15 = vmul.f32 %v1523_v31, %v1457_v32  ;;  %v1428_v27 = vadd.f32 1.0, %v4982_v39  ;;  %v6040_v53 = vmul.f32 %v1521_v25, %v1456_v56 }
 0x43c   : > { %v4986_v13 = vpop.eup %4985  ;;  %v1429_v19 = vadd.f32 1.0, %v4984_v63  ;;  %v1459_v26 = vmul.f32 0.5, %v1427_v8  ;;  %v6044_v35 = vmul.f32 %v1525_v52, %v1458_v5 }
 0x43d   : > { %1245 = vmatmul.bf16.gmra.mxu0 %v1075_v0  ;;  %1334 = vmatmul.bf16.gmra.mxu1 %v1075_v0  ;;  %v1430_v10 = vadd.f32 1.0, %v4986_v13  ;;  %v4988_v50 = vpop.eup %4987  ;;  %v2971_v17 = vrot.slane %v6036_v15, 2  ;;  %v2857_v40 = vrot.slane %v6036_v15, 1  ;;  %v3085_v18 = vrot.slane %v6036_v15, 3 }
 0x43e   : > { %v3427_v20 = vrot.slane %v6036_v15, 6  ;;  %v1460_v44 = vmul.f32 0.5, %v1428_v27  ;;  %v1461_v12 = vmul.f32 0.5, %v1429_v19  ;;  %v3313_v14 = vrot.slane %v6036_v15, 5  ;;  %v6089_v52 = vpop.eup %4989 }
 0x43f   : > { %v6051_v46 = vmul.f32 0.5, %v1430_v10  ;;  %v6055_v9 = vadd.f32 1.0, %v4988_v50  ;;  %v2613_v60 = vrot.slane %v6040_v53, 7  ;;  %v6058_v36 = vmul.f32 %v1527_v54, %v1459_v26  ;;  %v6102_v13 = vpop.f32.mrf.mxu0  ;;  %v6114_v5 = vpop.eup %4991 }
 0x440   : > { %v2043_v49 = vrot.slane %v6040_v53, 2  ;;  %v1929_v38 = vrot.slane %v6040_v53, 1  ;;  %v2385_v43 = vrot.slane %v6040_v53, 5  ;;  %v2614_v6 = vrot.slane %v6044_v35, 6 }
 0x441   : > { %v2044_v51 = vrot.slane %v6044_v35, 1  ;;  %v2157_v61 = vrot.slane %v6040_v53, 3  ;;  %v2271_v29 = vrot.slane %v6040_v53, 4  ;;  %v1808_v42 = vrot.slane %v6044_v35, 7 }
 0x442   : > { %v2499_v47 = vrot.slane %v6040_v53, 6  ;;  %v6073_v0 = vmul.f32 0.5, %v6001_v24  ;;  %v2386_v4 = vrot.slane %v6044_v35, 4  ;;  %v2158_v62 = vrot.slane %v6044_v35, 2 }
 0x443   : > { %v2972_v57 = vrot.slane %v6058_v36, 1  ;;  %v2743_v24 = vrot.slane %v6058_v36, 7  ;;  %v2615_v59 = vsel %vm1809_vm1, %v2614_v6, %v2613_v60  ;;  %v2045_v39 = vsel %vm1809_vm1, %v2044_v51, %v2043_v49 }
 0x444   : > { %v1930_v34 = vsel %vm1809_vm1, %v6044_v35, %v1929_v38  ;;  %v3200_v31 = vrot.slane %v6058_v36, 3  ;;  %v1810_v63 = vsel %vm1809_vm1, %v1808_v42, %v6040_v53  ;;  %v2272_v32 = vrot.slane %v6044_v35, 3 }
 0x445   : > { %v3086_v25 = vrot.slane %v6058_v36, 2  ;;  %v2387_v8 = vsel %vm1809_vm1, %v2386_v4, %v2385_v43  ;;  %v2159_v56 = vsel %vm1809_vm1, %v2158_v62, %v2157_v61  ;;  %v2500_v27 = vrot.slane %v6044_v35, 5 }
 0x446   : > { %1344 = vmatmul.bf16.gmra.mxu3 %v5925_v21  ;;  %v3199_v21 = vrot.slane %v6036_v15, 4  ;;  %v2973_v19 = vsel %vm1809_vm1, %v2972_v57, %v2971_v17  ;;  %v2858_v10 = vsel %vm1809_vm1, %v6058_v36, %v2857_v40  ;;  %v2744_v55 = vsel %vm1809_vm1, %v2743_v24, %v6036_v15 }
 0x447   : > { %v3428_v17 = vrot.slane %v6058_v36, 5  ;;  %v3542_v42 = vrot.slane %v6058_v36, 6  ;;  %4993 = vtanh.f32 %v6073_v0  ;;  %v6244_v0 = vadd.f32 %v6034_v22, %v5608_v41 }
 0x449   : > { %v3429_v61 = vsel %vm1809_vm1, %v3428_v17, %v3427_v20 }
 0x44b   : > { %v1529_v23 = vpop.permute.xlu0 %1528 }
 0x44c   : > { %v6096_v48 = vmul.f32 %v1529_v23, %v1460_v44  ;;  %v3201_v44 = vsel %vm1809_vm1, %v3200_v31, %v3199_v21 }
 0x44e   : > { %v1256_v16 = vpop.f32.mrf.mxu3  ;;  %v2616_v23 = vrot.slane %v6096_v48, 5  ;;  %v1811_v11 = vrot.slane %v6096_v48, 6  ;;  %v1931_v38 = vrot.slane %v6096_v48, 7  ;;  %v2388_v6 = vrot.slane %v6096_v48, 3 }
 0x44f   : > { %v6068_v28 = vadd.f32 %v1256_v16, %v5608_v41  ;;  %v2160_v62 = vrot.slane %v6096_v48, 1  ;;  %v2046_v20 = vsel %vm1812_vm2, %v6096_v48, %v2045_v39 }
 0x450   : > { %v2389_v17 = vsel %vm1812_vm2, %v2388_v6, %v2387_v8  ;;  %v2502_v8 = vrot.slane %v6096_v48, 4 }
 0x451   : > { %1572 = vrot.lane.b32.xlu1 %v6068_v28, %s5183_s12 }
 0x453   : > { %v1531_v3 = vpop.permute.xlu0 %1530 }
 0x454   : > { %v6104_v1 = vmul.f32 %v1531_v3, %v1461_v12  ;;  %v3087_v12 = vsel %vm1809_vm1, %v3086_v25, %v3085_v18 }
 0x456   : > { %1349 = vmatmul.bf16.gmra.mxu3 %v5954_v45  ;;  %v1258_v50 = vpop.f32.mrf.mxu3  ;;  %v6119_v26 = vsel %vm1812_vm2, %v6104_v1, %v2973_v19  ;;  %v2859_v54 = vrot.slane %v6104_v1, 7  ;;  %v3314_v45 = vrot.slane %v6058_v36, 4  ;;  %v2745_v49 = vrot.slane %v6104_v1, 6 }
 0x457   : > { %v6125_v40 = vadd.f32 %v1258_v50, %v5608_v41  ;;  %v3202_v21 = vrot.slane %v6104_v1, 2  ;;  %v3088_v18 = vrot.slane %v6104_v1, 1  ;;  %v3430_v43 = vrot.slane %v6104_v1, 4 }
 0x458   : > { %v6132_v60 = vsel %vm1812_vm2, %v2859_v54, %v2858_v10  ;;  %v3316_v16 = vrot.slane %v6104_v1, 3  ;;  %v6146_v51 = vsel %vm1812_vm2, %v2745_v49, %v2744_v55  ;;  %v3315_v25 = vsel %vm1809_vm1, %v3314_v45, %v3313_v14  ;;  %v6176_v54 = vpop.f32.mrf.mxu0 }
 0x459   : > { %1574 = vrot.lane.b32.xlu0 %v6125_v40, %s5183_s12  ;;  %1542 = vrot.lane.b32.xlu1 %v6079_v2, %s5183_s12  ;;  %v6154_v57 = vsel %vm1812_vm2, %v3202_v21, %v3201_v44  ;;  %v6157_v24 = vsel %vm1812_vm2, %v3088_v18, %v3087_v12  ;;  %v6160_v31 = vsel %vm1812_vm2, %v3430_v43, %v3429_v61  ;;  %v2274_v14 = vrot.slane %v6096_v48, 2 }
 0x45a   : > { %v2617_v19 = vsel %vm1812_vm2, %v2616_v23, %v2615_v59  ;;  %v1813_v10 = vsel %vm1812_vm2, %v1811_v11, %v1810_v63  ;;  %v1932_v55 = vsel %vm1812_vm2, %v1931_v38, %v1930_v34  ;;  %v6174_v50 = vsel %vm1812_vm2, %v3316_v16, %v3315_v25 }
 0x45b   : > { %v1533_v4 = vpop.permute.xlu0 %1532  ;;  %v2161_v23 = vsel %vm1812_vm2, %v2160_v62, %v2159_v56  ;;  %v3544_v38 = vrot.slane %v6104_v1, 5  ;;  %v1463_v18 = vmul.f32 0.5, %v6055_v9  ;;  %v3541_v16 = vrot.slane %v6036_v15, 7 }
 0x45c   : > { %v6163_v3 = vmul.f32 %v1533_v4, %v6051_v46  ;;  %v2273_v61 = vsel %vm1809_vm1, %v2272_v32, %v2271_v29  ;;  %v2501_v9 = vsel %vm1809_vm1, %v2500_v27, %v2499_v47  ;;  %v1432_v27 = vadd.f32 1.0, %v6089_v52 }
 0x45d   : > { %v2275_v25 = vsel %vm1812_vm2, %v2274_v14, %v2273_v61 }
 0x45e   : > { %v1261_v46 = vpop.f32.mrf.mxu3  ;;  %v2618_v44 = vrot.slane %v6163_v3, 4  ;;  %v2047_v39 = vrot.slane %v6163_v3, 7  ;;  %v1814_v63 = vrot.slane %v6163_v3, 5  ;;  %v1933_v34 = vrot.slane %v6163_v3, 6 }
 0x45f   : > { %v6183_v59 = vadd.f32 %v1261_v46, %v5608_v41  ;;  %v2390_v11 = vrot.slane %v6163_v3, 2  ;;  %v6208_v21 = vsel %vm1815_vm3, %v6163_v3, %v2161_v23  ;;  %v2276_v4 = vrot.slane %v6163_v3, 1 }
 0x460   : > { %v6189_v12 = vsel %vm1815_vm3, %v2618_v44, %v2617_v19  ;;  %v6192_v45 = vsel %vm1815_vm3, %v2047_v39, %v2046_v20  ;;  %v6201_v49 = vsel %vm1815_vm3, %v1814_v63, %v1813_v10  ;;  %v6204_v56 = vsel %vm1815_vm3, %v1933_v34, %v1932_v55  ;;  %v6251_v14 = vpop.f32.mrf.mxu0 }
 0x461   : > { %1544 = vrot.lane.b32.xlu0 %v6083_v37, %s5183_s12  ;;  %1576 = vrot.lane.b32.xlu2 %v6183_v59, %s5183_s12  ;;  %v6213_v43 = vsel %vm1815_vm3, %v2390_v11, %v2389_v17  ;;  %v2504_v62 = vrot.slane %v6163_v3, 3  ;;  %v2503_v19 = vsel %vm1812_vm2, %v2502_v8, %v2501_v9  ;;  %v3543_v10 = vsel %vm1809_vm1, %v3542_v42, %v3541_v16  ;;  %v4994_v11 = vpop.eup %4993 }
 0x462   : > { %v2277_v29 = vsel %vm1815_vm3, %v2276_v4, %v2275_v25  ;;  %v3545_v55 = vsel %vm1812_vm2, %v3544_v38, %v3543_v10  ;;  %v1449_v46 = vadd.f32 1.0, %v6114_v5  ;;  %v1464_v63 = vmul.f32 0.5, %v1432_v27 }
 0x463   : > { %v1535_v6 = vpop.permute.xlu0 %1534  ;;  %v2505_v32 = vsel %vm1815_vm3, %v2504_v62, %v2503_v19  ;;  %v1434_v4 = vadd.f32 1.0, %v4994_v11  ;;  %v6301_v62 = vadd.f32 %v6046_v30, %v5608_v41  ;;  %v1369_v10 = vmul.f32 0.5, %v5991_v33 }
 0x464   : > { %v6228_v20 = vmul.f32 %v1535_v6, %v1463_v18  ;;  %v1481_v34 = vmul.f32 0.5, %v1449_v46 }
 0x466   : > { %1354 = vmatmul.bf16.gmra.mxu3 %v6012_v7  ;;  %v1263_v47 = vpop.f32.mrf.mxu3  ;;  %v2975_v44 = vrot.slane %v6228_v20, 7  ;;  %v2861_v39 = vrot.slane %v6228_v20, 6  ;;  %v2747_v17 = vrot.slane %v6228_v20, 5  ;;  %v1384_v7 = vmul.f32 0.5, %v5984_v58 }
 0x467   : > { %v6247_v42 = vadd.f32 %v1263_v47, %v5608_v41  ;;  %v3204_v22 = vrot.slane %v6228_v20, 1  ;;  %v3318_v18 = vrot.slane %v6228_v20, 2 }
 0x468   : > { %v6255_v52 = vsel %vm1815_vm3, %v2975_v44, %v6119_v26  ;;  %v6259_v5 = vsel %vm1815_vm3, %v2861_v39, %v6132_v60  ;;  %v6268_v58 = vsel %vm1815_vm3, %v2747_v17, %v6146_v51  ;;  %v6273_v26 = vsel %vm1815_vm3, %v6228_v20, %v6157_v24  ;;  %v6322_v39 = vpop.f32.mrf.mxu0 }
 0x469   : > { %1578 = vrot.lane.b32.xlu1 %v6247_v42, %s5183_s12  ;;  %1546 = vrot.lane.b32.xlu2 %v6244_v0, %s5183_s12  ;;  %v3432_v60 = vrot.slane %v6228_v20, 3  ;;  %v6278_v23 = vsel %vm1815_vm3, %v3204_v22, %v6154_v57  ;;  %v3546_v24 = vrot.slane %v6228_v20, 4  ;;  %4995 = vtanh.f32 %v1384_v7 }
 0x46a   : > { %v6292_v57 = vsel %vm1815_vm3, %v3318_v18, %v6174_v50  ;;  %4997 = vtanh.f32 %v1369_v10 }
 0x46b   : > { %v1537_v8 = vpop.permute.xlu1 %1536  ;;  %v1571_v38 = vpop.permute.xlu2 %1570  ;;  %v6282_v51 = vsel %vm1815_vm3, %v3432_v60, %v6160_v31  ;;  %v6295_v61 = vsel %vm1815_vm3, %v3546_v24, %v3545_v55 }
 0x46c   : > { %v6286_v16 = vmul.f32 %v1537_v8, %v1464_v63  ;;  %v6288_v6 = vmul.f32 %v1571_v38, %v1481_v34 }
 0x46e   : > { %10388 = vst [vmem:[#allocation2_spill] sm:$0xff] %v6288_v6  ;;  %v2620_v31 = vrot.slane %v6286_v16, 3  ;;  %v2049_v9 = vrot.slane %v6286_v16, 6  ;;  %v1817_v25 = vrot.slane %v6286_v16, 4  ;;  %v1935_v19 = vrot.slane %v6286_v16, 5 }
 0x46f   : > { %v2392_v50 = vrot.slane %v6286_v16, 1  ;;  %v2163_v27 = vrot.slane %v6286_v16, 7  ;;  %v4996_v44 = vpop.eup %4995  ;;  %v2506_v7 = vrot.slane %v6286_v16, 2 }
 0x470   : > { %v2621_v55 = vsel %vm1818_vm4, %v2620_v31, %v6189_v12  ;;  %v2050_v47 = vsel %vm1818_vm4, %v2049_v9, %v6192_v45  ;;  %v1819_v30 = vsel %vm1818_vm4, %v1817_v25, %v6201_v49  ;;  %v1936_v46 = vsel %vm1818_vm4, %v1935_v19, %v6204_v56  ;;  %v4998_v19 = vpop.eup %4997 }
 0x471   : > { %1548 = vrot.lane.b32.xlu1 %v6301_v62, %s5183_s12  ;;  %v2393_v33 = vsel %vm1818_vm4, %v2392_v50, %v6213_v43  ;;  %v2278_v12 = vsel %vm1818_vm4, %v6286_v16, %v2277_v29  ;;  %v1466_v45 = vmul.f32 0.5, %v1434_v4  ;;  %v2164_v17 = vsel %vm1818_vm4, %v2163_v27, %v6208_v21 }
 0x472   : > { %v2507_v56 = vsel %vm1818_vm4, %v2506_v7, %v2505_v32  ;;  %v1448_v43 = vadd.f32 1.0, %v4996_v44  ;;  %v6332_v29 = vadd.f32 %v6176_v54, %v5608_v41  ;;  %v1433_v27 = vadd.f32 1.0, %v4998_v19 }
 0x473   : > { %v1541_v22 = vpop.permute.xlu2 %1540 }
 0x474   : > { %v6327_v49 = vmul.f32 %v1541_v22, %v1466_v45  ;;  %v1480_v25 = vmul.f32 0.5, %v1448_v43 }
 0x476   : > { %v2622_v60 = vrot.slane %v6327_v49, 2  ;;  %v2051_v63 = vrot.slane %v6327_v49, 5  ;;  %v1820_v21 = vrot.slane %v6327_v49, 3  ;;  %v1937_v34 = vrot.slane %v6327_v49, 4 }
 0x477   : > { %v6340_v11 = vsel %vm1821_vm5, %v6327_v49, %v2393_v33  ;;  %v2165_v32 = vrot.slane %v6327_v49, 6  ;;  %v2279_v8 = vrot.slane %v6327_v49, 7  ;;  %v2508_v9 = vrot.slane %v6327_v49, 1 }
 0x478   : > { %v6345_v38 = vsel %vm1821_vm5, %v2622_v60, %v2621_v55  ;;  %v6348_v54 = vsel %vm1821_vm5, %v2051_v63, %v2050_v47  ;;  %v6351_v18 = vsel %vm1821_vm5, %v1820_v21, %v1819_v30  ;;  %v6356_v24 = vsel %vm1821_vm5, %v1937_v34, %v1936_v46  ;;  %v1238_v55 = vpop.f32.mrf.mxu0 }
 0x479   : > { %1552 = vrot.lane.b32.xlu1 %v6332_v29, %s5183_s12  ;;  %v6359_v4 = vsel %vm1821_vm5, %v2165_v32, %v2164_v17  ;;  %v6362_v31 = vsel %vm1821_vm5, %v2279_v8, %v2278_v12  ;;  %v6366_v10 = vsel %vm1821_vm5, %v2508_v9, %v2507_v56  ;;  %v6371_v30 = vadd.f32 %v1238_v55, %v5608_v41 }
 0x47a   : > { %v1465_v46 = vmul.f32 0.5, %v1433_v27  ;;  %v6443_v55 = vadd.f32 %v6322_v39, %v5608_v41 }
 0x47b   : > { %v1569_v50 = vpop.permute.xlu0 %1568 }
 0x47c   : > { %v6368_v47 = vmul.f32 %v1569_v50, %v1480_v25  ;;  %v6425_v25 = vadd.f32 %v6102_v13, %v5608_v41  ;;  %v1387_v50 = vmul.f32 0.5, %v6125_v40  ;;  %v6439_v13 = vadd.f32 %v6251_v14, %v5608_v41 }
 0x47e   : > { %10389 = vst [vmem:[#allocation3_spill] sm:$0xff] %v6368_v47 }
 0x480   : > { %v1241_v8 = vpop.f32.mrf.mxu0 }
 0x481   : > { %1558 = vrot.lane.b32.xlu1 %v6371_v30, %s5183_s12  ;;  %v6453_v39 = vadd.f32 %v1241_v8, %v5608_v41 }
 0x483   : > { %v1539_v33 = vpop.permute.xlu0 %1538 }
 0x484   : > { %v6375_v12 = vmul.f32 %v1539_v33, %v1465_v46 }
 0x486   : > { %10390 = vst [vmem:[#allocation4_spill] sm:$0xff] %v6375_v12  ;;  %v2977_v44 = vrot.slane %v6375_v12, 6  ;;  %v2863_v45 = vrot.slane %v6375_v12, 5  ;;  %v2749_v17 = vrot.slane %v6375_v12, 4  ;;  %v6383_v7 = vsel %vm1818_vm4, %v6375_v12, %v6278_v23 }
 0x487   : > { %v3091_v22 = vrot.slane %v6375_v12, 7  ;;  %v3434_v56 = vrot.slane %v6375_v12, 2  ;;  %v3320_v43 = vrot.slane %v6375_v12, 1  ;;  %v3548_v60 = vrot.slane %v6375_v12, 3 }
 0x488   : > { %v6391_v63 = vsel %vm1818_vm4, %v2977_v44, %v6255_v52  ;;  %v6395_v21 = vsel %vm1818_vm4, %v2863_v45, %v6259_v5  ;;  %v6399_v23 = vsel %vm1818_vm4, %v2749_v17, %v6268_v58 }
 0x489   : > { %v6403_v34 = vsel %vm1818_vm4, %v3091_v22, %v6273_v26  ;;  %v6407_v32 = vsel %vm1818_vm4, %v3434_v56, %v6282_v51  ;;  %v6411_v52 = vsel %vm1818_vm4, %v3320_v43, %v6292_v57  ;;  %v6415_v5 = vsel %vm1818_vm4, %v3548_v60, %v6295_v61  ;;  %v1243_v57 = vpop.f32.mrf.mxu0 }
 0x48a   : > { %v1386_v26 = vmul.f32 0.5, %v6068_v28  ;;  %v1373_v61 = vmul.f32 0.5, %v6244_v0  ;;  %v1371_v28 = vmul.f32 0.5, %v6079_v2  ;;  %v1372_v0 = vmul.f32 0.5, %v6083_v37 }
 0x48c   : > { %4999 = vtanh.f32 %v1386_v26  ;;  %v1389_v26 = vmul.f32 0.5, %v6247_v42  ;;  %v1374_v42 = vmul.f32 0.5, %v6301_v62 }
 0x48d   : > { %5001 = vtanh.f32 %v1373_v61 }
 0x48e   : > { %5003 = vtanh.f32 %v1371_v28  ;;  %v6466_v28 = vadd.f32 %v1243_v57, %v5608_v41 }
 0x48f   : > { %5005 = vtanh.f32 %v1387_v50 }
 0x490   : > { %5007 = vtanh.f32 %v1372_v0 }
 0x491   : > { %5009 = vtanh.f32 %v1389_v26 }
 0x492   : > { %v5000_v46 = vpop.eup %4999  ;;  %5011 = vtanh.f32 %v1374_v42 }
 0x493   : > { %v1450_v40 = vadd.f32 1.0, %v5000_v46  ;;  %v5002_v14 = vpop.eup %5001 }
 0x494   : > { %v5004_v33 = vpop.eup %5003  ;;  %v1437_v60 = vadd.f32 1.0, %v5002_v14 }
 0x495   : > { %v1482_v45 = vmul.f32 0.5, %v1450_v40  ;;  %v5006_v17 = vpop.eup %5005  ;;  %v1435_v37 = vadd.f32 1.0, %v5004_v33 }
 0x496   : > { %v1451_v8 = vadd.f32 1.0, %v5006_v17  ;;  %v5008_v61 = vpop.eup %5007 }
 0x497   : > { %v1467_v46 = vmul.f32 0.5, %v1435_v37 }
 0x498   : > { %v1483_v40 = vmul.f32 0.5, %v1451_v8 }
 0x4a9   : > { %v1266_v9 = vpop.f32.mrf.mxu3 }
 0x4aa   : > { %v6418_v58 = vadd.f32 %v1266_v9, %v5608_v41 }
 0x4ac   : > { %1580 = vrot.lane.b32.xlu0 %v6418_v58, %s5183_s12 }
 0x4b1   : > { %v1268_v51 = vpop.f32.mrf.mxu3 }
 0x4b2   : > { %v6428_v19 = vadd.f32 %v1268_v51, %v5608_v41  ;;  %v1469_v51 = vmul.f32 0.5, %v1437_v60 }
 0x4b4   : > { %1582 = vrot.lane.b32.xlu2 %v6428_v19, %s5183_s12  ;;  %1550 = vrot.lane.b32.xlu0 %v6425_v25, %s5183_s12 }
 0x4ba   : > { %v1246_v27 = vpop.f32.mrf.mxu0 }
 0x4bb   : > { %v6449_v2 = vpop.permute.xlu2 %1576 }
 0x4bc   : > { %1554 = vrot.lane.b32.xlu2 %v6439_v13, %s5183_s12  ;;  %1556 = vrot.lane.b32.xlu0 %v6443_v55, %s5183_s12 }
 0x4c2   : > { %v1248_v44 = vpop.f32.mrf.mxu0 }
 0x4c3   : > { %v6456_v22 = vadd.f32 %v1248_v44, %v5608_v41  ;;  %v1573_v56 = vpop.permute.xlu1 %1572  ;;  %v1547_v9 = vpop.permute.xlu2 %1546 }
 0x4c4   : > { %v6458_v43 = vmul.f32 %v1573_v56, %v1482_v45  ;;  %1560 = vrot.lane.b32.xlu2 %v6453_v39, %s5183_s12  ;;  %v6468_v50 = vmul.f32 %v1547_v9, %v1469_v51  ;;  %v1436_v45 = vadd.f32 1.0, %v5008_v61 }
 0x4c5   : > { %1566 = vrot.lane.b32.xlu1 %v6456_v22, %s5183_s12 }
 0x4c6   : > { %10391 = vst [vmem:[#allocation5_spill] sm:$0xff] %v6458_v43  ;;  %v2981_v17 = vrot.slane %v6468_v50, 4  ;;  %v2867_v37 = vrot.slane %v6468_v50, 3  ;;  %v2753_v8 = vrot.slane %v6468_v50, 2  ;;  %v3095_v12 = vrot.slane %v6468_v50, 5 }
 0x4c7   : > { %v3323_v42 = vrot.slane %v6468_v50, 7 }
 0x4cb   : > { %v1543_v0 = vpop.permute.xlu1 %1542  ;;  %v1575_v14 = vpop.permute.xlu0 %1574 }
 0x4cc   : > { %v6470_v44 = vmul.f32 %v1543_v0, %v1467_v46  ;;  %1562 = vrot.lane.b32.xlu2 %v6466_v28, %s5183_s12  ;;  %v6474_v33 = vmul.f32 %v1575_v14, %v1483_v40  ;;  %v3209_v46 = vrot.slane %v6468_v50, 6 }
 0x4ce   : > { %10392 = vst [vmem:[#allocation6_spill] sm:$0xff] %v6470_v44  ;;  %v2979_v57 = vrot.slane %v6470_v44, 5  ;;  %v2865_v56 = vrot.slane %v6470_v44, 4  ;;  %v2751_v60 = vrot.slane %v6470_v44, 3  ;;  %v3207_v9 = vrot.slane %v6470_v44, 7 }
 0x4cf   : > { %10393 = vst [vmem:[#allocation7_spill] sm:$0xff] %v6474_v33  ;;  %v3093_v26 = vrot.slane %v6470_v44, 6 }
 0x4d0   : > { %v2980_v62 = vsel %vm1821_vm5, %v2979_v57, %v6391_v63  ;;  %v2866_v51 = vsel %vm1821_vm5, %v2865_v56, %v6395_v21  ;;  %v2752_v61 = vsel %vm1821_vm5, %v2751_v60, %v6399_v23  ;;  %v5010_v63 = vpop.eup %5009  ;;  %v6503_v57 = vadd.f32 %v1246_v27, %v5608_v41 }
 0x4d1   : > { %v6493_v40 = vsel %vm1824_vm6, %v2981_v17, %v2980_v62  ;;  %v6496_v0 = vsel %vm1824_vm6, %v2867_v37, %v2866_v51  ;;  %v6499_v14 = vsel %vm1824_vm6, %v2753_v8, %v2752_v61  ;;  %v1468_v21 = vmul.f32 0.5, %v1436_v45 }
 0x4d2   : > { %v3208_v23 = vsel %vm1821_vm5, %v3207_v9, %v6383_v7  ;;  %v3094_v17 = vsel %vm1821_vm5, %v3093_v26, %v6403_v34  ;;  %v1453_v41 = vadd.f32 1.0, %v5010_v63  ;;  %v3322_v7 = vsel %vm1821_vm5, %v6470_v44, %v6411_v52 }
 0x4d3   : > { %v1545_v56 = vpop.permute.xlu0 %1544  ;;  %v6510_v60 = vsel %vm1824_vm6, %v3209_v46, %v3208_v23  ;;  %v6513_v37 = vsel %vm1824_vm6, %v3095_v12, %v3094_v17  ;;  %v3436_v12 = vrot.slane %v6470_v44, 1 }
 0x4d4   : > { %1564 = vrot.lane.b32.xlu2 %v6503_v57, %s5183_s12  ;;  %v6517_v8 = vmul.f32 %v1545_v56, %v1468_v21  ;;  %v1485_v17 = vmul.f32 0.5, %v1453_v41  ;;  %v6551_v56 = vsel %vm1824_vm6, %v3323_v42, %v3322_v7 }
 0x4d6   : > { %10394 = vst [vmem:[#allocation8_spill] sm:$0xff] %v6517_v8  ;;  %v2624_v34 = vrot.slane %v6517_v8, 1  ;;  %v2053_v27 = vrot.slane %v6517_v8, 4  ;;  %v1823_v45 = vrot.slane %v6517_v8, 2  ;;  %v1939_v9 = vrot.slane %v6517_v8, 3 }
 0x4d7   : > { %v2395_v26 = vrot.slane %v6517_v8, 7  ;;  %v2167_v62 = vrot.slane %v6517_v8, 5  ;;  %v2281_v46 = vrot.slane %v6517_v8, 6 }
 0x4d8   : > { %v2625_v51 = vsel %vm1824_vm6, %v2624_v34, %v6345_v38  ;;  %v2054_v52 = vsel %vm1824_vm6, %v2053_v27, %v6348_v54  ;;  %v1825_v61 = vsel %vm1824_vm6, %v1823_v45, %v6351_v18  ;;  %v1940_v63 = vsel %vm1824_vm6, %v1939_v9, %v6356_v24  ;;  %v5012_v24 = vpop.eup %5011 }
 0x4d9   : > { %v2396_v21 = vsel %vm1824_vm6, %v2395_v26, %v6340_v11  ;;  %v2168_v23 = vsel %vm1824_vm6, %v2167_v62, %v6359_v4  ;;  %v2510_v38 = vsel %vm1824_vm6, %v6517_v8, %v6366_v10  ;;  %v2282_v54 = vsel %vm1824_vm6, %v2281_v46, %v6362_v31 }
 0x4da   : > { %v3437_v18 = vsel %vm1821_vm5, %v3436_v12, %v6407_v32  ;;  %v3550_v4 = vrot.slane %v6470_v44, 2  ;;  %v3552_v31 = vrot.slane %v6468_v50, 1  ;;  %v1438_v41 = vadd.f32 1.0, %v5012_v24 }
 0x4db   : > { %v1579_v34 = vpop.permute.xlu1 %1578  ;;  %v6555_v11 = vsel %vm1824_vm6, %v6468_v50, %v3437_v18 }
 0x4dc   : > { %v6558_v27 = vmul.f32 %v1579_v34, %v1485_v17  ;;  %v3551_v10 = vsel %vm1821_vm5, %v3550_v4, %v6415_v5  ;;  %v1470_v7 = vmul.f32 0.5, %v1438_v41  ;;  %v1380_v41 = vmul.f32 0.5, %v6453_v39 }
 0x4dd   : > { %v6564_v32 = vsel %vm1824_vm6, %v3552_v31, %v3551_v10 }
 0x4de   : > { %10395 = vst [vmem:[#allocation9_spill] sm:$0xff] %v6558_v27 }
 0x4e3   : > { %v1549_v45 = vpop.permute.xlu1 %1548 }
 0x4e4   : > { %v6566_v12 = vmul.f32 %v1549_v45, %v1470_v7  ;;  %v1381_v7 = vmul.f32 0.5, %v6466_v28  ;;  %v1383_v28 = vmul.f32 0.5, %v6456_v22 }
 0x4e6   : > { %10396 = vst [vmem:[#allocation10_spill] sm:$0xff] %v6566_v12  ;;  %v2626_v9 = vsel %vm1827_vm7, %v6566_v12, %v2625_v51  ;;  %v2055_v26 = vrot.slane %v6566_v12, 3  ;;  %v1826_v62 = vrot.slane %v6566_v12, 1  ;;  %v1941_v5 = vrot.slane %v6566_v12, 2 }
 0x4e7   : > { %2641 = vrot.lane.b32.xlu2 %v2626_v9, %s5184_s17  ;;  %v2397_v42 = vrot.slane %v6566_v12, 6  ;;  %v2169_v46 = vrot.slane %v6566_v12, 4  ;;  %v2283_v24 = vrot.slane %v6566_v12, 5  ;;  %v2511_v51 = vrot.slane %v6566_v12, 7 }
 0x4e8   : > { %v2056_v17 = vsel %vm1827_vm7, %v2055_v26, %v2054_v52  ;;  %v1828_v18 = vsel %vm1827_vm7, %v1826_v62, %v1825_v61  ;;  %v1942_v34 = vsel %vm1827_vm7, %v1941_v5, %v1940_v63  ;;  %v1375_v61 = vmul.f32 0.5, %v6425_v25 }
 0x4e9   : > { %2071 = vrot.lane.b32.xlu0 %v2056_v17, %s5184_s17  ;;  %1843 = vrot.lane.b32.xlu1 %v1828_v18, %s5184_s17  ;;  %v2398_v4 = vsel %vm1827_vm7, %v2397_v42, %v2396_v21  ;;  %v2170_v10 = vsel %vm1827_vm7, %v2169_v46, %v2168_v23  ;;  %v2284_v31 = vsel %vm1827_vm7, %v2283_v24, %v2282_v54  ;;  %v1376_v63 = vmul.f32 0.5, %v6332_v29 }
 0x4ea   : > { %v2512_v52 = vsel %vm1827_vm7, %v2511_v51, %v2510_v38  ;;  %v1377_v21 = vmul.f32 0.5, %v6439_v13  ;;  %v1378_v23 = vmul.f32 0.5, %v6443_v55  ;;  %5013 = vtanh.f32 %v1375_v61 }
 0x4eb   : > { %v1388_v38 = vmul.f32 0.5, %v6183_v59  ;;  %5015 = vtanh.f32 %v1376_v63  ;;  %v1379_v54 = vmul.f32 0.5, %v6371_v30  ;;  %v1390_v25 = vmul.f32 0.5, %v6418_v58  ;;  %v1553_v24 = vpop.permute.xlu1 %1552 }
 0x4ec   : > { %5017 = vtanh.f32 %v1377_v21  ;;  %v1391_v59 = vmul.f32 0.5, %v6428_v19  ;;  %v1382_v9 = vmul.f32 0.5, %v6503_v57  ;;  %v10564_v12 = vperm.slane %v6044_v35, 0 }
 0x4ed   : > { %5019 = vtanh.f32 %v1378_v23 }
 0x4ee   : > { %5021 = vtanh.f32 %v1388_v38 }
 0x4ef   : > { %1957 = vrot.lane.b32.xlu2 %v1942_v34, %s5184_s17  ;;  %5023 = vtanh.f32 %v1379_v54 }
 0x4f0   : > { %v5014_v29 = vpop.eup %5013  ;;  %5025 = vtanh.f32 %v1380_v41 }
 0x4f1   : > { %2413 = vrot.lane.b32.xlu0 %v2398_v4, %s5184_s17  ;;  %2185 = vrot.lane.b32.xlu1 %v2170_v10, %s5184_s17  ;;  %v5016_v13 = vpop.eup %5015  ;;  %5027 = vtanh.f32 %v1381_v7  ;;  %v1439_v58 = vadd.f32 1.0, %v5014_v29 }
 0x4f2   : > { %v5018_v55 = vpop.eup %5017  ;;  %5029 = vtanh.f32 %v1390_v25  ;;  %v1440_v17 = vadd.f32 1.0, %v5016_v13 }
 0x4f3   : > { %v5020_v30 = vpop.eup %5019  ;;  %5031 = vtanh.f32 %v1391_v59  ;;  %v1441_v18 = vadd.f32 1.0, %v5018_v55  ;;  %v1471_v61 = vmul.f32 0.5, %v1439_v58 }
 0x4f4   : > { %v5022_v39 = vpop.eup %5021  ;;  %5033 = vtanh.f32 %v1382_v9  ;;  %v1442_v19 = vadd.f32 1.0, %v5020_v30  ;;  %v1472_v22 = vmul.f32 0.5, %v1440_v17  ;;  %v2063_v9 = vrot.slane %v6368_v47, 6 }
 0x4f5   : > { %v5024_v26 = vpop.eup %5023  ;;  %v1452_v46 = vadd.f32 1.0, %v5022_v39  ;;  %5035 = vtanh.f32 %v1383_v28  ;;  %v1949_v28 = vrot.slane %v6368_v47, 5 }
 0x4f6   : > { %v5026_v5 = vpop.eup %5025  ;;  %v1443_v51 = vadd.f32 1.0, %v5024_v26  ;;  %v6606_v63 = vmul.f32 0.5, %v1442_v19 }
 0x4f7   : > { %2299 = vrot.lane.b32.xlu2 %v2284_v31, %s5184_s17  ;;  %v5028_v42 = vpop.eup %5027  ;;  %v1444_v34 = vadd.f32 1.0, %v5026_v5  ;;  %v1484_v31 = vmul.f32 0.5, %v1452_v46 }
 0x4f8   : > { %v5030_v57 = vpop.eup %5029  ;;  %v1445_v4 = vadd.f32 1.0, %v5028_v42  ;;  %v1475_v38 = vmul.f32 0.5, %v1443_v51  ;;  %v6622_v51 = vmul.f32 %v1553_v24, %v1472_v22 }
 0x4f9   : > { %2527 = vrot.lane.b32.xlu1 %v2512_v52, %s5184_s17  ;;  %v5032_v10 = vpop.eup %5031  ;;  %v1473_v52 = vmul.f32 0.5, %v1441_v18  ;;  %v6609_v23 = vmul.f32 %v6449_v2, %v1484_v31  ;;  %v1476_v54 = vmul.f32 0.5, %v1444_v34  ;;  %v1454_v7 = vadd.f32 1.0, %v5030_v57 }
 0x4fa   : > { %v5034_v21 = vpop.eup %5033  ;;  %v1455_v13 = vadd.f32 1.0, %v5032_v10  ;;  %v1477_v59 = vmul.f32 0.5, %v1445_v4  ;;  %10398 = vst [vmem:[#allocation12_spill] sm:$0xff] %v6622_v51  ;;  %v1559_v10 = vpop.permute.xlu1 %1558  ;;  %v2171_v22 = vrot.slane %v6622_v51, 3 }
 0x4fb   : > { %10397 = vst [vmem:[#allocation11_spill] sm:$0xff] %v6609_v23  ;;  %v5036_v25 = vpop.eup %5035  ;;  %v1446_v26 = vadd.f32 1.0, %v5034_v21  ;;  %v1486_v58 = vmul.f32 0.5, %v1454_v7  ;;  %v6639_v30 = vmul.f32 %v1559_v10, %v1475_v38 }
 0x4fc   : > { %v1447_v17 = vadd.f32 1.0, %v5036_v25  ;;  %v1487_v34 = vmul.f32 0.5, %v1455_v13 }
 0x4fd   : > { %v1478_v25 = vmul.f32 0.5, %v1446_v26  ;;  %10400 = vst [vmem:[#allocation14_spill] sm:$0xff] %v6639_v30  ;;  %v2057_v26 = vrot.slane %v6622_v51, 2  ;;  %v2757_v21 = vrot.slane %v6639_v30, 7 }
 0x4fe   : > { %v6635_v5 = vmul.f32 0.5, %v1447_v17 }
 0x50e   : > { %v6600_v45 = vpop.permute.xlu2 %1582 }
 0x516   : > { %v1555_v62 = vpop.permute.xlu2 %1554 }
 0x517   : > { %v6633_v13 = vmul.f32 %v1555_v62, %v1473_v52  ;;  %v1943_v62 = vrot.slane %v6622_v51, 1  ;;  %v2399_v52 = vrot.slane %v6622_v51, 5 }
 0x519   : > { %10399 = vst [vmem:[#allocation13_spill] sm:$0xff] %v6633_v13  ;;  %v3099_v24 = vrot.slane %v6633_v13, 3 }
 0x51e   : > { %v1561_v41 = vpop.permute.xlu2 %1560  ;;  %v1581_v29 = vpop.permute.xlu0 %1580 }
 0x51f   : > { %v6655_v10 = vmul.f32 %v1581_v29, %v1486_v58  ;;  %v6674_v29 = vmul.f32 %v6600_v45, %v1487_v34 }
 0x521   : > { %10403 = vst [vmem:[#allocation17_spill] sm:$0xff] %v6655_v10  ;;  %v2069_v58 = vrot.slane %v6655_v10, 3 }
 0x522   : > { %10405 = vst [vmem:[#allocation19_spill] sm:$0xff] %v6674_v29 }
 0x526   : > { %v1563_v42 = vpop.permute.xlu2 %1562  ;;  %v1551_v55 = vpop.permute.xlu0 %1550 }
 0x527   : > { %v6641_v7 = vmul.f32 %v1551_v55, %v1471_v61  ;;  %v6653_v55 = vmul.f32 %v1561_v41, %v1476_v54  ;;  %v6666_v61 = vmul.f32 %v1563_v42, %v1477_v59  ;;  %v3100_v41 = vrot.slane %v6639_v30, 2 }
 0x529   : > { %10401 = vst [vmem:[#allocation15_spill] sm:$0xff] %v6641_v7  ;;  %v2983_v4 = vrot.slane %v6641_v7, 3  ;;  %v2869_v2 = vrot.slane %v6641_v7, 2  ;;  %v2755_v38 = vrot.slane %v6641_v7, 1  ;;  %v3211_v54 = vrot.slane %v6641_v7, 5 }
 0x52a   : > { %10402 = vst [vmem:[#allocation16_spill] sm:$0xff] %v6653_v55  ;;  %v3101_v45 = vsel %vm1809_vm1, %v3100_v41, %v3099_v24  ;;  %v2288_v59 = vrot.slane %v6653_v55, 2  ;;  %v3102_v19 = vrot.slane %v6666_v61, 1 }
 0x52b   : > { %v2984_v18 = vsel %vm1827_vm7, %v2983_v4, %v6493_v40  ;;  %v2870_v17 = vsel %vm1827_vm7, %v2869_v2, %v6496_v0  ;;  %v2756_v57 = vsel %vm1827_vm7, %v2755_v38, %v6499_v14  ;;  %10404 = vst [vmem:[#allocation18_spill] sm:$0xff] %v6666_v61  ;;  %v3097_v0 = vrot.slane %v6641_v7, 4 }
 0x52c   : > { %2999 = vrot.lane.b32.xlu2 %v2984_v18, %s5184_s17  ;;  %2885 = vrot.lane.b32.xlu1 %v2870_v17, %s5184_s17  ;;  %v6680_v14 = vsel %vm1809_vm1, %v2757_v21, %v6633_v13  ;;  %v2174_v18 = vrot.slane %v6653_v55, 1  ;;  %v2183_v4 = vrot.slane %v6655_v10, 4  ;;  %v1945_v21 = vrot.slane %v6653_v55, 7 }
 0x52d   : > { %2771 = vrot.lane.b32.xlu0 %v2756_v57, %s5184_s17  ;;  %v1955_v17 = vrot.slane %v6655_v10, 2  ;;  %v3212_v38 = vsel %vm1827_vm7, %v3211_v54, %v6510_v60  ;;  %v2402_v40 = vrot.slane %v6653_v55, 3 }
 0x52e   : > { %v1565_v2 = vpop.permute.xlu2 %1564  ;;  %v1557_v42 = vpop.permute.xlu0 %1556 }
 0x52f   : > { %v6687_v34 = vmul.f32 %v1565_v2, %v1478_v25  ;;  %v6690_v57 = vmul.f32 %v1557_v42, %v6606_v63  ;;  %v3098_v25 = vsel %vm1827_vm7, %v3097_v0, %v6513_v37 }
 0x531   : > { %10406 = vst [vmem:[#allocation20_spill] sm:$0xff] %v6687_v34  ;;  %v2058_v24 = vrot.slane %v6690_v57, 1  ;;  %v2172_v63 = vrot.slane %v6690_v57, 2  ;;  %v1944_v41 = vsel %vm1809_vm1, %v6690_v57, %v1943_v62  ;;  %v2061_v2 = vrot.slane %v6687_v34, 7 }
 0x532   : > { %10407 = vst [vmem:[#allocation21_spill] sm:$0xff] %v6690_v57  ;;  %v1946_v60 = vsel %vm1812_vm2, %v1945_v21, %v1944_v41  ;;  %v1947_v54 = vrot.slane %v6687_v34, 6  ;;  %v2400_v42 = vrot.slane %v6690_v57, 4  ;;  %v2404_v37 = vrot.slane %v6687_v34, 2 }
 0x533   : > { %v2059_v31 = vsel %vm1809_vm1, %v2058_v24, %v2057_v26  ;;  %v2173_v46 = vsel %vm1809_vm1, %v2172_v63, %v2171_v22  ;;  %v2286_v0 = vrot.slane %v6690_v57, 3 }
 0x534   : > { %3227 = vrot.lane.b32.xlu1 %v3212_v38, %s5184_s17  ;;  %v2060_v62 = vsel %vm1812_vm2, %v6653_v55, %v2059_v31  ;;  %v2175_v39 = vsel %vm1812_vm2, %v2174_v18, %v2173_v46  ;;  %v1948_v21 = vsel %vm1815_vm3, %v1947_v54, %v1946_v60  ;;  %v2401_v41 = vsel %vm1809_vm1, %v2400_v42, %v2399_v52 }
 0x535   : > { %3113 = vrot.lane.b32.xlu0 %v3098_v25, %s5184_s17  ;;  %v2062_v26 = vsel %vm1815_vm3, %v2061_v2, %v2060_v62  ;;  %v2176_v22 = vsel %vm1815_vm3, %v6687_v34, %v2175_v39  ;;  %v1950_v38 = vsel %vm1818_vm4, %v1949_v28, %v1948_v21  ;;  %v2403_v24 = vsel %vm1812_vm2, %v2402_v40, %v2401_v41 }
 0x536   : > { %v2064_v46 = vsel %vm1818_vm4, %v2063_v9, %v2062_v26  ;;  %v10408_v31 = vrot.slane %v6368_v47, 7  ;;  %v10409_v18 = vrot.slane %v6458_v43, 4  ;;  %v2405_v39 = vsel %vm1815_vm3, %v2404_v37, %v2403_v24 }
 0x537   : > { %v1567_v63 = vpop.permute.xlu1 %1566  ;;  %v10410_v2 = vrot.slane %v6458_v43, 5  ;;  %v10411_v40 = vrot.slane %v6458_v43, 6  ;;  %v10412_v9 = vrot.slane %v6609_v23, 3  ;;  %v1831_v42 = vrot.slane %v6653_v55, 6 }
 0x538   : > { %v2178_v52 = vsel %vm1818_vm4, %v10408_v31, %v2176_v22  ;;  %v1952_v25 = vsel %vm1821_vm5, %v10409_v18, %v1950_v38  ;;  %v6748_v62 = vmul.f32 %v1567_v63, %v6635_v5  ;;  %v10414_v37 = vrot.slane %v6609_v23, 4 }
 0x539   : > { %v2066_v28 = vsel %vm1821_vm5, %v10410_v2, %v2064_v46  ;;  %v2180_v60 = vsel %vm1821_vm5, %v10411_v40, %v2178_v52  ;;  %v1954_v54 = vsel %vm1824_vm6, %v10412_v9, %v1952_v25  ;;  %v10415_v41 = vrot.slane %v6609_v23, 5 }
 0x53a   : > { %10413 = vst [vmem:[#allocation22_spill] sm:$0xff] %v6748_v62  ;;  %v2068_v21 = vsel %vm1824_vm6, %v10414_v37, %v2066_v28  ;;  %v10416_v22 = vrot.slane %v6368_v47, 1  ;;  %v10417_v46 = vrot.slane %v6622_v51, 4  ;;  %v2290_v5 = vrot.slane %v6687_v34, 1 }
 0x53b   : > { %v2182_v26 = vsel %vm1824_vm6, %v10415_v41, %v2180_v60  ;;  %v2070_v24 = vsel %vm1827_vm7, %v2069_v58, %v2068_v21  ;;  %v2630_v52 = vrot.slane %v6653_v55, 5  ;;  %v1956_v18 = vsel %vm1827_vm7, %v1955_v17, %v1954_v54 }
 0x53c   : > { %v2407_v38 = vsel %vm1818_vm4, %v10416_v22, %v2405_v39  ;;  %v2287_v31 = vsel %vm1809_vm1, %v2286_v0, %v10417_v46  ;;  %2073 = vrot.lane.b32.xlu2 %v2070_v24, %s5184_s17  ;;  %v1829_v63 = vrot.slane %v6690_v57, 7  ;;  %v3103_v39 = vsel %vm1812_vm2, %v3102_v19, %v3101_v45  ;;  %1959 = vrot.lane.b32.xlu1 %v1956_v18, %s5184_s17 }
 0x53d   : > { %v2289_v25 = vsel %vm1812_vm2, %v2288_v59, %v2287_v31  ;;  %v2184_v58 = vsel %vm1827_vm7, %v2183_v4, %v2182_v26  ;;  %v2408_v2 = vsel %vm1821_vm5, %v6458_v43, %v2407_v38  ;;  %v2628_v28 = vrot.slane %v6690_v57, 6 }
 0x53e   : > { %v2291_v0 = vsel %vm1815_vm3, %v2290_v5, %v2289_v25  ;;  %v1830_v59 = vsel %vm1809_vm1, %v1829_v63, %v6622_v51  ;;  %v1833_v40 = vrot.slane %v6687_v34, 5  ;;  %v3104_v19 = vsel %vm1815_vm3, %v6748_v62, %v3103_v39  ;;  %2187 = vrot.lane.b32.xlu0 %v2184_v58, %s5184_s17 }
 0x53f   : > { %v2292_v17 = vsel %vm1818_vm4, %v6368_v47, %v2291_v0  ;;  %v10418_v4 = vrot.slane %v6458_v43, 7  ;;  %v1832_v60 = vsel %vm1812_vm2, %v1831_v42, %v1830_v59  ;;  %v10419_v9 = vrot.slane %v6622_v51, 7 }
 0x540   : > { %v2632_v37 = vrot.slane %v6687_v34, 4  ;;  %v10420_v21 = vrot.slane %v6609_v23, 7  ;;  %v2411_v26 = vrot.slane %v6655_v10, 6  ;;  %v1834_v22 = vsel %vm1815_vm3, %v1833_v40, %v1832_v60 }
 0x541   : > { %v2294_v45 = vsel %vm1821_vm5, %v10418_v4, %v2292_v17  ;;  %v2629_v54 = vsel %vm1809_vm1, %v2628_v28, %v10419_v9  ;;  %v2297_v24 = vrot.slane %v6655_v10, 5  ;;  %v10421_v42 = vrot.slane %v6368_v47, 4 }
 0x542   : > { %v2410_v41 = vsel %vm1824_vm6, %v10420_v21, %v2408_v2  ;;  %v2631_v38 = vsel %vm1812_vm2, %v2630_v52, %v2629_v54  ;;  %v2759_v5 = vrot.slane %v6666_v61, 6  ;;  %v10422_v18 = vrot.slane %v6609_v23, 6 }
 0x543   : > { %v1836_v46 = vsel %vm1818_vm4, %v10421_v42, %v1834_v22  ;;  %v2633_v31 = vsel %vm1815_vm3, %v2632_v37, %v2631_v38  ;;  %v10423_v63 = vrot.slane %v6458_v43, 3  ;;  %v10424_v52 = vrot.slane %v6288_v6, 7 }
 0x544   : > { %v2296_v25 = vsel %vm1824_vm6, %v10422_v18, %v2294_v45  ;;  %v2514_v2 = vrot.slane %v6690_v57, 5  ;;  %v2412_v0 = vsel %vm1827_vm7, %v2411_v26, %v2410_v41  ;;  %v10425_v28 = vrot.slane %v6609_v23, 2 }
 0x545   : > { %v1838_v39 = vsel %vm1821_vm5, %v10423_v63, %v1836_v46  ;;  %v3106_v58 = vsel %vm1818_vm4, %v10424_v52, %v3104_v19  ;;  %v2516_v59 = vrot.slane %v6653_v55, 4  ;;  %v2761_v40 = vrot.slane %v6748_v62, 5  ;;  %2415 = vrot.lane.b32.xlu2 %v2412_v0, %s5184_s17 }
 0x546   : > { %v1840_v17 = vsel %vm1824_vm6, %v10425_v28, %v1838_v39  ;;  %v1841_v4 = vrot.slane %v6655_v10, 1  ;;  %v10426_v45 = vrot.slane %v6368_v47, 3  ;;  %v10427_v60 = vrot.slane %v6622_v51, 6 }
 0x547   : > { %v2518_v54 = vrot.slane %v6687_v34, 3  ;;  %v2298_v37 = vsel %vm1827_vm7, %v2297_v24, %v2296_v25  ;;  %v10428_v21 = vrot.slane %v6474_v33, 6  ;;  %v2989_v22 = vrot.slane %v6748_v62, 7 }
 0x548   : > { %v2635_v19 = vsel %vm1818_vm4, %v10426_v45, %v2633_v31  ;;  %v2515_v9 = vsel %vm1809_vm1, %v2514_v2, %v10427_v60  ;;  %2301 = vrot.lane.b32.xlu1 %v2298_v37, %s5184_s17  ;;  %v1842_v38 = vsel %vm1827_vm7, %v1841_v4, %v1840_v17  ;;  %v3109_v42 = vrot.slane %v6558_v27, 5 }
 0x549   : > { %v3108_v41 = vsel %vm1821_vm5, %v10428_v21, %v3106_v58  ;;  %v2517_v26 = vsel %vm1812_vm2, %v2516_v59, %v2515_v9  ;;  %v2760_v31 = vsel %vm1812_vm2, %v2759_v5, %v6680_v14  ;;  %1845 = vrot.lane.b32.xlu0 %v1842_v38, %s5184_s17  ;;  %v10429_v24 = vrot.slane %v6458_v43, 2 }
 0x54a   : > { %v2519_v46 = vsel %vm1815_vm3, %v2518_v54, %v2517_v26  ;;  %v10430_v25 = vrot.slane %v6368_v47, 2  ;;  %v2762_v39 = vsel %vm1815_vm3, %v2761_v40, %v2760_v31  ;;  %v10431_v52 = vrot.slane %v6633_v13, 2 }
 0x54b   : > { %v2637_v18 = vsel %vm1821_vm5, %v10429_v24, %v2635_v19  ;;  %v10432_v58 = vrot.slane %v6639_v30, 1  ;;  %v3110_v14 = vsel %vm1824_vm6, %v3109_v42, %v3108_v41  ;;  %v2638_v5 = vrot.slane %v6609_v23, 1 }
 0x54c   : > { %v2521_v63 = vsel %vm1818_vm4, %v10430_v25, %v2519_v46  ;;  %v10433_v0 = vrot.slane %v6458_v43, 1  ;;  %v3111_v59 = vrot.slane %v6674_v29, 4  ;;  %v2991_v4 = vrot.slane %v6288_v6, 6 }
 0x54d   : > { %v2987_v2 = vsel %vm1809_vm1, %v10432_v58, %v10431_v52  ;;  %v2639_v45 = vsel %vm1824_vm6, %v2638_v5, %v2637_v18  ;;  %v10434_v19 = vrot.slane %v6288_v6, 4  ;;  %v2765_v9 = vrot.slane %v6474_v33, 3 }
 0x54e   : > { %v2523_v28 = vsel %vm1821_vm5, %v10433_v0, %v2521_v63  ;;  %v2988_v17 = vsel %vm1812_vm2, %v6666_v61, %v2987_v2  ;;  %v2993_v54 = vrot.slane %v6474_v33, 5  ;;  %v3112_v37 = vsel %vm1827_vm7, %v3111_v59, %v3110_v14 }
 0x54f   : > { %v2990_v40 = vsel %vm1815_vm3, %v2989_v22, %v2988_v17  ;;  %v2764_v60 = vsel %vm1818_vm4, %v10434_v19, %v2762_v39  ;;  %v2524_v21 = vsel %vm1824_vm6, %v6609_v23, %v2523_v28  ;;  %v3327_v41 = vrot.slane %v6633_v13, 5  ;;  %3115 = vrot.lane.b32.xlu2 %v3112_v37, %s5184_s17 }
 0x550   : > { %v3328_v26 = vrot.slane %v6639_v30, 4  ;;  %v2525_v22 = vrot.slane %v6655_v10, 7  ;;  %v2992_v38 = vsel %vm1818_vm4, %v2991_v4, %v2990_v40  ;;  %v3330_v42 = vrot.slane %v6666_v61, 3 }
 0x551   : > { %v2871_v46 = vrot.slane %v6633_v13, 1  ;;  %v2640_v31 = vsel %vm1827_vm7, %v6655_v10, %v2639_v45  ;;  %v2766_v24 = vsel %vm1821_vm5, %v2765_v9, %v2764_v60  ;;  %v3332_v18 = vrot.slane %v6748_v62, 2 }
 0x552   : > { %v2873_v25 = vrot.slane %v6666_v61, 7  ;;  %2643 = vrot.lane.b32.xlu1 %v2640_v31, %s5184_s17  ;;  %v2526_v63 = vsel %vm1827_vm7, %v2525_v22, %v2524_v21  ;;  %v2767_v39 = vrot.slane %v6558_v27, 2  ;;  %v2875_v52 = vrot.slane %v6748_v62, 6 }
 0x553   : > { %2529 = vrot.lane.b32.xlu0 %v2526_v63, %s5184_s17  ;;  %v2994_v58 = vsel %vm1821_vm5, %v2993_v54, %v2992_v38  ;;  %v3329_v2 = vsel %vm1809_vm1, %v3328_v26, %v3327_v41  ;;  %v3334_v14 = vrot.slane %v6288_v6, 1  ;;  %v2877_v5 = vrot.slane %v6288_v6, 5 }
 0x554   : > { %v2768_v0 = vsel %vm1824_vm6, %v2767_v39, %v2766_v24  ;;  %v2995_v28 = vrot.slane %v6558_v27, 4  ;;  %v3331_v17 = vsel %vm1812_vm2, %v3330_v42, %v3329_v2  ;;  %v2872_v59 = vsel %vm1809_vm1, %v6639_v30, %v2871_v46 }
 0x555   : > { %v2769_v40 = vrot.slane %v6674_v29, 1  ;;  %v3333_v4 = vsel %vm1815_vm3, %v3332_v18, %v3331_v17  ;;  %v2874_v45 = vsel %vm1812_vm2, %v2873_v25, %v2872_v59  ;;  %v3441_v19 = vrot.slane %v6633_v13, 6 }
 0x556   : > { %v2996_v60 = vsel %vm1824_vm6, %v2995_v28, %v2994_v58  ;;  %v3439_v9 = vrot.slane %v6641_v7, 7  ;;  %v2876_v54 = vsel %vm1815_vm3, %v2875_v52, %v2874_v45  ;;  %v3444_v37 = vrot.slane %v6666_v61, 4 }
 0x557   : > { %v2770_v21 = vsel %vm1827_vm7, %v2769_v40, %v2768_v0  ;;  %v2997_v41 = vrot.slane %v6674_v29, 3  ;;  %v3442_v26 = vrot.slane %v6639_v30, 5  ;;  %v3446_v22 = vrot.slane %v6748_v62, 3 }
 0x558   : > { %2773 = vrot.lane.b32.xlu2 %v2770_v21, %s5184_s17  ;;  %v3335_v38 = vsel %vm1818_vm4, %v3334_v14, %v3333_v4  ;;  %v2879_v42 = vrot.slane %v6474_v33, 4  ;;  %v3213_v46 = vrot.slane %v6633_v13, 4  ;;  %v2878_v24 = vsel %vm1818_vm4, %v2877_v5, %v2876_v54 }
 0x559   : > { %v2998_v31 = vsel %vm1827_vm7, %v2997_v41, %v2996_v60  ;;  %v3443_v18 = vsel %vm1809_vm1, %v3442_v26, %v3441_v19  ;;  %v3216_v25 = vrot.slane %v6666_v61, 2  ;;  %v3440_v63 = vsel %vm1827_vm7, %v3439_v9, %v6555_v11 }
 0x55a   : > { %3001 = vrot.lane.b32.xlu1 %v2998_v31, %s5184_s17  ;;  %v3445_v39 = vsel %vm1812_vm2, %v3444_v37, %v3443_v18  ;;  %v3214_v52 = vrot.slane %v6639_v30, 3  ;;  %v3218_v58 = vrot.slane %v6748_v62, 1  ;;  %v3325_v2 = vrot.slane %v6641_v7, 6 }
 0x55b   : > { %3455 = vrot.lane.b32.xlu0 %v3440_v63, %s5184_s17  ;;  %v3336_v14 = vsel %vm1821_vm5, %v6474_v33, %v3335_v38  ;;  %v3447_v5 = vsel %vm1815_vm3, %v3446_v22, %v3445_v39  ;;  %v3337_v0 = vrot.slane %v6558_v27, 7  ;;  %v2880_v28 = vsel %vm1821_vm5, %v2879_v42, %v2878_v24 }
 0x55c   : > { %v3448_v11 = vrot.slane %v6288_v6, 2  ;;  %v3215_v17 = vsel %vm1809_vm1, %v3214_v52, %v3213_v46  ;;  %v2881_v59 = vrot.slane %v6558_v27, 3  ;;  %v3326_v60 = vsel %vm1827_vm7, %v3325_v2, %v6551_v56 }
 0x55d   : > { %v3217_v40 = vsel %vm1812_vm2, %v3216_v25, %v3215_v17  ;;  %v3338_v4 = vsel %vm1824_vm6, %v3337_v0, %v3336_v14  ;;  %v3339_v9 = vrot.slane %v6674_v29, 6  ;;  %v3450_v37 = vrot.slane %v6474_v33, 1 }
 0x55e   : > { %v3449_v45 = vsel %vm1818_vm4, %v3448_v11, %v3447_v5  ;;  %v3219_v19 = vsel %vm1815_vm3, %v3218_v58, %v3217_v40  ;;  %v2882_v54 = vsel %vm1824_vm6, %v2881_v59, %v2880_v28  ;;  %v2883_v21 = vrot.slane %v6674_v29, 2 }
 0x55f   : > { %v3555_v41 = vrot.slane %v6633_v13, 7  ;;  %v3340_v26 = vsel %vm1827_vm7, %v3339_v9, %v3338_v4  ;;  %v3451_v22 = vsel %vm1821_vm5, %v3450_v37, %v3449_v45  ;;  %v3220_v38 = vsel %vm1818_vm4, %v6288_v6, %v3219_v19 }
 0x560   : > { %3341 = vrot.lane.b32.xlu2 %v3326_v60, %s5184_s17  ;;  %v3558_v56 = vrot.slane %v6666_v61, 5  ;;  %v2884_v42 = vsel %vm1827_vm7, %v2883_v21, %v2882_v54  ;;  %v3221_v46 = vrot.slane %v6474_v33, 7  ;;  %v3556_v31 = vrot.slane %v6639_v30, 6 }
 0x561   : > { %v3560_v24 = vrot.slane %v6748_v62, 4  ;;  %v3452_v18 = vsel %vm1824_vm6, %v6558_v27, %v3451_v22  ;;  %v3453_v39 = vrot.slane %v6674_v29, 7  ;;  %v3223_v52 = vrot.slane %v6558_v27, 6 }
 0x562   : > { %3343 = vrot.lane.b32.xlu1 %v3340_v26, %s5184_s17  ;;  %v3222_v25 = vsel %vm1821_vm5, %v3221_v46, %v3220_v38  ;;  %v3557_v63 = vsel %vm1809_vm1, %v3556_v31, %v3555_v41  ;;  %v3562_v0 = vrot.slane %v6288_v6, 3  ;;  %v3225_v28 = vrot.slane %v6674_v29, 5 }
 0x563   : > { %2887 = vrot.lane.b32.xlu0 %v2884_v42, %s5184_s17  ;;  %v3559_v58 = vsel %vm1812_vm2, %v3558_v56, %v3557_v63  ;;  %v3454_v14 = vsel %vm1827_vm7, %v3453_v39, %v3452_v18  ;;  %v3224_v5 = vsel %vm1824_vm6, %v3223_v52, %v3222_v25  ;;  %v3554_v11 = vsel %vm1827_vm7, %v6641_v7, %v6564_v32  ;;  %v6985_v32 = vpop.permute.xlu2 %2641 }
 0x564   : > { %v3561_v2 = vsel %vm1815_vm3, %v3560_v24, %v3559_v58  ;;  %v3226_v59 = vsel %vm1827_vm7, %v3225_v28, %v3224_v5  ;;  %v3564_v40 = vrot.slane %v6474_v33, 2  ;;  %v3566_v45 = vrot.slane %v6558_v27, 1  ;;  %10435 = vst [vmem:[#allocation23_spill] sm:$0xff] %v6985_v32 }
 0x565   : > { %v3563_v17 = vsel %vm1818_vm4, %v3562_v0, %v3561_v2  ;;  %v10176_v56 = vperm.slane %v6040_v53, 0  ;;  %v10177_v42 = vperm.slane %v6040_v53, 1  ;;  %v10181_v46 = vperm.slane %v6040_v53, 2 }
 0x566   : > { %v3565_v4 = vsel %vm1821_vm5, %v3564_v40, %v3563_v17  ;;  %v10182_v31 = vperm.slane %v6040_v53, 3  ;;  %v10172_v39 = vperm.slane %v6044_v35, 0  ;;  %v10173_v52 = vperm.slane %v6044_v35, 1  ;;  %v10441_v40 = vld [vmem:[#allocation4_spill] sm:$0xff] }
 0x567   : > { %v3567_v19 = vsel %vm1824_vm6, %v3566_v45, %v3565_v4  ;;  %v10174_v58 = vperm.slane %v6044_v35, 2  ;;  %v10175_v2 = vperm.slane %v6044_v35, 3  ;;  %v10178_v5 = vperm.slane %v6044_v35, 4  ;;  %v7029_v4 = vpop.permute.xlu1 %1843 }
 0x568   : > { %3457 = vrot.lane.b32.xlu2 %v3454_v14, %s5184_s17  ;;  %v3568_v60 = vsel %vm1827_vm7, %v6674_v29, %v3567_v19  ;;  %v10180_v22 = vperm.slane %v6096_v48, 0  ;;  %v10185_v26 = vperm.slane %v6096_v48, 1  ;;  %10437 = vst [vmem:[#allocation25_spill] sm:$0xff] %v7029_v4  ;;  %v10179_v19 = vperm.slane %v6163_v3, 0 }
 0x569   : > { %v10183_v17 = vperm.slane %v6163_v3, 1  ;;  %v10189_v54 = vperm.slane %v6286_v16, 1  ;;  %v1851_v37 = vmul.f32 %v7029_v4, %v10172_v39  ;;  %v1849_v9 = vmul.f32 %v7029_v4, %v10176_v56 }
 0x56a   : > { %3569 = vrot.lane.b32.xlu1 %v3554_v11, %s5184_s17  ;;  %v10186_v56 = vperm.slane %v6517_v8, 0  ;;  %v10448_v0 = vperm.slane %v6517_v8, 1  ;;  %v10456_v10 = vperm.slane %v6517_v8, 2  ;;  %v10457_v43 = vperm.slane %v6517_v8, 3 }
 0x56b   : > { %3229 = vrot.lane.b32.xlu0 %v3226_v59, %s5184_s17  ;;  %v7007_v14 = vpop.permute.xlu2 %1957  ;;  %v10184_v59 = vperm.slane %v6286_v16, 0  ;;  %v10477_v23 = vperm.slane %v6058_v36, 1  ;;  %v10478_v47 = vperm.slane %v6096_v48, 6  ;;  %v10480_v55 = vperm.slane %v6517_v8, 5 }
 0x56c   : > { %10436 = vst [vmem:[#allocation24_spill] sm:$0xff] %v7007_v14  ;;  %v1965_v39 = vmul.f32 %v7007_v14, %v10173_v52  ;;  %v1853_v52 = vmul.f32 %v7029_v4, %v10180_v22  ;;  %v1967_v22 = vmul.f32 %v7007_v14, %v10185_v26  ;;  %v1975_v29 = vmul.f32 %v7007_v14, %v10448_v0 }
 0x56d   : > { %v10453_v0 = vperm.slane %v6096_v48, 3 }
 0x56e   : > { %v1997_v28 = vadd.f32 %v1965_v39, %v1851_v37 }
 0x56f   : > { %v7079_v25 = vpop.permute.xlu1 %2185 }
 0x570   : > { %10440 = vst [vmem:[#allocation28_spill] sm:$0xff] %v7079_v25  ;;  %v2193_v39 = vmul.f32 %v7079_v25, %v10175_v2 }
 0x573   : > { %3571 = vrot.lane.b32.xlu0 %v3568_v60, %s5184_s17  ;;  %v7051_v18 = vpop.permute.xlu2 %2299  ;;  %v7071_v60 = vpop.permute.xlu0 %2071 }
 0x574   : > { %10438 = vst [vmem:[#allocation26_spill] sm:$0xff] %v7051_v18  ;;  %v2079_v37 = vmul.f32 %v7071_v60, %v10174_v58  ;;  %v1963_v58 = vmul.f32 %v7007_v14, %v10177_v42  ;;  %v2307_v2 = vmul.f32 %v7051_v18, %v10178_v5  ;;  %v1857_v5 = vmul.f32 %v7029_v4, %v10184_v59 }
 0x575   : > { %10439 = vst [vmem:[#allocation27_spill] sm:$0xff] %v7071_v60  ;;  %v1971_v59 = vmul.f32 %v7007_v14, %v10189_v54  ;;  %v10446_v42 = vperm.slane %v6044_v35, 5 }
 0x576   : > { %v2111_v38 = vadd.f32 %v2079_v37, %v1997_v28  ;;  %v1995_v45 = vadd.f32 %v1963_v58, %v1849_v9  ;;  %v1855_v28 = vmul.f32 %v7029_v4, %v10179_v19  ;;  %v2077_v9 = vmul.f32 %v7071_v60, %v10181_v46 }
 0x577   : > { %v2191_v58 = vmul.f32 %v7079_v25, %v10182_v31  ;;  %v7143_v19 = vpop.permute.xlu1 %2527  ;;  %v1861_v46 = vmul.f32 %v7029_v4, %v10186_v56  ;;  %v10447_v37 = vperm.slane %v6040_v53, 4  ;;  %v1999_v31 = vadd.f32 %v1967_v22, %v1853_v52 }
 0x578   : > { %v2225_v11 = vadd.f32 %v2193_v39, %v2111_v38  ;;  %v1969_v39 = vmul.f32 %v7007_v14, %v10183_v17  ;;  %10444 = vst [vmem:[#allocation30_spill] sm:$0xff] %v7143_v19  ;;  %v2109_v24 = vadd.f32 %v2077_v9, %v1995_v45  ;;  %v10452_v22 = vperm.slane %v6096_v48, 2 }
 0x579   : > { %v2305_v56 = vmul.f32 %v7051_v18, %v10447_v37  ;;  %v2195_v37 = vmul.f32 %v7079_v25, %v10453_v0  ;;  %v2007_v33 = vadd.f32 %v1975_v29, %v1861_v46  ;;  %v2203_v0 = vmul.f32 %v7079_v25, %v10457_v43 }
 0x57a   : > { %v2339_v17 = vadd.f32 %v2307_v2, %v2225_v11  ;;  %v2001_v21 = vadd.f32 %v1969_v39, %v1855_v28  ;;  %v10449_v2 = vperm.slane %v6044_v35, 6  ;;  %v2223_v45 = vadd.f32 %v2191_v58, %v2109_v24 }
 0x57b   : > { %v7129_v38 = vpop.permute.xlu0 %2413  ;;  %v10450_v28 = vperm.slane %v6163_v3, 2  ;;  %v2003_v39 = vadd.f32 %v1971_v59, %v1857_v5  ;;  %v2081_v52 = vmul.f32 %v7071_v60, %v10452_v22  ;;  %v10454_v58 = vperm.slane %v6286_v16, 2 }
 0x57c   : > { %10443 = vst [vmem:[#allocation29_spill] sm:$0xff] %v7129_v38  ;;  %v2421_v26 = vmul.f32 %v7129_v38, %v10446_v42  ;;  %v2535_v11 = vmul.f32 %v7143_v19, %v10449_v2  ;;  %v10451_v42 = vperm.slane %v6163_v3, 3  ;;  %v10455_v5 = vperm.slane %v6286_v16, 3 }
 0x57d   : > { %v2083_v9 = vmul.f32 %v7071_v60, %v10450_v28  ;;  %v2085_v28 = vmul.f32 %v7071_v60, %v10454_v58  ;;  %v2089_v22 = vmul.f32 %v7071_v60, %v10456_v10  ;;  %v10458_v29 = vperm.slane %v6327_v49, 0 }
 0x57e   : > { %v2197_v54 = vmul.f32 %v7079_v25, %v10451_v42  ;;  %v2453_v2 = vadd.f32 %v2421_v26, %v2339_v17  ;;  %v2199_v59 = vmul.f32 %v7079_v25, %v10455_v5  ;;  %v2113_v42 = vadd.f32 %v2081_v52, %v1999_v31 }
 0x57f   : > { %v2115_v24 = vadd.f32 %v2083_v9, %v2001_v21  ;;  %v1859_v21 = vmul.f32 %v7029_v4, %v10458_v29  ;;  %v2337_v46 = vadd.f32 %v2305_v56, %v2223_v45  ;;  %v2117_v17 = vadd.f32 %v2085_v28, %v2003_v39 }
 0x580   : > { %v2567_v26 = vadd.f32 %v2535_v11, %v2453_v2  ;;  %v2227_v5 = vadd.f32 %v2195_v37, %v2113_v42  ;;  %v2121_v31 = vadd.f32 %v2089_v22, %v2007_v33  ;;  %v10459_v52 = vperm.slane %v6327_v49, 1 }
 0x581   : > { %v2229_v58 = vadd.f32 %v2197_v54, %v2115_v24  ;;  %v10461_v43 = vperm.slane %v6044_v35, 7  ;;  %v10462_v29 = vperm.slane %v6040_v53, 5  ;;  %v10463_v11 = vperm.slane %v6163_v3, 4 }
 0x582   : > { %v1973_v10 = vmul.f32 %v7007_v14, %v10459_v52  ;;  %v2231_v45 = vadd.f32 %v2199_v59, %v2117_v17  ;;  %v10464_v33 = vperm.slane %v6096_v48, 4  ;;  %v10465_v37 = vperm.slane %v6286_v16, 4 }
 0x583   : > { %v2649_v6 = vmul.f32 %v6985_v32, %v10461_v43  ;;  %v2419_v56 = vmul.f32 %v7129_v38, %v10462_v29  ;;  %v2311_v54 = vmul.f32 %v7051_v18, %v10463_v11  ;;  %v2235_v24 = vadd.f32 %v2203_v0, %v2121_v31 }
 0x584   : > { %v2309_v39 = vmul.f32 %v7051_v18, %v10464_v33  ;;  %v2313_v2 = vmul.f32 %v7051_v18, %v10465_v37  ;;  %v2005_v28 = vadd.f32 %v1973_v10, %v1859_v21  ;;  %v10467_v43 = vperm.slane %v6040_v53, 6 }
 0x585   : > { %v2681_v22 = vadd.f32 %v2649_v6, %v2567_v26  ;;  %v2451_v52 = vadd.f32 %v2419_v56, %v2337_v46  ;;  %v10468_v59 = vperm.slane %v6517_v8, 4  ;;  %v2343_v33 = vadd.f32 %v2311_v54, %v2229_v58 }
 0x586   : > { %v7092_v41 = vpop.permute.xlu2 %2999  ;;  %v2533_v29 = vmul.f32 %v7143_v19, %v10467_v43  ;;  %v2341_v9 = vadd.f32 %v2309_v39, %v2227_v5  ;;  %v10470_v37 = vperm.slane %v6327_v49, 2  ;;  %v10471_v21 = vperm.slane %v6327_v49, 3 }
 0x587   : > { %10442 = vst [vmem:[#allocation4_spill] sm:$0xff] %v7092_v41  ;;  %v2317_v17 = vmul.f32 %v7051_v18, %v10468_v59  ;;  %v10472_v26 = vperm.slane %v6058_v36, 0  ;;  %v10473_v31 = vperm.slane %v6163_v3, 5  ;;  %v10474_v56 = vperm.slane %v6096_v48, 5 }
 0x588   : > { %v2087_v0 = vmul.f32 %v7071_v60, %v10470_v37  ;;  %v2201_v6 = vmul.f32 %v7079_v25, %v10471_v21  ;;  %v2345_v5 = vadd.f32 %v2313_v2, %v2231_v45  ;;  %v10475_v54 = vperm.slane %v6163_v3, 6 }
 0x589   : > { %v2425_v10 = vmul.f32 %v7129_v38, %v10473_v31  ;;  %v2423_v58 = vmul.f32 %v7129_v38, %v10474_v56  ;;  %v10476_v43 = vperm.slane %v6286_v16, 5  ;;  %v2349_v37 = vadd.f32 %v2317_v17, %v2235_v24 }
 0x58a   : > { %v2539_v39 = vmul.f32 %v7143_v19, %v10475_v54  ;;  %v2119_v21 = vadd.f32 %v2087_v0, %v2005_v28  ;;  %v2537_v56 = vmul.f32 %v7143_v19, %v10478_v47  ;;  %v10479_v45 = vperm.slane %v6286_v16, 6 }
 0x58b   : > { %v2427_v59 = vmul.f32 %v7129_v38, %v10476_v43  ;;  %v2457_v54 = vadd.f32 %v2425_v10, %v2343_v33  ;;  %v2455_v61 = vadd.f32 %v2423_v58, %v2341_v9  ;;  %v2431_v24 = vmul.f32 %v7129_v38, %v10480_v55 }
 0x58c   : > { %v2541_v2 = vmul.f32 %v7143_v19, %v10479_v45  ;;  %v2233_v28 = vadd.f32 %v2201_v6, %v2119_v21  ;;  %v10483_v47 = vperm.slane %v6517_v8, 6  ;;  %v2565_v45 = vadd.f32 %v2533_v29, %v2451_v52 }
 0x58d   : > { %v2571_v33 = vadd.f32 %v2539_v39, %v2457_v54  ;;  %v10212_v9 = vperm.slane %v6517_v8, 7  ;;  %v10484_v10 = vperm.slane %v6327_v49, 4  ;;  %v2569_v21 = vadd.f32 %v2537_v56, %v2455_v61 }
 0x58e   : > { %v2545_v43 = vmul.f32 %v7143_v19, %v10483_v47  ;;  %v10488_v52 = vperm.slane %v6036_v15, 0  ;;  %v10489_v39 = vperm.slane %v6163_v3, 7  ;;  %v10566_v8 = vperm.slane %v6040_v53, 1 }
 0x58f   : > { %v2315_v55 = vmul.f32 %v7051_v18, %v10484_v10 }
 0x590   : > { %v2653_v54 = vmul.f32 %v6985_v32, %v10489_v39  ;;  %v10494_v39 = vperm.slane %v6058_v36, 4 }
 0x591   : > { %v2347_v47 = vadd.f32 %v2315_v55, %v2233_v28  ;;  %v10493_v28 = vperm.slane %v6327_v49, 5 }
 0x592   : > { %v2685_v10 = vadd.f32 %v2653_v54, %v2571_v33  ;;  %v10496_v33 = vperm.slane %v6104_v1, 0 }
 0x593   : > { %v2429_v55 = vmul.f32 %v7129_v38, %v10493_v28 }
 0x596   : > { %v7153_v63 = vpop.permute.xlu2 %2073 }
 0x597   : > { %10445 = vst [vmem:[#allocation31_spill] sm:$0xff] %v7153_v63 }
 0x59e   : > { %v7218_v42 = vpop.permute.xlu1 %2885 }
 0x59f   : > { %v7201_v27 = vpop.permute.xlu2 %2415  ;;  %10466 = vst [vmem:[#allocation33_spill] sm:$0xff] %v7218_v42  ;;  %v7226_v11 = vpop.permute.xlu0 %2771  ;;  %v2893_v31 = vmul.f32 %v7218_v42, %v10477_v23  ;;  %v10482_v23 = vperm.slane %v6058_v36, 2 }
 0x5a0   : > { %10460 = vst [vmem:[#allocation32_spill] sm:$0xff] %v7201_v27  ;;  %v2779_v46 = vmul.f32 %v7226_v11, %v10472_v26  ;;  %v2777_v29 = vmul.f32 %v7226_v11, %v10488_v52 }
 0x5a1   : > { %10469 = vst [vmem:[#allocation34_spill] sm:$0xff] %v7226_v11  ;;  %v3007_v0 = vmul.f32 %v7092_v41, %v10482_v23 }
 0x5a2   : > { %v2811_v26 = vadd.f32 %v2779_v46, %v2681_v22  ;;  %v2459_v46 = vadd.f32 %v2427_v59, %v2345_v5  ;;  %v10487_v5 = vperm.slane %v6040_v53, 7 }
 0x5a4   : > { %v2925_v17 = vadd.f32 %v2893_v31, %v2811_v26  ;;  %v2573_v26 = vadd.f32 %v2541_v2, %v2459_v46  ;;  %v2463_v31 = vadd.f32 %v2431_v24, %v2349_v37  ;;  %v2647_v59 = vmul.f32 %v6985_v32, %v10487_v5 }
 0x5a5   : > { %v10491_v37 = vperm.slane %v6096_v48, 7  ;;  %v10492_v2 = vperm.slane %v6286_v16, 7  ;;  %v2659_v5 = vmul.f32 %v6985_v32, %v10212_v9 }
 0x5a6   : > { %v7273_v6 = vpop.permute.xlu1 %3227  ;;  %v3039_v58 = vadd.f32 %v3007_v0, %v2925_v17  ;;  %v10490_v17 = vperm.slane %v6058_v36, 3  ;;  %v2577_v0 = vadd.f32 %v2545_v43, %v2463_v31  ;;  %v2679_v46 = vadd.f32 %v2647_v59, %v2565_v45 }
 0x5a7   : > { %10485 = vst [vmem:[#allocation36_spill] sm:$0xff] %v7273_v6  ;;  %v7275_v23 = vpop.permute.xlu0 %3113  ;;  %v2651_v56 = vmul.f32 %v6985_v32, %v10491_v37  ;;  %v2655_v24 = vmul.f32 %v6985_v32, %v10492_v2  ;;  %v10495_v43 = vperm.slane %v6228_v20, 0  ;;  %v2781_v31 = vmul.f32 %v7226_v11, %v10496_v33 }
 0x5a8   : > { %10486 = vst [vmem:[#allocation37_spill] sm:$0xff] %v7275_v23  ;;  %v3121_v61 = vmul.f32 %v7275_v23, %v10490_v17  ;;  %v3235_v17 = vmul.f32 %v7273_v6, %v10494_v39  ;;  %v2809_v13 = vadd.f32 %v2777_v29, %v2679_v46  ;;  %v2461_v59 = vadd.f32 %v2429_v55, %v2347_v47 }
 0x5a9   : > { %v7261_v22 = vpop.permute.xlu2 %3115  ;;  %v2683_v37 = vadd.f32 %v2651_v56, %v2569_v21  ;;  %v2687_v30 = vadd.f32 %v2655_v24, %v2573_v26  ;;  %v2783_v45 = vmul.f32 %v7226_v11, %v10495_v43  ;;  %v10499_v21 = vperm.slane %v10441_v40, 0 }
 0x5aa   : > { %10481 = vst [vmem:[#allocation35_spill] sm:$0xff] %v7261_v22  ;;  %v3153_v52 = vadd.f32 %v3121_v61, %v3039_v58  ;;  %v10498_v58 = vperm.slane %v6036_v15, 1  ;;  %v2691_v29 = vadd.f32 %v2659_v5, %v2577_v0  ;;  %v10500_v24 = vperm.slane %v6228_v20, 1 }
 0x5ab   : > { %v2785_v26 = vmul.f32 %v7226_v11, %v10499_v21  ;;  %v2815_v56 = vadd.f32 %v2783_v45, %v2685_v10  ;;  %v2813_v28 = vadd.f32 %v2781_v31, %v2683_v37  ;;  %v10501_v47 = vperm.slane %v6104_v1, 1 }
 0x5ac   : > { %v3267_v2 = vadd.f32 %v3235_v17, %v3153_v52  ;;  %v2891_v61 = vmul.f32 %v7218_v42, %v10498_v58  ;;  %v2897_v46 = vmul.f32 %v7218_v42, %v10500_v24  ;;  %v10503_v17 = vperm.slane %v10441_v40, 1 }
 0x5ad   : > { %v2895_v55 = vmul.f32 %v7218_v42, %v10501_v47  ;;  %v2817_v39 = vadd.f32 %v2785_v26, %v2687_v30  ;;  %v10504_v33 = vperm.slane %v6468_v50, 0  ;;  %v10505_v10 = vperm.slane %v6327_v49, 6 }
 0x5ae   : > { %v7324_v52 = vpop.permute.xlu1 %1959  ;;  %v2899_v43 = vmul.f32 %v7218_v42, %v10503_v17  ;;  %v2923_v45 = vadd.f32 %v2891_v61, %v2809_v13  ;;  %v2929_v31 = vadd.f32 %v2897_v46, %v2815_v56  ;;  %v10507_v58 = vperm.slane %v6228_v20, 2 }
 0x5af   : > { %10502 = vst [vmem:[#allocation39_spill] sm:$0xff] %v7324_v52  ;;  %v2789_v0 = vmul.f32 %v7226_v11, %v10504_v33  ;;  %v2543_v5 = vmul.f32 %v7143_v19, %v10505_v10  ;;  %v2927_v21 = vadd.f32 %v2895_v55, %v2813_v28  ;;  %v10508_v26 = vperm.slane %v6104_v1, 2 }
 0x5b0   : > { %v7335_v37 = vpop.permute.xlu0 %2187  ;;  %v3011_v30 = vmul.f32 %v7092_v41, %v10507_v58  ;;  %v2931_v47 = vadd.f32 %v2899_v43, %v2817_v39  ;;  %v10509_v17 = vperm.slane %v10441_v40, 2  ;;  %v10510_v10 = vperm.slane %v6036_v15, 2 }
 0x5b1   : > { %10506 = vst [vmem:[#allocation40_spill] sm:$0xff] %v7335_v37  ;;  %v3009_v24 = vmul.f32 %v7092_v41, %v10508_v26  ;;  %v2821_v9 = vadd.f32 %v2789_v0, %v2691_v29  ;;  %v10511_v46 = vperm.slane %v6327_v49, 7  ;;  %v10512_v39 = vperm.slane %v6468_v50, 1 }
 0x5b2   : > { %v7310_v54 = vpop.permute.xlu2 %2773  ;;  %v3013_v33 = vmul.f32 %v7092_v41, %v10509_v17  ;;  %v3005_v13 = vmul.f32 %v7092_v41, %v10510_v10  ;;  %v3043_v61 = vadd.f32 %v3011_v30, %v2929_v31  ;;  %v2575_v26 = vadd.f32 %v2543_v5, %v2461_v59 }
 0x5b3   : > { %10497 = vst [vmem:[#allocation38_spill] sm:$0xff] %v7310_v54  ;;  %v2657_v28 = vmul.f32 %v6985_v32, %v10511_v46  ;;  %v3041_v55 = vadd.f32 %v3009_v24, %v2927_v21  ;;  %v2903_v43 = vmul.f32 %v7218_v42, %v10512_v39  ;;  %v10513_v29 = vperm.slane %v6228_v20, 3 }
 0x5b4   : > { %v3045_v58 = vadd.f32 %v3013_v33, %v2931_v47  ;;  %v3037_v17 = vadd.f32 %v3005_v13, %v2923_v45  ;;  %v10514_v31 = vperm.slane %v6104_v1, 3  ;;  %v10515_v10 = vperm.slane %v6468_v50, 2 }
 0x5b5   : > { %v3125_v0 = vmul.f32 %v7275_v23, %v10513_v29  ;;  %v10517_v24 = vperm.slane %v6036_v15, 3  ;;  %v10518_v59 = vperm.slane %v6228_v20, 4  ;;  %v10519_v45 = vperm.slane %v10441_v40, 3 }
 0x5b6   : > { %v3123_v30 = vmul.f32 %v7275_v23, %v10514_v31  ;;  %v3017_v46 = vmul.f32 %v7092_v41, %v10515_v10  ;;  %v2935_v13 = vadd.f32 %v2903_v43, %v2821_v9  ;;  %v10520_v39 = vperm.slane %v6058_v36, 5 }
 0x5b7   : > { %v3119_v47 = vmul.f32 %v7275_v23, %v10517_v24  ;;  %v3239_v5 = vmul.f32 %v7273_v6, %v10518_v59  ;;  %v3127_v33 = vmul.f32 %v7275_v23, %v10519_v45  ;;  %v3157_v31 = vadd.f32 %v3125_v0, %v3043_v61 }
 0x5b8   : > { %v10521_v10 = vperm.slane %v6104_v1, 4  ;;  %v10522_v24 = vperm.slane %v10441_v40, 4  ;;  %v3155_v59 = vadd.f32 %v3123_v30, %v3041_v55  ;;  %v3049_v34 = vadd.f32 %v3017_v46, %v2935_v13 }
 0x5b9   : > { %v3159_v51 = vadd.f32 %v3127_v33, %v3045_v58  ;;  %v10524_v9 = vperm.slane %v6468_v50, 3  ;;  %v10526_v0 = vperm.slane %v6096_v48, 1  ;;  %v10528_v55 = vperm.slane %v6096_v48, 0 }
 0x5ba   : > { %v7365_v21 = vpop.permute.xlu2 %3341  ;;  %v3237_v56 = vmul.f32 %v7273_v6, %v10521_v10  ;;  %v3241_v57 = vmul.f32 %v7273_v6, %v10522_v24  ;;  %v7385_v62 = vpop.permute.xlu1 %2301  ;;  %v3271_v10 = vadd.f32 %v3239_v5, %v3157_v31  ;;  %v10527_v24 = vperm.slane %v6468_v50, 4 }
 0x5bb   : > { %10516 = vst [vmem:[#allocation41_spill] sm:$0xff] %v7365_v21  ;;  %v3349_v29 = vmul.f32 %v7365_v21, %v10520_v39  ;;  %v3131_v43 = vmul.f32 %v7275_v23, %v10524_v9  ;;  %v7390_v45 = vpop.permute.xlu0 %1845  ;;  %v1968_v39 = vmul.f32 %v7324_v52, %v10526_v0  ;;  %v2689_v31 = vadd.f32 %v2657_v28, %v2575_v26 }
 0x5bc   : > { %10523 = vst [vmem:[#allocation42_spill] sm:$0xff] %v7385_v62  ;;  %v3245_v32 = vmul.f32 %v7273_v6, %v10527_v24  ;;  %v1854_v58 = vmul.f32 %v7390_v45, %v10528_v55  ;;  %v3269_v30 = vadd.f32 %v3237_v56, %v3155_v59  ;;  %v7403_v46 = vadd.f32 %v3241_v57, %v3159_v51 }
 0x5bd   : > { %10525 = vst [vmem:[#allocation43_spill] sm:$0xff] %v7390_v45  ;;  %v7392_v61 = vadd.f32 %v3349_v29, %v3267_v2  ;;  %v3163_v33 = vadd.f32 %v3131_v43, %v3049_v34  ;;  %v10529_v2 = vperm.slane %v6096_v48, 2  ;;  %v3151_v9 = vadd.f32 %v3119_v47, %v3037_v17 }
 0x5be   : > { %v2000_v0 = vadd.f32 %v1968_v39, %v1854_v58  ;;  %v10531_v19 = vperm.slane %v6470_v44, 2  ;;  %v10533_v51 = vperm.slane %v6044_v35, 2  ;;  %v10534_v57 = vperm.slane %v6040_v53, 2 }
 0x5bf   : > { %v2082_v13 = vmul.f32 %v7153_v63, %v10529_v2  ;;  %v7410_v24 = vadd.f32 %v3245_v32, %v3163_v33  ;;  %v10535_v43 = vperm.slane %v6163_v3, 2  ;;  %v10536_v32 = vperm.slane %v6327_v49, 2 }
 0x5c0   : > { %v7415_v56 = vmul.f32 %v7092_v41, %v10531_v19  ;;  %v2080_v34 = vmul.f32 %v7153_v63, %v10533_v51  ;;  %v2078_v59 = vmul.f32 %v7153_v63, %v10534_v57  ;;  %v10537_v19 = vperm.slane %v6036_v15, 4 }
 0x5c1   : > { %10530 = vst [vmem:[#allocation44_spill] sm:$0xff] %v7410_v24  ;;  %v7426_v28 = vmul.f32 %v7153_v63, %v10535_v43  ;;  %v7431_v26 = vmul.f32 %v7153_v63, %v10536_v32  ;;  %v10538_v47 = vperm.slane %v6036_v15, 5  ;;  %v2114_v55 = vadd.f32 %v2082_v13, %v2000_v0 }
 0x5c2   : > { %10532 = vst [vmem:[#allocation45_spill] sm:$0xff] %v7415_v56  ;;  %v3233_v17 = vmul.f32 %v7273_v6, %v10537_v19  ;;  %v10539_v58 = vperm.slane %v6286_v16, 2  ;;  %v10541_v2 = vperm.slane %v6096_v48, 3  ;;  %v10542_v57 = vperm.slane %v6096_v48, 5 }
 0x5c3   : > { %v3347_v39 = vmul.f32 %v7365_v21, %v10538_v47  ;;  %v10543_v32 = vperm.slane %v6044_v35, 5  ;;  %v10544_v13 = vperm.slane %v6470_v44, 0  ;;  %v10546_v29 = vperm.slane %v6040_v53, 5 }
 0x5c4   : > { %v7442_v33 = vmul.f32 %v7153_v63, %v10539_v58  ;;  %v2196_v51 = vmul.f32 %v7335_v37, %v10541_v2  ;;  %v2424_v43 = vmul.f32 %v7201_v27, %v10542_v57  ;;  %v7458_v47 = vpop.permute.xlu1 %2643  ;;  %v3265_v58 = vadd.f32 %v3233_v17, %v3151_v9 }
 0x5c5   : > { %v7453_v19 = vmul.f32 %v7201_v27, %v10543_v32  ;;  %v2787_v0 = vmul.f32 %v7226_v11, %v10544_v13  ;;  %10545 = vst [vmem:[#allocation47_spill] sm:$0xff] %v7458_v47  ;;  %v7463_v2 = vmul.f32 %v7201_v27, %v10546_v29  ;;  %v10547_v5 = vperm.slane %v6163_v3, 5  ;;  %v7475_v38 = vpop.permute.xlu0 %2529 }
 0x5c6   : > { %10540 = vst [vmem:[#allocation46_spill] sm:$0xff] %v7442_v33  ;;  %v10548_v32 = vperm.slane %v6327_v49, 5  ;;  %v2228_v13 = vadd.f32 %v2196_v51, %v2114_v55  ;;  %v10551_v9 = vperm.slane %v6096_v48, 4  ;;  %v10552_v29 = vperm.slane %v6104_v1, 3 }
 0x5c7   : > { %v7468_v57 = vmul.f32 %v7201_v27, %v10547_v5  ;;  %10550 = vst [vmem:[#allocation49_spill] sm:$0xff] %v7475_v38  ;;  %v10553_v5 = vperm.slane %v6058_v36, 3  ;;  %v7490_v25 = vadd.f32 %v3347_v39, %v3265_v58  ;;  %v2819_v51 = vadd.f32 %v2787_v0, %v2689_v31 }
 0x5c8   : > { %v7473_v41 = vmul.f32 %v7201_v27, %v10548_v32  ;;  %v2310_v17 = vmul.f32 %v7385_v62, %v10551_v9  ;;  %v7483_v11 = vmul.f32 %v7261_v22, %v10552_v29  ;;  %v10554_v32 = vperm.slane %v6036_v15, 3 }
 0x5c9   : > { %v7488_v18 = vmul.f32 %v7261_v22, %v10553_v5  ;;  %v10555_v9 = vperm.slane %v6470_v44, 1  ;;  %v10556_v29 = vperm.slane %v6104_v1, 0  ;;  %v10557_v5 = vperm.slane %v6228_v20, 5 }
 0x5ca   : > { %10549 = vst [vmem:[#allocation48_spill] sm:$0xff] %v7473_v41  ;;  %v7495_v55 = vmul.f32 %v7261_v22, %v10554_v32  ;;  %v2342_v14 = vadd.f32 %v2310_v17, %v2228_v13  ;;  %v10558_v58 = vperm.slane %v6104_v1, 5  ;;  %v10559_v32 = vperm.slane %v6044_v35, 1 }
 0x5cb   : > { %v2901_v60 = vmul.f32 %v7218_v42, %v10555_v9  ;;  %v2782_v4 = vmul.f32 %v7310_v54, %v10556_v29  ;;  %v3353_v39 = vmul.f32 %v7365_v21, %v10557_v5  ;;  %v10560_v0 = vperm.slane %v6058_v36, 0 }
 0x5cc   : > { %v3351_v7 = vmul.f32 %v7365_v21, %v10558_v58  ;;  %v1966_v31 = vmul.f32 %v7324_v52, %v10559_v32  ;;  %v10561_v17 = vperm.slane %v6036_v15, 0  ;;  %v2456_v5 = vadd.f32 %v2424_v43, %v2342_v14  ;;  %v7547_v56 = vpop.permute.xlu1 %3001 }
 0x5cd   : > { %v7515_v13 = vmul.f32 %v7310_v54, %v10560_v0  ;;  %v7522_v29 = vadd.f32 %v2901_v60, %v2819_v51  ;;  %v10563_v42 = vperm.slane %v6096_v48, 6  ;;  %v1852_v32 = vmul.f32 %v7390_v45, %v10564_v12  ;;  %10570 = vst [vmem:[#allocation51_spill] sm:$0xff] %v7547_v56 }
 0x5ce   : > { %v7520_v9 = vmul.f32 %v7310_v54, %v10561_v17  ;;  %v10565_v63 = vperm.slane %v6040_v53, 0  ;;  %v1964_v17 = vmul.f32 %v7324_v52, %v10566_v8  ;;  %v3385_v6 = vadd.f32 %v3353_v39, %v3271_v10 }
 0x5cf   : > { %10562 = vst [vmem:[#allocation50_spill] sm:$0xff] %v7522_v29  ;;  %v2538_v58 = vmul.f32 %v7475_v38, %v10563_v42  ;;  %v3383_v60 = vadd.f32 %v3351_v7, %v3269_v30  ;;  %v10567_v14 = vperm.slane %v6228_v20, 0  ;;  %v10568_v51 = vperm.slane %v6096_v48, 7 }
 0x5d0   : > { %v1850_v0 = vmul.f32 %v7390_v45, %v10565_v63  ;;  %v1998_v23 = vadd.f32 %v1966_v31, %v1852_v32  ;;  %v10569_v24 = vperm.slane %v6044_v35, 3  ;;  %v10571_v7 = vperm.slane %v6040_v53, 3  ;;  %v7558_v31 = vpop.permute.xlu0 %3455 }
 0x5d1   : > { %v7539_v43 = vmul.f32 %v7310_v54, %v10567_v14  ;;  %v2570_v42 = vadd.f32 %v2538_v58, %v2456_v5  ;;  %v2652_v12 = vmul.f32 %v7458_v47, %v10568_v51  ;;  %v10572_v30 = vperm.slane %v6163_v3, 0  ;;  %v7566_v51 = vpop.permute.xlu2 %3457 }
 0x5d2   : > { %v2194_v63 = vmul.f32 %v7335_v37, %v10569_v24  ;;  %v1996_v8 = vadd.f32 %v1964_v17, %v1850_v0  ;;  %v2192_v10 = vmul.f32 %v7335_v37, %v10571_v7  ;;  %v10573_v48 = vperm.slane %v6163_v3, 1  ;;  %10576 = vst [vmem:[#allocation52_spill] sm:$0xff] %v7566_v51 }
 0x5d3   : > { %v1856_v39 = vmul.f32 %v7390_v45, %v10572_v30  ;;  %v2684_v58 = vadd.f32 %v2652_v12, %v2570_v42  ;;  %v2112_v32 = vadd.f32 %v2080_v34, %v1998_v23  ;;  %v10574_v24 = vperm.slane %v6163_v3, 3 }
 0x5d4   : > { %v1970_v5 = vmul.f32 %v7324_v52, %v10573_v48  ;;  %v10575_v17 = vperm.slane %v6327_v49, 1  ;;  %v10577_v7 = vperm.slane %v6058_v36, 6  ;;  %v2110_v29 = vadd.f32 %v2078_v59, %v1996_v8 }
 0x5d5   : > { %v2198_v0 = vmul.f32 %v7335_v37, %v10574_v24  ;;  %v10578_v48 = vperm.slane %v10441_v40, 5  ;;  %v10579_v23 = vperm.slane %v6327_v49, 3  ;;  %v2814_v12 = vadd.f32 %v2782_v4, %v2684_v58 }
 0x5d6   : > { %v1974_v14 = vmul.f32 %v7324_v52, %v10575_v17  ;;  %v3463_v30 = vmul.f32 %v7558_v31, %v10577_v7  ;;  %v2226_v24 = vadd.f32 %v2194_v63, %v2112_v32  ;;  %v10580_v17 = vperm.slane %v6044_v35, 4 }
 0x5d7   : > { %v3355_v42 = vmul.f32 %v7365_v21, %v10578_v48  ;;  %v7577_v34 = vmul.f32 %v7335_v37, %v10579_v23  ;;  %v10581_v52 = vperm.slane %v6228_v20, 6  ;;  %v2224_v8 = vadd.f32 %v2192_v10, %v2110_v29 }
 0x5d8   : > { %v2308_v33 = vmul.f32 %v7385_v62, %v10580_v17  ;;  %v7586_v59 = vadd.f32 %v3463_v30, %v7392_v61  ;;  %v10582_v48 = vperm.slane %v6040_v53, 4  ;;  %v2002_v23 = vadd.f32 %v1970_v5, %v1856_v39 }
 0x5d9   : > { %v3467_v7 = vmul.f32 %v7558_v31, %v10581_v52  ;;  %v10583_v4 = vperm.slane %v6104_v1, 6  ;;  %v10584_v32 = vperm.slane %v6044_v35, 6  ;;  %v10585_v61 = vperm.slane %v6044_v35, 7 }
 0x5da   : > { %v2306_v21 = vmul.f32 %v7385_v62, %v10582_v48  ;;  %v2340_v58 = vadd.f32 %v2308_v33, %v2226_v24  ;;  %v10586_v10 = vperm.slane %v6058_v36, 6  ;;  %v2116_v5 = vadd.f32 %v7426_v28, %v2002_v23 }
 0x5db   : > { %v7594_v63 = vmul.f32 %v7566_v51, %v10583_v4  ;;  %v2536_v17 = vmul.f32 %v7475_v38, %v10584_v32  ;;  %v3499_v52 = vadd.f32 %v3467_v7, %v3385_v6  ;;  %v2650_v29 = vmul.f32 %v7458_v47, %v10585_v61 }
 0x5dc   : > { %v7605_v30 = vmul.f32 %v7566_v51, %v10586_v10  ;;  %v2338_v39 = vadd.f32 %v2306_v21, %v2224_v8  ;;  %v2454_v48 = vadd.f32 %v7453_v19, %v2340_v58  ;;  %v10587_v33 = vperm.slane %v6040_v53, 6  ;;  %v7625_v58 = vpop.permute.xlu0 %2887 }
 0x5dd   : > { %v10588_v6 = vmov %v10583_v4  ;;  %v3387_v7 = vadd.f32 %v3355_v42, %v7403_v46  ;;  %v7616_v4 = vpop.permute.xlu1 %3343  ;;  %v10590_v21 = vperm.slane %v6040_v53, 7  ;;  %v2230_v8 = vadd.f32 %v2198_v0, %v2116_v5  ;;  %10592 = vst [vmem:[#allocation54_spill] sm:$0xff] %v7625_v58 }
 0x5de   : > { %v2534_v24 = vmul.f32 %v7475_v38, %v10587_v33  ;;  %v3465_v35 = vmul.f32 %v7558_v31, %v10588_v6  ;;  %10589 = vst [vmem:[#allocation53_spill] sm:$0xff] %v7616_v4  ;;  %v2452_v32 = vadd.f32 %v7463_v2, %v2338_v39  ;;  %v10591_v19 = vperm.slane %v6327_v49, 0 }
 0x5df   : > { %v2648_v28 = vmul.f32 %v7458_v47, %v10590_v21  ;;  %v10593_v61 = vperm.slane %v6036_v15, 6  ;;  %v10594_v46 = vperm.slane %v6104_v1, 2  ;;  %v2568_v2 = vadd.f32 %v2536_v17, %v2454_v48 }
 0x5e0   : > { %v1860_v23 = vmul.f32 %v7390_v45, %v10591_v19  ;;  %v10595_v53 = vperm.slane %v6163_v3, 4  ;;  %v10596_v0 = vperm.slane %v6104_v1, 1  ;;  %v10597_v33 = vperm.slane %v6058_v36, 2 }
 0x5e1   : > { %v3461_v10 = vmul.f32 %v7558_v31, %v10593_v61  ;;  %v3010_v42 = vmul.f32 %v7547_v56, %v10594_v46  ;;  %v2566_v21 = vadd.f32 %v2534_v24, %v2452_v32  ;;  %v10598_v19 = vperm.slane %v6036_v15, 2 }
 0x5e2   : > { %v2312_v39 = vmul.f32 %v7385_v62, %v10595_v53  ;;  %v2896_v5 = vmul.f32 %v7625_v58, %v10596_v0  ;;  %v3008_v6 = vmul.f32 %v7547_v56, %v10597_v33  ;;  %v2682_v46 = vadd.f32 %v2650_v29, %v2568_v2 }
 0x5e3   : > { %v3006_v61 = vmul.f32 %v7547_v56, %v10598_v19  ;;  %v10599_v17 = vperm.slane %v6058_v36, 1  ;;  %v3497_v53 = vadd.f32 %v3465_v35, %v3383_v60  ;;  %v2680_v54 = vadd.f32 %v2648_v28, %v2566_v21 }
 0x5e4   : > { %v2344_v37 = vadd.f32 %v2312_v39, %v2230_v8  ;;  %v2928_v45 = vadd.f32 %v2896_v5, %v2814_v12  ;;  %v10600_v0 = vperm.slane %v6036_v15, 1  ;;  %v2006_v41 = vadd.f32 %v1974_v14, %v1860_v23 }
 0x5e5   : > { %v2894_v48 = vmul.f32 %v7625_v58, %v10599_v17  ;;  %v3493_v24 = vadd.f32 %v3461_v10, %v7490_v25  ;;  %v2812_v32 = vadd.f32 %v7515_v13, %v2682_v46  ;;  %v10601_v29 = vperm.slane %v10441_v40, 6 }
 0x5e6   : > { %v2892_v44 = vmul.f32 %v7625_v58, %v10600_v0  ;;  %v2458_v33 = vadd.f32 %v7468_v57, %v2344_v37  ;;  %v3042_v19 = vadd.f32 %v3010_v42, %v2928_v45  ;;  %v2810_v60 = vadd.f32 %v7520_v9, %v2680_v54  ;;  %v7672_v54 = vpop.permute.xlu1 %3569  ;;  %v7676_v42 = vpop.permute.xlu0 %3229 }
 0x5e7   : > { %v3469_v2 = vmul.f32 %v7558_v31, %v10601_v29  ;;  %v10602_v12 = vperm.slane %v6163_v3, 6  ;;  %v10603_v28 = vperm.slane %v6163_v3, 7  ;;  %v10604_v25 = vperm.slane %v6104_v1, 5  ;;  %10606 = vst [vmem:[#allocation55_spill] sm:$0xff] %v7672_v54 }
 0x5e8   : > { %v2926_v37 = vadd.f32 %v2894_v48, %v2812_v32  ;;  %v10605_v57 = vperm.slane %v6058_v36, 5  ;;  %v3156_v9 = vadd.f32 %v7483_v11, %v3042_v19  ;;  %v2924_v23 = vadd.f32 %v2892_v44, %v2810_v60  ;;  %10607 = vst [vmem:[#allocation56_spill] sm:$0xff] %v7676_v42 }
 0x5e9   : > { %v2540_v35 = vmul.f32 %v7475_v38, %v10602_v12  ;;  %v2654_v14 = vmul.f32 %v7458_v47, %v10603_v28  ;;  %v3352_v13 = vmul.f32 %v7616_v4, %v10604_v25  ;;  %v7670_v45 = vadd.f32 %v3469_v2, %v3387_v7 }
 0x5ea   : > { %v3350_v8 = vmul.f32 %v7616_v4, %v10605_v57  ;;  %v2120_v3 = vadd.f32 %v7431_v26, %v2006_v41  ;;  %v10608_v39 = vperm.slane %v6058_v36, 7  ;;  %v10609_v21 = vperm.slane %v6036_v15, 7 }
 0x5eb   : > { %v2572_v10 = vadd.f32 %v2540_v35, %v2458_v33  ;;  %v3040_v7 = vadd.f32 %v3008_v6, %v2926_v37  ;;  %v10610_v17 = vperm.slane %v6228_v20, 7  ;;  %v10611_v44 = vperm.slane %v6104_v1, 4 }
 0x5ec   : > { %v3577_v5 = vmul.f32 %v7672_v54, %v10608_v39  ;;  %v3575_v46 = vmul.f32 %v7672_v54, %v10609_v21  ;;  %v10612_v41 = vperm.slane %v6058_v36, 4  ;;  %v3038_v0 = vadd.f32 %v3006_v61, %v2924_v23 }
 0x5ed   : > { %v3581_v48 = vmul.f32 %v7672_v54, %v10610_v17  ;;  %v3238_v11 = vmul.f32 %v7676_v42, %v10611_v44  ;;  %v10613_v32 = vperm.slane %v6036_v15, 4  ;;  %v3154_v2 = vadd.f32 %v7488_v18, %v3040_v7 }
 0x5ee   : > { %v3236_v26 = vmul.f32 %v7676_v42, %v10612_v41  ;;  %v7697_v29 = vadd.f32 %v3577_v5, %v7586_v59  ;;  %v7699_v6 = vadd.f32 %v3575_v46, %v3493_v24  ;;  %v3152_v12 = vadd.f32 %v7495_v55, %v3038_v0 }
 0x5ef   : > { %v3234_v33 = vmul.f32 %v7676_v42, %v10613_v32  ;;  %v7702_v19 = vadd.f32 %v3581_v48, %v3499_v52  ;;  %v3270_v60 = vadd.f32 %v3238_v11, %v3156_v9  ;;  %v10614_v35 = vperm.slane %v6036_v15, 5 }
 0x5f0   : > { %v10615_v28 = vperm.slane %v6104_v1, 7  ;;  %v3646_v59 = vsel %vm3639_vm8, %v7697_v29, 0.0  ;;  %v3640_v24 = vsel %vm3639_vm8, %v7699_v6, 0.0  ;;  %v3268_v18 = vadd.f32 %v3236_v26, %v3154_v2 }
 0x5f1   : > { %v3348_v61 = vmul.f32 %v7616_v4, %v10614_v35  ;;  %v2234_v52 = vadd.f32 %v7577_v34, %v2120_v3  ;;  %3647 = vadd.xlane.f32.xlu0 %v3646_v59  ;;  %3641 = vadd.xlane.f32.xlu2 %v3640_v24  ;;  %v3384_v55 = vadd.f32 %v3352_v13, %v3270_v60  ;;  %v3417_v9 = vperm.slane %v6468_v50, 6  ;;  %v10625_v35 = vld [vmem:[#allocation48_spill] sm:$0xff] }
 0x5f2   : > { %v3579_v25 = vmul.f32 %v7672_v54, %v10615_v28  ;;  %v3266_v37 = vadd.f32 %v3234_v33, %v3152_v12  ;;  %v3382_v23 = vadd.f32 %v3350_v8, %v3268_v18  ;;  %v2686_v39 = vadd.f32 %v2654_v14, %v2572_v10  ;;  %v7734_v14 = vpop.permute.xlu0 %3571 }
 0x5f3   : > { %v10616_v5 = vperm.slane %v6228_v20, 1  ;;  %v10617_v46 = vperm.slane %v6327_v49, 4  ;;  %v3498_v34 = vadd.f32 %v7594_v63, %v3384_v55  ;;  %v10618_v13 = vperm.slane %v6036_v15, 6 }
 0x5f4   : > { %v7716_v57 = vadd.f32 %v3579_v25, %v3497_v53  ;;  %v3380_v3 = vadd.f32 %v3348_v61, %v3266_v37  ;;  %v10619_v17 = vperm.slane %v6286_v16, 5  ;;  %v3496_v10 = vadd.f32 %v7605_v30, %v3382_v23 }
 0x5f5   : > { %v2898_v21 = vmul.f32 %v7625_v58, %v10616_v5  ;;  %v2316_v7 = vmul.f32 %v7385_v62, %v10617_v46  ;;  %v3462_v53 = vmul.f32 %v7566_v51, %v10618_v13  ;;  %v2816_v48 = vadd.f32 %v7539_v43, %v2686_v39 }
 0x5f6   : > { %v7732_v8 = vmul.f32 %v7201_v27, %v10619_v17  ;;  %v10620_v44 = vperm.slane %v6228_v20, 3  ;;  %v10621_v41 = vmov %v10615_v28  ;;  %v10622_v0 = vperm.slane %v6058_v36, 7  ;;  %v10626_v28 = vld [vmem:[#allocation6_spill] sm:$0xff] }
 0x5f7   : > { %v2348_v11 = vadd.f32 %v2316_v7, %v2234_v52  ;;  %v3580_v26 = vmul.f32 %v7734_v14, %v10621_v41  ;;  %v3494_v33 = vadd.f32 %v3462_v53, %v3380_v3  ;;  %v10623_v2 = vperm.slane %v6036_v15, 7  ;;  %v10634_v17 = vld [vmem:[#allocation38_spill] sm:$0xff] }
 0x5f8   : > { %v3126_v63 = vmul.f32 %v7261_v22, %v10620_v44  ;;  %v3578_v32 = vmul.f32 %v7734_v14, %v10622_v0  ;;  %v2930_v60 = vadd.f32 %v2898_v21, %v2816_v48  ;;  %v10624_v43 = vperm.slane %v6228_v20, 2  ;;  %v10637_v0 = vld [vmem:[#allocation43_spill] sm:$0xff] }
 0x5f9   : > { %v3576_v30 = vmul.f32 %v7734_v14, %v10623_v2  ;;  %v2462_v61 = vadd.f32 %v10625_v35, %v2348_v11  ;;  %v10627_v1 = vperm.slane %v10626_v28, 3  ;;  %v7757_v59 = vadd.f32 %v3580_v26, %v3498_v34 }
 0x5fa   : > { %v3012_v12 = vmul.f32 %v7547_v56, %v10624_v43  ;;  %v7759_v36 = vadd.f32 %v3578_v32, %v3496_v10  ;;  %v10628_v15 = vperm.slane %v6327_v49, 6  ;;  %v10629_v55 = vperm.slane %v6228_v20, 4 }
 0x5fb   : > { %v3130_v25 = vmul.f32 %v7261_v22, %v10627_v1  ;;  %v7761_v24 = vadd.f32 %v3576_v30, %v3494_v33  ;;  %v10630_v23 = vperm.slane %v10441_v40, 7  ;;  %v10631_v5 = vperm.slane %v6327_v49, 7 }
 0x5fc   : > { %v2544_v18 = vmul.f32 %v7475_v38, %v10628_v15  ;;  %v3044_v52 = vadd.f32 %v3012_v12, %v2930_v60  ;;  %v3240_v37 = vmul.f32 %v7676_v42, %v10629_v55  ;;  %v3655_v46 = vsel %vm3639_vm8, %v7757_v59, 0.0 }
 0x5fd   : > { %v3583_v39 = vmul.f32 %v7672_v54, %v10630_v23  ;;  %v2658_v21 = vmul.f32 %v7458_v47, %v10631_v5  ;;  %v3649_v7 = vsel %vm3639_vm8, %v7759_v36, 0.0  ;;  %v3643_v34 = vsel %vm3639_vm8, %v7761_v24, 0.0  ;;  %3656 = vadd.xlane.f32.xlu0 %v3655_v46 }
 0x5fe   : > { %v2576_v3 = vadd.f32 %v2544_v18, %v2462_v61  ;;  %3650 = vadd.xlane.f32.xlu2 %v3649_v7  ;;  %v3158_v13 = vadd.f32 %v3126_v63, %v3044_v52  ;;  %v10633_v49 = vperm.slane %v10626_v28, 0  ;;  %v3531_v48 = vperm.slane %v6468_v50, 7  ;;  %3644 = vadd.xlane.f32.xlu1 %v3643_v34  ;;  %v10643_v61 = vld [vmem:[#allocation40_spill] sm:$0xff]  ;;  %v10647_v7 = vld [vmem:[#allocation41_spill] sm:$0xff] }
 0x5ff   : > { %v7782_v53 = vadd.f32 %v3583_v39, %v7670_v45  ;;  %v10635_v11 = vperm.slane %v10626_v28, 1  ;;  %v10636_v26 = vperm.slane %v6286_v16, 0  ;;  %v10638_v63 = vperm.slane %v6286_v16, 1  ;;  %v10639_v45 = vld [vmem:[#allocation39_spill] sm:$0xff] }
 0x600   : > { %v2788_v10 = vmul.f32 %v10634_v17, %v10633_v49  ;;  %v2690_v44 = vadd.f32 %v2658_v21, %v2576_v3  ;;  %v3272_v2 = vadd.f32 %v3240_v37, %v3158_v13  ;;  %v10640_v30 = vperm.slane %v6228_v20, 5  ;;  %v10648_v13 = vld [vmem:[#allocation46_spill] sm:$0xff] }
 0x601   : > { %10632 = vst [vmem:[#allocation48_spill] sm:$0xff] %v7782_v53  ;;  %v2902_v41 = vmul.f32 %v7625_v58, %v10635_v11  ;;  %v1858_v32 = vmul.f32 %v10637_v0, %v10636_v26  ;;  %v1972_v33 = vmul.f32 %v10639_v45, %v10638_v63  ;;  %v10641_v43 = vperm.slane %v6228_v20, 6  ;;  %v10650_v11 = vld [vmem:[#allocation45_spill] sm:$0xff] }
 0x602   : > { %v3354_v60 = vmul.f32 %v7616_v4, %v10640_v30  ;;  %v10642_v35 = vperm.slane %v6286_v16, 3  ;;  %v3658_v15 = vsel %vm3639_vm8, %v7702_v19, 0.0  ;;  %v2820_v18 = vadd.f32 %v2788_v10, %v2690_v44  ;;  %v10649_v44 = vld [vmem:[#allocation50_spill] sm:$0xff] }
 0x603   : > { %v3468_v12 = vmul.f32 %v7566_v51, %v10641_v43  ;;  %v10644_v52 = vperm.slane %v10626_v28, 2  ;;  %v2004_v37 = vadd.f32 %v1972_v33, %v1858_v32  ;;  %v3652_v23 = vsel %vm3639_vm8, %v7716_v57, 0.0 }
 0x604   : > { %v2200_v1 = vmul.f32 %v10643_v61, %v10642_v35  ;;  %v3386_v39 = vadd.f32 %v3354_v60, %v3272_v2  ;;  %v10645_v5 = vperm.slane %v10626_v28, 4  ;;  %v10646_v46 = vperm.slane %v6468_v50, 5  ;;  %v10653_v60 = vld [vmem:[#allocation44_spill] sm:$0xff] }
 0x605   : > { %v3016_v55 = vmul.f32 %v7547_v56, %v10644_v52  ;;  %v2934_v3 = vadd.f32 %v2902_v41, %v2820_v18  ;;  %v2118_v49 = vadd.f32 %v10648_v13, %v2004_v37  ;;  %v3473_v10 = vmul.f32 %v7558_v31, %v3417_v9  ;;  %v10655_v37 = vld [vmem:[#allocation37_spill] sm:$0xff]  ;;  %3659 = vadd.xlane.f32.xlu0 %v3658_v15 }
 0x606   : > { %v3244_v21 = vmul.f32 %v7676_v42, %v10645_v5  ;;  %v3359_v34 = vmul.f32 %v10647_v7, %v10646_v46  ;;  %v3047_v26 = vadd.f32 %v10650_v11, %v10649_v44  ;;  %v3500_v32 = vadd.f32 %v3468_v12, %v3386_v39  ;;  %3653 = vadd.xlane.f32.xlu1 %v3652_v23 }
 0x607   : > { %v10651_v63 = vperm.slane %v6228_v20, 7  ;;  %v10652_v2 = vperm.slane %v6286_v16, 4  ;;  %v3048_v43 = vadd.f32 %v3016_v55, %v2934_v3  ;;  %v2232_v35 = vadd.f32 %v2200_v1, %v2118_v49  ;;  %v10659_v55 = vld [vmem:[#allocation36_spill] sm:$0xff] }
 0x608   : > { %v3391_v41 = vadd.f32 %v3359_v34, %v10653_v60  ;;  %v3587_v18 = vmul.f32 %v7672_v54, %v3531_v48  ;;  %v10654_v52 = vperm.slane %v10626_v28, 3  ;;  %v10657_v39 = vperm.slane %v10626_v28, 5 }
 0x609   : > { %v3582_v33 = vmul.f32 %v7734_v14, %v10651_v63  ;;  %v2314_v30 = vmul.f32 %v7385_v62, %v10652_v2  ;;  %v10658_v34 = vperm.slane %v10626_v28, 4  ;;  %v3162_v3 = vadd.f32 %v3130_v25, %v3048_v43  ;;  %v10664_v2 = vld [vmem:[#allocation8_spill] sm:$0xff] }
 0x60a   : > { %v3129_v12 = vmul.f32 %v10655_v37, %v10654_v52  ;;  %v3358_v5 = vmul.f32 %v7616_v4, %v10657_v39  ;;  %v3505_v46 = vadd.f32 %v3473_v10, %v3391_v41  ;;  %v10660_v44 = vmov %v10657_v39 }
 0x60b   : > { %v7838_v20 = vadd.f32 %v3582_v33, %v3500_v32  ;;  %v3243_v1 = vmul.f32 %v10659_v55, %v10658_v34  ;;  %v2346_v13 = vadd.f32 %v2314_v30, %v2232_v35  ;;  %v3357_v11 = vmul.f32 %v10647_v7, %v10660_v44 }
 0x60c   : > { %v3161_v49 = vadd.f32 %v3129_v12, %v3047_v26  ;;  %v10661_v15 = vperm.slane %v6286_v16, 6  ;;  %v7852_v63 = vadd.f32 %v3587_v18, %v3505_v46  ;;  %v10663_v10 = vperm.slane %v10626_v28, 6 }
 0x60d   : > { %10656 = vst [vmem:[#allocation6_spill] sm:$0xff] %v7838_v20  ;;  %v10665_v60 = vperm.slane %v10664_v2, 0  ;;  %v3276_v23 = vadd.f32 %v3244_v21, %v3162_v3  ;;  %v2460_v26 = vadd.f32 %v7732_v8, %v2346_v13  ;;  %v10666_v41 = vperm.slane %v10664_v2, 1  ;;  %v10671_v8 = vld [vmem:[#allocation31_spill] sm:$0xff] }
 0x60e   : > { %v2542_v32 = vmul.f32 %v7475_v38, %v10661_v15  ;;  %10662 = vst [vmem:[#allocation41_spill] sm:$0xff] %v7852_v63  ;;  %v3471_v33 = vmul.f32 %v7558_v31, %v10663_v10  ;;  %v3275_v30 = vadd.f32 %v3243_v1, %v3161_v49  ;;  %v10667_v35 = vmov %v10663_v10 }
 0x60f   : > { %v1862_v25 = vmul.f32 %v10637_v0, %v10665_v60  ;;  %v1976_v43 = vmul.f32 %v10639_v45, %v10666_v41  ;;  %v3472_v18 = vmul.f32 %v7566_v51, %v10667_v35  ;;  %v10668_v52 = vperm.slane %v10626_v28, 7 }
 0x610   : > { %v10669_v39 = vperm.slane %v6286_v16, 7  ;;  %v10670_v21 = vperm.slane %v10664_v2, 2  ;;  %v3390_v1 = vadd.f32 %v3358_v5, %v3276_v23  ;;  %v2574_v3 = vadd.f32 %v2542_v32, %v2460_v26  ;;  %v10675_v5 = vld [vmem:[#allocation10_spill] sm:$0xff] }
 0x611   : > { %v3586_v12 = vmul.f32 %v7734_v14, %v10668_v52  ;;  %v3389_v13 = vadd.f32 %v3357_v11, %v3275_v30  ;;  %v2008_v49 = vadd.f32 %v1976_v43, %v1862_v25  ;;  %v10672_v44 = vperm.slane %v10441_v40, 0 }
 0x612   : > { %v2656_v46 = vmul.f32 %v7458_v47, %v10669_v39  ;;  %v2090_v34 = vmul.f32 %v10671_v8, %v10670_v21  ;;  %v10673_v10 = vperm.slane %v10441_v40, 1  ;;  %v10674_v16 = vperm.slane %v10664_v2, 3 }
 0x613   : > { %v2786_v15 = vmul.f32 %v10634_v17, %v10672_v44  ;;  %v3504_v35 = vadd.f32 %v3472_v18, %v3390_v1  ;;  %v3503_v39 = vadd.f32 %v3471_v33, %v3389_v13  ;;  %v1783_v32 = vperm.slane %v10675_v5, 0 }
 0x614   : > { %v2900_v60 = vmul.f32 %v7625_v58, %v10673_v10  ;;  %v2204_v41 = vmul.f32 %v10643_v61, %v10674_v16  ;;  %v2688_v52 = vadd.f32 %v2656_v46, %v2574_v3  ;;  %v2122_v21 = vadd.f32 %v2090_v34, %v2008_v49 }
 0x615   : > { %v1920_v11 = vperm.slane %v10675_v5, 1  ;;  %v7887_v25 = vadd.f32 %v3586_v12, %v3504_v35  ;;  %v10677_v30 = vperm.slane %v10664_v2, 4  ;;  %v10678_v44 = vperm.slane %v10441_v40, 2 }
 0x616   : > { %v2818_v23 = vadd.f32 %v2786_v15, %v2688_v52  ;;  %v2236_v26 = vadd.f32 %v2204_v41, %v2122_v21  ;;  %v1864_v33 = vmul.f32 %v10637_v0, %v1783_v32  ;;  %v10679_v34 = vperm.slane %v10664_v2, 5 }
 0x617   : > { %10676 = vst [vmem:[#allocation46_spill] sm:$0xff] %v7887_v25  ;;  %v2318_v43 = vmul.f32 %v7385_v62, %v10677_v30  ;;  %v3014_v10 = vmul.f32 %v7547_v56, %v10678_v44  ;;  %v1978_v1 = vmul.f32 %v10639_v45, %v1920_v11  ;;  %v10680_v3 = vperm.slane %v10441_v40, 3 }
 0x618   : > { %v2932_v18 = vadd.f32 %v2900_v60, %v2818_v23  ;;  %v2432_v12 = vmul.f32 %v7201_v27, %v10679_v34  ;;  %v10681_v49 = vperm.slane %v10441_v40, 4  ;;  %v2034_v16 = vperm.slane %v10675_v5, 2 }
 0x619   : > { %v2350_v46 = vadd.f32 %v2318_v43, %v2236_v26  ;;  %v3128_v13 = vmul.f32 %v7261_v22, %v10680_v3  ;;  %v10682_v35 = vperm.slane %v10664_v2, 6  ;;  %v2010_v21 = vadd.f32 %v1978_v1, %v1864_v33 }
 0x61a   : > { %v3242_v15 = vmul.f32 %v7676_v42, %v10681_v49  ;;  %v3046_v60 = vadd.f32 %v3014_v10, %v2932_v18  ;;  %v2148_v23 = vperm.slane %v10675_v5, 3  ;;  %v10683_v43 = vperm.slane %v10664_v2, 7 }
 0x61b   : > { %v2464_v41 = vadd.f32 %v2432_v12, %v2350_v46  ;;  %v2546_v52 = vmul.f32 %v7475_v38, %v10682_v35  ;;  %v2092_v34 = vmul.f32 %v10671_v8, %v2034_v16  ;;  %v10684_v10 = vperm.slane %v10441_v40, 5 }
 0x61c   : > { %v3160_v26 = vadd.f32 %v3128_v13, %v3046_v60  ;;  %v2660_v44 = vmul.f32 %v7458_v47, %v10683_v43  ;;  %v10685_v46 = vperm.slane %v10626_v28, 7  ;;  %v10686_v12 = vperm.slane %v6468_v50, 0 }
 0x61d   : > { %v2578_v30 = vadd.f32 %v2546_v52, %v2464_v41  ;;  %v3356_v18 = vmul.f32 %v7616_v4, %v10684_v10  ;;  %v2262_v2 = vperm.slane %v10675_v5, 4  ;;  %v2124_v49 = vadd.f32 %v2092_v34, %v2010_v21 }
 0x61e   : > { %v3585_v33 = vmul.f32 %v7672_v54, %v10685_v46  ;;  %v2790_v1 = vmul.f32 %v10634_v17, %v10686_v12  ;;  %v3274_v3 = vadd.f32 %v3242_v15, %v3160_v26  ;;  %v2206_v60 = vmul.f32 %v10643_v61, %v2148_v23 }
 0x61f   : > { %v2692_v13 = vadd.f32 %v2660_v44, %v2578_v30  ;;  %v10687_v41 = vperm.slane %v10441_v40, 6  ;;  %v10688_v28 = vperm.slane %v10441_v40, 7  ;;  %v2320_v15 = vmul.f32 %v7385_v62, %v2262_v2 }
 0x620   : > { %v7940_v43 = vadd.f32 %v3585_v33, %v3503_v39  ;;  %v3388_v10 = vadd.f32 %v3356_v18, %v3274_v3  ;;  %v2238_v12 = vadd.f32 %v2206_v60, %v2124_v49  ;;  %v2376_v26 = vperm.slane %v10675_v5, 5 }
 0x621   : > { %v3470_v35 = vmul.f32 %v7566_v51, %v10687_v41  ;;  %v3584_v52 = vmul.f32 %v7734_v14, %v10688_v28  ;;  %v2822_v46 = vadd.f32 %v2790_v1, %v2692_v13  ;;  %v10690_v44 = vperm.slane %v6468_v50, 1 }
 0x622   : > { %10689 = vst [vmem:[#allocation50_spill] sm:$0xff] %v7940_v43  ;;  %v2352_v30 = vadd.f32 %v2320_v15, %v2238_v12  ;;  %v2434_v39 = vmul.f32 %v7201_v27, %v2376_v26  ;;  %v10692_v33 = vperm.slane %v6468_v50, 2  ;;  %v2490_v3 = vperm.slane %v10675_v5, 6 }
 0x623   : > { %v3502_v21 = vadd.f32 %v3470_v35, %v3388_v10  ;;  %v2904_v34 = vmul.f32 %v7625_v58, %v10690_v44  ;;  %v10693_v60 = vperm.slane %v6468_v50, 3 }
 0x624   : > { %v3018_v1 = vmul.f32 %v7547_v56, %v10692_v33  ;;  %v2466_v13 = vadd.f32 %v2434_v39, %v2352_v30  ;;  %v2548_v35 = vmul.f32 %v7475_v38, %v2490_v3  ;;  %v10695_v30 = vperm.slane %v6468_v50, 5 }
 0x625   : > { %v7949_v40 = vadd.f32 %v3584_v52, %v3502_v21  ;;  %v2936_v18 = vadd.f32 %v2904_v34, %v2822_v46  ;;  %v3132_v41 = vmul.f32 %v7261_v22, %v10693_v60  ;;  %v2604_v52 = vperm.slane %v10675_v5, 7  ;;  %v10696_v34 = vld [vmem:[#allocation15_spill] sm:$0xff] }
 0x626   : > { %v2580_v10 = vadd.f32 %v2548_v35, %v2466_v13  ;;  %v10694_v46 = vperm.slane %v6468_v50, 4  ;;  %v3360_v44 = vmul.f32 %v7616_v4, %v10695_v30  ;;  %v2718_v39 = vperm.slane %v10696_v34, 0 }
 0x627   : > { %10691 = vst [vmem:[#allocation45_spill] sm:$0xff] %v7949_v40  ;;  %v3050_v49 = vadd.f32 %v3018_v1, %v2936_v18  ;;  %v2662_v15 = vmul.f32 %v7458_v47, %v2604_v52  ;;  %v3474_v1 = vmul.f32 %v7566_v51, %v3417_v9  ;;  %v10273_v13 = vperm.slane %v10696_v34, 1 }
 0x628   : > { %v3246_v12 = vmul.f32 %v7676_v42, %v10694_v46  ;;  %v10271_v9 = vperm.slane %v10696_v34, 3  ;;  %v10267_v50 = vperm.slane %v10696_v34, 5  ;;  %v3667_v5 = vsel %vm3639_vm8, %v7949_v40, 0.0 }
 0x629   : > { %v3164_v28 = vadd.f32 %v3132_v41, %v3050_v49  ;;  %v2694_v18 = vadd.f32 %v2662_v15, %v2580_v10  ;;  %v2792_v49 = vmul.f32 %v10634_v17, %v2718_v39  ;;  %v10272_v41 = vperm.slane %v10696_v34, 2 }
 0x62a   : > { %v3588_v10 = vmul.f32 %v7734_v14, %v3531_v48  ;;  %v3134_v30 = vmul.f32 %v7261_v22, %v10271_v9 }
 0x62b   : > { %v3278_v21 = vadd.f32 %v3246_v12, %v3164_v28  ;;  %v2824_v35 = vadd.f32 %v2792_v49, %v2694_v18  ;;  %v2906_v28 = vmul.f32 %v7625_v58, %v10273_v13  ;;  %v3020_v12 = vmul.f32 %v7547_v56, %v10272_v41 }
 0x62c   : > { %v3362_v49 = vmul.f32 %v7616_v4, %v10267_v50 }
 0x62d   : > { %v3392_v33 = vadd.f32 %v3360_v44, %v3278_v21  ;;  %v2938_v46 = vadd.f32 %v2906_v28, %v2824_v35  ;;  %v10269_v44 = vperm.slane %v10696_v34, 4  ;;  %v10270_v28 = vperm.slane %v10696_v34, 7 }
 0x62f   : > { %v3506_v60 = vadd.f32 %v3474_v1, %v3392_v33  ;;  %v3052_v21 = vadd.f32 %v3020_v12, %v2938_v46  ;;  %v3248_v48 = vmul.f32 %v7676_v42, %v10269_v44  ;;  %v10268_v33 = vperm.slane %v10696_v34, 6 }
 0x630   : > { %v3590_v46 = vmul.f32 %v7734_v14, %v10270_v28  ;;  %v10702_v28 = vld [vmem:[#allocation27_spill] sm:$0xff] }
 0x631   : > { %v7993_v15 = vadd.f32 %v3588_v10, %v3506_v60  ;;  %v3166_v18 = vadd.f32 %v3134_v30, %v3052_v21  ;;  %v3476_v35 = vmul.f32 %v7566_v51, %v10268_v33  ;;  %v5185_v21 = vmov 32.0  }
 0x632   : > { %5037 = vrcp.f32 %v5185_v21  ;;  %v2091_v9 = vmul.f32 %v10702_v28, %v2034_v16  ;;  %v3661_v16 = vsel %vm3639_vm8, %v7838_v20, 0.0 }
 0x633   : > { %10697 = vst [vmem:[#allocation44_spill] sm:$0xff] %v7993_v15  ;;  %v3280_v1 = vadd.f32 %v3248_v48, %v3166_v18 }
 0x635   : > { %v3394_v60 = vadd.f32 %v3362_v49, %v3280_v1 }
 0x637   : > { %v3508_v10 = vadd.f32 %v3476_v35, %v3394_v60 }
 0x638   : > { %v5038_v30 = vpop.eup %5037 }
 0x639   : > { %v8014_v12 = vadd.f32 %v3590_v46, %v3508_v10  ;;  %v3737_v18 = vmul.f32 32.0, %v5038_v30  ;;  %vm3741_vm9 = vweird.f32 %v5038_v30  ;;  %v10700_v46 = vld [vmem:[#allocation25_spill] sm:$0xff] }
 0x63a   : > { %v1863_v21 = vmul.f32 %v10700_v46, %v1783_v32  ;;  %v10703_v32 = vld [vmem:[#allocation28_spill] sm:$0xff] }
 0x63b   : > { %10698 = vst [vmem:[#allocation37_spill] sm:$0xff] %v8014_v12  ;;  %v3738_v48 = vsub.f32 1.0, %v3737_v18 }
 0x63d   : > { %v3739_v50 = vmul.f32 %v5038_v30, %v3738_v48 }
 0x63f   : > { %v3740_v1 = vadd.f32 %v5038_v30, %v3739_v50  ;;  %v10701_v50 = vld [vmem:[#allocation24_spill] sm:$0xff] }
 0x641   : > { %v8016_v49 = vsel %vm3741_vm9, %v5038_v30, %v3740_v1  ;;  %v1977_v30 = vmul.f32 %v10701_v50, %v1920_v11 }
 0x664   : > { %v3642_v33 = vpop.xlane.xlu2 %3641  ;;  %v3648_v35 = vpop.xlane.xlu0 %3647 }
 0x665   : > { %v3743_v44 = vmul.f32 %v8016_v49, %v3642_v33  ;;  %v2009_v33 = vadd.f32 %v1977_v30, %v1863_v21  ;;  %v3745_v11 = vmul.f32 %v8016_v49, %v3648_v35 }
 0x667   : > { %v8020_v60 = vsub.f32 %v7699_v6, %v3743_v44  ;;  %v8054_v35 = vsub.f32 %v7697_v29, %v3745_v11  ;;  %v10709_v11 = vld [vmem:[#allocation29_spill] sm:$0xff] }
 0x669   : > { %10699 = vst [vmem:[#allocation36_spill] sm:$0xff] %v8020_v60  ;;  %v3807_v10 = vmul.f32 %v8020_v60, %v8020_v60  ;;  %v3809_v29 = vmul.f32 %v8054_v35, %v8054_v35 }
 0x66a   : > { %10706 = vst [vmem:[#allocation15_spill] sm:$0xff] %v8054_v35 }
 0x66b   : > { %v3839_v18 = vsel %vm3639_vm8, %v3807_v10, 0.0  ;;  %v2205_v10 = vmul.f32 %v10703_v32, %v2148_v23 }
 0x66c   : > { %3840 = vadd.xlane.f32.xlu2 %v3839_v18  ;;  %v2123_v18 = vadd.f32 %v2091_v9, %v2009_v33  ;;  %v10707_v9 = vld [vmem:[#allocation26_spill] sm:$0xff] }
 0x66d   : > { %v2319_v33 = vmul.f32 %v10707_v9, %v2262_v2  ;;  %v10710_v2 = vld [vmem:[#allocation30_spill] sm:$0xff] }
 0x66e   : > { %v2237_v23 = vadd.f32 %v2205_v10, %v2123_v18 }
 0x670   : > { %v3657_v30 = vpop.xlane.xlu0 %3656  ;;  %v2351_v10 = vadd.f32 %v2319_v33, %v2237_v23  ;;  %v10712_v33 = vld [vmem:[#allocation23_spill] sm:$0xff] }
 0x671   : > { %v3651_v48 = vpop.xlane.xlu2 %3650  ;;  %v3645_v44 = vpop.xlane.xlu1 %3644 }
 0x672   : > { %v3746_v6 = vmul.f32 %v8016_v49, %v3651_v48  ;;  %v3744_v1 = vmul.f32 %v8016_v49, %v3645_v44 }
 0x674   : > { %v8040_v41 = vsub.f32 %v7759_v36, %v3746_v6  ;;  %v8044_v21 = vsub.f32 %v7761_v24, %v3744_v1  ;;  %3662 = vadd.xlane.f32.xlu2 %v3661_v16  ;;  %v3748_v1 = vmul.f32 %v8016_v49, %v3657_v30  ;;  %v2547_v16 = vmul.f32 %v10710_v2, %v2490_v3 }
 0x675   : > { %v3664_v30 = vsel %vm3639_vm8, %v7782_v53, 0.0  ;;  %v10729_v53 = vld [vmem:[#allocation13_spill] sm:$0xff] }
 0x676   : > { %10704 = vst [vmem:[#allocation8_spill] sm:$0xff] %v8040_v41  ;;  %v3810_v48 = vmul.f32 %v8040_v41, %v8040_v41  ;;  %v3808_v44 = vmul.f32 %v8044_v21, %v8044_v21 }
 0x677   : > { %10705 = vst [vmem:[#allocation10_spill] sm:$0xff] %v8044_v21 }
 0x678   : > { %v3848_v36 = vsel %vm3639_vm8, %v3810_v48, 0.0  ;;  %v3842_v24 = vsel %vm3639_vm8, %v3808_v44, 0.0  ;;  %v2433_v48 = vmul.f32 %v10709_v11, %v2376_v26  ;;  %v8074_v44 = vsub.f32 %v7757_v59, %v3748_v1  ;;  %v3660_v23 = vpop.xlane.xlu0 %3659  ;;  %v10713_v1 = vld [vmem:[#allocation34_spill] sm:$0xff] }
 0x679   : > { %3849 = vadd.xlane.f32.xlu0 %v3848_v36  ;;  %3843 = vadd.xlane.f32.xlu1 %v3842_v24  ;;  %v3654_v6 = vpop.xlane.xlu1 %3653  ;;  %v3845_v26 = vsel %vm3639_vm8, %v3809_v29, 0.0  ;;  %v3749_v3 = vmul.f32 %v8016_v49, %v3660_v23 }
 0x67a   : > { %v3747_v13 = vmul.f32 %v8016_v49, %v3654_v6  ;;  %10711 = vst [vmem:[#allocation24_spill] sm:$0xff] %v8074_v44  ;;  %v3812_v59 = vmul.f32 %v8074_v44, %v8074_v44  ;;  %v2661_v6 = vmul.f32 %v10712_v33, %v2604_v52  ;;  %v10715_v52 = vperm.slane %v10696_v34, 1 }
 0x67c   : > { %v8063_v18 = vsub.f32 %v7716_v57, %v3747_v13  ;;  %v2465_v13 = vadd.f32 %v2433_v48, %v2351_v10  ;;  %3665 = vadd.xlane.f32.xlu2 %v3664_v30  ;;  %v2791_v10 = vmul.f32 %v10713_v1, %v2718_v39  ;;  %v8092_v30 = vsub.f32 %v7702_v19, %v3749_v3 }
 0x67d   : > { %v3854_v29 = vsel %vm3639_vm8, %v3812_v59, 0.0  ;;  %v10719_v3 = vperm.slane %v10696_v34, 3 }
 0x67e   : > { %10708 = vst [vmem:[#allocation25_spill] sm:$0xff] %v8063_v18  ;;  %v3811_v57 = vmul.f32 %v8063_v18, %v8063_v18  ;;  %v2579_v24 = vadd.f32 %v2547_v16, %v2465_v13  ;;  %v10716_v13 = vld [vmem:[#allocation33_spill] sm:$0xff]  ;;  %v3813_v19 = vmul.f32 %v8092_v30, %v8092_v30 }
 0x67f   : > { %10714 = vst [vmem:[#allocation27_spill] sm:$0xff] %v8092_v30  ;;  %v2905_v23 = vmul.f32 %v10716_v13, %v10715_v52  ;;  %v3133_v59 = vmul.f32 %v10655_v37, %v10719_v3  ;;  %v10721_v52 = vperm.slane %v10696_v34, 5 }
 0x680   : > { %v3851_v36 = vsel %vm3639_vm8, %v3811_v57, 0.0  ;;  %v2693_v48 = vadd.f32 %v2661_v6, %v2579_v24  ;;  %v3673_v57 = vsel %vm3639_vm8, %v7887_v25, 0.0  ;;  %v3857_v6 = vsel %vm3639_vm8, %v3813_v19, 0.0 }
 0x681   : > { %3852 = vadd.xlane.f32.xlu0 %v3851_v36  ;;  %3846 = vadd.xlane.f32.xlu1 %v3845_v26  ;;  %v10717_v36 = vperm.slane %v10696_v34, 2  ;;  %v10718_v26 = vld [vmem:[#allocation4_spill] sm:$0xff] }
 0x682   : > { %v2823_v16 = vadd.f32 %v2791_v10, %v2693_v48  ;;  %v3676_v48 = vsel %vm3639_vm8, %v7852_v63, 0.0 }
 0x683   : > { %v3019_v24 = vmul.f32 %v10718_v26, %v10717_v36 }
 0x684   : > { %3855 = vadd.xlane.f32.xlu2 %v3854_v29  ;;  %v2937_v39 = vadd.f32 %v2905_v23, %v2823_v16  ;;  %v3670_v29 = vsel %vm3639_vm8, %v7940_v43, 0.0  ;;  %v10720_v16 = vperm.slane %v10696_v34, 4  ;;  %v3361_v23 = vmul.f32 %v10647_v7, %v10721_v52 }
 0x686   : > { %v3051_v10 = vadd.f32 %v3019_v24, %v2937_v39  ;;  %v10722_v39 = vperm.slane %v10696_v34, 6  ;;  %v3679_v24 = vsel %vm3639_vm8, %v7993_v15, 0.0 }
 0x688   : > { %v3475_v36 = vmul.f32 %v7558_v31, %v10722_v39 }
 0x689   : > { %3674 = vadd.xlane.f32.xlu0 %v3673_v57  ;;  %3668 = vadd.xlane.f32.xlu1 %v3667_v5  ;;  %v3165_v57 = vadd.f32 %v3133_v59, %v3051_v10  ;;  %v3247_v5 = vmul.f32 %v10659_v55, %v10720_v16  ;;  %v10723_v59 = vperm.slane %v10696_v34, 7 }
 0x68b   : > { %v3279_v19 = vadd.f32 %v3247_v5, %v3165_v57  ;;  %v10725_v57 = vld [vmem:[#allocation20_spill] sm:$0xff] }
 0x68c   : > { %3858 = vadd.xlane.f32.xlu2 %v3857_v6  ;;  %v3589_v6 = vmul.f32 %v7672_v54, %v10723_v59  ;;  %v10277_v16 = vperm.slane %v10725_v57, 0  ;;  %v10276_v5 = vperm.slane %v10725_v57, 1  ;;  %v10274_v52 = vperm.slane %v10725_v57, 2 }
 0x68d   : > { %v3393_v3 = vadd.f32 %v3361_v23, %v3279_v19  ;;  %v10275_v19 = vperm.slane %v10725_v57, 3 }
 0x68e   : > { %v1872_v34 = vmul.f32 %v10637_v0, %v10277_v16  ;;  %v1986_v23 = vmul.f32 %v10639_v45, %v10276_v5  ;;  %v10726_v5 = vld [vmem:[#allocation12_spill] sm:$0xff] }
 0x68f   : > { %v3507_v10 = vadd.f32 %v3475_v36, %v3393_v3  ;;  %v2100_v36 = vmul.f32 %v10671_v8, %v10274_v52  ;;  %v2214_v59 = vmul.f32 %v10643_v61, %v10275_v19  ;;  %v2035_v44 = vperm.slane %v10726_v5, 2 }
 0x690   : > { %v2018_v39 = vadd.f32 %v1986_v23, %v1872_v34  ;;  %v10281_v34 = vperm.slane %v10725_v57, 6  ;;  %v2605_v60 = vperm.slane %v10726_v5, 7 }
 0x691   : > { %3677 = vadd.xlane.f32.xlu0 %v3676_v48  ;;  %3671 = vadd.xlane.f32.xlu1 %v3670_v29  ;;  %v8129_v48 = vadd.f32 %v3589_v6, %v3507_v10  ;;  %v10279_v6 = vperm.slane %v10725_v57, 5  ;;  %v2094_v25 = vmul.f32 %v10671_v8, %v2035_v44 }
 0x692   : > { %v2132_v3 = vadd.f32 %v2100_v36, %v2018_v39  ;;  %v10285_v39 = vperm.slane %v10725_v57, 7  ;;  %v2556_v19 = vmul.f32 %v7475_v38, %v10281_v34 }
 0x693   : > { %10724 = vst [vmem:[#allocation28_spill] sm:$0xff] %v8129_v48  ;;  %v3682_v29 = vsel %vm3639_vm8, %v8129_v48, 0.0  ;;  %v2442_v52 = vmul.f32 %v7201_v27, %v10279_v6  ;;  %v1921_v6 = vperm.slane %v10726_v5, 1 }
 0x694   : > { %3680 = vadd.xlane.f32.xlu2 %v3679_v24  ;;  %v10280_v24 = vperm.slane %v10725_v57, 4  ;;  %v2246_v10 = vadd.f32 %v2214_v59, %v2132_v3  ;;  %v1784_v3 = vperm.slane %v10726_v5, 0  ;;  %v10727_v59 = vld [vmem:[#allocation22_spill] sm:$0xff] }
 0x695   : > { %v10287_v16 = vperm.slane %v10727_v59, 0  ;;  %v10296_v35 = vperm.slane %v10727_v59, 2 }
 0x69c   : > { %3683 = vadd.xlane.f32.xlu2 %v3682_v29  ;;  %v2328_v29 = vmul.f32 %v7385_v62, %v10280_v24 }
 0x69e   : > { %v2360_v23 = vadd.f32 %v2328_v29, %v2246_v10  ;;  %v2670_v10 = vmul.f32 %v7458_v47, %v10285_v39  ;;  %v1865_v29 = vmul.f32 %v10700_v46, %v1784_v3  ;;  %v2093_v39 = vmul.f32 %v10702_v28, %v2035_v44 }
 0x69f   : > { %v10307_v44 = vperm.slane %v10727_v59, 4 }
 0x6a0   : > { %v2474_v36 = vadd.f32 %v2442_v52, %v2360_v23  ;;  %v2800_v52 = vmul.f32 %v10634_v17, %v10287_v16  ;;  %v1979_v23 = vmul.f32 %v10701_v50, %v1921_v6 }
 0x6a2   : > { %v2588_v30 = vadd.f32 %v2556_v19, %v2474_v36  ;;  %v2011_v18 = vadd.f32 %v1979_v23, %v1865_v29  ;;  %v2149_v19 = vperm.slane %v10726_v5, 3  ;;  %v10728_v36 = vld [vmem:[#allocation21_spill] sm:$0xff] }
 0x6a3   : > { %v10290_v48 = vperm.slane %v10728_v36, 0  ;;  %v10294_v16 = vperm.slane %v10728_v36, 1  ;;  %v10300_v43 = vperm.slane %v10728_v36, 2 }
 0x6a4   : > { %v2702_v24 = vadd.f32 %v2670_v10, %v2588_v30  ;;  %v2207_v41 = vmul.f32 %v10703_v32, %v2149_v19  ;;  %v1866_v30 = vmul.f32 %v10637_v0, %v1784_v3  ;;  %v2125_v29 = vadd.f32 %v2093_v39, %v2011_v18 }
 0x6a5   : > { %v1868_v10 = vmul.f32 %v10637_v0, %v10290_v48  ;;  %v1982_v23 = vmul.f32 %v10639_v45, %v10294_v16  ;;  %v2263_v48 = vperm.slane %v10726_v5, 4  ;;  %v10299_v18 = vperm.slane %v10727_v59, 3 }
 0x6a6   : > { %v2832_v34 = vadd.f32 %v2800_v52, %v2702_v24  ;;  %v10297_v24 = vperm.slane %v10727_v59, 1  ;;  %v1980_v52 = vmul.f32 %v10639_v45, %v1921_v6  ;;  %v2239_v15 = vadd.f32 %v2207_v41, %v2125_v29 }
 0x6a7   : > { %v2014_v21 = vadd.f32 %v1982_v23, %v1868_v10  ;;  %v3028_v39 = vmul.f32 %v7547_v56, %v10296_v35  ;;  %v2321_v16 = vmul.f32 %v10707_v9, %v2263_v48  ;;  %v2096_v41 = vmul.f32 %v10671_v8, %v10300_v43 }
 0x6a8   : > { %v2914_v3 = vmul.f32 %v7625_v58, %v10297_v24  ;;  %v2012_v63 = vadd.f32 %v1980_v52, %v1866_v30  ;;  %v3142_v30 = vmul.f32 %v7261_v22, %v10299_v18  ;;  %v2491_v52 = vperm.slane %v10726_v5, 6 }
 0x6a9   : > { %v2353_v10 = vadd.f32 %v2321_v16, %v2239_v15  ;;  %v2150_v35 = vperm.slane %v10728_v36, 3  ;;  %v10306_v15 = vperm.slane %v10727_v59, 5  ;;  %v10310_v16 = vperm.slane %v10728_v36, 4 }
 0x6aa   : > { %v2946_v6 = vadd.f32 %v2914_v3, %v2832_v34  ;;  %v2377_v34 = vperm.slane %v10726_v5, 5  ;;  %v2126_v23 = vadd.f32 %v2094_v25, %v2012_v63  ;;  %v2128_v3 = vadd.f32 %v2096_v41, %v2014_v21 }
 0x6ab   : > { %v2210_v18 = vmul.f32 %v10643_v61, %v2150_v35  ;;  %v3256_v63 = vmul.f32 %v7676_v42, %v10307_v44  ;;  %v2322_v20 = vmul.f32 %v7385_v62, %v2263_v48  ;;  %v10309_v5 = vperm.slane %v10728_v36, 5 }
 0x6ac   : > { %v3060_v29 = vadd.f32 %v3028_v39, %v2946_v6  ;;  %v2435_v40 = vmul.f32 %v10709_v11, %v2377_v34  ;;  %v2549_v6 = vmul.f32 %v10710_v2, %v2491_v52  ;;  %v2208_v39 = vmul.f32 %v10643_v61, %v2149_v19 }
 0x6ad   : > { %v2242_v41 = vadd.f32 %v2210_v18, %v2128_v3  ;;  %v3370_v19 = vmul.f32 %v7616_v4, %v10306_v15  ;;  %v2719_v61 = vperm.slane %v10729_v53, 0  ;;  %v2663_v18 = vmul.f32 %v10712_v33, %v2605_v60 }
 0x6ae   : > { %v3174_v24 = vadd.f32 %v3142_v30, %v3060_v29  ;;  %v2467_v25 = vadd.f32 %v2435_v40, %v2353_v10  ;;  %v2240_v21 = vadd.f32 %v2208_v39, %v2126_v23  ;;  %v10305_v29 = vperm.slane %v10727_v59, 6 }
 0x6af   : > { %v2324_v40 = vmul.f32 %v7385_v62, %v10310_v16  ;;  %v2793_v23 = vmul.f32 %v10713_v1, %v2719_v61  ;;  %v10308_v39 = vperm.slane %v10727_v59, 7  ;;  %v10738_v16 = vld [vmem:[#allocation16_spill] sm:$0xff] }
 0x6b0   : > { %v3288_v30 = vadd.f32 %v3256_v63, %v3174_v24  ;;  %v2581_v43 = vadd.f32 %v2549_v6, %v2467_v25  ;;  %v3484_v24 = vmul.f32 %v7566_v51, %v10305_v29  ;;  %v2354_v3 = vadd.f32 %v2322_v20, %v2240_v21 }
 0x6b1   : > { %v2356_v6 = vadd.f32 %v2324_v40, %v2242_v41  ;;  %v2436_v25 = vmul.f32 %v7201_v27, %v2377_v34  ;;  %v3598_v20 = vmul.f32 %v7734_v14, %v10308_v39  ;;  %v2849_v41 = vperm.slane %v10729_v53, 1 }
 0x6b2   : > { %v3402_v10 = vadd.f32 %v3370_v19, %v3288_v30  ;;  %v2695_v63 = vadd.f32 %v2663_v18, %v2581_v43  ;;  %v2438_v30 = vmul.f32 %v7201_v27, %v10309_v5  ;;  %v10730_v19 = vperm.slane %v10728_v36, 0 }
 0x6b3   : > { %v2468_v40 = vadd.f32 %v2436_v25, %v2354_v3  ;;  %v2492_v43 = vperm.slane %v10728_v36, 6  ;;  %v10731_v34 = vperm.slane %v10728_v36, 1  ;;  %v2907_v15 = vmul.f32 %v10716_v13, %v2849_v41 }
 0x6b4   : > { %v3516_v48 = vadd.f32 %v3484_v24, %v3402_v10  ;;  %v1867_v29 = vmul.f32 %v10700_v46, %v10730_v19  ;;  %v2825_v21 = vadd.f32 %v2793_v23, %v2695_v63  ;;  %v2470_v10 = vadd.f32 %v2438_v30, %v2356_v6 }
 0x6b5   : > { %v1981_v24 = vmul.f32 %v10701_v50, %v10731_v34  ;;  %v2550_v19 = vmul.f32 %v7475_v38, %v2491_v52  ;;  %v2552_v44 = vmul.f32 %v7475_v38, %v2492_v43  ;;  %v2963_v63 = vperm.slane %v10729_v53, 2 }
 0x6b6   : > { %v8251_v18 = vadd.f32 %v3598_v20, %v3516_v48  ;;  %v2939_v23 = vadd.f32 %v2907_v15, %v2825_v21  ;;  %v3077_v3 = vperm.slane %v10729_v53, 3  ;;  %v2606_v30 = vperm.slane %v10728_v36, 7  ;;  %v10734_v21 = vld [vmem:[#allocation14_spill] sm:$0xff] }
 0x6b7   : > { %v2013_v39 = vadd.f32 %v1981_v24, %v1867_v29  ;;  %v2582_v6 = vadd.f32 %v2550_v19, %v2468_v40  ;;  %v2584_v25 = vadd.f32 %v2552_v44, %v2470_v10  ;;  %v10733_v34 = vperm.slane %v10728_v36, 2 }
 0x6b8   : > { %10732 = vst [vmem:[#allocation26_spill] sm:$0xff] %v8251_v18  ;;  %v2209_v20 = vmul.f32 %v10703_v32, %v2150_v35  ;;  %v3021_v52 = vmul.f32 %v10718_v26, %v2963_v63  ;;  %v3135_v5 = vmul.f32 %v10655_v37, %v3077_v3  ;;  %v2664_v15 = vmul.f32 %v7458_v47, %v2605_v60 }
 0x6b9   : > { %v2095_v48 = vmul.f32 %v10702_v28, %v10733_v34  ;;  %v2666_v29 = vmul.f32 %v7458_v47, %v2606_v30  ;;  %v3191_v47 = vperm.slane %v10729_v53, 4  ;;  %v2794_v24 = vmul.f32 %v10634_v17, %v2719_v61 }
 0x6ba   : > { %v3053_v10 = vadd.f32 %v3021_v52, %v2939_v23  ;;  %v2696_v19 = vadd.f32 %v2664_v15, %v2582_v6  ;;  %v2908_v44 = vmul.f32 %v7625_v58, %v2849_v41  ;;  %v10735_v23 = vperm.slane %v10734_v21, 0 }
 0x6bb   : > { %v2127_v40 = vadd.f32 %v2095_v48, %v2013_v39  ;;  %v2698_v35 = vadd.f32 %v2666_v29, %v2584_v25  ;;  %v3305_v39 = vperm.slane %v10729_v53, 5  ;;  %v10736_v25 = vperm.slane %v10734_v21, 1 }
 0x6bc   : > { %v3167_v60 = vadd.f32 %v3135_v5, %v3053_v10  ;;  %v2796_v6 = vmul.f32 %v10634_v17, %v10735_v23  ;;  %v10737_v52 = vperm.slane %v10728_v36, 4  ;;  %v2826_v15 = vadd.f32 %v2794_v24, %v2696_v19 }
 0x6bd   : > { %v2241_v38 = vadd.f32 %v2209_v20, %v2127_v40  ;;  %v2910_v48 = vmul.f32 %v7625_v58, %v10736_v25  ;;  %v3249_v20 = vmul.f32 %v10659_v55, %v3191_v47  ;;  %v3363_v29 = vmul.f32 %v10647_v7, %v3305_v39 }
 0x6be   : > { %v2323_v5 = vmul.f32 %v10707_v9, %v10737_v52  ;;  %v3419_v40 = vperm.slane %v10729_v53, 6  ;;  %v2828_v10 = vadd.f32 %v2796_v6, %v2698_v35  ;;  %v2940_v18 = vadd.f32 %v2908_v44, %v2826_v15 }
 0x6bf   : > { %v3281_v59 = vadd.f32 %v3249_v20, %v3167_v60  ;;  %v1786_v34 = vperm.slane %v10738_v16, 0  ;;  %v3136_v52 = vmul.f32 %v7261_v22, %v3077_v3  ;;  %v10739_v24 = vperm.slane %v10728_v36, 5 }
 0x6c0   : > { %v2355_v23 = vadd.f32 %v2323_v5, %v2241_v38  ;;  %v2942_v58 = vadd.f32 %v2910_v48, %v2828_v10  ;;  %v2551_v41 = vmul.f32 %v10710_v2, %v2492_v43  ;;  %v3022_v61 = vmul.f32 %v7547_v56, %v2963_v63 }
 0x6c1   : > { %v2437_v19 = vmul.f32 %v10709_v11, %v10739_v24  ;;  %v10740_v35 = vperm.slane %v10734_v21, 3  ;;  %v2665_v60 = vmul.f32 %v10712_v33, %v2606_v30  ;;  %v1869_v44 = vmul.f32 %v10700_v46, %v1786_v34 }
 0x6c2   : > { %v3395_v6 = vadd.f32 %v3363_v29, %v3281_v59  ;;  %v10741_v3 = vperm.slane %v10734_v21, 2  ;;  %v1923_v5 = vperm.slane %v10738_v16, 1  ;;  %v3054_v20 = vadd.f32 %v3022_v61, %v2940_v18 }
 0x6c3   : > { %v3138_v38 = vmul.f32 %v7261_v22, %v10740_v35  ;;  %v2469_v36 = vadd.f32 %v2437_v19, %v2355_v23  ;;  %v10321_v59 = vperm.slane %v10738_v16, 7  ;;  %v3250_v29 = vmul.f32 %v7676_v42, %v3191_v47  ;;  %v10744_v47 = vld [vmem:[#allocation18_spill] sm:$0xff] }
 0x6c4   : > { %v3024_v48 = vmul.f32 %v7547_v56, %v10741_v3  ;;  %v3478_v35 = vmul.f32 %v7566_v51, %v3419_v40  ;;  %v10742_v23 = vperm.slane %v10734_v21, 6  ;;  %v10743_v19 = vperm.slane %v10734_v21, 4 }
 0x6c5   : > { %v2583_v24 = vadd.f32 %v2551_v41, %v2469_v36  ;;  %v8326_v41 = vmul.f32 %v10712_v33, %v10321_v59  ;;  %v3168_v36 = vadd.f32 %v3136_v52, %v3054_v20  ;;  %v10745_v52 = vperm.slane %v10725_v57, 0 }
 0x6c6   : > { %v3056_v10 = vadd.f32 %v3024_v48, %v2942_v58  ;;  %v3480_v18 = vmul.f32 %v7566_v51, %v10742_v23  ;;  %v3252_v3 = vmul.f32 %v7676_v42, %v10743_v19  ;;  %v1983_v58 = vmul.f32 %v10701_v50, %v1923_v5 }
 0x6c7   : > { %v8332_v25 = vadd.f32 %v2665_v60, %v2583_v24  ;;  %v3477_v51 = vmul.f32 %v7558_v31, %v3419_v40  ;;  %v3282_v59 = vadd.f32 %v3250_v29, %v3168_v36  ;;  %v1871_v20 = vmul.f32 %v10700_v46, %v10745_v52 }
 0x6c8   : > { %v3170_v15 = vadd.f32 %v3138_v38, %v3056_v10  ;;  %v2015_v19 = vadd.f32 %v1983_v58, %v1869_v44  ;;  %v10746_v38 = vperm.slane %v10738_v16, 2  ;;  %v10747_v44 = vperm.slane %v10738_v16, 3 }
 0x6c9   : > { %v3364_v40 = vmul.f32 %v7616_v4, %v3305_v39  ;;  %v10748_v58 = vperm.slane %v10725_v57, 1  ;;  %v10750_v52 = vperm.slane %v10734_v21, 5  ;;  %v3509_v39 = vadd.f32 %v3477_v51, %v3395_v6 }
 0x6ca   : > { %v3284_v30 = vadd.f32 %v3252_v3, %v3170_v15  ;;  %v2097_v60 = vmul.f32 %v10702_v28, %v10746_v38  ;;  %v2211_v10 = vmul.f32 %v10703_v32, %v10747_v44  ;;  %v10749_v15 = vperm.slane %v10729_v53, 7 }
 0x6cb   : > { %v1985_v36 = vmul.f32 %v10701_v50, %v10748_v58  ;;  %v3366_v38 = vmul.f32 %v7616_v4, %v10750_v52  ;;  %v3396_v42 = vadd.f32 %v3364_v40, %v3282_v59  ;;  %v1870_v24 = vmul.f32 %v10637_v0, %v1786_v34 }
 0x6cc   : > { %v3591_v3 = vmul.f32 %v7672_v54, %v10749_v15  ;;  %v2129_v44 = vadd.f32 %v2097_v60, %v2015_v19  ;;  %v3592_v48 = vmul.f32 %v7734_v14, %v10749_v15  ;;  %v1984_v19 = vmul.f32 %v10639_v45, %v1923_v5 }
 0x6cd   : > { %v2017_v29 = vadd.f32 %v1985_v36, %v1871_v20  ;;  %v3398_v63 = vadd.f32 %v3366_v38, %v3284_v30  ;;  %v10752_v51 = vperm.slane %v10725_v57, 2  ;;  %v10753_v6 = vperm.slane %v10725_v57, 3 }
 0x6ce   : > { %v2243_v58 = vadd.f32 %v2211_v10, %v2129_v44  ;;  %v8380_v59 = vsel %vm3639_vm8, %v8014_v12, 0.0  ;;  %v8382_v20 = vadd.f32 %v3591_v3, %v3509_v39  ;;  %v10755_v53 = vperm.slane %v10738_v16, 4 }
 0x6cf   : > { %v2099_v34 = vmul.f32 %v10702_v28, %v10752_v51  ;;  %v2213_v30 = vmul.f32 %v10703_v32, %v10753_v6  ;;  %v10756_v5 = vperm.slane %v10725_v57, 4  ;;  %v3510_v36 = vadd.f32 %v3478_v35, %v3396_v42 }
 0x6d0   : > { %10754 = vst [vmem:[#allocation29_spill] sm:$0xff] %v8382_v20  ;;  %v2325_v60 = vmul.f32 %v10707_v9, %v10755_v53  ;;  %v10757_v52 = vperm.slane %v10734_v21, 7  ;;  %v2016_v44 = vadd.f32 %v1984_v19, %v1870_v24  ;;  %v3512_v39 = vadd.f32 %v3480_v18, %v3398_v63  ;;  %v10761_v19 = vld [vmem:[#allocation6_spill] sm:$0xff] }
 0x6d1   : > { %v2327_v10 = vmul.f32 %v10707_v9, %v10756_v5  ;;  %v10758_v6 = vperm.slane %v10738_v16, 5  ;;  %v8398_v45 = vadd.f32 %v3592_v48, %v3510_v36  ;;  %v10760_v42 = vperm.slane %v10738_v16, 2 }
 0x6d2   : > { %v3594_v38 = vmul.f32 %v7734_v14, %v10757_v52  ;;  %v2357_v51 = vadd.f32 %v2325_v60, %v2243_v58  ;;  %v10763_v18 = vperm.slane %v10734_v21, 0  ;;  %v10764_v60 = vperm.slane %v10738_v16, 6 }
 0x6d3   : > { %v2439_v53 = vmul.f32 %v10709_v11, %v10758_v6  ;;  %10759 = vst [vmem:[#allocation30_spill] sm:$0xff] %v8398_v45  ;;  %v2098_v35 = vmul.f32 %v10671_v8, %v10760_v42  ;;  %v10782_v8 = vld [vmem:[#allocation49_spill] sm:$0xff] }
 0x6d4   : > { %v2795_v58 = vmul.f32 %v10713_v1, %v10763_v18  ;;  %v2553_v48 = vmul.f32 %v10710_v2, %v10764_v60 }
 0x6d5   : > { %v2130_v52 = vadd.f32 %v2098_v35, %v2016_v44 }
 0x6d6   : > { %v2827_v35 = vadd.f32 %v2795_v58, %v8332_v25  ;;  %v10771_v58 = vperm.slane %v10734_v21, 2 }
 0x6df   : > { %v3841_v43 = vpop.xlane.xlu2 %3840 }
 0x6e0   : > { %v3935_v23 = vmul.f32 %v3841_v43, %v8016_v49 }
 0x6e2   : > { %v8353_v43 = vadd.f32 1e-05, %v3935_v23  ;;  %v10751_v23 = vperm.slane %v10725_v57, 7 }
 0x6e4   : > { %5039 = vrsqrt.f32 %v8353_v43  ;;  %v8366_v61 = vmul.f32 %v10712_v33, %v10751_v23  ;;  %v2131_v23 = vadd.f32 %v2099_v34, %v2017_v29  ;;  %vm4005_vm11 = vweird.f32 %v8353_v43 }
 0x6e6   : > { %v2245_v24 = vadd.f32 %v2213_v30, %v2131_v23  ;;  %v8419_v30 = vadd.f32 %v3594_v38, %v3512_v39 }
 0x6e7   : > { %v3663_v40 = vpop.xlane.xlu2 %3662 }
 0x6e8   : > { %v3750_v15 = vmul.f32 %v8016_v49, %v3663_v40  ;;  %10765 = vst [vmem:[#allocation34_spill] sm:$0xff] %v8419_v30  ;;  %v2359_v39 = vadd.f32 %v2327_v10, %v2245_v24  ;;  %v10769_v24 = vperm.slane %v10725_v57, 6 }
 0x6ea   : > { %v8403_v29 = vpop.eup %5039  ;;  %v8406_v34 = vsub.f32 %v10761_v19, %v3750_v15  ;;  %v2471_v15 = vadd.f32 %v2439_v53, %v2357_v51  ;;  %v10768_v19 = vld [vmem:[#allocation40_spill] sm:$0xff]  ;;  %v4438_v53 = vld [vmem:[%s10168_s5 + $0x18] sm:$0xff] }
 0x6eb   : > { %v4000_v40 = vmul.f32 %v8403_v29, %v8353_v43  ;;  %v4437_v51 = vld [vmem:[%s10168_s5 + $0x10] sm:$0xff]  ;;  %vm4006_vm10 = vweird.f32 %v8403_v29 }
 0x6ec   : > { %v3850_v3 = vpop.xlane.xlu0 %3849  ;;  %v3844_v12 = vpop.xlane.xlu1 %3843  ;;  %10762 = vst [vmem:[#allocation23_spill] sm:$0xff] %v8406_v34  ;;  %vm8515_vm12 = vmor %vm4005_vm11, %vm4006_vm10 }
 0x6ed   : > { %v3938_v5 = vmul.f32 %v3850_v3, %v8016_v49  ;;  %v3936_v63 = vmul.f32 %v3844_v12, %v8016_v49  ;;  %v3814_v12 = vmul.f32 %v8406_v34, %v8406_v34  ;;  %v10766_v3 = vperm.slane %v10725_v57, 5 }
 0x6ee   : > { %v4001_v42 = vmul.f32 %v8403_v29, %v4000_v40  ;;  %v4440_v40 = vpack.c.bf16 %v4438_v53, %v4437_v51  ;;  %v10770_v34 = vperm.slane %v10734_v21, 1  ;;  %v8458_v57 = vsel %vm3639_vm8, %v8398_v45, 0.0  ;;  %v10773_v53 = vld [vmem:[#allocation48_spill] sm:$0xff] }
 0x6ef   : > { %v8417_v36 = vadd.f32 1e-05, %v3938_v5  ;;  %v8421_v23 = vadd.f32 1e-05, %v3936_v63  ;;  %v2441_v6 = vmul.f32 %v10709_v11, %v10766_v3  ;;  %v10767_v5 = vperm.slane %v10738_v16, 3  ;;  %v3666_v60 = vpop.xlane.xlu2 %3665 }
 0x6f0   : > { %v3860_v44 = vsel %vm3639_vm8, %v3814_v12, 0.0  ;;  %v2585_v63 = vadd.f32 %v2553_v48, %v2471_v15  ;;  %v4002_v18 = vmul.f32 0.5, %v4001_v42  ;;  %v2555_v12 = vmul.f32 %v10710_v2, %v10769_v24  ;;  %4497 = vmatpush.bf16.msra.mxu2 %v4440_v40  ;;  %4888 = vmatpush.bf16.msra.mxu3 %v4440_v40 }
 0x6f1   : > { %5041 = vrsqrt.f32 %v8417_v36  ;;  %v2212_v38 = vmul.f32 %v10768_v19, %v10767_v5  ;;  %3861 = vadd.xlane.f32.xlu1 %v3860_v44  ;;  %v3751_v3 = vmul.f32 %v8016_v49, %v3666_v60  ;;  %v8448_v5 = vsel %vm3639_vm8, %v8382_v20, 0.0 }
 0x6f2   : > { %5043 = vrsqrt.f32 %v8421_v23  ;;  %v2909_v25 = vmul.f32 %v10716_v13, %v10770_v34  ;;  %v3023_v48 = vmul.f32 %v10718_v26, %v10771_v58  ;;  %v4003_v15 = vsub.f32 1.5, %v4002_v18 }
 0x6f3   : > { %v2244_v10 = vadd.f32 %v2212_v38, %v2130_v52  ;;  %v10772_v38 = vperm.slane %v10738_v16, 4  ;;  %v2473_v51 = vadd.f32 %v2441_v6, %v2359_v39  ;;  %v8464_v34 = vsub.f32 %v10773_v53, %v3751_v3 }
 0x6f4   : > { %v3847_v52 = vpop.xlane.xlu1 %3846  ;;  %v3853_v42 = vpop.xlane.xlu0 %3852  ;;  %v8469_v18 = vsel %vm3639_vm8, %v8419_v30, 0.0  ;;  %v2941_v24 = vadd.f32 %v2909_v25, %v2827_v35  ;;  %v10775_v45 = vperm.slane %v10734_v21, 3  ;;  %v10777_v25 = vperm.slane %v10738_v16, 5 }
 0x6f5   : > { %v2326_v44 = vmul.f32 %v7385_v62, %v10772_v38  ;;  %10774 = vst [vmem:[#allocation33_spill] sm:$0xff] %v8464_v34  ;;  %v3937_v60 = vmul.f32 %v3847_v52, %v8016_v49  ;;  %v2699_v38 = vadd.f32 %v8326_v41, %v2585_v63  ;;  %v8477_v39 = vadd.f32 %v2555_v12, %v2473_v51 }
 0x6f6   : > { %v3137_v20 = vmul.f32 %v10655_v37, %v10775_v45  ;;  %v10776_v52 = vperm.slane %v10744_v47, 0  ;;  %v2440_v53 = vmul.f32 %v7201_v27, %v10777_v25  ;;  %v4004_v45 = vmul.f32 %v8403_v29, %v4003_v15  ;;  %v4436_v15 = vld [vmem:[%s10168_s5 + $0x8] sm:$0xff] }
 0x6f7   : > { %v8471_v58 = vpop.eup %5041  ;;  %v2358_v6 = vadd.f32 %v2326_v44, %v2244_v10  ;;  %v8482_v3 = vadd.f32 1e-05, %v3937_v60  ;;  %v3939_v63 = vmul.f32 %v3853_v42, %v8016_v49  ;;  %v3815_v10 = vmul.f32 %v8464_v34, %v8464_v34  ;;  %v4435_v44 = vld [vmem:[%s10168_s5] sm:$0xff]  ;;  %v3856_v34 = vpop.xlane.xlu2 %3855 }
 0x6f8   : > { %v8479_v40 = vpop.eup %5043  ;;  %v2797_v35 = vmul.f32 %v10713_v1, %v10776_v52  ;;  %v4030_v12 = vmul.f32 %v8471_v58, %v8417_v36  ;;  %v3055_v51 = vadd.f32 %v3023_v48, %v2941_v24  ;;  %v10778_v60 = vperm.slane %v10734_v21, 4 }
 0x6f9   : > { %v4010_v41 = vmul.f32 %v8479_v40, %v8421_v23  ;;  %5045 = vrsqrt.f32 %v8482_v3  ;;  %v3863_v25 = vsel %vm3639_vm8, %v3815_v10, 0.0  ;;  %v2472_v30 = vadd.f32 %v2440_v53, %v2358_v6 }
 0x6fa   : > { %v8508_v42 = vmul.f32 %v10659_v55, %v10778_v60  ;;  %3864 = vadd.xlane.f32.xlu1 %v3863_v25  ;;  %v3940_v48 = vmul.f32 %v3856_v34, %v8016_v49  ;;  %v4439_v24 = vpack.c.bf16 %v4436_v15, %v4435_v44  ;;  %v8520_v60 = vadd.f32 %v3137_v20, %v3055_v51  ;;  %v10786_v15 = vld [vmem:[#allocation45_spill] sm:$0xff] }
 0x6fb   : > { %v4011_v52 = vmul.f32 %v8479_v40, %v4010_v41  ;;  %v2829_v62 = vadd.f32 %v2797_v35, %v2699_v38  ;;  %v4008_v43 = vsel %vm8515_vm12, %v8403_v29, %v4004_v45  ;;  %v8525_v10 = vadd.f32 1e-05, %v3939_v63  ;;  %v10784_v45 = vld [vmem:[#allocation47_spill] sm:$0xff] }
 0x6fc   : > { %v3669_v6 = vpop.xlane.xlu1 %3668  ;;  %v3675_v53 = vpop.xlane.xlu0 %3674  ;;  %v10781_v19 = vperm.slane %v10738_v16, 6  ;;  %v4031_v25 = vmul.f32 %v8471_v58, %v4030_v12  ;;  %v8532_v20 = vadd.f32 1e-05, %v3940_v48  ;;  %4498 = vmatpush.bf16.msra.mxu2 %v4439_v24  ;;  %4889 = vmatpush.bf16.msra.mxu3 %v4439_v24  ;;  %vm4016_vm13 = vweird.f32 %v8479_v40  ;;  %v8557_v48 = vld [vmem:[%s10167_s4] ss:$0 sm:$0xff] }
 0x6fd   : > { %v4012_v41 = vmul.f32 0.5, %v4011_v52  ;;  %v3752_v34 = vmul.f32 %v8016_v49, %v3669_v6  ;;  %v3754_v38 = vmul.f32 %v8016_v49, %v3675_v53  ;;  %v10783_v35 = vperm.slane %v10738_v16, 7  ;;  %v10788_v16 = vld [vmem:[#allocation46_spill] sm:$0xff] }
 0x6fe   : > { %v2554_v0 = vmul.f32 %v10782_v8, %v10781_v19  ;;  %v10785_v19 = vld [vmem:[#allocation36_spill] sm:$0xff]  ;;  %vm4015_vm14 = vweird.f32 %v8421_v23  ;;  %5047 = vrsqrt.f32 %v8532_v20  ;;  %v4032_v23 = vmul.f32 0.5, %v4031_v25 }
 0x6ff   : > { %v4013_v27 = vsub.f32 1.5, %v4012_v41  ;;  %v2668_v63 = vmul.f32 %v10784_v45, %v10783_v35  ;;  %v8539_v44 = vpop.eup %5045  ;;  %v4319_v12 = vmul.f32 %v4008_v43, %v10785_v19  ;;  %v8544_v51 = vsub.f32 %v10786_v15, %v3752_v34  ;;  %vm4017_vm15 = vmor %vm4015_vm14, %vm4016_vm13  ;;  %v10792_v19 = vld [vmem:[#allocation10_spill] sm:$0xff] }
 0x700   : > { %v2586_v29 = vadd.f32 %v2554_v0, %v2472_v30  ;;  %v4020_v0 = vmul.f32 %v8539_v44, %v8482_v3  ;;  %5049 = vrsqrt.f32 %v8525_v10  ;;  %v8552_v30 = vsub.f32 %v10788_v16, %v3754_v38 }
 0x701   : > { %10787 = vst [vmem:[#allocation4_spill] sm:$0xff] %v8544_v51  ;;  %v4014_v52 = vmul.f32 %v8479_v40, %v4013_v27  ;;  %v3816_v24 = vmul.f32 %v8544_v51, %v8544_v51  ;;  %v10790_v43 = vperm.slane %v10744_v47, 1  ;;  %v10791_v6 = vperm.slane %v10744_v47, 2  ;;  %v8569_v27 = vpop.xlane.xlu2 %3858 }
 0x702   : > { %10789 = vst [vmem:[#allocation20_spill] sm:$0xff] %v8552_v30  ;;  %v4021_v38 = vmul.f32 %v8539_v44, %v4020_v0  ;;  %v3818_v25 = vmul.f32 %v8552_v30, %v8552_v30  ;;  %v2700_v35 = vadd.f32 %v2668_v63, %v2586_v29  ;;  %3686 = vadd.xlane.f32.xlu1 %v8380_v59  ;;  %v8584_v29 = vld [vmem:[%s10167_s4 + $0x1] ss:$0 sm:$0xff]  ;;  %v10794_v59 = vperm.slane %v10744_v47, 0 }
 0x703   : > { %v2911_v41 = vmul.f32 %v10716_v13, %v10790_v43  ;;  %v3025_v53 = vmul.f32 %v10718_v26, %v10791_v6  ;;  %v4018_v34 = vsel %vm4017_vm15, %v8479_v40, %v4014_v52  ;;  %v3866_v16 = vsel %vm3639_vm8, %v3816_v24, 0.0 }
 0x704   : > { %v4320_v15 = vmul.f32 %v4018_v34, %v10792_v19  ;;  %v10793_v43 = vperm.slane %v10734_v21, 5  ;;  %v4022_v40 = vmul.f32 0.5, %v4021_v38  ;;  %3867 = vadd.xlane.f32.xlu0 %v3866_v16  ;;  %v3672_v52 = vpop.xlane.xlu1 %3671  ;;  %v3872_v0 = vsel %vm3639_vm8, %v3818_v25, 0.0  ;;  %v3678_v45 = vpop.xlane.xlu0 %3677 }
 0x705   : > { %v2943_v51 = vadd.f32 %v2911_v41, %v2829_v62  ;;  %v4353_v30 = vmul.f32 %v8557_v48, %v4319_v12  ;;  %v2798_v63 = vmul.f32 %v10634_v17, %v10794_v59  ;;  %v8589_v24 = vpop.eup %5047  ;;  %v4033_v62 = vsub.f32 1.5, %v4032_v23  ;;  %3873 = vadd.xlane.f32.xlu2 %v3872_v0  ;;  %v10797_v17 = vld [vmem:[#allocation54_spill] sm:$0xff] }
 0x706   : > { %v3365_v6 = vmul.f32 %v10647_v7, %v10793_v43  ;;  %v3753_v41 = vmul.f32 %v8016_v49, %v3672_v52  ;;  %v3755_v34 = vmul.f32 %v8016_v49, %v3678_v45  ;;  %v10795_v38 = vperm.slane %v10744_v47, 3  ;;  %v8596_v25 = vpop.eup %5049  ;;  %v10798_v23 = vld [vmem:[#allocation50_spill] sm:$0xff] }
 0x707   : > { %v4023_v19 = vsub.f32 1.5, %v4022_v40  ;;  %v4354_v16 = vmul.f32 %v8557_v48, %v4320_v15  ;;  %v2830_v43 = vadd.f32 %v2798_v63, %v2700_v35  ;;  %v10796_v59 = vperm.slane %v10744_v47, 1  ;;  %v10800_v40 = vld [vmem:[#allocation41_spill] sm:$0xff] }
 0x708   : > { %v3139_v12 = vmul.f32 %v10655_v37, %v10795_v38  ;;  %vm4036_vm0 = vweird.f32 %v8471_v58  ;;  %vm4026_vm1 = vweird.f32 %v8539_v44  ;;  %v4050_v45 = vmul.f32 %v8589_v24, %v8532_v20 }
 0x709   : > { %v2912_v8 = vmul.f32 %v10797_v17, %v10796_v59  ;;  %v8607_v52 = vsub.f32 %v10798_v23, %v3753_v41  ;;  %v4024_v0 = vmul.f32 %v8539_v44, %v4023_v19  ;;  %v8611_v38 = vsub.f32 %v10800_v40, %v3755_v34 }
 0x70a   : > { %v4387_v35 = vadd.f32 %v8584_v29, %v4353_v30  ;;  %v4388_v15 = vadd.f32 %v8584_v29, %v4354_v16  ;;  %v4034_v63 = vmul.f32 %v8471_v58, %v4033_v62  ;;  %vm4025_vm2 = vweird.f32 %v8482_v3  ;;  %v3681_v30 = vpop.xlane.xlu2 %3680  ;;  %3689 = vadd.xlane.f32.xlu1 %v8448_v5 }
 0x70b   : > { %10799 = vst [vmem:[#allocation12_spill] sm:$0xff] %v8607_v52  ;;  %v4040_v59 = vmul.f32 %v8596_v25, %v8525_v10  ;;  %v3817_v41 = vmul.f32 %v8607_v52, %v8607_v52  ;;  %vm4035_vm3 = vweird.f32 %v8417_v36  ;;  %vm8622_vm4 = vmor %vm4025_vm2, %vm4026_vm1  ;;  %v3819_v16 = vmul.f32 %v8611_v38, %v8611_v38 }
 0x70c   : > { %10801 = vst [vmem:[#allocation21_spill] sm:$0xff] %v8611_v38  ;;  %v4419_v34 = vpack.c.bf16 %v4388_v15, %v4387_v35  ;;  %v2944_v62 = vadd.f32 %v2912_v8, %v2830_v43  ;;  %v4028_v3 = vsel %vm8622_vm4, %v8539_v44, %v4024_v0  ;;  %v4051_v23 = vmul.f32 %v8589_v24, %v4050_v45  ;;  %vm8637_vm5 = vmor %vm4035_vm3, %vm4036_vm0  ;;  %v10813_v35 = vld [vmem:[#allocation8_spill] sm:$0xff] }
 0x70d   : > { %v3869_v36 = vsel %vm3639_vm8, %v3817_v41, 0.0  ;;  %v3756_v40 = vmul.f32 %v8016_v49, %v3681_v30  ;;  %v3875_v8 = vsel %vm3639_vm8, %v3819_v16, 0.0  ;;  %v3283_v44 = vadd.f32 %v8508_v42, %v8520_v60  ;;  %v10807_v41 = vld [vmem:[#allocation44_spill] sm:$0xff]  ;;  %v10811_v42 = vld [vmem:[#allocation15_spill] sm:$0xff] }
 0x70e   : > { %4836 = vmatmul.msk.bf16.vlgmr.msra.gmra.mxu2 %vm3639_vm8, %v4419_v34  ;;  %3870 = vadd.xlane.f32.xlu0 %v3869_v36  ;;  %v3057_v43 = vadd.f32 %v3025_v53, %v2943_v51  ;;  %v10806_v5 = vperm.slane %v10744_v47, 2  ;;  %v4038_v0 = vsel %vm8637_vm5, %v8471_v58, %v4034_v63  ;;  %v4041_v15 = vmul.f32 %v8596_v25, %v4040_v59  ;;  %v10809_v34 = vld [vmem:[#allocation22_spill] sm:$0xff] }
 0x70f   : > { %v8653_v19 = vsub.f32 %v10807_v41, %v3756_v40  ;;  %3876 = vadd.xlane.f32.xlu2 %v3875_v8  ;;  %v10810_v30 = vperm.slane %v10809_v34, 0  ;;  %v4321_v60 = vmul.f32 %v4028_v3, %v10811_v42  ;;  %v2701_v36 = vadd.f32 %v8366_v61, %v8477_v39  ;;  %v10817_v39 = vld [vmem:[#allocation56_spill] sm:$0xff] }
 0x710   : > { %v3026_v45 = vmul.f32 %v7547_v56, %v10806_v5  ;;  %v3171_v51 = vadd.f32 %v3139_v12, %v3057_v43  ;;  %v4052_v5 = vmul.f32 0.5, %v4051_v23  ;;  %v3397_v63 = vadd.f32 %v3365_v6, %v3283_v44 }
 0x711   : > { %10808 = vst [vmem:[#allocation13_spill] sm:$0xff] %v8653_v19  ;;  %v2799_v16 = vmul.f32 %v10713_v1, %v10810_v30  ;;  %v3820_v58 = vmul.f32 %v8653_v19, %v8653_v19  ;;  %v10812_v59 = vperm.slane %v10744_v47, 3  ;;  %v4322_v8 = vmul.f32 %v4038_v0, %v10813_v35 }
 0x712   : > { %v3058_v53 = vadd.f32 %v3026_v45, %v2944_v62  ;;  %v10814_v41 = vperm.slane %v10744_v47, 4  ;;  %v10815_v12 = vperm.slane %v10744_v47, 5  ;;  %v4042_v43 = vmul.f32 0.5, %v4041_v15  ;;  %v3684_v30 = vpop.xlane.xlu2 %3683 }
 0x713   : > { %v3140_v40 = vmul.f32 %v7261_v22, %v10812_v59  ;;  %v3878_v6 = vsel %vm3639_vm8, %v3820_v58, 0.0  ;;  %v10818_v44 = vperm.slane %v10734_v21, 6  ;;  %v2831_v0 = vadd.f32 %v2799_v16, %v2701_v36 }
 0x714   : > { %v3253_v3 = vmul.f32 %v10659_v55, %v10814_v41  ;;  %v3367_v62 = vmul.f32 %v10647_v7, %v10815_v12  ;;  %v10816_v61 = vmov %v10814_v41  ;;  %v4355_v42 = vmul.f32 %v8557_v48, %v4321_v60  ;;  %3879 = vadd.xlane.f32.xlu1 %v3878_v6 }
 0x715   : > { %v3254_v23 = vmul.f32 %v10817_v39, %v10816_v61  ;;  %v3479_v45 = vmul.f32 %v7558_v31, %v10818_v44  ;;  %v10819_v35 = vperm.slane %v10744_v47, 6  ;;  %v3172_v12 = vadd.f32 %v3140_v40, %v3058_v53 }
 0x716   : > { %v3285_v59 = vadd.f32 %v3253_v3, %v3171_v51  ;;  %v4053_v38 = vsub.f32 1.5, %v4052_v5  ;;  %v3757_v15 = vmul.f32 %v8016_v49, %v3684_v30  ;;  %v10820_v58 = vperm.slane %v10734_v21, 7  ;;  %3692 = vadd.xlane.f32.xlu0 %v8458_v57  ;;  %v10823_v3 = vld [vmem:[#allocation28_spill] sm:$0xff] }
 0x717   : > { %v3481_v41 = vmul.f32 %v7558_v31, %v10819_v35  ;;  %v10821_v44 = vperm.slane %v10809_v34, 1  ;;  %v4356_v60 = vmul.f32 %v8557_v48, %v4322_v8  ;;  %v10822_v36 = vperm.slane %v10744_v47, 7  ;;  %3698 = vadd.xlane.f32.xlu2 %v8469_v18 }
 0x718   : > { %v3593_v61 = vmul.f32 %v7672_v54, %v10820_v58  ;;  %v3399_v51 = vadd.f32 %v3367_v62, %v3285_v59  ;;  %v3286_v5 = vadd.f32 %v3254_v23, %v3172_v12  ;;  %v4043_v40 = vsub.f32 1.5, %v4042_v43 }
 0x719   : > { %v2913_v16 = vmul.f32 %v10716_v13, %v10821_v44  ;;  %v3595_v53 = vmul.f32 %v7672_v54, %v10822_v36  ;;  %v8697_v6 = vsub.f32 %v10823_v3, %v3757_v15  ;;  %v3511_v21 = vadd.f32 %v3479_v45, %v3397_v63 }
 0x71a   : > { %v10825_v30 = vperm.slane %v10809_v34, 2  ;;  %v4389_v57 = vadd.f32 %v8584_v29, %v4355_v42  ;;  %v3513_v8 = vadd.f32 %v3481_v41, %v3399_v51  ;;  %v10826_v62 = vperm.slane %v10744_v47, 5 }
 0x71b   : > { %10824 = vst [vmem:[#allocation14_spill] sm:$0xff] %v8697_v6  ;;  %v2945_v58 = vadd.f32 %v2913_v16, %v2831_v0  ;;  %v4054_v23 = vmul.f32 %v8589_v24, %v4053_v38  ;;  %vm4056_vm6 = vweird.f32 %v8589_v24  ;;  %v8709_v43 = vadd.f32 %v3593_v61, %v3511_v21  ;;  %v10833_v16 = vld [vmem:[#allocation52_spill] sm:$0xff] }
 0x71c   : > { %v3027_v35 = vmul.f32 %v10718_v26, %v10825_v30  ;;  %v3368_v59 = vmul.f32 %v7616_v4, %v10826_v62  ;;  %v3821_v18 = vmul.f32 %v8697_v6, %v8697_v6  ;;  %v4390_v63 = vadd.f32 %v8584_v29, %v4356_v60 }
 0x71d   : > { %10827 = vst [vmem:[#allocation16_spill] sm:$0xff] %v8709_v43  ;;  %v8714_v45 = vadd.f32 %v3595_v53, %v3513_v8  ;;  %v10829_v41 = vperm.slane %v10809_v34, 3  ;;  %v4044_v0 = vmul.f32 %v8596_v25, %v4043_v40  ;;  %vm4046_vm7 = vweird.f32 %v8596_v25 }
 0x71e   : > { %v3400_v42 = vadd.f32 %v3368_v59, %v3286_v5  ;;  %vm4055_vm9 = vweird.f32 %v8532_v20  ;;  %v3881_v38 = vsel %vm3639_vm8, %v3821_v18, 0.0  ;;  %v4420_v61 = vpack.c.bf16 %v4390_v63, %v4389_v57  ;;  %v10839_v59 = vld [vmem:[#allocation25_spill] sm:$0xff] }
 0x71f   : > { %10828 = vst [vmem:[#allocation18_spill] sm:$0xff] %v8714_v45  ;;  %v3141_v12 = vmul.f32 %v10655_v37, %v10829_v41  ;;  %vm8723_vm10 = vmor %vm4055_vm9, %vm4056_vm6  ;;  %v10832_v44 = vperm.slane %v10744_v47, 6  ;;  %v10834_v51 = vmov %v10822_v36  ;;  %v3059_v53 = vadd.f32 %v3027_v35, %v2945_v58  ;;  %3882 = vadd.xlane.f32.xlu1 %v3881_v38 }
 0x720   : > { %v3596_v36 = vmul.f32 %v7734_v14, %v10834_v51  ;;  %vm4045_vm11 = vweird.f32 %v8525_v10  ;;  %v4058_v20 = vsel %vm8723_vm10, %v8589_v24, %v4054_v23  ;;  %v3694_v5 = vsel %vm3639_vm8, %v8709_v43, 0.0  ;;  %4837 = vmatmul.msk.bf16.gmra.mxu2 %vm3639_vm8, %v4420_v61  ;;  %v10835_v10 = vld [vmem:[#allocation24_spill] sm:$0xff] }
 0x721   : > { %v3482_v60 = vmul.f32 %v10833_v16, %v10832_v44  ;;  %vm4047_vm12 = vmor %vm4045_vm11, %vm4046_vm7  ;;  %3695 = vadd.xlane.f32.xlu0 %v3694_v5  ;;  %v3700_v47 = vsel %vm3639_vm8, %v8714_v45, 0.0  ;;  %v3173_v3 = vadd.f32 %v3141_v12, %v3059_v53  ;;  %v4324_v30 = vmul.f32 %v4058_v20, %v10835_v10 }
 0x722   : > { %v4048_v21 = vsel %vm4047_vm12, %v8596_v25, %v4044_v0  ;;  %3701 = vadd.xlane.f32.xlu2 %v3700_v47  ;;  %v10837_v24 = vperm.slane %v10809_v34, 4  ;;  %v10838_v8 = vperm.slane %v10809_v34, 5  ;;  %v10840_v18 = vperm.slane %v10809_v34, 6 }
 0x723   : > { %v3514_v40 = vadd.f32 %v3482_v60, %v3400_v42  ;;  %v4323_v58 = vmul.f32 %v4048_v21, %v10839_v59  ;;  %v4358_v42 = vmul.f32 %v8557_v48, %v4324_v30  ;;  %v10841_v12 = vperm.slane %v10809_v34, 7  ;;  %v10843_v34 = vld [vmem:[#allocation3_spill] sm:$0xff] }
 0x724   : > { %v3255_v57 = vmul.f32 %v10659_v55, %v10837_v24  ;;  %v3369_v62 = vmul.f32 %v10647_v7, %v10838_v8  ;;  %v3483_v25 = vmul.f32 %v7558_v31, %v10840_v18  ;;  %v10347_v53 = vperm.slane %v10843_v34, 0 }
 0x725   : > { %v8744_v35 = vadd.f32 %v3596_v36, %v3514_v40  ;;  %v3597_v0 = vmul.f32 %v7672_v54, %v10841_v12  ;;  %v4357_v38 = vmul.f32 %v8557_v48, %v4323_v58  ;;  %v4392_v61 = vadd.f32 %v8584_v29, %v4358_v42  ;;  %v10845_v12 = vld [vmem:[#allocation2_spill] sm:$0xff] }
 0x726   : > { %v3287_v23 = vadd.f32 %v3255_v57, %v3173_v3  ;;  %v1873_v20 = vmul.f32 %v10700_v46, %v10347_v53  ;;  %v10346_v5 = vperm.slane %v10843_v34, 1  ;;  %v10345_v3 = vperm.slane %v10843_v34, 2  ;;  %v10846_v53 = vld [vmem:[#allocation9_spill] sm:$0xff] }
 0x727   : > { %10836 = vst [vmem:[#allocation6_spill] sm:$0xff] %v8744_v35  ;;  %v3703_v63 = vsel %vm3639_vm8, %v8744_v35, 0.0  ;;  %v4391_v60 = vadd.f32 %v8584_v29, %v4357_v38  ;;  %v10344_v21 = vperm.slane %v10843_v34, 3  ;;  %v10342_v8 = vperm.slane %v10843_v34, 4 }
 0x728   : > { %v3401_v41 = vadd.f32 %v3369_v62, %v3287_v23  ;;  %3704 = vadd.xlane.f32.xlu1 %v3703_v63  ;;  %v1987_v47 = vmul.f32 %v10701_v50, %v10346_v5  ;;  %v2101_v10 = vmul.f32 %v10702_v28, %v10345_v3  ;;  %v10844_v62 = vld [vmem:[#allocation11_spill] sm:$0xff]  ;;  %v10343_v63 = vperm.slane %v10843_v34, 5 }
 0x729   : > { %v4421_v51 = vpack.c.bf16 %v4392_v61, %v4391_v60  ;;  %v2215_v30 = vmul.f32 %v10703_v32, %v10344_v21  ;;  %v1790_v59 = vperm.slane %v10844_v62, 0  ;;  %v2329_v58 = vmul.f32 %v10707_v9, %v10342_v8 }
 0x72a   : > { %v3515_v15 = vadd.f32 %v3483_v25, %v3401_v41  ;;  %v2019_v40 = vadd.f32 %v1987_v47, %v1873_v20  ;;  %v1927_v18 = vperm.slane %v10844_v62, 1  ;;  %v10341_v42 = vperm.slane %v10843_v34, 6 }
 0x72b   : > { %v1877_v23 = vmul.f32 %v10700_v46, %v1790_v59  ;;  %v10348_v41 = vperm.slane %v10843_v34, 7  ;;  %v10354_v60 = vperm.slane %v10845_v12, 1  ;;  %v10352_v47 = vperm.slane %v10844_v62, 2 }
 0x72c   : > { %v8764_v44 = vadd.f32 %v3597_v0, %v3515_v15  ;;  %v2133_v24 = vadd.f32 %v2101_v10, %v2019_v40  ;;  %v10350_v0 = vperm.slane %v10845_v12, 0  ;;  %v1991_v38 = vmul.f32 %v10701_v50, %v1927_v18 }
 0x72d   : > { %v2443_v15 = vmul.f32 %v10709_v11, %v10343_v63  ;;  %v2557_v61 = vmul.f32 %v10710_v2, %v10341_v42  ;;  %v10351_v40 = vperm.slane %v10844_v62, 3  ;;  %v2105_v42 = vmul.f32 %v10702_v28, %v10352_v47 }
 0x72e   : > { %10842 = vst [vmem:[#allocation48_spill] sm:$0xff] %v8764_v44  ;;  %v3706_v36 = vsel %vm3639_vm8, %v8764_v44, 0.0  ;;  %v2247_v57 = vadd.f32 %v2215_v30, %v2133_v24  ;;  %v2023_v20 = vadd.f32 %v1991_v38, %v1877_v23  ;;  %v10349_v38 = vperm.slane %v10844_v62, 7 }
 0x72f   : > { %v2219_v23 = vmul.f32 %v10703_v32, %v10351_v40  ;;  %v10360_v63 = vperm.slane %v10844_v62, 6  ;;  %v2671_v21 = vmul.f32 %v10712_v33, %v10348_v41  ;;  %v10847_v40 = vld [vmem:[#allocation5_spill] sm:$0xff] }
 0x730   : > { %3707 = vadd.xlane.f32.xlu1 %v3706_v36  ;;  %4838 = vmatmul.msk.bf16.gmra.mxu2 %vm3639_vm8, %v4421_v51  ;;  %v2361_v25 = vadd.f32 %v2329_v58, %v2247_v57  ;;  %v2137_v3 = vadd.f32 %v2105_v42, %v2023_v20  ;;  %v8829_v5 = vmul.f32 %v10712_v33, %v10349_v38  ;;  %v10356_v47 = vperm.slane %v10847_v40, 0  ;;  %v10849_v36 = vld [vmem:[#allocation17_spill] sm:$0xff] }
 0x731   : > { %v10358_v57 = vperm.slane %v10847_v40, 1  ;;  %v10857_v38 = vperm.slane %v10847_v40, 3  ;;  %v10858_v44 = vperm.slane %v10849_v36, 2 }
 0x732   : > { %v2475_v10 = vadd.f32 %v2443_v15, %v2361_v25  ;;  %v10353_v25 = vperm.slane %v10844_v62, 4  ;;  %v10355_v15 = vperm.slane %v10844_v62, 5  ;;  %v2251_v42 = vadd.f32 %v2219_v23, %v2137_v3 }
 0x733   : > { %v2915_v3 = vmul.f32 %v10716_v13, %v10354_v60  ;;  %v2107_v19 = vmul.f32 %v10702_v28, %v10858_v44 }
 0x734   : > { %v2589_v8 = vadd.f32 %v2557_v61, %v2475_v10  ;;  %v2801_v61 = vmul.f32 %v10713_v1, %v10350_v0  ;;  %v2333_v10 = vmul.f32 %v10707_v9, %v10353_v25  ;;  %v3941_v25 = vmul.f32 %v8569_v27, %v8016_v49  ;;  %v10848_v0 = vld [vmem:[#allocation43_spill] sm:$0xff] }
 0x735   : > { %v1878_v24 = vmul.f32 %v10848_v0, %v1790_v59  ;;  %v10357_v27 = vperm.slane %v10849_v36, 0 }
 0x736   : > { %v2703_v58 = vadd.f32 %v2671_v21, %v2589_v8  ;;  %v2365_v30 = vadd.f32 %v2333_v10, %v2251_v42  ;;  %v10359_v21 = vperm.slane %v10849_v36, 1  ;;  %v8865_v8 = vadd.f32 1e-05, %v3941_v25  ;;  %v10851_v10 = vld [vmem:[#allocation39_spill] sm:$0xff] }
 0x737   : > { %v1992_v59 = vmul.f32 %v10851_v10, %v1927_v18  ;;  %v1875_v42 = vmul.f32 %v10700_v46, %v10356_v47  ;;  %v1879_v60 = vmul.f32 %v10700_v46, %v10357_v27  ;;  %v1989_v18 = vmul.f32 %v10701_v50, %v10358_v57 }
 0x738   : > { %v2833_v20 = vadd.f32 %v2801_v61, %v2703_v58  ;;  %v2447_v58 = vmul.f32 %v10709_v11, %v10355_v15  ;;  %v10850_v61 = vld [vmem:[#allocation7_spill] sm:$0xff]  ;;  %v2561_v15 = vmul.f32 %v10710_v2, %v10360_v63  ;;  %v1993_v47 = vmul.f32 %v10701_v50, %v10359_v21 }
 0x739   : > { %v2024_v51 = vadd.f32 %v1992_v59, %v1878_v24  ;;  %v10852_v46 = vperm.slane %v10845_v12, 2  ;;  %5051 = vrsqrt.f32 %v8865_v8  ;;  %v10854_v24 = vperm.slane %v10844_v62, 2 }
 0x73a   : > { %v2947_v41 = vadd.f32 %v2915_v3, %v2833_v20  ;;  %v2479_v23 = vadd.f32 %v2447_v58, %v2365_v30  ;;  %v10853_v3 = vperm.slane %v10845_v12, 3  ;;  %v10855_v58 = vld [vmem:[#allocation31_spill] sm:$0xff]  ;;  %v2021_v57 = vadd.f32 %v1989_v18, %v1875_v42  ;;  %v10861_v18 = vld [vmem:[#allocation40_spill] sm:$0xff] }
 0x73b   : > { %v3029_v20 = vmul.f32 %v10718_v26, %v10852_v46  ;;  %v2106_v59 = vmul.f32 %v10855_v58, %v10854_v24  ;;  %v2025_v50 = vadd.f32 %v1993_v47, %v1879_v60  ;;  %v10856_v46 = vperm.slane %v10847_v40, 2 }
 0x73c   : > { %v3143_v27 = vmul.f32 %v10655_v37, %v10853_v3  ;;  %v2593_v25 = vadd.f32 %v2561_v15, %v2479_v23  ;;  %v2217_v30 = vmul.f32 %v10703_v32, %v10857_v38  ;;  %v10859_v42 = vperm.slane %v10849_v36, 3  ;;  %v10865_v23 = vld [vmem:[#allocation19_spill] sm:$0xff] }
 0x73d   : > { %v3061_v21 = vadd.f32 %v3029_v20, %v2947_v41  ;;  %v2103_v63 = vmul.f32 %v10702_v28, %v10856_v46  ;;  %v2138_v6 = vadd.f32 %v2106_v59, %v2024_v51  ;;  %v10860_v51 = vperm.slane %v10844_v62, 3 }
 0x73e   : > { %v2221_v41 = vmul.f32 %v10703_v32, %v10859_v42  ;;  %v2139_v59 = vadd.f32 %v2107_v19, %v2025_v50  ;;  %v10862_v28 = vperm.slane %v10845_v12, 4  ;;  %v10863_v32 = vperm.slane %v10845_v12, 5 }
 0x73f   : > { %v3175_v60 = vadd.f32 %v3143_v27, %v3061_v21  ;;  %v2220_v20 = vmul.f32 %v10861_v18, %v10860_v51  ;;  %v2135_v38 = vadd.f32 %v2103_v63, %v2021_v57  ;;  %v2707_v27 = vadd.f32 %v8829_v5, %v2593_v25  ;;  %v8925_v42 = vpop.eup %5051  ;;  %v10867_v25 = vld [vmem:[#allocation42_spill] sm:$0xff] }
 0x740   : > { %v3257_v44 = vmul.f32 %v10659_v55, %v10862_v28  ;;  %v3371_v21 = vmul.f32 %v10647_v7, %v10863_v32  ;;  %v10864_v51 = vperm.slane %v10846_v53, 0  ;;  %v2253_v50 = vadd.f32 %v2221_v41, %v2139_v59 }
 0x741   : > { %v2252_v57 = vadd.f32 %v2220_v20, %v2138_v6  ;;  %v2249_v19 = vadd.f32 %v2217_v30, %v2135_v38  ;;  %v10866_v5 = vperm.slane %v10844_v62, 4  ;;  %v10868_v3 = vperm.slane %v10847_v40, 4 }
 0x742   : > { %v2805_v63 = vmul.f32 %v10713_v1, %v10864_v51  ;;  %v3289_v24 = vadd.f32 %v3257_v44, %v3175_v60  ;;  %v10869_v51 = vperm.slane %v10849_v36, 4  ;;  %v10364_v30 = vperm.slane %v10849_v36, 5 }
 0x743   : > { %v2334_v47 = vmul.f32 %v10867_v25, %v10866_v5  ;;  %v2331_v46 = vmul.f32 %v10707_v9, %v10868_v3  ;;  %v4060_v41 = vmul.f32 %v8925_v42, %v8865_v8  ;;  %v10870_v20 = vperm.slane %v10845_v12, 6 }
 0x744   : > { %v2335_v6 = vmul.f32 %v10707_v9, %v10869_v51  ;;  %v3403_v60 = vadd.f32 %v3371_v21, %v3289_v24  ;;  %v10369_v59 = vperm.slane %v10849_v36, 6  ;;  %v2837_v44 = vadd.f32 %v2805_v63, %v2707_v27  ;;  %v10876_v63 = vld [vmem:[#allocation32_spill] sm:$0xff] }
 0x745   : > { %v3485_v38 = vmul.f32 %v7558_v31, %v10870_v20  ;;  %v2366_v5 = vadd.f32 %v2334_v47, %v2252_v57  ;;  %v2363_v15 = vadd.f32 %v2331_v46, %v2249_v19  ;;  %v10871_v28 = vperm.slane %v10845_v12, 7 }
 0x746   : > { %v2367_v3 = vadd.f32 %v2335_v6, %v2253_v50  ;;  %v10872_v51 = vperm.slane %v10843_v34, 0  ;;  %v10873_v24 = vperm.slane %v10847_v40, 5  ;;  %v2449_v20 = vmul.f32 %v10709_v11, %v10364_v30 }
 0x747   : > { %v3599_v9 = vmul.f32 %v7672_v54, %v10871_v28  ;;  %v10874_v47 = vperm.slane %v10846_v53, 1  ;;  %v10875_v46 = vperm.slane %v10844_v62, 5  ;;  %v10877_v19 = vperm.slane %v10847_v40, 6 }
 0x748   : > { %v1874_v32 = vmul.f32 %v10848_v0, %v10872_v51  ;;  %v2445_v21 = vmul.f32 %v10709_v11, %v10873_v24  ;;  %v2563_v28 = vmul.f32 %v10710_v2, %v10369_v59  ;;  %v4061_v6 = vmul.f32 %v8925_v42, %v4060_v41  ;;  %v10883_v59 = vld [vmem:[#allocation49_spill] sm:$0xff] }
 0x749   : > { %v2919_v27 = vmul.f32 %v10716_v13, %v10874_v47  ;;  %v2448_v57 = vmul.f32 %v10876_v63, %v10875_v46  ;;  %v2559_v50 = vmul.f32 %v10710_v2, %v10877_v19  ;;  %v3517_v51 = vadd.f32 %v3485_v38, %v3403_v60 }
 0x74a   : > { %v10878_v11 = vperm.slane %v10843_v34, 1  ;;  %v2477_v46 = vadd.f32 %v2445_v21, %v2363_v15  ;;  %v2481_v52 = vadd.f32 %v2449_v20, %v2367_v3  ;;  %v10880_v19 = vperm.slane %v10846_v53, 2 }
 0x74b   : > { %v2951_v30 = vadd.f32 %v2919_v27, %v2837_v44  ;;  %v2480_v45 = vadd.f32 %v2448_v57, %v2366_v5  ;;  %v8978_v35 = vadd.f32 %v3599_v9, %v3517_v51  ;;  %v10370_v41 = vperm.slane %v10849_v36, 7 }
 0x74c   : > { %v1988_v24 = vmul.f32 %v10851_v10, %v10878_v11  ;;  %v3033_v43 = vmul.f32 %v10718_v26, %v10880_v19  ;;  %v10881_v60 = vperm.slane %v10846_v53, 3  ;;  %v10882_v11 = vperm.slane %v10844_v62, 6  ;;  %v10890_v19 = vld [vmem:[#allocation47_spill] sm:$0xff] }
 0x74d   : > { %10879 = vst [vmem:[#allocation36_spill] sm:$0xff] %v8978_v35  ;;  %v2591_v5 = vadd.f32 %v2559_v50, %v2477_v46  ;;  %v2595_v15 = vadd.f32 %v2563_v28, %v2481_v52  ;;  %v4062_v3 = vmul.f32 0.5, %v4061_v6  ;;  %v10884_v9 = vperm.slane %v10843_v34, 2  ;;  %v10886_v52 = vld [vmem:[#allocation26_spill] sm:$0xff] }
 0x74e   : > { %v2020_v2 = vadd.f32 %v1988_v24, %v1874_v32  ;;  %v3147_v38 = vmul.f32 %v10655_v37, %v10881_v60  ;;  %v2562_v44 = vmul.f32 %v10883_v59, %v10882_v11  ;;  %v3065_v27 = vadd.f32 %v3033_v43, %v2951_v30 }
 0x74f   : > { %v2102_v21 = vmul.f32 %v10855_v58, %v10884_v9  ;;  %v10885_v51 = vperm.slane %v10847_v40, 7  ;;  %v2677_v50 = vmul.f32 %v10712_v33, %v10370_v41  ;;  %v9003_v28 = vsel %vm3639_vm8, %v10886_v52, 0.0 }
 0x750   : > { %v2594_v57 = vadd.f32 %v2562_v44, %v2480_v45  ;;  %10887 = vst [vmem:[#allocation45_spill] sm:$0xff] %v9003_v28  ;;  %v9007_v6 = vsel %vm3639_vm8, %v8978_v35, 0.0  ;;  %v3179_v45 = vadd.f32 %v3147_v38, %v3065_v27  ;;  %v10889_v30 = vperm.slane %v10844_v62, 7 }
 0x751   : > { %v2673_v24 = vmul.f32 %v10712_v33, %v10885_v51  ;;  %10888 = vst [vmem:[#allocation46_spill] sm:$0xff] %v9007_v6  ;;  %v2134_v46 = vadd.f32 %v2102_v21, %v2020_v2  ;;  %v9013_v44 = vadd.f32 %v2677_v50, %v2595_v15  ;;  %v4063_v33 = vsub.f32 1.5, %v4062_v3 }
 0x752   : > { %v2676_v60 = vmul.f32 %v10890_v19, %v10889_v30  ;;  %v10891_v9 = vperm.slane %v10843_v34, 3  ;;  %v10892_v41 = vperm.slane %v10843_v34, 5  ;;  %v10893_v2 = vperm.slane %v10850_v61, 2 }
 0x753   : > { %v2705_v11 = vadd.f32 %v2673_v24, %v2591_v5  ;;  %v10894_v21 = vperm.slane %v10846_v53, 4  ;;  %v10895_v15 = vperm.slane %v10846_v53, 5  ;;  %v10896_v24 = vperm.slane %v10865_v23, 2 }
 0x754   : > { %v2216_v51 = vmul.f32 %v10861_v18, %v10891_v9  ;;  %v2444_v32 = vmul.f32 %v10876_v63, %v10892_v41  ;;  %v9024_v38 = vmul.f32 %v10718_v26, %v10893_v2  ;;  %v2708_v27 = vadd.f32 %v2676_v60, %v2594_v57 }
 0x755   : > { %v3261_v5 = vmul.f32 %v10659_v55, %v10894_v21  ;;  %v3375_v3 = vmul.f32 %v10647_v7, %v10895_v15  ;;  %v9035_v50 = vmul.f32 %v10718_v26, %v10896_v24  ;;  %v10897_v30 = vperm.slane %v10846_v53, 3  ;;  %v10901_v15 = vld [vmem:[#allocation38_spill] sm:$0xff] }
 0x756   : > { %v2248_v2 = vadd.f32 %v2216_v51, %v2134_v46  ;;  %v10898_v43 = vperm.slane %v10845_v12, 3  ;;  %v10899_v57 = vperm.slane %v10846_v53, 6  ;;  %v10900_v26 = vperm.slane %v10846_v53, 0 }
 0x757   : > { %v3148_v9 = vmul.f32 %v7261_v22, %v10897_v30  ;;  %v3293_v20 = vadd.f32 %v3261_v5, %v3179_v45  ;;  %v4064_v46 = vmul.f32 %v8925_v42, %v4063_v33  ;;  %vm4066_vm13 = vweird.f32 %v8925_v42 }
 0x758   : > { %v9044_v21 = vmul.f32 %v7261_v22, %v10898_v43  ;;  %v3489_v60 = vmul.f32 %v7558_v31, %v10899_v57  ;;  %v2806_v24 = vmul.f32 %v10901_v15, %v10900_v26  ;;  %v10903_v43 = vperm.slane %v10843_v34, 4 }
 0x759   : > { %v3407_v5 = vadd.f32 %v3375_v3, %v3293_v20  ;;  %v10904_v57 = vperm.slane %v10845_v12, 0  ;;  %v10905_v35 = vperm.slane %v10849_v36, 2  ;;  %vm4065_vm14 = vweird.f32 %v8865_v8 }
 0x75a   : > { %v2330_v45 = vmul.f32 %v10867_v25, %v10903_v43  ;;  %v2838_v30 = vadd.f32 %v2806_v24, %v2708_v27  ;;  %v10906_v33 = vperm.slane %v10846_v53, 7  ;;  %vm9077_vm15 = vmor %vm4065_vm14, %vm4066_vm13  ;;  %v10909_v43 = vperm.slane %v10846_v53, 2 }
 0x75b   : > { %v9065_v26 = vmul.f32 %v10901_v15, %v10904_v57  ;;  %v3521_v27 = vadd.f32 %v3489_v60, %v3407_v5  ;;  %v10910_v57 = vperm.slane %v10846_v53, 6  ;;  %v10913_v5 = vperm.slane %v10850_v61, 0 }
 0x75c   : > { %v2362_v20 = vadd.f32 %v2330_v45, %v2248_v2  ;;  %v10911_v2 = vperm.slane %v10846_v53, 5  ;;  %v10915_v3 = vperm.slane %v10845_v12, 1 }
 0x75d   : > { %v9087_v8 = vmul.f32 %v10833_v16, %v10910_v57 }
 0x75e   : > { %v9095_v45 = vmul.f32 %v7616_v4, %v10911_v2  ;;  %v2476_v22 = vadd.f32 %v2444_v32, %v2362_v20  ;;  %v10925_v20 = vperm.slane %v10850_v61, 3 }
 0x764   : > { %v3862_v62 = vpop.xlane.xlu1 %3861 }
 0x765   : > { %v3942_v41 = vmul.f32 %v3862_v62, %v8016_v49  ;;  %v10902_v62 = vmov %v10874_v47 }
 0x766   : > { %v2920_v47 = vmul.f32 %v10797_v17, %v10902_v62  ;;  %v9070_v62 = vmul.f32 %v10855_v58, %v10905_v35  ;;  %v3034_v35 = vmul.f32 %v7547_v56, %v10909_v43  ;;  %v10914_v43 = vperm.slane %v10843_v34, 7 }
 0x767   : > { %v9057_v51 = vadd.f32 1e-05, %v3942_v41  ;;  %v3603_v41 = vmul.f32 %v7672_v54, %v10906_v33  ;;  %v4068_v33 = vsel %vm9077_vm15, %v8925_v42, %v4064_v46  ;;  %v9109_v42 = vmul.f32 %v10797_v17, %v10915_v3 }
 0x768   : > { %v2952_v24 = vadd.f32 %v2920_v47, %v2838_v30  ;;  %v10912_v47 = vperm.slane %v10843_v34, 6  ;;  %v2803_v30 = vmul.f32 %v10713_v1, %v10913_v5  ;;  %v2672_v57 = vmul.f32 %v10890_v19, %v10914_v43 }
 0x769   : > { %5053 = vrsqrt.f32 %v9057_v51  ;;  %v10916_v46 = vperm.slane %v10845_v12, 2  ;;  %v9121_v54 = vadd.f32 %v3603_v41, %v3521_v27  ;;  %v10919_v34 = vperm.slane %v10846_v53, 4 }
 0x76a   : > { %v2558_v60 = vmul.f32 %v10883_v59, %v10912_v47  ;;  %v10917_v47 = vperm.slane %v10845_v12, 5  ;;  %v10920_v3 = vperm.slane %v10845_v12, 6  ;;  %v3066_v28 = vadd.f32 %v3034_v35, %v2952_v24 }
 0x76b   : > { %v9114_v2 = vmul.f32 %v7547_v56, %v10916_v46  ;;  %10918 = vst [vmem:[#allocation10_spill] sm:$0xff] %v9121_v54  ;;  %v3262_v43 = vmul.f32 %v10817_v39, %v10919_v34  ;;  %v10922_v46 = vld [vmem:[#allocation27_spill] sm:$0xff]  ;;  %v10924_v34 = vperm.slane %v10850_v61, 1  ;;  %vm4075_vm1 = vweird.f32 %v9057_v51 }
 0x76c   : > { %v9119_v52 = vmul.f32 %v7616_v4, %v10917_v47  ;;  %v9129_v6 = vmul.f32 %v10833_v16, %v10920_v3  ;;  %v4325_v56 = vmul.f32 %v4068_v33, %v10922_v46  ;;  %v10923_v47 = vperm.slane %v10845_v12, 4 }
 0x76d   : > { %v3865_v5 = vpop.xlane.xlu1 %3864  ;;  %v2835_v4 = vadd.f32 %v2803_v30, %v2705_v11  ;;  %v2917_v32 = vmul.f32 %v10716_v13, %v10924_v34  ;;  %v9144_v3 = vmul.f32 %v10655_v37, %v10925_v20  ;;  %v10926_v33 = vperm.slane %v10849_v36, 0 }
 0x76e   : > { %10921 = vst [vmem:[#allocation50_spill] sm:$0xff] %v9129_v6  ;;  %v3943_v17 = vmul.f32 %v3865_v5, %v8016_v49  ;;  %v9136_v41 = vmul.f32 %v10817_v39, %v10923_v47  ;;  %v10927_v46 = vperm.slane %v10850_v61, 4  ;;  %v10928_v30 = vperm.slane %v10865_v23, 0 }
 0x76f   : > { %v5054_v27 = vpop.eup %5053  ;;  %v1880_v24 = vmul.f32 %v10848_v0, %v10926_v33  ;;  %v9162_v34 = vsel %vm3639_vm8, %v9121_v54, 0.0  ;;  %v2590_v20 = vadd.f32 %v2558_v60, %v2476_v22  ;;  %v10930_v33 = vperm.slane %v10850_v61, 5 }
 0x770   : > { %v4070_v35 = vmul.f32 %v5054_v27, %v9057_v51  ;;  %v9150_v5 = vadd.f32 1e-05, %v3943_v17  ;;  %v9155_v11 = vmul.f32 %v10659_v55, %v10927_v46  ;;  %v2807_v47 = vmul.f32 %v10713_v1, %v10928_v30  ;;  %10929 = vst [vmem:[#allocation41_spill] sm:$0xff] %v9162_v34 }
 0x771   : > { %v9167_v16 = vmul.f32 %v10647_v7, %v10930_v33  ;;  %v10932_v17 = vperm.slane %v10849_v36, 1  ;;  %v3180_v6 = vadd.f32 %v3148_v9, %v3066_v28  ;;  %v10933_v1 = vperm.slane %v10865_v23, 1 }
 0x772   : > { %v4071_v46 = vmul.f32 %v5054_v27, %v4070_v35  ;;  %5055 = vrsqrt.f32 %v9150_v5  ;;  %v2949_v54 = vadd.f32 %v2917_v32, %v2835_v4  ;;  %v10934_v22 = vperm.slane %v10865_v23, 3 }
 0x773   : > { %10931 = vst [vmem:[#allocation44_spill] sm:$0xff] %v9167_v16  ;;  %v1994_v39 = vmul.f32 %v10851_v10, %v10932_v17  ;;  %v2921_v30 = vmul.f32 %v10716_v13, %v10933_v1  ;;  %v10935_v33 = vperm.slane %v10865_v23, 4  ;;  %v3294_v16 = vadd.f32 %v3262_v43, %v3180_v6 }
 0x774   : > { %v9179_v60 = vmul.f32 %v10655_v37, %v10934_v22  ;;  %v4072_v35 = vmul.f32 0.5, %v4071_v46  ;;  %v2839_v28 = vadd.f32 %v2807_v47, %v9013_v44  ;;  %v10936_v9 = vperm.slane %v10865_v23, 5 }
 0x775   : > { %v9184_v34 = vmul.f32 %v10659_v55, %v10935_v33  ;;  %v2026_v17 = vadd.f32 %v1994_v39, %v1880_v24  ;;  %v3687_v4 = vpop.xlane.xlu1 %3686  ;;  %v10937_v32 = vperm.slane %v10846_v53, 7  ;;  %v2704_v1 = vadd.f32 %v2672_v57, %v2590_v20 }
 0x776   : > { %v9190_v13 = vmul.f32 %v10647_v7, %v10936_v9  ;;  %v10938_v55 = vperm.slane %v10845_v12, 7  ;;  %v10939_v6 = vperm.slane %v10849_v36, 3  ;;  %v4073_v43 = vsub.f32 1.5, %v4072_v35 }
 0x777   : > { %v9195_v37 = vmul.f32 %v7734_v14, %v10937_v32  ;;  %vm4076_vm0 = vweird.f32 %v5054_v27  ;;  %v3758_v7 = vmul.f32 %v8016_v49, %v3687_v4  ;;  %v3868_v24 = vpop.xlane.xlu0 %3867  ;;  %v10940_v53 = vperm.slane %v10847_v40, 0  ;;  %v10942_v4 = vld [vmem:[#allocation37_spill] sm:$0xff] }
 0x778   : > { %v9200_v39 = vmul.f32 %v7734_v14, %v10938_v55  ;;  %v2222_v44 = vmul.f32 %v10861_v18, %v10939_v6  ;;  %v3874_v46 = vpop.xlane.xlu2 %3873  ;;  %v3944_v57 = vmul.f32 %v3868_v24, %v8016_v49  ;;  %v3063_v12 = vadd.f32 %v9024_v38, %v2949_v54  ;;  %v9215_v35 = vpop.eup %5055  ;;  %vm4077_vm2 = vmor %vm4075_vm1, %vm4076_vm0 }
 0x779   : > { %v1876_v47 = vmul.f32 %v10848_v0, %v10940_v53  ;;  %v2140_v20 = vadd.f32 %v9070_v62, %v2026_v17  ;;  %v10941_v22 = vperm.slane %v10847_v40, 1  ;;  %v4074_v9 = vmul.f32 %v5054_v27, %v4073_v43  ;;  %v10943_v43 = vld [vmem:[#allocation23_spill] sm:$0xff] }
 0x77a   : > { %v9219_v32 = vsub.f32 %v10942_v4, %v3758_v7  ;;  %v3946_v0 = vmul.f32 %v3874_v46, %v8016_v49  ;;  %v4080_v54 = vmul.f32 %v9215_v35, %v9150_v5  ;;  %v9224_v38 = vadd.f32 1e-05, %v3944_v57 }
 0x77b   : > { %v1990_v33 = vmul.f32 %v10851_v10, %v10941_v22  ;;  %v3408_v62 = vadd.f32 %v9095_v45, %v3294_v16  ;;  %v2834_v10 = vadd.f32 %v9065_v26, %v2704_v1  ;;  %v4078_v17 = vsel %vm4077_vm2, %v5054_v27, %v4074_v9 }
 0x77c   : > { %v9228_v55 = vadd.f32 1e-05, %v3946_v0  ;;  %v3822_v51 = vmul.f32 %v9219_v32, %v9219_v32  ;;  %v4326_v7 = vmul.f32 %v4078_v17, %v10943_v43  ;;  %v4081_v24 = vmul.f32 %v9215_v35, %v4080_v54 }
 0x77d   : > { %v2022_v6 = vadd.f32 %v1990_v33, %v1876_v47  ;;  %5057 = vrsqrt.f32 %v9224_v38  ;;  %v4359_v53 = vmul.f32 %v8557_v48, %v4325_v56  ;;  %v2948_v16 = vadd.f32 %v9109_v42, %v2834_v10  ;;  %v3690_v27 = vpop.xlane.xlu1 %3689  ;;  %v10947_v10 = vld [vmem:[#allocation29_spill] sm:$0xff] }
 0x77e   : > { %v3884_v46 = vsel %vm3639_vm8, %v3822_v51, 0.0  ;;  %v2953_v26 = vadd.f32 %v2921_v30, %v2839_v28  ;;  %v2254_v45 = vadd.f32 %v2222_v44, %v2140_v20  ;;  %5059 = vrsqrt.f32 %v9228_v55 }
 0x77f   : > { %3885 = vadd.xlane.f32.xlu0 %v3884_v46  ;;  %v4360_v1 = vmul.f32 %v8557_v48, %v4326_v7  ;;  %v10944_v47 = vperm.slane %v10849_v36, 4  ;;  %v10945_v22 = vperm.slane %v10847_v40, 2  ;;  %v4082_v33 = vmul.f32 0.5, %v4081_v24 }
 0x780   : > { %v3759_v9 = vmul.f32 %v8016_v49, %v3690_v27  ;;  %v3177_v30 = vadd.f32 %v9144_v3, %v3063_v12  ;;  %v10946_v28 = vperm.slane %v10849_v36, 5  ;;  %v4393_v4 = vadd.f32 %v8584_v29, %v4359_v53 }
 0x781   : > { %v2336_v57 = vmul.f32 %v10867_v25, %v10944_v47  ;;  %v2104_v56 = vmul.f32 %v10855_v58, %v10945_v22  ;;  %v3871_v42 = vpop.xlane.xlu0 %3870  ;;  %v4394_v0 = vadd.f32 %v8584_v29, %v4360_v1  ;;  %v3062_v17 = vadd.f32 %v9114_v2, %v2948_v16 }
 0x782   : > { %v2450_v44 = vmul.f32 %v10876_v63, %v10946_v28  ;;  %v3877_v20 = vpop.xlane.xlu2 %3876  ;;  %v3945_v48 = vmul.f32 %v3871_v42, %v8016_v49  ;;  %v9255_v58 = vsub.f32 %v10947_v10, %v3759_v9  ;;  %v10948_v3 = vperm.slane %v10865_v23, 0 }
 0x783   : > { %v2136_v54 = vadd.f32 %v2104_v56, %v2022_v6  ;;  %v2368_v51 = vadd.f32 %v2336_v57, %v2254_v45  ;;  %v9263_v43 = vpop.eup %5057  ;;  %v4422_v24 = vpack.c.bf16 %v4394_v0, %v4393_v4  ;;  %v9268_v53 = vadd.f32 %v9087_v8, %v3408_v62 }
 0x784   : > { %v9261_v12 = vmul.f32 %v10901_v15, %v10948_v3  ;;  %v9265_v7 = vadd.f32 1e-05, %v3945_v48  ;;  %v10949_v29 = vperm.slane %v10847_v40, 3  ;;  %v4083_v46 = vsub.f32 1.5, %v4082_v33  ;;  %v9282_v1 = vpop.eup %5059 }
 0x785   : > { %v4090_v2 = vmul.f32 %v9263_v43, %v9224_v38  ;;  %v3823_v16 = vmul.f32 %v9255_v58, %v9255_v58  ;;  %v10950_v45 = vperm.slane %v10850_v61, 6  ;;  %4839 = vmatmul.msk.bf16.gmra.mxu2 %vm3639_vm8, %v4422_v24  ;;  %v9290_v8 = vadd.f32 %v9035_v50, %v2953_v26 }
 0x786   : > { %v2218_v6 = vmul.f32 %v10861_v18, %v10949_v29  ;;  %5061 = vrsqrt.f32 %v9265_v7  ;;  %v9287_v18 = vadd.f32 %v9155_v11, %v3177_v30  ;;  %v3176_v57 = vadd.f32 %v9044_v21, %v3062_v17 }
 0x787   : > { %v9280_v27 = vmul.f32 %v7558_v31, %v10950_v45  ;;  %v4091_v47 = vmul.f32 %v9263_v43, %v4090_v2  ;;  %v2482_v22 = vadd.f32 %v2450_v44, %v2368_v51  ;;  %v10951_v56 = vperm.slane %v10849_v36, 6  ;;  %v3880_v42 = vpop.xlane.xlu1 %3879 }
 0x788   : > { %v2250_v62 = vadd.f32 %v2218_v6, %v2136_v54  ;;  %vm4086_vm3 = vweird.f32 %v9215_v35  ;;  %v3947_v9 = vmul.f32 %v3877_v20, %v8016_v49  ;;  %v3887_v11 = vsel %vm3639_vm8, %v3823_v16, 0.0 }
 0x789   : > { %v2564_v33 = vmul.f32 %v10883_v59, %v10951_v56  ;;  %v10952_v50 = vperm.slane %v10847_v40, 4  ;;  %v4084_v30 = vmul.f32 %v9215_v35, %v4083_v46  ;;  %v4110_v21 = vmul.f32 %v9282_v1, %v9228_v55  ;;  %3888 = vadd.xlane.f32.xlu0 %v3887_v11  ;;  %v3693_v48 = vpop.xlane.xlu0 %3692 }
 0x78a   : > { %v4092_v28 = vmul.f32 0.5, %v4091_v47  ;;  %v3948_v44 = vmul.f32 %v3880_v42, %v8016_v49  ;;  %vm4085_vm4 = vweird.f32 %v9150_v5  ;;  %v3699_v20 = vpop.xlane.xlu2 %3698  ;;  %v3760_v4 = vmul.f32 %v8016_v49, %v3693_v48 }
 0x78b   : > { %v2332_v26 = vmul.f32 %v10867_v25, %v10952_v50  ;;  %v10953_v54 = vperm.slane %v10847_v40, 5  ;;  %vm4096_vm5 = vweird.f32 %v9263_v43  ;;  %v3762_v51 = vmul.f32 %v8016_v49, %v3699_v20  ;;  %vm9320_vm6 = vmor %vm4085_vm4, %vm4086_vm3  ;;  %v10961_v50 = vld [vmem:[#allocation33_spill] sm:$0xff] }
 0x78c   : > { %v4093_v10 = vsub.f32 1.5, %v4092_v28  ;;  %v9313_v17 = vadd.f32 1e-05, %v3948_v44  ;;  %v9316_v3 = vpop.eup %5061  ;;  %vm4095_vm7 = vweird.f32 %v9224_v38  ;;  %v9325_v24 = vadd.f32 1e-05, %v3947_v9  ;;  %v10960_v9 = vld [vmem:[#allocation34_spill] sm:$0xff] }
 0x78d   : > { %v2364_v0 = vadd.f32 %v2332_v26, %v2250_v62  ;;  %v2446_v25 = vmul.f32 %v10876_v63, %v10953_v54  ;;  %v10956_v63 = vld [vmem:[#allocation30_spill] sm:$0xff]  ;;  %v2596_v6 = vadd.f32 %v2564_v33, %v2482_v22  ;;  %v4088_v46 = vsel %vm9320_vm6, %v9215_v35, %v4084_v30  ;;  %vm9337_vm9 = vmor %vm4095_vm7, %vm4096_vm5  ;;  %v10963_v28 = vld [vmem:[#allocation45_spill] sm:$0xff] }
 0x78e   : > { %v9328_v29 = vsub.f32 %v10956_v63, %v3760_v4  ;;  %v4111_v2 = vmul.f32 %v9282_v1, %v4110_v21  ;;  %v4094_v16 = vmul.f32 %v9263_v43, %v4093_v10  ;;  %v4100_v45 = vmul.f32 %v9316_v3, %v9265_v7  ;;  %v10965_v4 = vld [vmem:[#allocation54_spill] sm:$0xff]  ;;  %v10966_v54 = vld [vmem:[#allocation4_spill] sm:$0xff] }
 0x78f   : > { %5063 = vrsqrt.f32 %v9313_v17  ;;  %v3290_v38 = vadd.f32 %v9136_v41, %v3176_v57  ;;  %v10959_v47 = vperm.slane %v10849_v36, 7  ;;  %v2478_v35 = vadd.f32 %v2446_v25, %v2364_v0 }
 0x790   : > { %v4098_v56 = vsel %vm9337_vm9, %v9263_v43, %v4094_v16  ;;  %v4101_v33 = vmul.f32 %v9316_v3, %v4100_v45  ;;  %v9351_v11 = vsub.f32 %v10960_v9, %v3762_v51  ;;  %v3824_v42 = vmul.f32 %v9328_v29, %v9328_v29  ;;  %v9383_v16 = vld [vmem:[%s10167_s4] ss:$0 sm:$0xff] }
 0x791   : > { %v2678_v22 = vmul.f32 %v10890_v19, %v10959_v47  ;;  %v4327_v26 = vmul.f32 %v4088_v46, %v10961_v50  ;;  %5065 = vrsqrt.f32 %v9325_v24  ;;  %v10962_v57 = vperm.slane %v10847_v40, 6  ;;  %3710 = vadd.xlane.f32.xlu0 %v10963_v28  ;;  %v10973_v28 = vld [vmem:[#allocation46_spill] sm:$0xff] }
 0x792   : > { %v9357_v36 = vpop.xlane.xlu1 %3882  ;;  %v4112_v43 = vmul.f32 0.5, %v4111_v2  ;;  %v4102_v21 = vmul.f32 0.5, %v4101_v33  ;;  %v3826_v44 = vmul.f32 %v9351_v11, %v9351_v11  ;;  %v10964_v20 = vperm.slane %v10865_v23, 1 }
 0x793   : > { %v2710_v41 = vadd.f32 %v2678_v22, %v2596_v6  ;;  %v2560_v30 = vmul.f32 %v10883_v59, %v10962_v57  ;;  %v4328_v25 = vmul.f32 %v4098_v56, %v10966_v54  ;;  %v3890_v10 = vsel %vm3639_vm8, %v3824_v42, 0.0 }
 0x794   : > { %v3696_v48 = vpop.xlane.xlu0 %3695  ;;  %v2922_v0 = vmul.f32 %v10965_v4, %v10964_v20  ;;  %v4103_v59 = vsub.f32 1.5, %v4102_v21  ;;  %v3896_v63 = vsel %vm3639_vm8, %v3826_v44, 0.0  ;;  %3891 = vadd.xlane.f32.xlu2 %v3890_v10  ;;  %v9374_v6 = vadd.f32 %v9195_v37, %v9268_v53 }
 0x795   : > { %v3761_v51 = vmul.f32 %v8016_v49, %v3696_v48  ;;  %v2592_v5 = vadd.f32 %v2560_v30, %v2478_v35  ;;  %v3181_v46 = vadd.f32 %v9179_v60, %v9290_v8  ;;  %v9378_v2 = vpop.eup %5063  ;;  %3897 = vadd.xlane.f32.xlu1 %v3896_v63  ;;  %v4361_v45 = vmul.f32 %v9383_v16, %v4327_v26  ;;  %v10969_v35 = vld [vmem:[#allocation44_spill] sm:$0xff] }
 0x796   : > { %v10967_v62 = vperm.slane %v10865_v23, 6  ;;  %v2840_v37 = vadd.f32 %v9261_v12, %v2710_v41  ;;  %v10968_v53 = vperm.slane %v10847_v40, 7  ;;  %v4113_v8 = vsub.f32 1.5, %v4112_v43 }
 0x797   : > { %v3404_v22 = vadd.f32 %v9119_v52, %v3290_v38  ;;  %v3405_v56 = vadd.f32 %v10969_v35, %v9287_v18  ;;  %v10970_v33 = vperm.slane %v10850_v61, 0  ;;  %v9401_v42 = vpop.eup %5065  ;;  %v4362_v12 = vmul.f32 %v9383_v16, %v4328_v25  ;;  %v9419_v38 = vld [vmem:[%s10167_s4 + $0x1] ss:$0 sm:$0xff] }
 0x798   : > { %v9389_v47 = vmul.f32 %v7558_v31, %v10967_v62  ;;  %v2674_v60 = vmul.f32 %v10890_v19, %v10968_v53  ;;  %v10971_v31 = vld [vmem:[#allocation16_spill] sm:$0xff]  ;;  %v2954_v40 = vadd.f32 %v2922_v0, %v2840_v37  ;;  %v4104_v19 = vmul.f32 %v9316_v3, %v4103_v59  ;;  %v10977_v0 = vld [vmem:[#allocation51_spill] sm:$0xff] }
 0x799   : > { %v2804_v9 = vmul.f32 %v10901_v15, %v10970_v33  ;;  %v9404_v50 = vsub.f32 %v10971_v31, %v3761_v51  ;;  %vm4106_vm10 = vweird.f32 %v9316_v3  ;;  %v4130_v52 = vmul.f32 %v9378_v2, %v9313_v17  ;;  %3713 = vadd.xlane.f32.xlu0 %v10973_v28  ;;  %v10983_v53 = vld [vmem:[#allocation35_spill] sm:$0xff] }
 0x79a   : > { %v2706_v26 = vadd.f32 %v2674_v60, %v2592_v5  ;;  %v10972_v18 = vperm.slane %v10850_v61, 1  ;;  %vm4116_vm11 = vweird.f32 %v9282_v1  ;;  %vm4105_vm12 = vweird.f32 %v9265_v7  ;;  %v10978_v5 = vld [vmem:[#allocation6_spill] sm:$0xff] }
 0x79b   : > { %v4395_v41 = vadd.f32 %v9419_v38, %v4361_v45  ;;  %v4396_v57 = vadd.f32 %v9419_v38, %v4362_v12  ;;  %v3705_v30 = vpop.xlane.xlu1 %3704  ;;  %v4114_v43 = vmul.f32 %v9282_v1, %v4113_v8  ;;  %v4120_v21 = vmul.f32 %v9401_v42, %v9325_v24  ;;  %vm9433_vm14 = vmor %vm4105_vm12, %vm4106_vm10  ;;  %v10981_v45 = vld [vmem:[#allocation41_spill] sm:$0xff]  ;;  %v10984_v12 = vld [vmem:[#allocation50_spill] sm:$0xff] }
 0x79c   : > { %v2918_v15 = vmul.f32 %v10965_v4, %v10972_v18  ;;  %v3764_v44 = vmul.f32 %v8016_v49, %v3705_v30  ;;  %v3825_v7 = vmul.f32 %v9404_v50, %v9404_v50  ;;  %vm4115_vm13 = vweird.f32 %v9228_v55 }
 0x79d   : > { %v4423_v20 = vpack.c.bf16 %v4396_v57, %v4395_v41  ;;  %v10976_v4 = vperm.slane %v10865_v23, 2  ;;  %v2836_v25 = vadd.f32 %v2804_v9, %v2706_v26  ;;  %v4108_v10 = vsel %vm9433_vm14, %v9316_v3, %v4104_v19  ;;  %vm9450_vm15 = vmor %vm4115_vm13, %vm4116_vm11  ;;  %3725 = vadd.xlane.f32.xlu1 %v10981_v45  ;;  %v3702_v9 = vpop.xlane.xlu2 %3701  ;;  %v10985_v19 = vld [vmem:[#allocation12_spill] sm:$0xff] }
 0x79e   : > { %v4131_v51 = vmul.f32 %v9378_v2, %v4130_v52  ;;  %v9445_v55 = vsub.f32 %v10978_v5, %v3764_v44  ;;  %v3893_v59 = vsel %vm3639_vm8, %v3825_v7, 0.0  ;;  %v3540_v62 = vperm.slane %v10865_v23, 7  ;;  %v10991_v7 = vld [vmem:[#allocation20_spill] sm:$0xff] }
 0x79f   : > { %v3036_v54 = vmul.f32 %v10977_v0, %v10976_v4  ;;  %4840 = vmatmul.msk.bf16.gmra.mxu2 %vm3639_vm8, %v4423_v20  ;;  %v10982_v37 = vperm.slane %v10865_v23, 3  ;;  %v2950_v8 = vadd.f32 %v2918_v15, %v2836_v25  ;;  %v4118_v35 = vsel %vm9450_vm15, %v9282_v1, %v4114_v43  ;;  %3894 = vadd.xlane.f32.xlu2 %v3893_v59  ;;  %v10987_v15 = vld [vmem:[#allocation56_spill] sm:$0xff] }
 0x7a0   : > { %v4121_v33 = vmul.f32 %v9401_v42, %v4120_v21  ;;  %v3828_v31 = vmul.f32 %v9445_v55, %v9445_v55  ;;  %v3518_v26 = vadd.f32 %v10984_v12, %v3404_v22  ;;  %v3727_v52 = vsel %vm3639_vm8, %v9374_v6, 0.0  ;;  %v10990_v22 = vld [vmem:[#allocation55_spill] sm:$0xff] }
 0x7a1   : > { %v3068_v3 = vadd.f32 %v3036_v54, %v2954_v40  ;;  %v3150_v60 = vmul.f32 %v10983_v53, %v10982_v37  ;;  %v4329_v40 = vmul.f32 %v4108_v10, %v10985_v19  ;;  %v10986_v18 = vperm.slane %v10865_v23, 4  ;;  %3728 = vadd.xlane.f32.xlu0 %v3727_v52 }
 0x7a2   : > { %v10988_v1 = vperm.slane %v10850_v61, 2  ;;  %v4132_v30 = vmul.f32 0.5, %v4131_v51  ;;  %v9477_v43 = vadd.f32 %v9200_v39, %v3518_v26  ;;  %v10989_v21 = vperm.slane %v10850_v61, 7 }
 0x7a3   : > { %v3264_v41 = vmul.f32 %v10987_v15, %v10986_v18  ;;  %v3295_v44 = vadd.f32 %v9184_v34, %v3181_v46  ;;  %v4330_v48 = vmul.f32 %v4118_v35, %v10991_v7  ;;  %v3763_v20 = vmul.f32 %v8016_v49, %v3702_v9 }
 0x7a4   : > { %v3032_v57 = vmul.f32 %v10977_v0, %v10988_v1  ;;  %v3601_v28 = vmul.f32 %v10990_v22, %v10989_v21  ;;  %v3182_v4 = vadd.f32 %v3150_v60, %v3068_v3  ;;  %v4122_v25 = vmul.f32 0.5, %v4121_v33 }
 0x7a5   : > { %v3902_v0 = vsel %vm3639_vm8, %v3828_v31, 0.0  ;;  %v3519_v10 = vadd.f32 %v9280_v27, %v3405_v56  ;;  %v3409_v39 = vadd.f32 %v9190_v13, %v3295_v44  ;;  %v4363_v51 = vmul.f32 %v9383_v16, %v4329_v40  ;;  %v10994_v13 = vld [vmem:[#allocation18_spill] sm:$0xff]  ;;  %v10998_v40 = vld [vmem:[#allocation52_spill] sm:$0xff] }
 0x7a6   : > { %v3064_v54 = vadd.f32 %v3032_v57, %v2950_v8  ;;  %v3296_v5 = vadd.f32 %v3264_v41, %v3182_v4  ;;  %v10992_v59 = vperm.slane %v10850_v61, 3  ;;  %v10993_v46 = vperm.slane %v10850_v61, 4  ;;  %3903 = vadd.xlane.f32.xlu1 %v3902_v0  ;;  %v10996_v8 = vld [vmem:[#allocation53_spill] sm:$0xff] }
 0x7a7   : > { %v4133_v45 = vsub.f32 1.5, %v4132_v30  ;;  %v3715_v3 = vsel %vm3639_vm8, %v9477_v43, 0.0  ;;  %v9497_v37 = vadd.f32 %v3601_v28, %v3519_v10  ;;  %v3605_v27 = vmul.f32 %v10990_v22, %v3540_v62  ;;  %v3708_v10 = vpop.xlane.xlu1 %3707 }
 0x7a8   : > { %v3146_v34 = vmul.f32 %v10983_v53, %v10992_v59  ;;  %v3260_v63 = vmul.f32 %v10987_v15, %v10993_v46  ;;  %v9501_v56 = vsub.f32 %v10994_v13, %v3763_v20  ;;  %v4364_v60 = vmul.f32 %v9383_v16, %v4330_v48  ;;  %3716 = vadd.xlane.f32.xlu2 %v3715_v3  ;;  %v11005_v59 = vld [vmem:[#allocation21_spill] sm:$0xff] }
 0x7a9   : > { %v10995_v53 = vperm.slane %v10865_v23, 5  ;;  %v4123_v9 = vsub.f32 1.5, %v4122_v25  ;;  %v3523_v31 = vadd.f32 %v9389_v47, %v3409_v39  ;;  %v4397_v12 = vadd.f32 %v9419_v38, %v4363_v51  ;;  %v11004_v39 = vld [vmem:[#allocation13_spill] sm:$0xff] }
 0x7aa   : > { %v3178_v33 = vadd.f32 %v3146_v34, %v3064_v54  ;;  %v10997_v19 = vperm.slane %v10865_v23, 6  ;;  %v4134_v15 = vmul.f32 %v9378_v2, %v4133_v45  ;;  %vm4136_vm0 = vweird.f32 %v9378_v2 }
 0x7ab   : > { %v3378_v35 = vmul.f32 %v10996_v8, %v10995_v53  ;;  %v3718_v41 = vsel %vm3639_vm8, %v9497_v37, 0.0  ;;  %v9516_v1 = vadd.f32 %v3605_v27, %v3523_v31  ;;  %v4398_v57 = vadd.f32 %v9419_v38, %v4364_v60  ;;  %v9571_v31 = vpop.f32.mrf.mxu1 }
 0x7ac   : > { %v3492_v52 = vmul.f32 %v10998_v40, %v10997_v19  ;;  %v3292_v18 = vadd.f32 %v3260_v63, %v3178_v33  ;;  %v3827_v47 = vmul.f32 %v9501_v56, %v9501_v56  ;;  %v3606_v30 = vmul.f32 %v7734_v14, %v3540_v62  ;;  %3719 = vadd.xlane.f32.xlu0 %v3718_v41 }
 0x7ad   : > { %v3410_v26 = vadd.f32 %v3378_v35, %v3296_v5  ;;  %v10999_v23 = vperm.slane %v10850_v61, 5  ;;  %v4124_v22 = vmul.f32 %v9401_v42, %v4123_v9  ;;  %vm4126_vm1 = vweird.f32 %v9401_v42 }
 0x7ae   : > { %vm4135_vm2 = vweird.f32 %v9313_v17  ;;  %v4424_v44 = vpack.c.bf16 %v4398_v57, %v4397_v12  ;;  %vm4125_vm4 = vweird.f32 %v9325_v24  ;;  %v3730_v20 = vsel %vm3639_vm8, %v9516_v1, 0.0 }
 0x7af   : > { %v3374_v21 = vmul.f32 %v10996_v8, %v10999_v23  ;;  %vm9528_vm3 = vmor %vm4135_vm2, %vm4136_vm0  ;;  %v3524_v7 = vadd.f32 %v3492_v52, %v3410_v26  ;;  %3731 = vadd.xlane.f32.xlu1 %v3730_v20  ;;  %v3899_v17 = vsel %vm3639_vm8, %v3827_v47, 0.0  ;;  %v11002_v54 = vperm.slane %v10850_v61, 6 }
 0x7b0   : > { %v4138_v62 = vsel %vm9528_vm3, %v9378_v2, %v4134_v15  ;;  %vm4127_vm5 = vmor %vm4125_vm4, %vm4126_vm1  ;;  %4841 = vmatmul.msk.bf16.gmra.mxu2 %vm3639_vm8, %v4424_v44  ;;  %v11003_v24 = vperm.slane %v10850_v61, 7  ;;  %3900 = vadd.xlane.f32.xlu2 %v3899_v17  ;;  %v3765_v46 = vmul.f32 %v8016_v49, %v3708_v10  ;;  %v3949_v33 = vmul.f32 %v9357_v36, %v8016_v49 }
 0x7b1   : > { %v3406_v48 = vadd.f32 %v3374_v21, %v3292_v18  ;;  %v9540_v4 = vadd.f32 %v3606_v30, %v3524_v7  ;;  %v3488_v25 = vmul.f32 %v10998_v40, %v11002_v54  ;;  %v4128_v2 = vsel %vm4127_vm5, %v9401_v42, %v4124_v22  ;;  %v11007_v54 = vld [vmem:[#allocation14_spill] sm:$0xff] }
 0x7b2   : > { %v3602_v0 = vmul.f32 %v7734_v14, %v11003_v24  ;;  %v4332_v51 = vmul.f32 %v4138_v62, %v11004_v39  ;;  %v4331_v34 = vmul.f32 %v4128_v2, %v11005_v59  ;;  %v11006_v14 = vld [vmem:[#allocation48_spill] sm:$0xff]  ;;  %v3981_v9 = vadd.f32 1e-05, %v3949_v33 }
 0x7b3   : > { %v3520_v5 = vadd.f32 %v3488_v25, %v3406_v48  ;;  %v3733_v63 = vsel %vm3639_vm8, %v9540_v4, 0.0  ;;  %v9558_v3 = vsub.f32 %v11006_v14, %v3765_v46  ;;  %v9573_v19 = vpop.f32.mrf.mxu1 }
 0x7b4   : > { %3734 = vadd.xlane.f32.xlu0 %v3733_v63  ;;  %v4366_v61 = vmul.f32 %v9383_v16, %v4332_v51  ;;  %v4365_v27 = vmul.f32 %v9383_v16, %v4331_v34  ;;  %5067 = vrsqrt.f32 %v3981_v9  ;;  %vm4145_vm7 = vweird.f32 %v3981_v9 }
 0x7b5   : > { %v9554_v45 = vadd.f32 %v3602_v0, %v3520_v5  ;;  %v3829_v53 = vmul.f32 %v9558_v3, %v9558_v3  ;;  %v11008_v5 = vld [vmem:[#allocation26_spill] sm:$0xff] }
 0x7b6   : > { %v4400_v13 = vadd.f32 %v9419_v38, %v4366_v61  ;;  %v4399_v60 = vadd.f32 %v9419_v38, %v4365_v27 }
 0x7b7   : > { %v3721_v42 = vsel %vm3639_vm8, %v9554_v45, 0.0  ;;  %v3905_v35 = vsel %vm3639_vm8, %v3829_v53, 0.0 }
 0x7b8   : > { %3722 = vadd.xlane.f32.xlu2 %v3721_v42  ;;  %v4425_v8 = vpack.c.bf16 %v4400_v13, %v4399_v60 }
 0x7ba   : > { %v5068_v12 = vpop.eup %5067 }
 0x7bb   : > { %v4140_v26 = vmul.f32 %v5068_v12, %v3981_v9  ;;  %v9576_v30 = vpop.f32.mrf.mxu1  ;;  %vm4146_vm6 = vweird.f32 %v5068_v12 }
 0x7bc   : > { %vm4147_vm9 = vmor %vm4145_vm7, %vm4146_vm6 }
 0x7bd   : > { %v4141_v40 = vmul.f32 %v5068_v12, %v4140_v26 }
 0x7bf   : > { %v4142_v41 = vmul.f32 0.5, %v4141_v40 }
 0x7c0   : > { %4842 = vmatmul.msk.bf16.gmra.mxu2 %vm3639_vm8, %v4425_v8  ;;  %3906 = vadd.xlane.f32.xlu2 %v3905_v35 }
 0x7c1   : > { %v4143_v57 = vsub.f32 1.5, %v4142_v41 }
 0x7c3   : > { %v4144_v21 = vmul.f32 %v5068_v12, %v4143_v57  ;;  %v9586_v2 = vpop.f32.mrf.mxu1 }
 0x7c5   : > { %v4148_v7 = vsel %vm4147_vm9, %v5068_v12, %v4144_v21 }
 0x7c6   : > { %v4333_v25 = vmul.f32 %v4148_v7, %v11007_v54 }
 0x7c8   : > { %v4367_v53 = vmul.f32 %v9383_v16, %v4333_v25 }
 0x7cb   : > { %v9611_v26 = vpop.f32.mrf.mxu1 }
 0x7f2   : > { %v3886_v52 = vpop.xlane.xlu0 %3885 }
 0x7f3   : > { %v3950_v18 = vmul.f32 %v3886_v52, %v8016_v49  ;;  %v11009_v52 = vld [vmem:[#allocation36_spill] sm:$0xff] }
 0x7f5   : > { %v3982_v15 = vadd.f32 1e-05, %v3950_v18 }
 0x7f7   : > { %5069 = vrsqrt.f32 %v3982_v15  ;;  %vm4155_vm11 = vweird.f32 %v3982_v15 }
 0x7fc   : > { %v3889_v47 = vpop.xlane.xlu0 %3888 }
 0x7fd   : > { %v3951_v36 = vmul.f32 %v3889_v47, %v8016_v49  ;;  %v5070_v23 = vpop.eup %5069 }
 0x7fe   : > { %v4150_v22 = vmul.f32 %v5070_v23, %v3982_v15  ;;  %vm4156_vm10 = vweird.f32 %v5070_v23  ;;  %v4401_v15 = vadd.f32 %v9419_v38, %v4367_v53 }
 0x7ff   : > { %v9579_v28 = vadd.f32 1e-05, %v3951_v36  ;;  %vm4157_vm12 = vmor %vm4155_vm11, %vm4156_vm10 }
 0x800   : > { %v4151_v44 = vmul.f32 %v5070_v23, %v4150_v22 }
 0x801   : > { %5071 = vrsqrt.f32 %v9579_v28  ;;  %vm4165_vm14 = vweird.f32 %v9579_v28 }
 0x802   : > { %v4152_v48 = vmul.f32 0.5, %v4151_v44 }
 0x804   : > { %v3711_v62 = vpop.xlane.xlu0 %3710  ;;  %v4153_v20 = vsub.f32 1.5, %v4152_v48 }
 0x805   : > { %v3766_v17 = vmul.f32 %v8016_v49, %v3711_v62  ;;  %v11010_v62 = vld [vmem:[#allocation10_spill] sm:$0xff] }
 0x806   : > { %v4154_v10 = vmul.f32 %v5070_v23, %v4153_v20 }
 0x807   : > { %v3892_v24 = vpop.xlane.xlu2 %3891  ;;  %v9584_v0 = vpop.eup %5071  ;;  %v9590_v59 = vsub.f32 %v11008_v5, %v3766_v17 }
 0x808   : > { %v3898_v39 = vpop.xlane.xlu1 %3897  ;;  %v3952_v51 = vmul.f32 %v3892_v24, %v8016_v49  ;;  %v4160_v34 = vmul.f32 %v9584_v0, %v9579_v28  ;;  %v4158_v63 = vsel %vm4157_vm12, %v5070_v23, %v4154_v10  ;;  %vm4166_vm13 = vweird.f32 %v9584_v0 }
 0x809   : > { %v3954_v46 = vmul.f32 %v3898_v39, %v8016_v49  ;;  %v3830_v14 = vmul.f32 %v9590_v59, %v9590_v59  ;;  %v4334_v42 = vmul.f32 %v4158_v63, %v9219_v32  ;;  %v9609_v32 = vpop.f32.mrf.mxu2  ;;  %vm9639_vm15 = vmor %vm4165_vm14, %vm4166_vm13 }
 0x80a   : > { %v9595_v61 = vadd.f32 1e-05, %v3952_v51  ;;  %v4161_v27 = vmul.f32 %v9584_v0, %v4160_v34 }
 0x80b   : > { %v9601_v13 = vadd.f32 1e-05, %v3954_v46  ;;  %v3908_v60 = vsel %vm3639_vm8, %v3830_v14, 0.0  ;;  %v4368_v9 = vmul.f32 %v9383_v16, %v4334_v42 }
 0x80c   : > { %5073 = vrsqrt.f32 %v9595_v61  ;;  %v4162_v8 = vmul.f32 0.5, %v4161_v27  ;;  %3909 = vadd.xlane.f32.xlu1 %v3908_v60  ;;  %v3714_v35 = vpop.xlane.xlu0 %3713  ;;  %vm4175_vm1 = vweird.f32 %v9595_v61 }
 0x80d   : > { %5075 = vrsqrt.f32 %v9601_v13  ;;  %v3767_v33 = vmul.f32 %v8016_v49, %v3714_v35  ;;  %v4402_v41 = vadd.f32 %v9419_v38, %v4368_v9  ;;  %v9656_v35 = vpop.f32.mrf.mxu1  ;;  %vm4195_vm5 = vweird.f32 %v9601_v13 }
 0x80e   : > { %v4163_v12 = vsub.f32 1.5, %v4162_v8 }
 0x80f   : > { %v9614_v18 = vsub.f32 %v11009_v52, %v3767_v33  ;;  %v4426_v21 = vpack.c.bf16 %v4402_v41, %v4401_v15 }
 0x810   : > { %v3726_v40 = vpop.xlane.xlu1 %3725  ;;  %v4164_v7 = vmul.f32 %v9584_v0, %v4163_v12 }
 0x811   : > { %v3771_v57 = vmul.f32 %v8016_v49, %v3726_v40  ;;  %v3831_v22 = vmul.f32 %v9614_v18, %v9614_v18  ;;  %4843 = vmatmul.msk.bf16.gmra.mxu2 %vm3639_vm8, %v4426_v21  ;;  %v9653_v27 = vpop.f32.mrf.mxu2 }
 0x812   : > { %v3895_v47 = vpop.xlane.xlu2 %3894  ;;  %v5074_v36 = vpop.eup %5073  ;;  %v4168_v28 = vsel %vm9639_vm15, %v9584_v0, %v4164_v7 }
 0x813   : > { %v3953_v23 = vmul.f32 %v3895_v47, %v8016_v49  ;;  %v9622_v44 = vpop.eup %5075  ;;  %v4170_v48 = vmul.f32 %v5074_v36, %v9595_v61  ;;  %v9628_v20 = vsub.f32 %v11010_v62, %v3771_v57  ;;  %v3911_v10 = vsel %vm3639_vm8, %v3831_v22, 0.0 }
 0x814   : > { %v4190_v17 = vmul.f32 %v9622_v44, %v9601_v13  ;;  %v3729_v39 = vpop.xlane.xlu0 %3728  ;;  %3912 = vadd.xlane.f32.xlu0 %v3911_v10  ;;  %vm4176_vm0 = vweird.f32 %v5074_v36  ;;  %v4335_v33 = vmul.f32 %v4168_v28, %v9255_v58  ;;  %vm4196_vm3 = vweird.f32 %v9622_v44 }
 0x815   : > { %v9632_v54 = vadd.f32 1e-05, %v3953_v23  ;;  %v4171_v25 = vmul.f32 %v5074_v36, %v4170_v48  ;;  %v3835_v24 = vmul.f32 %v9628_v20, %v9628_v20  ;;  %v3772_v34 = vmul.f32 %v8016_v49, %v3729_v39  ;;  %vm4177_vm2 = vmor %vm4175_vm1, %vm4176_vm0 }
 0x816   : > { %v4191_v5 = vmul.f32 %v9622_v44, %v4190_v17  ;;  %v4369_v22 = vmul.f32 %v9383_v16, %v4335_v33  ;;  %vm9703_vm6 = vmor %vm4195_vm5, %vm4196_vm3 }
 0x817   : > { %5077 = vrsqrt.f32 %v9632_v54  ;;  %v4172_v46 = vmul.f32 0.5, %v4171_v25  ;;  %v3923_v63 = vsel %vm3639_vm8, %v3835_v24, 0.0  ;;  %v9651_v42 = vsub.f32 %v9374_v6, %v3772_v34 }
 0x818   : > { %3924 = vadd.xlane.f32.xlu1 %v3923_v63  ;;  %v4192_v0 = vmul.f32 0.5, %v4191_v5  ;;  %v4403_v51 = vadd.f32 %v9419_v38, %v4369_v22  ;;  %vm4185_vm7 = vweird.f32 %v9632_v54 }
 0x819   : > { %v3904_v14 = vpop.xlane.xlu1 %3903  ;;  %v4173_v60 = vsub.f32 1.5, %v4172_v46  ;;  %v3836_v12 = vmul.f32 %v9651_v42, %v9651_v42  ;;  %v9689_v28 = vpop.f32.mrf.mxu2 }
 0x81a   : > { %v3956_v53 = vmul.f32 %v3904_v14, %v8016_v49  ;;  %v4193_v23 = vsub.f32 1.5, %v4192_v0  ;;  %v9696_v14 = vpop.f32.mrf.mxu1 }
 0x81b   : > { %v3717_v8 = vpop.xlane.xlu2 %3716  ;;  %v4174_v40 = vmul.f32 %v5074_v36, %v4173_v60  ;;  %v3926_v41 = vsel %vm3639_vm8, %v3836_v12, 0.0 }
 0x81c   : > { %v3768_v9 = vmul.f32 %v8016_v49, %v3717_v8  ;;  %v9663_v6 = vadd.f32 1e-05, %v3956_v53  ;;  %3927 = vadd.xlane.f32.xlu0 %v3926_v41  ;;  %v4194_v10 = vmul.f32 %v9622_v44, %v4193_v23 }
 0x81d   : > { %v5078_v52 = vpop.eup %5077  ;;  %v4178_v57 = vsel %vm4177_vm2, %v5074_v36, %v4174_v40 }
 0x81e   : > { %v9666_v15 = vsub.f32 %v9477_v43, %v3768_v9  ;;  %v4180_v58 = vmul.f32 %v5078_v52, %v9632_v54  ;;  %5079 = vrsqrt.f32 %v9663_v6  ;;  %v4336_v21 = vmul.f32 %v4178_v57, %v9328_v29 }
 0x81f   : > { %v3720_v47 = vpop.xlane.xlu0 %3719  ;;  %vm4186_vm4 = vweird.f32 %v5078_v52  ;;  %v4198_v40 = vsel %vm9703_vm6, %v9622_v44, %v4194_v10  ;;  %vm4215_vm12 = vweird.f32 %v9663_v6 }
 0x820   : > { %v3832_v61 = vmul.f32 %v9666_v15, %v9666_v15  ;;  %v4181_v7 = vmul.f32 %v5078_v52, %v4180_v58  ;;  %v3769_v43 = vmul.f32 %v8016_v49, %v3720_v47  ;;  %v4370_v62 = vmul.f32 %v9383_v16, %v4336_v21  ;;  %vm4187_vm9 = vmor %vm4185_vm7, %vm4186_vm4 }
 0x821   : > { %v4338_v21 = vmul.f32 %v4198_v40, %v9351_v11 }
 0x822   : > { %v3732_v48 = vpop.xlane.xlu1 %3731  ;;  %v3914_v36 = vsel %vm3639_vm8, %v3832_v61, 0.0  ;;  %v4182_v17 = vmul.f32 0.5, %v4181_v7  ;;  %v9681_v24 = vsub.f32 %v9497_v37, %v3769_v43  ;;  %v4404_v5 = vadd.f32 %v9419_v38, %v4370_v62  ;;  %v9730_v43 = vpop.f32.mrf.mxu2 }
 0x823   : > { %v3773_v25 = vmul.f32 %v8016_v49, %v3732_v48  ;;  %3915 = vadd.xlane.f32.xlu2 %v3914_v36  ;;  %v3901_v29 = vpop.xlane.xlu2 %3900  ;;  %v9732_v48 = vpop.f32.mrf.mxu1  ;;  %v4372_v62 = vmul.f32 %v9383_v16, %v4338_v21 }
 0x824   : > { %v3955_v39 = vmul.f32 %v3901_v29, %v8016_v49  ;;  %v9687_v34 = vpop.eup %5079  ;;  %v4183_v46 = vsub.f32 1.5, %v4182_v17  ;;  %v3833_v37 = vmul.f32 %v9681_v24, %v9681_v24  ;;  %v4427_v8 = vpack.c.bf16 %v4404_v5, %v4403_v51 }
 0x825   : > { %v9692_v63 = vsub.f32 %v9516_v1, %v3773_v25  ;;  %v4210_v60 = vmul.f32 %v9687_v34, %v9663_v6  ;;  %vm4216_vm10 = vweird.f32 %v9687_v34 }
 0x826   : > { %v3987_v53 = vadd.f32 1e-05, %v3955_v39  ;;  %v4184_v1 = vmul.f32 %v5078_v52, %v4183_v46  ;;  %4844 = vmatmul.msk.bf16.gmra.mxu2 %vm3639_vm8, %v4427_v8  ;;  %v3917_v13 = vsel %vm3639_vm8, %v3833_v37, 0.0  ;;  %v4406_v39 = vadd.f32 %v9419_v38, %v4372_v62  ;;  %vm4217_vm13 = vmor %vm4215_vm12, %vm4216_vm10 }
 0x827   : > { %v3837_v0 = vmul.f32 %v9692_v63, %v9692_v63  ;;  %v3735_v9 = vpop.xlane.xlu0 %3734  ;;  %v4211_v57 = vmul.f32 %v9687_v34, %v4210_v60 }
 0x828   : > { %5081 = vrsqrt.f32 %v3987_v53  ;;  %v3774_v12 = vmul.f32 %v8016_v49, %v3735_v9  ;;  %v4188_v41 = vsel %vm4187_vm9, %v5078_v52, %v4184_v1  ;;  %vm4205_vm14 = vweird.f32 %v3987_v53 }
 0x829   : > { %v3929_v54 = vsel %vm3639_vm8, %v3837_v0, 0.0  ;;  %v4337_v58 = vmul.f32 %v4188_v41, %v9404_v50  ;;  %v4212_v52 = vmul.f32 0.5, %v4211_v57 }
 0x82a   : > { %3930 = vadd.xlane.f32.xlu0 %v3929_v54  ;;  %v9720_v47 = vsub.f32 %v9540_v4, %v3774_v12  ;;  %v9745_v60 = vpop.f32.mrf.mxu2 }
 0x82b   : > { %v3723_v23 = vpop.xlane.xlu2 %3722  ;;  %3918 = vadd.xlane.f32.xlu2 %v3917_v13  ;;  %v4371_v50 = vmul.f32 %v9383_v16, %v4337_v58  ;;  %v4213_v17 = vsub.f32 1.5, %v4212_v52  ;;  %v9748_v1 = vpop.f32.mrf.mxu1 }
 0x82c   : > { %v3770_v61 = vmul.f32 %v8016_v49, %v3723_v23  ;;  %v3838_v44 = vmul.f32 %v9720_v47, %v9720_v47 }
 0x82d   : > { %v4214_v51 = vmul.f32 %v9687_v34, %v4213_v17 }
 0x82e   : > { %v5082_v22 = vpop.eup %5081  ;;  %v9727_v7 = vsub.f32 %v9554_v45, %v3770_v61  ;;  %v3932_v36 = vsel %vm3639_vm8, %v3838_v44, 0.0  ;;  %v4405_v45 = vadd.f32 %v9419_v38, %v4371_v50 }
 0x82f   : > { %v4200_v4 = vmul.f32 %v5082_v22, %v3987_v53  ;;  %vm4206_vm11 = vweird.f32 %v5082_v22  ;;  %v4218_v8 = vsel %vm4217_vm13, %v9687_v34, %v4214_v51 }
 0x830   : > { %v3834_v11 = vmul.f32 %v9727_v7, %v9727_v7  ;;  %v4428_v46 = vpack.c.bf16 %v4406_v39, %v4405_v45  ;;  %vm4207_vm15 = vmor %vm4205_vm14, %vm4206_vm11  ;;  %v4340_v9 = vmul.f32 %v4218_v8, %v9445_v55  ;;  %v5171_v55 = vld [vmem:[%s10165_s2] sm:$0x3] }
 0x831   : > { %v4201_v25 = vmul.f32 %v5082_v22, %v4200_v4  ;;  %v9768_v54 = vperm.slane %v5171_v55, 1 }
 0x832   : > { %v3920_v29 = vsel %vm3639_vm8, %v3834_v11, 0.0  ;;  %v4374_v13 = vmul.f32 %v9383_v16, %v4340_v9  ;;  %v9755_v12 = vpop.f32.mrf.mxu2  ;;  %v9785_v11 = vld [vmem:[%s10168_s5 + $0x20] ss:$0 sm:$0xff] }
 0x833   : > { %v4202_v10 = vmul.f32 0.5, %v4201_v25  ;;  %3921 = vadd.xlane.f32.xlu1 %v3920_v29  ;;  %3933 = vadd.xlane.f32.xlu2 %v3932_v36  ;;  %v9757_v40 = vpop.f32.mrf.mxu1  ;;  %v1281_v58 = vadd.f32 %v9571_v31, %v9768_v54  ;;  %v1283_v44 = vadd.f32 %v9573_v19, %v9768_v54  ;;  %v1286_v31 = vadd.f32 %v9576_v30, %v9768_v54  ;;  %v3907_v39 = vpop.xlane.xlu2 %3906 }
 0x834   : > { %v4408_v41 = vadd.f32 %v9419_v38, %v4374_v13  ;;  %v4501_v62 = vadd.f32 %v9785_v11, %v9609_v32  ;;  %v1288_v51 = vadd.f32 %v9586_v2, %v9768_v54  ;;  %v3957_v30 = vmul.f32 %v3907_v39, %v8016_v49 }
 0x835   : > { %v4203_v5 = vsub.f32 1.5, %v4202_v10  ;;  %v1648_v61 = vmul.f32 0.5, %v1281_v58  ;;  %v1650_v19 = vmul.f32 0.5, %v1286_v31  ;;  %v4503_v32 = vadd.f32 %v9785_v11, %v9653_v27 }
 0x836   : > { %4845 = vmatmul.msk.bf16.gmra.mxu2 %vm3639_vm8, %v4428_v46  ;;  %v1651_v46 = vmul.f32 0.5, %v1288_v51  ;;  %v4506_v27 = vadd.f32 %v9785_v11, %v9689_v28 }
 0x837   : > { %v4204_v37 = vmul.f32 %v5082_v22, %v4203_v5  ;;  %5083 = vtanh.f32 %v1648_v61  ;;  %v1293_v61 = vadd.f32 %v9656_v35, %v9768_v54 }
 0x839   : > { %v4208_v33 = vsel %vm4207_vm15, %v5082_v22, %v4204_v37  ;;  %v1649_v22 = vmul.f32 0.5, %v1283_v44  ;;  %v1653_v31 = vmul.f32 0.5, %v1293_v61 }
 0x83a   : > { %v4339_v0 = vmul.f32 %v4208_v33, %v9501_v56  ;;  %v9761_v57 = vpop.f32.mrf.mxu2  ;;  %v9800_v33 = vadd.f32 1e-05, %v3957_v30  ;;  %v4511_v30 = vadd.f32 %v9785_v11, %v9745_v60 }
 0x83b   : > { %v9763_v56 = vpop.f32.mrf.mxu1  ;;  %5085 = vtanh.f32 %v1649_v22 }
 0x83c   : > { %v4373_v6 = vmul.f32 %v9383_v16, %v4339_v0  ;;  %5087 = vtanh.f32 %v1650_v19  ;;  %vm4225_vm1 = vweird.f32 %v9800_v33 }
 0x83d   : > { %v5084_v4 = vpop.eup %5083  ;;  %5089 = vtanh.f32 %v1651_v46 }
 0x83e   : > { %v4407_v53 = vadd.f32 %v9419_v38, %v4373_v6  ;;  %v1712_v36 = vadd.f32 1.0, %v5084_v4  ;;  %v1291_v6 = vadd.f32 %v9611_v26, %v9768_v54  ;;  %5091 = vrsqrt.f32 %v9800_v33 }
 0x83f   : > { %v4508_v4 = vadd.f32 %v9785_v11, %v9730_v43  ;;  %v1298_v43 = vadd.f32 %v9732_v48, %v9768_v54 }
 0x840   : > { %v4429_v34 = vpack.c.bf16 %v4408_v41, %v4407_v53  ;;  %v1744_v17 = vmul.f32 0.5, %v1712_v36  ;;  %v1652_v53 = vmul.f32 0.5, %v1291_v6  ;;  %v1296_v36 = vadd.f32 %v9696_v14, %v9768_v54 }
 0x841   : > { %v5086_v29 = vpop.eup %5085  ;;  %v1301_v14 = vadd.f32 %v9748_v1, %v9768_v54  ;;  %v1303_v1 = vadd.f32 %v9757_v40, %v9768_v54  ;;  %v4513_v40 = vadd.f32 %v9785_v11, %v9755_v12 }
 0x842   : > { %v9772_v23 = vpop.f32.mrf.mxu2  ;;  %v4580_v10 = vmul.f32 %v4501_v62, %v1744_v17  ;;  %v1713_v5 = vadd.f32 1.0, %v5086_v29  ;;  %v5088_v8 = vpop.eup %5087  ;;  %5093 = vtanh.f32 %v1652_v53  ;;  %v1654_v39 = vmul.f32 0.5, %v1296_v36 }
 0x843   : > { %v9774_v21 = vpop.f32.mrf.mxu1  ;;  %v1714_v13 = vadd.f32 1.0, %v5088_v8  ;;  %5095 = vtanh.f32 %v1653_v31  ;;  %v1656_v48 = vmul.f32 0.5, %v1301_v14 }
 0x844   : > { %v1745_v37 = vmul.f32 0.5, %v1713_v5 }
 0x845   : > { %v1746_v41 = vmul.f32 0.5, %v1714_v13 }
 0x846   : > { %4846 = vmatmul.msk.bf16.gmra.mxu2 %vm3639_vm8, %v4429_v34  ;;  %v4581_v0 = vmul.f32 %v4503_v32, %v1745_v37  ;;  %v5090_v34 = vpop.eup %5089 }
 0x847   : > { %v4582_v55 = vmul.f32 %v4506_v27, %v1746_v41  ;;  %v9811_v58 = vpop.eup %5091  ;;  %v1715_v26 = vadd.f32 1.0, %v5090_v34 }
 0x848   : > { %v4220_v28 = vmul.f32 %v9811_v58, %v9800_v33  ;;  %v5094_v19 = vpop.eup %5093  ;;  %vm4226_vm0 = vweird.f32 %v9811_v58 }
 0x849   : > { %v1747_v62 = vmul.f32 0.5, %v1715_v26  ;;  %v1716_v51 = vadd.f32 1.0, %v5094_v19  ;;  %v5096_v6 = vpop.eup %5095  ;;  %vm9856_vm2 = vmor %vm4225_vm1, %vm4226_vm0 }
 0x84a   : > { %v9778_v52 = vpop.f32.mrf.mxu2  ;;  %v4221_v29 = vmul.f32 %v9811_v58, %v4220_v28  ;;  %v1717_v34 = vadd.f32 1.0, %v5096_v6 }
 0x84b   : > { %v9780_v50 = vpop.f32.mrf.mxu1  ;;  %v4583_v35 = vmul.f32 %v4508_v4, %v1747_v62  ;;  %v1748_v8 = vmul.f32 0.5, %v1716_v51  ;;  %v1657_v62 = vmul.f32 0.5, %v1303_v1 }
 0x84c   : > { %v4222_v32 = vmul.f32 0.5, %v4221_v29 }
 0x84d   : > { %v4584_v13 = vmul.f32 %v4511_v30, %v1748_v8 }
 0x84e   : > { %v4223_v27 = vsub.f32 1.5, %v4222_v32 }
 0x850   : > { %v4224_v36 = vmul.f32 %v9811_v58, %v4223_v27 }
 0x852   : > { %v9791_v25 = vpop.f32.mrf.mxu2  ;;  %v4228_v32 = vsel %vm9856_vm2, %v9811_v58, %v4224_v36 }
 0x853   : > { %v9793_v45 = vpop.f32.mrf.mxu1 }
 0x85a   : > { %v9802_v9 = vpop.f32.mrf.mxu2 }
 0x85b   : > { %v9806_v2 = vpop.f32.mrf.mxu1 }
 0x862   : > { %v9815_v44 = vpop.f32.mrf.mxu2 }
 0x863   : > { %v9817_v22 = vpop.f32.mrf.mxu1 }
 0x86a   : > { %v9835_v46 = vpop.f32.mrf.mxu2 }
 0x86b   : > { %v1320_v37 = vpop.f32.mrf.mxu1 }
 0x86c   : > { %v1321_v31 = vadd.f32 %v1320_v37, %v9768_v54 }
 0x86d   : > { %4612 = vxpose.xlu1.b32.start [1/16] %v4580_v10, 128 }
 0x86e   : > { %v1664_v14 = vmul.f32 0.5, %v1321_v31 }
 0x875   : > { %4613 = vxpose.xlu1.b32.cont [2/16] %v4581_v0, 128  ;;  %v1655_v0 = vmul.f32 0.5, %v1298_v43 }
 0x87d   : > { %4614 = vxpose.xlu1.b32.cont [3/16] %v4582_v55, 128 }
 0x87f   : > { %v3910_v17 = vpop.xlane.xlu1 %3909 }
 0x880   : > { %v3958_v10 = vmul.f32 %v3910_v17, %v8016_v49 }
 0x882   : > { %v9829_v5 = vadd.f32 1e-05, %v3958_v10  ;;  %v9854_v10 = vpop.f32.mrf.mxu2 }
 0x884   : > { %5097 = vrsqrt.f32 %v9829_v5  ;;  %vm4235_vm4 = vweird.f32 %v9829_v5 }
 0x885   : > { %4615 = vxpose.xlu1.b32.cont [4/16] %v4583_v35, 128  ;;  %5099 = vtanh.f32 %v1654_v39  ;;  %v1749_v35 = vmul.f32 0.5, %v1717_v34  ;;  %v1322_v39 = vpop.f32.mrf.mxu1  ;;  %v4516_v34 = vadd.f32 %v9785_v11, %v9761_v57 }
 0x886   : > { %5101 = vtanh.f32 %v1655_v0 }
 0x887   : > { %v3913_v53 = vpop.xlane.xlu0 %3912  ;;  %5103 = vtanh.f32 %v1656_v48  ;;  %v4585_v30 = vmul.f32 %v4513_v40, %v1749_v35  ;;  %v1306_v48 = vadd.f32 %v9763_v56, %v9768_v54 }
 0x888   : > { %v3959_v41 = vmul.f32 %v3913_v53, %v8016_v49  ;;  %v4341_v53 = vmul.f32 %v4228_v32, %v9558_v3 }
 0x88a   : > { %v5098_v60 = vpop.eup %5097  ;;  %v9843_v28 = vadd.f32 1e-05, %v3959_v41 }
 0x88b   : > { %v3925_v55 = vpop.xlane.xlu1 %3924  ;;  %v5100_v61 = vpop.eup %5099  ;;  %v4230_v26 = vmul.f32 %v5098_v60, %v9829_v5  ;;  %vm4236_vm3 = vweird.f32 %v5098_v60  ;;  %v1658_v5 = vmul.f32 0.5, %v1306_v48 }
 0x88c   : > { %v3963_v4 = vmul.f32 %v3925_v55, %v8016_v49  ;;  %5105 = vrsqrt.f32 %v9843_v28  ;;  %v1718_v29 = vadd.f32 1.0, %v5100_v61  ;;  %v5102_v43 = vpop.eup %5101  ;;  %vm4237_vm5 = vmor %vm4235_vm4, %vm4236_vm3  ;;  %vm4245_vm12 = vweird.f32 %v9843_v28 }
 0x88d   : > { %4616 = vxpose.xlu1.b32.cont [5/16] %v4584_v13, 128  ;;  %v4231_v19 = vmul.f32 %v5098_v60, %v4230_v26  ;;  %v5104_v8 = vpop.eup %5103  ;;  %v1323_v13 = vadd.f32 %v1322_v39, %v9768_v54  ;;  %v1719_v26 = vadd.f32 1.0, %v5102_v43 }
 0x88e   : > { %v9850_v17 = vadd.f32 1e-05, %v3963_v4  ;;  %v1750_v6 = vmul.f32 0.5, %v1718_v29  ;;  %v1720_v3 = vadd.f32 1.0, %v5104_v8  ;;  %v4375_v29 = vmul.f32 %v9383_v16, %v4341_v53 }
 0x88f   : > { %v4232_v12 = vmul.f32 0.5, %v4231_v19  ;;  %v3928_v37 = vpop.xlane.xlu0 %3927  ;;  %v1665_v19 = vmul.f32 0.5, %v1323_v13  ;;  %v4518_v53 = vadd.f32 %v9785_v11, %v9772_v23 }
 0x890   : > { %5107 = vrsqrt.f32 %v9850_v17  ;;  %v3964_v0 = vmul.f32 %v3928_v37, %v8016_v49  ;;  %v4586_v39 = vmul.f32 %v4516_v34, %v1750_v6  ;;  %v4409_v13 = vadd.f32 %v9419_v38, %v4375_v29 }
 0x891   : > { %5109 = vtanh.f32 %v1657_v62  ;;  %v4233_v33 = vsub.f32 1.5, %v4232_v12  ;;  %v1751_v12 = vmul.f32 0.5, %v1719_v26  ;;  %vm4285_vm7 = vweird.f32 %v9850_v17 }
 0x892   : > { %v9868_v27 = vpop.eup %5105  ;;  %v9872_v41 = vadd.f32 1e-05, %v3964_v0  ;;  %5111 = vtanh.f32 %v1664_v14  ;;  %v1325_v0 = vpop.f32.mrf.mxu1 }
 0x893   : > { %v4234_v1 = vmul.f32 %v5098_v60, %v4233_v33  ;;  %v4240_v56 = vmul.f32 %v9868_v27, %v9843_v28  ;;  %vm4246_vm10 = vweird.f32 %v9868_v27 }
 0x894   : > { %5113 = vrsqrt.f32 %v9872_v41  ;;  %v9886_v36 = vpop.f32.mrf.mxu2  ;;  %vm4295_vm13 = vweird.f32 %v9872_v41  ;;  %vm9948_vm14 = vmor %vm4245_vm12, %vm4246_vm10 }
 0x895   : > { %4617 = vxpose.xlu1.b32.cont [6/16] %v4585_v30, 128  ;;  %v4238_v4 = vsel %vm4237_vm5, %v5098_v60, %v4234_v1  ;;  %v4241_v57 = vmul.f32 %v9868_v27, %v4240_v56 }
 0x896   : > { %v3916_v58 = vpop.xlane.xlu2 %3915  ;;  %v9879_v61 = vpop.eup %5107  ;;  %v4342_v31 = vmul.f32 %v4238_v4, %v9590_v59  ;;  %v9893_v59 = vmul.f32 0.5, %v1720_v3 }
 0x897   : > { %v3960_v55 = vmul.f32 %v3916_v58, %v8016_v49  ;;  %v4280_v40 = vmul.f32 %v9879_v61, %v9850_v17  ;;  %v5110_v62 = vpop.eup %5109  ;;  %v4242_v43 = vmul.f32 0.5, %v4241_v57  ;;  %vm4286_vm6 = vweird.f32 %v9879_v61 }
 0x898   : > { %v4376_v51 = vmul.f32 %v9383_v16, %v4342_v31  ;;  %v5112_v14 = vpop.eup %5111  ;;  %v9896_v30 = vadd.f32 1.0, %v5110_v62  ;;  %v1308_v16 = vadd.f32 %v9774_v21, %v9768_v54  ;;  %v1326_v31 = vadd.f32 %v1325_v0, %v9768_v54  ;;  %vm9923_vm9 = vmor %vm4285_vm7, %vm4286_vm6 }
 0x899   : > { %v9888_v35 = vadd.f32 1e-05, %v3960_v55  ;;  %v4281_v60 = vmul.f32 %v9879_v61, %v4280_v40  ;;  %v4243_v34 = vsub.f32 1.5, %v4242_v43  ;;  %v1728_v26 = vadd.f32 1.0, %v5112_v14 }
 0x89a   : > { %v4410_v8 = vadd.f32 %v9419_v38, %v4376_v51  ;;  %v9899_v33 = vpop.eup %5113  ;;  %v4587_v62 = vmul.f32 %v4518_v53, %v1751_v12  ;;  %v4521_v51 = vadd.f32 %v9785_v11, %v9778_v52 }
 0x89b   : > { %5115 = vrsqrt.f32 %v9888_v35  ;;  %v4282_v32 = vmul.f32 0.5, %v4281_v60  ;;  %v4290_v58 = vmul.f32 %v9899_v33, %v9872_v41  ;;  %v4244_v43 = vmul.f32 %v9868_v27, %v4243_v34 }
 0x89c   : > { %5117 = vtanh.f32 %v1658_v5  ;;  %v4430_v55 = vpack.c.bf16 %v4410_v8, %v4409_v13  ;;  %v9916_v23 = vpop.f32.mrf.mxu2  ;;  %v9920_v5 = vmul.f32 0.5, %v1308_v16  ;;  %v1760_v14 = vmul.f32 0.5, %v1728_v26 }
 0x89d   : > { %4618 = vxpose.xlu1.b32.cont [7/16] %v4586_v39, 128  ;;  %v3931_v37 = vpop.xlane.xlu0 %3930  ;;  %5119 = vtanh.f32 %v1665_v19  ;;  %v4283_v1 = vsub.f32 1.5, %v4282_v32  ;;  %v4291_v38 = vmul.f32 %v9899_v33, %v4290_v58  ;;  %vm4296_vm11 = vweird.f32 %v9899_v33 }
 0x89e   : > { %v3919_v6 = vpop.xlane.xlu2 %3918  ;;  %v3965_v48 = vmul.f32 %v3931_v37, %v8016_v49  ;;  %4847 = vmatmul.msk.bf16.gmra.mxu2 %vm3639_vm8, %v4430_v55  ;;  %v4588_v28 = vmul.f32 %v4521_v51, %v9893_v59  ;;  %v4248_v41 = vsel %vm9948_vm14, %v9868_v27, %v4244_v43  ;;  %vm4255_vm15 = vweird.f32 %v9888_v35  ;;  %vm4297_vm0 = vmor %vm4295_vm13, %vm4296_vm11  ;;  %v9973_v59 = vld [vmem:[%s10167_s4] ss:$0 sm:$0xff] }
 0x89f   : > { %v3961_v56 = vmul.f32 %v3919_v6, %v8016_v49  ;;  %v4284_v3 = vmul.f32 %v9879_v61, %v4283_v1  ;;  %v4292_v39 = vmul.f32 0.5, %v4291_v38  ;;  %v1327_v1 = vpop.f32.mrf.mxu1 }
 0x8a0   : > { %v9911_v21 = vadd.f32 1e-05, %v3965_v48 }
 0x8a1   : > { %v9918_v4 = vpop.eup %5115  ;;  %v9927_v57 = vadd.f32 1e-05, %v3961_v56  ;;  %v4288_v19 = vsel %vm9923_vm9, %v9879_v61, %v4284_v3  ;;  %v4293_v32 = vsub.f32 1.5, %v4292_v39  ;;  %v1666_v61 = vmul.f32 0.5, %v1326_v31 }
 0x8a2   : > { %5121 = vrsqrt.f32 %v9911_v21  ;;  %v9931_v17 = vpop.eup %5117  ;;  %v4250_v29 = vmul.f32 %v9918_v4, %v9888_v35  ;;  %v4347_v37 = vmul.f32 %v4288_v19, %v9628_v20  ;;  %vm4256_vm1 = vweird.f32 %v9918_v4 }
 0x8a3   : > { %v5120_v60 = vpop.eup %5119  ;;  %5123 = vrsqrt.f32 %v9927_v57  ;;  %v4294_v6 = vmul.f32 %v9899_v33, %v4293_v32  ;;  %v1328_v19 = vadd.f32 %v1327_v1, %v9768_v54  ;;  %vm4257_vm2 = vmor %vm4255_vm15, %vm4256_vm1  ;;  %vm4265_vm5 = vweird.f32 %v9927_v57 }
 0x8a4   : > { %v4251_v12 = vmul.f32 %v9918_v4, %v4250_v29  ;;  %v1729_v20 = vadd.f32 1.0, %v5120_v60  ;;  %v4381_v27 = vmul.f32 %v9973_v59, %v4347_v37  ;;  %v4523_v29 = vadd.f32 %v9785_v11, %v9791_v25  ;;  %v10001_v25 = vld [vmem:[%s10167_s4 + $0x1] ss:$0 sm:$0xff] }
 0x8a5   : > { %4619 = vxpose.xlu1.b32.cont [8/16] %v4587_v62, 128  ;;  %vm4305_vm7 = vweird.f32 %v9911_v21 }
 0x8a6   : > { %v3922_v52 = vpop.xlane.xlu1 %3921  ;;  %v3934_v8 = vpop.xlane.xlu2 %3933  ;;  %v4252_v0 = vmul.f32 0.5, %v4251_v12  ;;  %v4415_v35 = vadd.f32 %v10001_v25, %v4381_v27 }
 0x8a7   : > { %v3962_v48 = vmul.f32 %v3922_v52, %v8016_v49  ;;  %v3966_v13 = vmul.f32 %v3934_v8, %v8016_v49  ;;  %v4298_v49 = vsel %vm4297_vm0, %v9899_v33, %v4294_v6  ;;  %v4343_v33 = vmul.f32 %v4248_v41, %v9614_v18  ;;  %v1330_v1 = vpop.f32.mrf.mxu1 }
 0x8a8   : > { %v9955_v53 = vpop.eup %5121  ;;  %v4253_v58 = vsub.f32 1.5, %v4252_v0  ;;  %v4348_v55 = vmul.f32 %v4298_v49, %v9651_v42  ;;  %v1722_v6 = vadd.f32 1.0, %v9931_v17 }
 0x8a9   : > { %v4300_v34 = vmul.f32 %v9955_v53, %v9911_v21  ;;  %v9968_v56 = vpop.eup %5123  ;;  %v9977_v26 = vadd.f32 1e-05, %v3962_v48  ;;  %v9979_v3 = vadd.f32 1e-05, %v3966_v13  ;;  %v4540_v62 = vpop.f32.mrf.mxu2  ;;  %v4377_v37 = vmul.f32 %v9973_v59, %v4343_v33 }
 0x8aa   : > { %v4254_v38 = vmul.f32 %v9918_v4, %v4253_v58  ;;  %v4260_v31 = vmul.f32 %v9968_v56, %v9927_v57  ;;  %v4382_v18 = vmul.f32 %v9973_v59, %v4348_v55  ;;  %v4541_v12 = vadd.f32 %v9785_v11, %v4540_v62 }
 0x8ab   : > { %v4301_v40 = vmul.f32 %v9955_v53, %v4300_v34  ;;  %5125 = vrsqrt.f32 %v9977_v26  ;;  %vm4266_vm3 = vweird.f32 %v9968_v56  ;;  %vm4306_vm4 = vweird.f32 %v9955_v53 }
 0x8ac   : > { %v4258_v42 = vsel %vm4257_vm2, %v9918_v4, %v4254_v38  ;;  %v4261_v39 = vmul.f32 %v9968_v56, %v4260_v31  ;;  %5127 = vrsqrt.f32 %v9979_v3  ;;  %v4416_v43 = vadd.f32 %v10001_v25, %v4382_v18  ;;  %vm10035_vm6 = vmor %vm4265_vm5, %vm4266_vm3 }
 0x8ad   : > { %v4302_v60 = vmul.f32 0.5, %v4301_v40  ;;  %4620 = vxpose.xlu1.b32.cont [9/16] %v4588_v28, 128  ;;  %v4344_v51 = vmul.f32 %v4258_v42, %v9666_v15  ;;  %v1753_v4 = vmul.f32 0.5, %v9896_v30  ;;  %5129 = vtanh.f32 %v1666_v61  ;;  %vm10048_vm9 = vmor %vm4305_vm7, %vm4306_vm4 }
 0x8ae   : > { %v4262_v32 = vmul.f32 0.5, %v4261_v39  ;;  %v4596_v8 = vmul.f32 %v4541_v12, %v1760_v14  ;;  %v4433_v0 = vpack.c.bf16 %v4416_v43, %v4415_v35  ;;  %5131 = vtanh.f32 %v9920_v5 }
 0x8af   : > { %v4303_v52 = vsub.f32 1.5, %v4302_v60  ;;  %v4378_v16 = vmul.f32 %v9973_v59, %v4344_v51  ;;  %v1311_v15 = vadd.f32 %v9780_v50, %v9768_v54  ;;  %v1761_v30 = vmul.f32 0.5, %v1729_v20 }
 0x8b0   : > { %v4263_v48 = vsub.f32 1.5, %v4262_v32  ;;  %v1667_v61 = vmul.f32 0.5, %v1328_v19  ;;  %v4589_v28 = vmul.f32 %v4523_v29, %v1753_v4  ;;  %4644 = vxpose.xlu0.b32.start [1/16] %v4596_v8, 128  ;;  %4850 = vmatmul.msk.bf16.vlgmr.msra.gmra.mxu3 %vm3639_vm8, %v4433_v0  ;;  %v4411_v20 = vadd.f32 %v10001_v25, %v4377_v37  ;;  %v1332_v8 = vpop.f32.mrf.mxu1 }
 0x8b1   : > { %v10014_v13 = vpop.eup %5125  ;;  %v4412_v14 = vadd.f32 %v10001_v25, %v4378_v16  ;;  %v4542_v5 = vpop.f32.mrf.mxu2  ;;  %v4304_v58 = vmul.f32 %v9955_v53, %v4303_v52  ;;  %v1331_v55 = vadd.f32 %v1330_v1, %v9768_v54  ;;  %v1660_v31 = vmul.f32 0.5, %v1311_v15 }
 0x8b2   : > { %v10018_v41 = vpop.eup %5127  ;;  %v4264_v17 = vmul.f32 %v9968_v56, %v4263_v48  ;;  %v4270_v50 = vmul.f32 %v10014_v13, %v9977_v26  ;;  %v4543_v34 = vadd.f32 %v9785_v11, %v4542_v5  ;;  %5133 = vtanh.f32 %v1667_v61 }
 0x8b3   : > { %v4310_v49 = vmul.f32 %v10018_v41, %v9979_v3  ;;  %v5130_v27 = vpop.eup %5129  ;;  %v4431_v38 = vpack.c.bf16 %v4412_v14, %v4411_v20  ;;  %v4526_v57 = vadd.f32 %v9785_v11, %v9802_v9  ;;  %v1754_v21 = vmul.f32 0.5, %v1722_v6 }
 0x8b4   : > { %v4271_v33 = vmul.f32 %v10014_v13, %v4270_v50  ;;  %v4597_v19 = vmul.f32 %v4543_v34, %v1761_v30  ;;  %v5132_v29 = vpop.eup %5131  ;;  %v4268_v18 = vsel %vm10035_vm6, %v9968_v56, %v4264_v17  ;;  %v1730_v60 = vadd.f32 1.0, %v5130_v27 }
 0x8b5   : > { %4621 = vxpose.xlu1.b32.cont [10/16] %v4589_v28, 128  ;;  %v4311_v62 = vmul.f32 %v10018_v41, %v4310_v49  ;;  %4848 = vmatmul.msk.bf16.gmra.mxu2 %vm3639_vm8, %v4431_v38  ;;  %v4308_v35 = vsel %vm10048_vm9, %v9955_v53, %v4304_v58  ;;  %v1313_v51 = vadd.f32 %v9793_v45, %v9768_v54  ;;  %v1668_v56 = vmul.f32 0.5, %v1331_v55 }
 0x8b6   : > { %v4272_v39 = vmul.f32 0.5, %v4271_v33  ;;  %vm4276_vm10 = vweird.f32 %v10014_v13  ;;  %5135 = vtanh.f32 %v1660_v31  ;;  %v4345_v12 = vmul.f32 %v4268_v18, %v9681_v24 }
 0x8b7   : > { %v4312_v9 = vmul.f32 0.5, %v4311_v62  ;;  %vm4316_vm11 = vweird.f32 %v10018_v41  ;;  %v4590_v32 = vmul.f32 %v4526_v57, %v1754_v21  ;;  %v4349_v37 = vmul.f32 %v4308_v35, %v9692_v63 }
 0x8b8   : > { %v4273_v43 = vsub.f32 1.5, %v4272_v39  ;;  %4645 = vxpose.xlu0.b32.cont [2/16] %v4597_v19, 128  ;;  %vm4275_vm12 = vweird.f32 %v9977_v26  ;;  %v1762_v45 = vmul.f32 0.5, %v1730_v60  ;;  %vm4315_vm14 = vweird.f32 %v9979_v3  ;;  %v5134_v0 = vpop.eup %5133 }
 0x8b9   : > { %v4313_v4 = vsub.f32 1.5, %v4312_v9  ;;  %v4545_v52 = vpop.f32.mrf.mxu2  ;;  %vm4277_vm13 = vmor %vm4275_vm12, %vm4276_vm10  ;;  %v1723_v6 = vadd.f32 1.0, %v5132_v29  ;;  %v1661_v15 = vmul.f32 0.5, %v1313_v51  ;;  %5137 = vtanh.f32 %v1668_v56 }
 0x8ba   : > { %v4274_v53 = vmul.f32 %v10014_v13, %v4273_v43  ;;  %v4546_v24 = vadd.f32 %v9785_v11, %v4545_v52  ;;  %vm4317_vm15 = vmor %vm4315_vm14, %vm4316_vm11  ;;  %v4379_v61 = vmul.f32 %v9973_v59, %v4345_v12  ;;  %v1333_v3 = vadd.f32 %v1332_v8, %v9768_v54 }
 0x8bb   : > { %v4314_v16 = vmul.f32 %v10018_v41, %v4313_v4  ;;  %v4528_v1 = vadd.f32 %v9785_v11, %v9815_v44  ;;  %v1731_v17 = vadd.f32 1.0, %v5134_v0  ;;  %v1755_v5 = vmul.f32 0.5, %v1723_v6 }
 0x8bc   : > { %v4278_v63 = vsel %vm4277_vm13, %v10014_v13, %v4274_v53  ;;  %v4598_v30 = vmul.f32 %v4546_v24, %v1762_v45  ;;  %v4383_v13 = vmul.f32 %v9973_v59, %v4349_v37  ;;  %v5136_v14 = vpop.eup %5135  ;;  %5139 = vtanh.f32 %v1661_v15 }
 0x8bd   : > { %4622 = vxpose.xlu1.b32.cont [11/16] %v4590_v32, 128  ;;  %v4346_v26 = vmul.f32 %v4278_v63, %v9727_v7  ;;  %v4318_v48 = vsel %vm4317_vm15, %v10018_v41, %v4314_v16  ;;  %v4413_v41 = vadd.f32 %v10001_v25, %v4379_v61  ;;  %v1669_v49 = vmul.f32 0.5, %v1333_v3 }
 0x8be   : > { %v4350_v28 = vmul.f32 %v4318_v48, %v9720_v47  ;;  %v4591_v44 = vmul.f32 %v4528_v1, %v1755_v5  ;;  %v4417_v47 = vadd.f32 %v10001_v25, %v4383_v13  ;;  %v1316_v55 = vadd.f32 %v9806_v2, %v9768_v54  ;;  %v1335_v48 = vpop.f32.mrf.mxu1 }
 0x8bf   : > { %v4380_v50 = vmul.f32 %v9973_v59, %v4346_v26  ;;  %v5138_v58 = vpop.eup %5137  ;;  %v1763_v33 = vmul.f32 0.5, %v1731_v17  ;;  %v1724_v31 = vadd.f32 1.0, %v5136_v14  ;;  %5141 = vtanh.f32 %v1669_v49  ;;  %v1340_v26 = vpop.f32.mrf.mxu3 }
 0x8c0   : > { %v4384_v7 = vmul.f32 %v9973_v59, %v4350_v28  ;;  %4646 = vxpose.xlu0.b32.cont [3/16] %v4598_v30, 128  ;;  %v4531_v19 = vadd.f32 %v9785_v11, %v9835_v46  ;;  %v1662_v29 = vmul.f32 0.5, %v1316_v55  ;;  %v1732_v57 = vadd.f32 1.0, %v5138_v58 }
 0x8c1   : > { %v4414_v20 = vadd.f32 %v10001_v25, %v4380_v50  ;;  %v4547_v34 = vpop.f32.mrf.mxu2  ;;  %v1756_v2 = vmul.f32 0.5, %v1724_v31  ;;  %v1318_v39 = vadd.f32 %v9817_v22, %v9768_v54  ;;  %v4533_v51 = vadd.f32 %v9785_v11, %v9854_v10 }
 0x8c2   : > { %v4418_v27 = vadd.f32 %v10001_v25, %v4384_v7  ;;  %v4548_v59 = vadd.f32 %v9785_v11, %v4547_v34  ;;  %v5140_v25 = vpop.eup %5139  ;;  %5143 = vtanh.f32 %v1662_v29  ;;  %v1764_v21 = vmul.f32 0.5, %v1732_v57 }
 0x8c3   : > { %v4432_v38 = vpack.c.bf16 %v4414_v20, %v4413_v41  ;;  %v4592_v18 = vmul.f32 %v4531_v19, %v1756_v2  ;;  %v1725_v46 = vadd.f32 1.0, %v5140_v25  ;;  %v1663_v56 = vmul.f32 0.5, %v1318_v39 }
 0x8c4   : > { %v4434_v40 = vpack.c.bf16 %v4418_v27, %v4417_v47  ;;  %v4599_v62 = vmul.f32 %v4548_v59, %v1763_v33  ;;  %v4536_v8 = vadd.f32 %v9785_v11, %v9886_v36  ;;  %v4538_v6 = vadd.f32 %v9785_v11, %v9916_v23 }
 0x8c5   : > { %4623 = vxpose.xlu1.b32.cont [12/16] %v4591_v44, 128  ;;  %4849 = vmatmul.msk.bf16.gmra.mxu2 %vm3639_vm8, %v4432_v38  ;;  %v5142_v35 = vpop.eup %5141  ;;  %v1757_v12 = vmul.f32 0.5, %v1725_v46  ;;  %5145 = vtanh.f32 %v1663_v56  ;;  %v1336_v61 = vadd.f32 %v1335_v48, %v9768_v54  ;;  %v1341_v5 = vadd.f32 %v1340_v26, %v9768_v54 }
 0x8c6   : > { %4851 = vmatmul.msk.bf16.gmra.mxu3 %vm3639_vm8, %v4434_v40  ;;  %v1733_v43 = vadd.f32 1.0, %v5142_v35  ;;  %v1337_v1 = vpop.f32.mrf.mxu1 }
 0x8c7   : > { %v4593_v32 = vmul.f32 %v4533_v51, %v1757_v12  ;;  %v1342_v30 = vpop.f32.mrf.mxu3  ;;  %v1670_v3 = vmul.f32 0.5, %v1336_v61  ;;  %v1338_v28 = vadd.f32 %v1337_v1, %v9768_v54  ;;  %v1672_v49 = vmul.f32 0.5, %v1341_v5 }
 0x8c8   : > { %4647 = vxpose.xlu0.b32.cont [4/16] %v4599_v62, 128  ;;  %v5144_v4 = vpop.eup %5143  ;;  %v1765_v53 = vmul.f32 0.5, %v1733_v43  ;;  %v1343_v27 = vadd.f32 %v1342_v30, %v9768_v54 }
 0x8c9   : > { %v4550_v42 = vpop.f32.mrf.mxu2  ;;  %v1726_v52 = vadd.f32 1.0, %v5144_v4  ;;  %5147 = vtanh.f32 %v1670_v3  ;;  %v1671_v13 = vmul.f32 0.5, %v1338_v28 }
 0x8ca   : > { %v4551_v60 = vadd.f32 %v9785_v11, %v4550_v42  ;;  %v1673_v38 = vmul.f32 0.5, %v1343_v27 }
 0x8cb   : > { %v1758_v16 = vmul.f32 0.5, %v1726_v52  ;;  %v5146_v24 = vpop.eup %5145  ;;  %5149 = vtanh.f32 %v1671_v13 }
 0x8cc   : > { %v4600_v9 = vmul.f32 %v4551_v60, %v1764_v21  ;;  %v1727_v0 = vadd.f32 1.0, %v5146_v24  ;;  %5151 = vtanh.f32 %v1672_v49 }
 0x8cd   : > { %4624 = vxpose.xlu1.b32.cont [13/16] %v4592_v18, 128  ;;  %v4594_v10 = vmul.f32 %v4536_v8, %v1758_v16  ;;  %5153 = vtanh.f32 %v1673_v38 }
 0x8ce   : > { %v1759_v15 = vmul.f32 0.5, %v1727_v0 }
 0x8cf   : > { %v1345_v36 = vpop.f32.mrf.mxu3  ;;  %v5148_v14 = vpop.eup %5147 }
 0x8d0   : > { %4648 = vxpose.xlu0.b32.cont [5/16] %v4600_v9, 128  ;;  %v4595_v63 = vmul.f32 %v4538_v6, %v1759_v15  ;;  %v1734_v50 = vadd.f32 1.0, %v5148_v14  ;;  %v1346_v62 = vadd.f32 %v1345_v36, %v9768_v54 }
 0x8d1   : > { %v4552_v37 = vpop.f32.mrf.mxu2  ;;  %v5150_v20 = vpop.eup %5149 }
 0x8d2   : > { %v4553_v22 = vadd.f32 %v9785_v11, %v4552_v37  ;;  %v1766_v7 = vmul.f32 0.5, %v1734_v50  ;;  %v1735_v44 = vadd.f32 1.0, %v5150_v20  ;;  %v5152_v31 = vpop.eup %5151  ;;  %v1674_v25 = vmul.f32 0.5, %v1346_v62 }
 0x8d3   : > { %v1736_v19 = vadd.f32 1.0, %v5152_v31  ;;  %v5154_v18 = vpop.eup %5153 }
 0x8d4   : > { %v4601_v45 = vmul.f32 %v4553_v22, %v1765_v53  ;;  %v1767_v55 = vmul.f32 0.5, %v1735_v44  ;;  %5155 = vtanh.f32 %v1674_v25  ;;  %v1737_v60 = vadd.f32 1.0, %v5154_v18 }
 0x8d5   : > { %4625 = vxpose.xlu1.b32.cont [14/16] %v4593_v32, 128  ;;  %v1768_v57 = vmul.f32 0.5, %v1736_v19 }
 0x8d6   : > { %v1769_v9 = vmul.f32 0.5, %v1737_v60 }
 0x8d7   : > { %v1347_v17 = vpop.f32.mrf.mxu3 }
 0x8d8   : > { %4649 = vxpose.xlu0.b32.cont [6/16] %v4601_v45, 128  ;;  %v1348_v39 = vadd.f32 %v1347_v17, %v9768_v54 }
 0x8da   : > { %v1675_v35 = vmul.f32 0.5, %v1348_v39  ;;  %v5156_v56 = vpop.eup %5155 }
 0x8db   : > { %v1738_v4 = vadd.f32 1.0, %v5156_v56 }
 0x8dc   : > { %5157 = vtanh.f32 %v1675_v35 }
 0x8dd   : > { %4626 = vxpose.xlu1.b32.cont [15/16] %v4594_v10, 128  ;;  %v1770_v22 = vmul.f32 0.5, %v1738_v4 }
 0x8df   : > { %v1350_v34 = vpop.f32.mrf.mxu3 }
 0x8e0   : > { %v1351_v12 = vadd.f32 %v1350_v34, %v9768_v54 }
 0x8e2   : > { %v1676_v37 = vmul.f32 0.5, %v1351_v12  ;;  %v5158_v45 = vpop.eup %5157 }
 0x8e3   : > { %v1739_v24 = vadd.f32 1.0, %v5158_v45 }
 0x8e4   : > { %5159 = vtanh.f32 %v1676_v37 }
 0x8e5   : > { %4627 = vxpose.xlu1.b32.end [16/16] %v4595_v63, 128  ;;  %v1771_v15 = vmul.f32 0.5, %v1739_v24 }
 0x8e7   : > { %v1352_v40 = vpop.f32.mrf.mxu3 }
 0x8e8   : > { %v1353_v16 = vadd.f32 %v1352_v40, %v9768_v54 }
 0x8ea   : > { %v1677_v0 = vmul.f32 0.5, %v1353_v16  ;;  %v5160_v26 = vpop.eup %5159 }
 0x8eb   : > { %v1740_v61 = vadd.f32 1.0, %v5160_v26 }
 0x8ec   : > { %5161 = vtanh.f32 %v1677_v0 }
 0x8ed   : > { %v1772_v13 = vmul.f32 0.5, %v1740_v61 }
 0x8ef   : > { %v1355_v21 = vpop.f32.mrf.mxu3 }
 0x8f0   : > { %v1356_v30 = vadd.f32 %v1355_v21, %v9768_v54 }
 0x8f2   : > { %v1678_v36 = vmul.f32 0.5, %v1356_v30  ;;  %v5162_v14 = vpop.eup %5161 }
 0x8f4   : > { %5163 = vtanh.f32 %v1678_v36 }
 0x8f7   : > { %v1357_v32 = vpop.f32.mrf.mxu3 }
 0x8f8   : > { %v1358_v50 = vadd.f32 %v1357_v32, %v9768_v54 }
 0x8fa   : > { %v5164_v20 = vpop.eup %5163 }
 0x8fb   : > { %v1742_v44 = vadd.f32 1.0, %v5164_v20 }
 0x911   : > { %v4628_v3 = vpop.trf.xlu1 }
 0x912   : > { %4676 = vst [vmem:[%s10120_s27] sm:$0xff] %v4628_v3 }
 0x919   : > { %v4629_v40 = vpop.trf.xlu1 }
 0x91a   : > { %4678 = vst [vmem:[%s10120_s27 + $0x10] sm:$0xff] %v4629_v40 }
 0x921   : > { %v4555_v23 = vpop.f32.mrf.mxu2  ;;  %v4630_v62 = vpop.trf.xlu1 }
 0x922   : > { %v4556_v41 = vadd.f32 %v9785_v11, %v4555_v23  ;;  %v1741_v23 = vadd.f32 1.0, %v5162_v14  ;;  %4680 = vst [vmem:[%s10120_s27 + $0x20] sm:$0xff] %v4630_v62 }
 0x924   : > { %v4602_v58 = vmul.f32 %v4556_v41, %v1766_v7  ;;  %v1679_v7 = vmul.f32 0.5, %v1358_v50  ;;  %v1773_v41 = vmul.f32 0.5, %v1741_v23 }
 0x926   : > { %4650 = vxpose.xlu0.b32.cont [7/16] %v4602_v58, 128  ;;  %5165 = vtanh.f32 %v1679_v7 }
 0x929   : > { %v4557_v47 = vpop.f32.mrf.mxu2  ;;  %v4631_v19 = vpop.trf.xlu1 }
 0x92a   : > { %v4558_v33 = vadd.f32 %v9785_v11, %v4557_v47  ;;  %v1774_v47 = vmul.f32 0.5, %v1742_v44  ;;  %4682 = vst [vmem:[%s10120_s27 + $0x30] sm:$0xff] %v4631_v19 }
 0x92c   : > { %v4603_v59 = vmul.f32 %v4558_v33, %v1767_v55  ;;  %v5166_v27 = vpop.eup %5165 }
 0x92d   : > { %v1743_v33 = vadd.f32 1.0, %v5166_v27 }
 0x92e   : > { %4651 = vxpose.xlu0.b32.cont [8/16] %v4603_v59, 128 }
 0x92f   : > { %v1775_v38 = vmul.f32 0.5, %v1743_v33 }
 0x931   : > { %v4632_v25 = vpop.trf.xlu1 }
 0x932   : > { %4684 = vst [vmem:[%s10120_s27 + $0x40] sm:$0xff] %v4632_v25 }
 0x933   : > { %v4570_v10 = vpop.f32.mrf.mxu3 }
 0x934   : > { %v4571_v1 = vadd.f32 %v9785_v11, %v4570_v10 }
 0x936   : > { %v4608_v17 = vmul.f32 %v4571_v1, %v1772_v13 }
 0x938   : > { %v4560_v29 = vpop.f32.mrf.mxu2 }
 0x939   : > { %v4561_v2 = vadd.f32 %v9785_v11, %v4560_v29 }
 0x93b   : > { %v4604_v42 = vmul.f32 %v4561_v2, %v1768_v57  ;;  %v4572_v28 = vpop.f32.mrf.mxu3 }
 0x93c   : > { %v4573_v5 = vadd.f32 %v9785_v11, %v4572_v28 }
 0x93d   : > { %4652 = vxpose.xlu0.b32.cont [9/16] %v4604_v42, 128 }
 0x93e   : > { %v4609_v49 = vmul.f32 %v4573_v5, %v1773_v41 }
 0x940   : > { %v4562_v46 = vpop.f32.mrf.mxu2 }
 0x941   : > { %v4563_v51 = vadd.f32 %v9785_v11, %v4562_v46 }
 0x943   : > { %v4605_v43 = vmul.f32 %v4563_v51, %v1769_v9 }
 0x945   : > { %4653 = vxpose.xlu0.b32.cont [10/16] %v4605_v43, 128 }
 0x948   : > { %v4565_v53 = vpop.f32.mrf.mxu2 }
 0x949   : > { %v4566_v52 = vadd.f32 %v9785_v11, %v4565_v53  ;;  %v4575_v58 = vpop.f32.mrf.mxu3 }
 0x94a   : > { %v4576_v34 = vadd.f32 %v9785_v11, %v4575_v58 }
 0x94b   : > { %v4606_v8 = vmul.f32 %v4566_v52, %v1770_v22 }
 0x94c   : > { %v4610_v54 = vmul.f32 %v4576_v34, %v1774_v47 }
 0x94d   : > { %4654 = vxpose.xlu0.b32.cont [11/16] %v4606_v8, 128 }
 0x950   : > { %v4567_v6 = vpop.f32.mrf.mxu2 }
 0x951   : > { %v4568_v63 = vadd.f32 %v9785_v11, %v4567_v6  ;;  %v4577_v55 = vpop.f32.mrf.mxu3 }
 0x952   : > { %v4578_v59 = vadd.f32 %v9785_v11, %v4577_v55  ;;  %v4633_v11 = vpop.trf.xlu1 }
 0x953   : > { %v4607_v48 = vmul.f32 %v4568_v63, %v1771_v15  ;;  %4686 = vst [vmem:[%s10120_s27 + $0x50] sm:$0xff] %v4633_v11 }
 0x954   : > { %v4611_v31 = vmul.f32 %v4578_v59, %v1775_v38 }
 0x955   : > { %4655 = vxpose.xlu0.b32.cont [12/16] %v4607_v48, 128 }
 0x95a   : > { %v4634_v2 = vpop.trf.xlu1 }
 0x95b   : > { %4688 = vst [vmem:[%s10120_s27 + $0x60] sm:$0xff] %v4634_v2 }
 0x95d   : > { %4656 = vxpose.xlu0.b32.cont [13/16] %v4608_v17, 128 }
 0x962   : > { %v4635_v42 = vpop.trf.xlu1 }
 0x963   : > { %4690 = vst [vmem:[%s10120_s27 + $0x70] sm:$0xff] %v4635_v42 }
 0x965   : > { %4657 = vxpose.xlu0.b32.cont [14/16] %v4609_v49, 128 }
 0x96a   : > { %v4636_v21 = vpop.trf.xlu1 }
 0x96b   : > { %4692 = vst [vmem:[%s10120_s27 + $0x80] sm:$0xff] %v4636_v21 }
 0x96d   : > { %4658 = vxpose.xlu0.b32.cont [15/16] %v4610_v54, 128 }
 0x972   : > { %v4637_v35 = vpop.trf.xlu1 }
 0x973   : > { %4694 = vst [vmem:[%s10120_s27 + $0x90] sm:$0xff] %v4637_v35 }
 0x975   : > { %4659 = vxpose.xlu0.b32.end [16/16] %v4611_v31, 128 }
 0x97a   : > { %v4638_v9 = vpop.trf.xlu1 }
 0x97b   : > { %4696 = vst [vmem:[%s10120_s27 + $0xa0] sm:$0xff] %v4638_v9 }
 0x982   : > { %v4639_v56 = vpop.trf.xlu1 }
 0x983   : > { %4698 = vst [vmem:[%s10120_s27 + $0xb0] sm:$0xff] %v4639_v56 }
 0x98a   : > { %v4640_v12 = vpop.trf.xlu1 }
 0x98b   : > { %4700 = vst [vmem:[%s10120_s27 + $0xc0] sm:$0xff] %v4640_v12 }
 0x992   : > { %v4641_v32 = vpop.trf.xlu1 }
 0x993   : > { %4702 = vst [vmem:[%s10120_s27 + $0xd0] sm:$0xff] %v4641_v32 }
 0x99a   : > { %v4642_v53 = vpop.trf.xlu1 }
 0x99b   : > { %4704 = vst [vmem:[%s10120_s27 + $0xe0] sm:$0xff] %v4642_v53 }
 0x9a1   : > { %v4660_v29 = vpop.trf.xlu0 }
 0x9a2   : > { %4677 = vst [vmem:[%s10120_s27 + $0x8] sm:$0xff] %v4660_v29  ;;  %v4643_v52 = vpop.trf.xlu1 }
 0x9a3   : > { %4706 = vst [vmem:[%s10120_s27 + $0xf0] sm:$0xff] %v4643_v52 }
 0x9a9   : > { %v4661_v57 = vpop.trf.xlu0 }
 0x9aa   : > { %4679 = vst [vmem:[%s10120_s27 + $0x18] sm:$0xff] %v4661_v57 }
 0x9b1   : > { %v4662_v18 = vpop.trf.xlu0 }
 0x9b2   : > { %4681 = vst [vmem:[%s10120_s27 + $0x28] sm:$0xff] %v4662_v18 }
 0x9b9   : > { %v4663_v39 = vpop.trf.xlu0 }
 0x9ba   : > { %4683 = vst [vmem:[%s10120_s27 + $0x38] sm:$0xff] %v4663_v39 }
 0x9c1   : > { %v4664_v60 = vpop.trf.xlu0 }
 0x9c2   : > { %4685 = vst [vmem:[%s10120_s27 + $0x48] sm:$0xff] %v4664_v60 }
 0x9c9   : > { %v4665_v46 = vpop.trf.xlu0 }
 0x9ca   : > { %4687 = vst [vmem:[%s10120_s27 + $0x58] sm:$0xff] %v4665_v46 }
 0x9d1   : > { %v4666_v51 = vpop.trf.xlu0 }
 0x9d2   : > { %4689 = vst [vmem:[%s10120_s27 + $0x68] sm:$0xff] %v4666_v51 }
 0x9d9   : > { %v4667_v43 = vpop.trf.xlu0 }
 0x9da   : > { %4691 = vst [vmem:[%s10120_s27 + $0x78] sm:$0xff] %v4667_v43 }
 0x9e1   : > { %v4668_v4 = vpop.trf.xlu0 }
 0x9e2   : > { %4693 = vst [vmem:[%s10120_s27 + $0x88] sm:$0xff] %v4668_v4 }
 0x9e9   : > { %v4669_v37 = vpop.trf.xlu0 }
 0x9ea   : > { %4695 = vst [vmem:[%s10120_s27 + $0x98] sm:$0xff] %v4669_v37 }
 0x9f1   : > { %v4670_v22 = vpop.trf.xlu0 }
 0x9f2   : > { %4697 = vst [vmem:[%s10120_s27 + $0xa8] sm:$0xff] %v4670_v22 }
 0x9f9   : > { %v4671_v45 = vpop.trf.xlu0 }
 0x9fa   : > { %4699 = vst [vmem:[%s10120_s27 + $0xb8] sm:$0xff] %v4671_v45 }
 0xa01   : > { %v4672_v8 = vpop.trf.xlu0 }
 0xa02   : > { %4701 = vst [vmem:[%s10120_s27 + $0xc8] sm:$0xff] %v4672_v8 }
 0xa09   : > { %v4673_v16 = vpop.trf.xlu0 }
 0xa0a   : > { %4703 = vst [vmem:[%s10120_s27 + $0xd8] sm:$0xff] %v4673_v16 }
 0xa11   : > { %v4674_v24 = vpop.trf.xlu0 }
 0xa12   : > { %4705 = vst [vmem:[%s10120_s27 + $0xe8] sm:$0xff] %v4674_v24 }
 0xa19   : > { %v4675_v10 = vpop.trf.xlu0 }
 0xa1a   : > { %4707 = vst [vmem:[%s10120_s27 + $0xf8] sm:$0xff] %v4675_v10 }
 0xa1b PF: > { %s16_s21 = sadd.s32 1, %s5180_s21  }
 0xa1c   : > { %p13_p4 = scmp.ge.s32.totalorder %s16_s21, 4  }
 0xa1e   :  { %15 = sbr.rel (!%p13_p4) target bundleno = 1 (0x1), region = 74 }

</bundles_post_ra>
